<compile_context>
chip_gen: v7x
topology: tpu7x:2x2x1
jax: 0.10.0
libtpu: 0.0.40
codegen_flags: <defaults>
</compile_context>

<pallas_src>
import jax
import jax.numpy as jnp
from jax.experimental import pallas as pl
from jax.experimental.pallas import tpu as pltpu

EPS = 1e-5  # torch.nn.BatchNorm default eps

_COMPILER_PARAMS = pltpu.CompilerParams(
    dimension_semantics=("arbitrary",),
    # Keep the scoped-VMEM request inside v7x's 64 MiB physical VMEM.
    vmem_limit_bytes=32 * 1024 * 1024,
)


def _full_spec(shape):
    """BlockSpec covering the whole array (single grid step)."""
    n = len(shape)
    return pl.BlockSpec(tuple(shape), lambda i, n=n: (0,) * n)


# ----------------------------------------------------------------------------
# Pallas kernels
# ----------------------------------------------------------------------------
def conv_bn_sig_pool_kernel(p0_ref, p1_ref, p2_ref, p3_ref,
                            w_ref, b_ref, g_ref, beta_ref, o_ref):
    """conv (as matmul) + bias + BatchNorm (batch stats) + sigmoid + 2x2 avgpool.

    p{s}: (G, K) bf16 -- im2col patches of pooling phase s, G = N*(OH/2)*(OW/2)
    w:    (K, C) bf16;  b/g/beta: (1, C) f32  ->  o: (G, C) f32 (pooled NHWC rows)
    """
    w = w_ref[...]
    b = b_ref[...]
    ys = [jnp.dot(p_ref[...], w, preferred_element_type=jnp.float32) + b
          for p_ref in (p0_ref, p1_ref, p2_ref, p3_ref)]

    # BatchNorm statistics over *all* conv-output pixels (the four pooling
    # phases partition them), per output channel.  Biased variance, matching
    # torch train-mode semantics.
    count = 4.0 * ys[0].shape[0]
    mean = sum(y.sum(axis=0, keepdims=True) for y in ys) / count
    var = sum(jnp.square(y - mean).sum(axis=0, keepdims=True) for y in ys) / count
    scale = g_ref[...] * jax.lax.rsqrt(var + EPS)
    shift = beta_ref[...] - mean * scale

    # sigmoid + 2x2 average pool (the four phases are the four window taps).
    acc = sum(jax.nn.sigmoid(y * scale + shift) for y in ys)
    o_ref[...] = 0.25 * acc


def fc_fused_kernel(x_ref, w1_ref, b1_ref, g1_ref, be1_ref,
                    w2_ref, b2_ref, g2_ref, be2_ref,
                    w3_ref, b3_ref, o_ref):
    """fc1+bn3+sigmoid -> fc2+bn4+sigmoid -> fc3(+bias), fully fused."""

    def bn_sigmoid(y, g, beta):
        mean = jnp.mean(y, axis=0, keepdims=True)
        var = jnp.mean(jnp.square(y - mean), axis=0, keepdims=True)
        scale = g * jax.lax.rsqrt(var + EPS)
        return jax.nn.sigmoid(y * scale + (beta - mean * scale))

    h = jnp.dot(x_ref[...], w1_ref[...],
                preferred_element_type=jnp.float32) + b1_ref[...]
    h = bn_sigmoid(h, g1_ref[...], be1_ref[...])
    h = jnp.dot(h.astype(jnp.bfloat16), w2_ref[...],
                preferred_element_type=jnp.float32) + b2_ref[...]
    h = bn_sigmoid(h, g2_ref[...], be2_ref[...])
    o_ref[...] = jnp.dot(h.astype(jnp.bfloat16), w3_ref[...],
                         preferred_element_type=jnp.float32) + b3_ref[...]


# ----------------------------------------------------------------------------
# pallas_call wrappers
# ----------------------------------------------------------------------------
def conv_bn_sig_pool(parts, w, b, g, beta):
    G = parts[0].shape[0]
    C = w.shape[1]
    args = tuple(parts) + (w, b, g, beta)
    return pl.pallas_call(
        conv_bn_sig_pool_kernel,
        grid=(1,),
        in_specs=[_full_spec(a.shape) for a in args],
        out_specs=_full_spec((G, C)),
        out_shape=jax.ShapeDtypeStruct((G, C), jnp.float32),
        compiler_params=_COMPILER_PARAMS,
    )(*args)


def fc_fused(x, w1, b1, g1, be1, w2, b2, g2, be2, w3, b3):
    N = x.shape[0]
    C = w3.shape[1]
    args = (x, w1, b1, g1, be1, w2, b2, g2, be2, w3, b3)
    return pl.pallas_call(
        fc_fused_kernel,
        grid=(1,),
        in_specs=[_full_spec(a.shape) for a in args],
        out_specs=_full_spec((N, C)),
        out_shape=jax.ShapeDtypeStruct((N, C), jnp.float32),
        compiler_params=_COMPILER_PARAMS,
    )(*args)


# ----------------------------------------------------------------------------
# JAX glue: pool-phase-grouped im2col (channels-last, single expanded copy)
# ----------------------------------------------------------------------------
def im2col_pooled(x_nhwc, k, pad):
    """Return 4 bf16 patch matrices p[2*dy+dx] of shape (N*PH*PW, k*k*C) with

        p[2*dy+dx][(n, ph, pw), (i, j, c)] = xpad[n, 2*ph+dy+i, 2*pw+dx+j, c]

    i.e. pooling phase (dy, dx) of every 2x2 window of the conv output.  The
    strided slices are stacked directly into the final layout (the trailing
    reshape is metadata-only), so only one expanded copy is written per phase.
    """
    x = x_nhwc.astype(jnp.bfloat16)
    if pad:
        x = jnp.pad(x, ((0, 0), (pad, pad), (pad, pad), (0, 0)))
    N, H, W, C = x.shape
    OH, OW = H - k + 1, W - k + 1
    PH, PW = OH // 2, OW // 2
    parts = []
    for dy in range(2):
        for dx in range(2):
            slabs = [x[:, dy + i:dy + i + 2 * PH:2, dx + j:dx + j + 2 * PW:2, :]
                     for i in range(k) for j in range(k)]
            p = jnp.stack(slabs, axis=3)                 # (N, PH, PW, k*k, C)
            parts.append(p.reshape(N * PH * PW, k * k * C))
    return parts, PH, PW


# ----------------------------------------------------------------------------
# Parameters (deterministic, PyTorch-like uniform init for weights)
# ----------------------------------------------------------------------------
def init_params(key):
    ks = jax.random.split(key, 14)

    def u(k, shape, fan_in):
        bound = 1.0 / jnp.sqrt(float(fan_in))
        return jax.random.uniform(k, shape, jnp.float32, -bound, bound)

    def bn(k, c):
        k1, k2 = jax.random.split(k)
        g = 1.0 + 0.1 * jax.random.normal(k1, (c,), jnp.float32)
        b = 0.1 * jax.random.normal(k2, (c,), jnp.float32)
        return g, b

    p = {}
    p["conv1_w"] = u(ks[0], (6, 1, 5, 5), 1 * 25)
    p["conv1_b"] = u(ks[1], (6,), 1 * 25)
    p["bn1_g"], p["bn1_b"] = bn(ks[2], 6)
    p["conv2_w"] = u(ks[3], (16, 6, 5, 5), 6 * 25)
    p["conv2_b"] = u(ks[4], (16,), 6 * 25)
    p["bn2_g"], p["bn2_b"] = bn(ks[5], 16)
    p["fc1_w"] = u(ks[6], (400, 120), 400)     # acts on NHWC-flattened features
    p["fc1_b"] = u(ks[7], (120,), 400)
    p["bn3_g"], p["bn3_b"] = bn(ks[8], 120)
    p["fc2_w"] = u(ks[9], (120, 84), 120)
    p["fc2_b"] = u(ks[10], (84,), 120)
    p["bn4_g"], p["bn4_b"] = bn(ks[11], 84)
    p["fc3_w"] = u(ks[12], (84, 10), 84)
    p["fc3_b"] = u(ks[13], (10,), 84)
    return p


# ----------------------------------------------------------------------------
# Forward pass: 3 Pallas kernels total (conv1-block, conv2-block, FC head)
# ----------------------------------------------------------------------------
@jax.jit
def lenet_bn_forward(x_nchw, params):
    N = x_nchw.shape[0]
    x = jnp.transpose(x_nchw, (0, 2, 3, 1))            # NHWC (N, 28, 28, 1)

    # conv1(5x5, pad=2) + bn1 + sigmoid + 2x2 avgpool  (one fused kernel)
    parts, PH, PW = im2col_pooled(x, 5, 2)              # 4 x (N*14*14, 25) bf16
    w = params["conv1_w"].transpose(2, 3, 1, 0).reshape(25, 6).astype(jnp.bfloat16)
    y = conv_bn_sig_pool(parts, w, params["conv1_b"][None, :],
                         params["bn1_g"][None, :], params["bn1_b"][None, :])
    y = y.reshape(N, PH, PW, 6)                         # NHWC (N,14,14,6), free reshape

    # conv2(5x5) + bn2 + sigmoid + 2x2 avgpool  (one fused kernel)
    parts, PH, PW = im2col_pooled(y, 5, 0)              # 4 x (N*5*5, 150) bf16
    w = params["conv2_w"].transpose(2, 3, 1, 0).reshape(150, 16).astype(jnp.bfloat16)
    y = conv_bn_sig_pool(parts, w, params["conv2_b"][None, :],
                         params["bn2_g"][None, :], params["bn2_b"][None, :])
    feat = y.reshape(N, PH * PW * 16)                   # (N, 400) NHWC-flatten, free

    # fc1+bn3+sigmoid -> fc2+bn4+sigmoid -> fc3  (one fused kernel)
    out = fc_fused(
        feat.astype(jnp.bfloat16),
        params["fc1_w"].astype(jnp.bfloat16), params["fc1_b"][None, :],
        params["bn3_g"][None, :], params["bn3_b"][None, :],
        params["fc2_w"].astype(jnp.bfloat16), params["fc2_b"][None, :],
        params["bn4_g"][None, :], params["bn4_b"][None, :],
        params["fc3_w"].astype(jnp.bfloat16), params["fc3_b"][None, :])
    return out                                          # (N, 10)


# ----------------------------------------------------------------------------
# Pure-JAX reference (same math / precision choices, no Pallas)
# ----------------------------------------------------------------------------
def ref_forward(x_nchw, params):
    x = jnp.transpose(x_nchw, (0, 2, 3, 1))

    def conv(x, w_oihw, b, pad):
        w = jnp.transpose(w_oihw, (2, 3, 1, 0)).astype(jnp.bfloat16)   # HWIO
        y = jax.lax.conv_general_dilated(
            x.astype(jnp.bfloat16), w, window_strides=(1, 1),
            padding=((pad, pad), (pad, pad)),
            dimension_numbers=("NHWC", "HWIO", "NHWC"),
            preferred_element_type=jnp.float32)
        return y + b

    def bn_sig(y, g, beta, axes):
        mean = jnp.mean(y, axis=axes, keepdims=True)
        var = jnp.mean(jnp.square(y - mean), axis=axes, keepdims=True)
        return jax.nn.sigmoid(g * (y - mean) * jax.lax.rsqrt(var + EPS) + beta)

    def pool(y):
        n, h, w, c = y.shape
        return y.reshape(n, h // 2, 2, w // 2, 2, c).mean(axis=(2, 4))

    def fc(h, w, b):
        return jnp.dot(h.astype(jnp.bfloat16), w.astype(jnp.bfloat16),
                       preferred_element_type=jnp.float32) + b

    y = pool(bn_sig(conv(x, params["conv1_w"], params["conv1_b"], 2),
                    params["bn1_g"], params["bn1_b"], (0, 1, 2)))
    y = pool(bn_sig(conv(y, params["conv2_w"], params["conv2_b"], 0),
                    params["bn2_g"], params["bn2_b"], (0, 1, 2)))
    y = y.reshape(y.shape[0], -1)                       # NHWC flatten (N, 400)
    y = bn_sig(fc(y, params["fc1_w"], params["fc1_b"]),
               params["bn3_g"], params["bn3_b"], (0,))
    y = bn_sig(fc(y, params["fc2_w"], params["fc2_b"]),
               params["bn4_g"], params["bn4_b"], (0,))
    return fc(y, params["fc3_w"], params["fc3_b"])


if __name__ == "__main__":
    key = jax.random.PRNGKey(0)
    k_x, k_p = jax.random.split(key)
    # MNIST-like input implied by the module (fc1 expects 16*5*5 = 400 features).
    x = jax.random.normal(k_x, (2, 1, 28, 28), jnp.float32)
    params = init_params(k_p)

    out = jax.block_until_ready(lenet_bn_forward(x, params))
    ref = jax.block_until_ready(ref_forward(x, params))

    assert out.shape == (2, 10), out.shape
    max_diff = float(jnp.max(jnp.abs(out - ref)))
    assert jnp.allclose(out, ref, atol=1e-2, rtol=1e-2), f"max abs diff {max_diff}"

    print("KERNEL_OK")
</pallas_src>

<mosaic_0001>
module attributes {stable_mosaic.version = 11 : i64} {
  func.func @conv_bn_sig_pool_kernel(%arg0: i32, %arg1: memref<392x25xbf16, #tpu.memory_space<vmem>>, %arg2: memref<392x25xbf16, #tpu.memory_space<vmem>>, %arg3: memref<392x25xbf16, #tpu.memory_space<vmem>>, %arg4: memref<392x25xbf16, #tpu.memory_space<vmem>>, %arg5: memref<25x6xbf16, #tpu.memory_space<vmem>>, %arg6: memref<1x6xf32, #tpu.memory_space<vmem>>, %arg7: memref<1x6xf32, #tpu.memory_space<vmem>>, %arg8: memref<1x6xf32, #tpu.memory_space<vmem>>, %arg9: memref<392x6xf32, #tpu.memory_space<vmem>>) attributes {dimension_semantics = [#tpu.dimension_semantics<arbitrary>], iteration_bounds = array<i64: 1>, scalar_prefetch = 0 : i64, scratch_operands = 0 : i64, tpu.core_type = #tpu.core_type<tc>, window_params = [{pipeline_mode = #tpu.pipeline_mode<synchronous>, transform_indices = @transform_0, window_bounds = array<i64: 392, 25>}, {pipeline_mode = #tpu.pipeline_mode<synchronous>, transform_indices = @transform_1, window_bounds = array<i64: 392, 25>}, {pipeline_mode = #tpu.pipeline_mode<synchronous>, transform_indices = @transform_2, window_bounds = array<i64: 392, 25>}, {pipeline_mode = #tpu.pipeline_mode<synchronous>, transform_indices = @transform_3, window_bounds = array<i64: 392, 25>}, {pipeline_mode = #tpu.pipeline_mode<synchronous>, transform_indices = @transform_4, window_bounds = array<i64: 25, 6>}, {pipeline_mode = #tpu.pipeline_mode<synchronous>, transform_indices = @transform_5, window_bounds = array<i64: 1, 6>}, {pipeline_mode = #tpu.pipeline_mode<synchronous>, transform_indices = @transform_6, window_bounds = array<i64: 1, 6>}, {pipeline_mode = #tpu.pipeline_mode<synchronous>, transform_indices = @transform_7, window_bounds = array<i64: 1, 6>}, {pipeline_mode = #tpu.pipeline_mode<synchronous>, transform_indices = @transform_8, window_bounds = array<i64: 392, 6>}]} {
    %c0 = arith.constant 0 : index
    %c0_0 = arith.constant 0 : index
    %0 = vector.load %arg5[%c0, %c0_0] : memref<25x6xbf16, #tpu.memory_space<vmem>>, vector<25x6xbf16>
    %c0_1 = arith.constant 0 : index
    %c0_2 = arith.constant 0 : index
    %1 = vector.load %arg6[%c0_1, %c0_2] : memref<1x6xf32, #tpu.memory_space<vmem>>, vector<1x6xf32>
    %c0_3 = arith.constant 0 : index
    %c0_4 = arith.constant 0 : index
    %2 = vector.load %arg1[%c0_3, %c0_4] : memref<392x25xbf16, #tpu.memory_space<vmem>>, vector<392x25xbf16>
    %cst = arith.constant dense<0.000000e+00> : vector<392x6xf32>
    %3 = tpu.matmul %2, %0, %cst {dimension_numbers = #tpu.dot_dimension_numbers<[1], [0], [0], [1], [0, 0, 1, 1], [], []>} : vector<392x25xbf16>, vector<25x6xbf16>, vector<392x6xf32> -> vector<392x6xf32>
    %4 = vector.broadcast %1 : vector<1x6xf32> to vector<392x6xf32>
    %5 = arith.addf %3, %4 : vector<392x6xf32>
    %c0_5 = arith.constant 0 : index
    %c0_6 = arith.constant 0 : index
    %6 = vector.load %arg2[%c0_5, %c0_6] : memref<392x25xbf16, #tpu.memory_space<vmem>>, vector<392x25xbf16>
    %cst_7 = arith.constant dense<0.000000e+00> : vector<392x6xf32>
    %7 = tpu.matmul %6, %0, %cst_7 {dimension_numbers = #tpu.dot_dimension_numbers<[1], [0], [0], [1], [0, 0, 1, 1], [], []>} : vector<392x25xbf16>, vector<25x6xbf16>, vector<392x6xf32> -> vector<392x6xf32>
    %8 = vector.broadcast %1 : vector<1x6xf32> to vector<392x6xf32>
    %9 = arith.addf %7, %8 : vector<392x6xf32>
    %c0_8 = arith.constant 0 : index
    %c0_9 = arith.constant 0 : index
    %10 = vector.load %arg3[%c0_8, %c0_9] : memref<392x25xbf16, #tpu.memory_space<vmem>>, vector<392x25xbf16>
    %cst_10 = arith.constant dense<0.000000e+00> : vector<392x6xf32>
    %11 = tpu.matmul %10, %0, %cst_10 {dimension_numbers = #tpu.dot_dimension_numbers<[1], [0], [0], [1], [0, 0, 1, 1], [], []>} : vector<392x25xbf16>, vector<25x6xbf16>, vector<392x6xf32> -> vector<392x6xf32>
    %12 = vector.broadcast %1 : vector<1x6xf32> to vector<392x6xf32>
    %13 = arith.addf %11, %12 : vector<392x6xf32>
    %c0_11 = arith.constant 0 : index
    %c0_12 = arith.constant 0 : index
    %14 = vector.load %arg4[%c0_11, %c0_12] : memref<392x25xbf16, #tpu.memory_space<vmem>>, vector<392x25xbf16>
    %cst_13 = arith.constant dense<0.000000e+00> : vector<392x6xf32>
    %15 = tpu.matmul %14, %0, %cst_13 {dimension_numbers = #tpu.dot_dimension_numbers<[1], [0], [0], [1], [0, 0, 1, 1], [], []>} : vector<392x25xbf16>, vector<25x6xbf16>, vector<392x6xf32> -> vector<392x6xf32>
    %16 = vector.broadcast %1 : vector<1x6xf32> to vector<392x6xf32>
    %17 = arith.addf %15, %16 : vector<392x6xf32>
    %cst_14 = arith.constant dense<0.000000e+00> : vector<6xf32>
    %18 = vector.multi_reduction <add>, %5, %cst_14 [0] : vector<392x6xf32> to vector<6xf32>
    %19 = vector.shape_cast %18 : vector<6xf32> to vector<1x6xf32>
    %cst_15 = arith.constant 0.000000e+00 : f32
    %20 = vector.broadcast %cst_15 : f32 to vector<1x6xf32>
    %21 = arith.addf %20, %19 : vector<1x6xf32>
    %cst_16 = arith.constant dense<0.000000e+00> : vector<6xf32>
    %22 = vector.multi_reduction <add>, %9, %cst_16 [0] : vector<392x6xf32> to vector<6xf32>
    %23 = vector.shape_cast %22 : vector<6xf32> to vector<1x6xf32>
    %24 = arith.addf %21, %23 : vector<1x6xf32>
    %cst_17 = arith.constant dense<0.000000e+00> : vector<6xf32>
    %25 = vector.multi_reduction <add>, %13, %cst_17 [0] : vector<392x6xf32> to vector<6xf32>
    %26 = vector.shape_cast %25 : vector<6xf32> to vector<1x6xf32>
    %27 = arith.addf %24, %26 : vector<1x6xf32>
    %cst_18 = arith.constant dense<0.000000e+00> : vector<6xf32>
    %28 = vector.multi_reduction <add>, %17, %cst_18 [0] : vector<392x6xf32> to vector<6xf32>
    %29 = vector.shape_cast %28 : vector<6xf32> to vector<1x6xf32>
    %30 = arith.addf %27, %29 : vector<1x6xf32>
    %cst_19 = arith.constant 1.568000e+03 : f32
    %31 = vector.broadcast %cst_19 : f32 to vector<1x6xf32>
    %32 = arith.divf %30, %31 : vector<1x6xf32>
    %33 = vector.broadcast %32 : vector<1x6xf32> to vector<392x6xf32>
    %34 = arith.subf %5, %33 : vector<392x6xf32>
    %35 = arith.mulf %34, %34 : vector<392x6xf32>
    %cst_20 = arith.constant dense<0.000000e+00> : vector<6xf32>
    %36 = vector.multi_reduction <add>, %35, %cst_20 [0] : vector<392x6xf32> to vector<6xf32>
    %37 = vector.shape_cast %36 : vector<6xf32> to vector<1x6xf32>
    %cst_21 = arith.constant 0.000000e+00 : f32
    %38 = vector.broadcast %cst_21 : f32 to vector<1x6xf32>
    %39 = arith.addf %38, %37 : vector<1x6xf32>
    %40 = vector.broadcast %32 : vector<1x6xf32> to vector<392x6xf32>
    %41 = arith.subf %9, %40 : vector<392x6xf32>
    %42 = arith.mulf %41, %41 : vector<392x6xf32>
    %cst_22 = arith.constant dense<0.000000e+00> : vector<6xf32>
    %43 = vector.multi_reduction <add>, %42, %cst_22 [0] : vector<392x6xf32> to vector<6xf32>
    %44 = vector.shape_cast %43 : vector<6xf32> to vector<1x6xf32>
    %45 = arith.addf %39, %44 : vector<1x6xf32>
    %46 = vector.broadcast %32 : vector<1x6xf32> to vector<392x6xf32>
    %47 = arith.subf %13, %46 : vector<392x6xf32>
    %48 = arith.mulf %47, %47 : vector<392x6xf32>
    %cst_23 = arith.constant dense<0.000000e+00> : vector<6xf32>
    %49 = vector.multi_reduction <add>, %48, %cst_23 [0] : vector<392x6xf32> to vector<6xf32>
    %50 = vector.shape_cast %49 : vector<6xf32> to vector<1x6xf32>
    %51 = arith.addf %45, %50 : vector<1x6xf32>
    %52 = vector.broadcast %32 : vector<1x6xf32> to vector<392x6xf32>
    %53 = arith.subf %17, %52 : vector<392x6xf32>
    %54 = arith.mulf %53, %53 : vector<392x6xf32>
    %cst_24 = arith.constant dense<0.000000e+00> : vector<6xf32>
    %55 = vector.multi_reduction <add>, %54, %cst_24 [0] : vector<392x6xf32> to vector<6xf32>
    %56 = vector.shape_cast %55 : vector<6xf32> to vector<1x6xf32>
    %57 = arith.addf %51, %56 : vector<1x6xf32>
    %cst_25 = arith.constant 1.568000e+03 : f32
    %58 = vector.broadcast %cst_25 : f32 to vector<1x6xf32>
    %59 = arith.divf %57, %58 : vector<1x6xf32>
    %c0_26 = arith.constant 0 : index
    %c0_27 = arith.constant 0 : index
    %60 = vector.load %arg7[%c0_26, %c0_27] : memref<1x6xf32, #tpu.memory_space<vmem>>, vector<1x6xf32>
    %cst_28 = arith.constant 9.99999974E-6 : f32
    %61 = vector.broadcast %cst_28 : f32 to vector<1x6xf32>
    %62 = arith.addf %59, %61 : vector<1x6xf32>
    %63 = math.rsqrt %62 : vector<1x6xf32>
    %64 = arith.mulf %60, %63 : vector<1x6xf32>
    %c0_29 = arith.constant 0 : index
    %c0_30 = arith.constant 0 : index
    %65 = vector.load %arg8[%c0_29, %c0_30] : memref<1x6xf32, #tpu.memory_space<vmem>>, vector<1x6xf32>
    %66 = arith.mulf %32, %64 : vector<1x6xf32>
    %67 = arith.subf %65, %66 : vector<1x6xf32>
    %68 = vector.broadcast %64 : vector<1x6xf32> to vector<392x6xf32>
    %69 = arith.mulf %5, %68 : vector<392x6xf32>
    %70 = vector.broadcast %67 : vector<1x6xf32> to vector<392x6xf32>
    %71 = arith.addf %69, %70 : vector<392x6xf32>
    %72 = arith.negf %71 : vector<392x6xf32>
    %73 = math.exp %72 : vector<392x6xf32>
    %cst_31 = arith.constant 1.000000e+00 : f32
    %74 = vector.broadcast %cst_31 : f32 to vector<392x6xf32>
    %75 = arith.addf %74, %73 : vector<392x6xf32>
    %76 = arith.divf %74, %75 : vector<392x6xf32>
    %cst_32 = arith.constant 0.000000e+00 : f32
    %77 = vector.broadcast %cst_32 : f32 to vector<392x6xf32>
    %78 = arith.addf %77, %76 : vector<392x6xf32>
    %79 = vector.broadcast %64 : vector<1x6xf32> to vector<392x6xf32>
    %80 = arith.mulf %9, %79 : vector<392x6xf32>
    %81 = vector.broadcast %67 : vector<1x6xf32> to vector<392x6xf32>
    %82 = arith.addf %80, %81 : vector<392x6xf32>
    %83 = arith.negf %82 : vector<392x6xf32>
    %84 = math.exp %83 : vector<392x6xf32>
    %cst_33 = arith.constant 1.000000e+00 : f32
    %85 = vector.broadcast %cst_33 : f32 to vector<392x6xf32>
    %86 = arith.addf %85, %84 : vector<392x6xf32>
    %87 = arith.divf %85, %86 : vector<392x6xf32>
    %88 = arith.addf %78, %87 : vector<392x6xf32>
    %89 = vector.broadcast %64 : vector<1x6xf32> to vector<392x6xf32>
    %90 = arith.mulf %13, %89 : vector<392x6xf32>
    %91 = vector.broadcast %67 : vector<1x6xf32> to vector<392x6xf32>
    %92 = arith.addf %90, %91 : vector<392x6xf32>
    %93 = arith.negf %92 : vector<392x6xf32>
    %94 = math.exp %93 : vector<392x6xf32>
    %cst_34 = arith.constant 1.000000e+00 : f32
    %95 = vector.broadcast %cst_34 : f32 to vector<392x6xf32>
    %96 = arith.addf %95, %94 : vector<392x6xf32>
    %97 = arith.divf %95, %96 : vector<392x6xf32>
    %98 = arith.addf %88, %97 : vector<392x6xf32>
    %99 = vector.broadcast %64 : vector<1x6xf32> to vector<392x6xf32>
    %100 = arith.mulf %17, %99 : vector<392x6xf32>
    %101 = vector.broadcast %67 : vector<1x6xf32> to vector<392x6xf32>
    %102 = arith.addf %100, %101 : vector<392x6xf32>
    %103 = arith.negf %102 : vector<392x6xf32>
    %104 = math.exp %103 : vector<392x6xf32>
    %cst_35 = arith.constant 1.000000e+00 : f32
    %105 = vector.broadcast %cst_35 : f32 to vector<392x6xf32>
    %106 = arith.addf %105, %104 : vector<392x6xf32>
    %107 = arith.divf %105, %106 : vector<392x6xf32>
    %108 = arith.addf %98, %107 : vector<392x6xf32>
    %cst_36 = arith.constant 2.500000e-01 : f32
    %109 = vector.broadcast %cst_36 : f32 to vector<392x6xf32>
    %110 = arith.mulf %109, %108 : vector<392x6xf32>
    %c0_37 = arith.constant 0 : index
    %c0_38 = arith.constant 0 : index
    %111 = vector.load %arg9[%c0_37, %c0_38] : memref<392x6xf32, #tpu.memory_space<vmem>>, vector<392x6xf32>
    tpu.vector_store %arg9[%c0_37, %c0_38], %110 {strides = array<i32>} : memref<392x6xf32, #tpu.memory_space<vmem>>, vector<392x6xf32>,
    return
  }
  func.func @transform_0(%arg0: i32) -> (i32, i32) {
    %c0_i32 = arith.constant 0 : i32
    %c0_i32_0 = arith.constant 0 : i32
    %c0_i32_1 = arith.constant 0 : i32
    return %c0_i32, %c0_i32_0 : i32, i32
  }
  func.func @transform_1(%arg0: i32) -> (i32, i32) {
    %c0_i32 = arith.constant 0 : i32
    %c0_i32_0 = arith.constant 0 : i32
    %c0_i32_1 = arith.constant 0 : i32
    return %c0_i32, %c0_i32_0 : i32, i32
  }
  func.func @transform_2(%arg0: i32) -> (i32, i32) {
    %c0_i32 = arith.constant 0 : i32
    %c0_i32_0 = arith.constant 0 : i32
    %c0_i32_1 = arith.constant 0 : i32
    return %c0_i32, %c0_i32_0 : i32, i32
  }
  func.func @transform_3(%arg0: i32) -> (i32, i32) {
    %c0_i32 = arith.constant 0 : i32
    %c0_i32_0 = arith.constant 0 : i32
    %c0_i32_1 = arith.constant 0 : i32
    return %c0_i32, %c0_i32_0 : i32, i32
  }
  func.func @transform_4(%arg0: i32) -> (i32, i32) {
    %c0_i32 = arith.constant 0 : i32
    %c0_i32_0 = arith.constant 0 : i32
    %c0_i32_1 = arith.constant 0 : i32
    return %c0_i32, %c0_i32_0 : i32, i32
  }
  func.func @transform_5(%arg0: i32) -> (i32, i32) {
    %c0_i32 = arith.constant 0 : i32
    %c0_i32_0 = arith.constant 0 : i32
    %c0_i32_1 = arith.constant 0 : i32
    return %c0_i32, %c0_i32_0 : i32, i32
  }
  func.func @transform_6(%arg0: i32) -> (i32, i32) {
    %c0_i32 = arith.constant 0 : i32
    %c0_i32_0 = arith.constant 0 : i32
    %c0_i32_1 = arith.constant 0 : i32
    return %c0_i32, %c0_i32_0 : i32, i32
  }
  func.func @transform_7(%arg0: i32) -> (i32, i32) {
    %c0_i32 = arith.constant 0 : i32
    %c0_i32_0 = arith.constant 0 : i32
    %c0_i32_1 = arith.constant 0 : i32
    return %c0_i32, %c0_i32_0 : i32, i32
  }
  func.func @transform_8(%arg0: i32) -> (i32, i32) {
    %c0_i32 = arith.constant 0 : i32
    %c0_i32_0 = arith.constant 0 : i32
    %c0_i32_1 = arith.constant 0 : i32
    return %c0_i32, %c0_i32_0 : i32, i32
  }
}

module attributes {stable_mosaic.version = 11 : i64} {
  func.func @conv_bn_sig_pool_kernel(%arg0: i32, %arg1: memref<50x150xbf16, #tpu.memory_space<vmem>>, %arg2: memref<50x150xbf16, #tpu.memory_space<vmem>>, %arg3: memref<50x150xbf16, #tpu.memory_space<vmem>>, %arg4: memref<50x150xbf16, #tpu.memory_space<vmem>>, %arg5: memref<150x16xbf16, #tpu.memory_space<vmem>>, %arg6: memref<1x16xf32, #tpu.memory_space<vmem>>, %arg7: memref<1x16xf32, #tpu.memory_space<vmem>>, %arg8: memref<1x16xf32, #tpu.memory_space<vmem>>, %arg9: memref<50x16xf32, #tpu.memory_space<vmem>>) attributes {dimension_semantics = [#tpu.dimension_semantics<arbitrary>], iteration_bounds = array<i64: 1>, scalar_prefetch = 0 : i64, scratch_operands = 0 : i64, tpu.core_type = #tpu.core_type<tc>, window_params = [{pipeline_mode = #tpu.pipeline_mode<synchronous>, transform_indices = @transform_0, window_bounds = array<i64: 50, 150>}, {pipeline_mode = #tpu.pipeline_mode<synchronous>, transform_indices = @transform_1, window_bounds = array<i64: 50, 150>}, {pipeline_mode = #tpu.pipeline_mode<synchronous>, transform_indices = @transform_2, window_bounds = array<i64: 50, 150>}, {pipeline_mode = #tpu.pipeline_mode<synchronous>, transform_indices = @transform_3, window_bounds = array<i64: 50, 150>}, {pipeline_mode = #tpu.pipeline_mode<synchronous>, transform_indices = @transform_4, window_bounds = array<i64: 150, 16>}, {pipeline_mode = #tpu.pipeline_mode<synchronous>, transform_indices = @transform_5, window_bounds = array<i64: 1, 16>}, {pipeline_mode = #tpu.pipeline_mode<synchronous>, transform_indices = @transform_6, window_bounds = array<i64: 1, 16>}, {pipeline_mode = #tpu.pipeline_mode<synchronous>, transform_indices = @transform_7, window_bounds = array<i64: 1, 16>}, {pipeline_mode = #tpu.pipeline_mode<synchronous>, transform_indices = @transform_8, window_bounds = array<i64: 50, 16>}]} {
    %c0 = arith.constant 0 : index
    %c0_0 = arith.constant 0 : index
    %0 = vector.load %arg5[%c0, %c0_0] : memref<150x16xbf16, #tpu.memory_space<vmem>>, vector<150x16xbf16>
    %c0_1 = arith.constant 0 : index
    %c0_2 = arith.constant 0 : index
    %1 = vector.load %arg6[%c0_1, %c0_2] : memref<1x16xf32, #tpu.memory_space<vmem>>, vector<1x16xf32>
    %c0_3 = arith.constant 0 : index
    %c0_4 = arith.constant 0 : index
    %2 = vector.load %arg1[%c0_3, %c0_4] : memref<50x150xbf16, #tpu.memory_space<vmem>>, vector<50x150xbf16>
    %cst = arith.constant dense<0.000000e+00> : vector<50x16xf32>
    %3 = tpu.matmul %2, %0, %cst {dimension_numbers = #tpu.dot_dimension_numbers<[1], [0], [0], [1], [0, 0, 1, 1], [], []>} : vector<50x150xbf16>, vector<150x16xbf16>, vector<50x16xf32> -> vector<50x16xf32>
    %4 = vector.broadcast %1 : vector<1x16xf32> to vector<50x16xf32>
    %5 = arith.addf %3, %4 : vector<50x16xf32>
    %c0_5 = arith.constant 0 : index
    %c0_6 = arith.constant 0 : index
    %6 = vector.load %arg2[%c0_5, %c0_6] : memref<50x150xbf16, #tpu.memory_space<vmem>>, vector<50x150xbf16>
    %cst_7 = arith.constant dense<0.000000e+00> : vector<50x16xf32>
    %7 = tpu.matmul %6, %0, %cst_7 {dimension_numbers = #tpu.dot_dimension_numbers<[1], [0], [0], [1], [0, 0, 1, 1], [], []>} : vector<50x150xbf16>, vector<150x16xbf16>, vector<50x16xf32> -> vector<50x16xf32>
    %8 = vector.broadcast %1 : vector<1x16xf32> to vector<50x16xf32>
    %9 = arith.addf %7, %8 : vector<50x16xf32>
    %c0_8 = arith.constant 0 : index
    %c0_9 = arith.constant 0 : index
    %10 = vector.load %arg3[%c0_8, %c0_9] : memref<50x150xbf16, #tpu.memory_space<vmem>>, vector<50x150xbf16>
    %cst_10 = arith.constant dense<0.000000e+00> : vector<50x16xf32>
    %11 = tpu.matmul %10, %0, %cst_10 {dimension_numbers = #tpu.dot_dimension_numbers<[1], [0], [0], [1], [0, 0, 1, 1], [], []>} : vector<50x150xbf16>, vector<150x16xbf16>, vector<50x16xf32> -> vector<50x16xf32>
    %12 = vector.broadcast %1 : vector<1x16xf32> to vector<50x16xf32>
    %13 = arith.addf %11, %12 : vector<50x16xf32>
    %c0_11 = arith.constant 0 : index
    %c0_12 = arith.constant 0 : index
    %14 = vector.load %arg4[%c0_11, %c0_12] : memref<50x150xbf16, #tpu.memory_space<vmem>>, vector<50x150xbf16>
    %cst_13 = arith.constant dense<0.000000e+00> : vector<50x16xf32>
    %15 = tpu.matmul %14, %0, %cst_13 {dimension_numbers = #tpu.dot_dimension_numbers<[1], [0], [0], [1], [0, 0, 1, 1], [], []>} : vector<50x150xbf16>, vector<150x16xbf16>, vector<50x16xf32> -> vector<50x16xf32>
    %16 = vector.broadcast %1 : vector<1x16xf32> to vector<50x16xf32>
    %17 = arith.addf %15, %16 : vector<50x16xf32>
    %cst_14 = arith.constant dense<0.000000e+00> : vector<16xf32>
    %18 = vector.multi_reduction <add>, %5, %cst_14 [0] : vector<50x16xf32> to vector<16xf32>
    %19 = vector.shape_cast %18 : vector<16xf32> to vector<1x16xf32>
    %cst_15 = arith.constant 0.000000e+00 : f32
    %20 = vector.broadcast %cst_15 : f32 to vector<1x16xf32>
    %21 = arith.addf %20, %19 : vector<1x16xf32>
    %cst_16 = arith.constant dense<0.000000e+00> : vector<16xf32>
    %22 = vector.multi_reduction <add>, %9, %cst_16 [0] : vector<50x16xf32> to vector<16xf32>
    %23 = vector.shape_cast %22 : vector<16xf32> to vector<1x16xf32>
    %24 = arith.addf %21, %23 : vector<1x16xf32>
    %cst_17 = arith.constant dense<0.000000e+00> : vector<16xf32>
    %25 = vector.multi_reduction <add>, %13, %cst_17 [0] : vector<50x16xf32> to vector<16xf32>
    %26 = vector.shape_cast %25 : vector<16xf32> to vector<1x16xf32>
    %27 = arith.addf %24, %26 : vector<1x16xf32>
    %cst_18 = arith.constant dense<0.000000e+00> : vector<16xf32>
    %28 = vector.multi_reduction <add>, %17, %cst_18 [0] : vector<50x16xf32> to vector<16xf32>
    %29 = vector.shape_cast %28 : vector<16xf32> to vector<1x16xf32>
    %30 = arith.addf %27, %29 : vector<1x16xf32>
    %cst_19 = arith.constant 2.000000e+02 : f32
    %31 = vector.broadcast %cst_19 : f32 to vector<1x16xf32>
    %32 = arith.divf %30, %31 : vector<1x16xf32>
    %33 = vector.broadcast %32 : vector<1x16xf32> to vector<50x16xf32>
    %34 = arith.subf %5, %33 : vector<50x16xf32>
    %35 = arith.mulf %34, %34 : vector<50x16xf32>
    %cst_20 = arith.constant dense<0.000000e+00> : vector<16xf32>
    %36 = vector.multi_reduction <add>, %35, %cst_20 [0] : vector<50x16xf32> to vector<16xf32>
    %37 = vector.shape_cast %36 : vector<16xf32> to vector<1x16xf32>
    %cst_21 = arith.constant 0.000000e+00 : f32
    %38 = vector.broadcast %cst_21 : f32 to vector<1x16xf32>
    %39 = arith.addf %38, %37 : vector<1x16xf32>
    %40 = vector.broadcast %32 : vector<1x16xf32> to vector<50x16xf32>
    %41 = arith.subf %9, %40 : vector<50x16xf32>
    %42 = arith.mulf %41, %41 : vector<50x16xf32>
    %cst_22 = arith.constant dense<0.000000e+00> : vector<16xf32>
    %43 = vector.multi_reduction <add>, %42, %cst_22 [0] : vector<50x16xf32> to vector<16xf32>
    %44 = vector.shape_cast %43 : vector<16xf32> to vector<1x16xf32>
    %45 = arith.addf %39, %44 : vector<1x16xf32>
    %46 = vector.broadcast %32 : vector<1x16xf32> to vector<50x16xf32>
    %47 = arith.subf %13, %46 : vector<50x16xf32>
    %48 = arith.mulf %47, %47 : vector<50x16xf32>
    %cst_23 = arith.constant dense<0.000000e+00> : vector<16xf32>
    %49 = vector.multi_reduction <add>, %48, %cst_23 [0] : vector<50x16xf32> to vector<16xf32>
    %50 = vector.shape_cast %49 : vector<16xf32> to vector<1x16xf32>
    %51 = arith.addf %45, %50 : vector<1x16xf32>
    %52 = vector.broadcast %32 : vector<1x16xf32> to vector<50x16xf32>
    %53 = arith.subf %17, %52 : vector<50x16xf32>
    %54 = arith.mulf %53, %53 : vector<50x16xf32>
    %cst_24 = arith.constant dense<0.000000e+00> : vector<16xf32>
    %55 = vector.multi_reduction <add>, %54, %cst_24 [0] : vector<50x16xf32> to vector<16xf32>
    %56 = vector.shape_cast %55 : vector<16xf32> to vector<1x16xf32>
    %57 = arith.addf %51, %56 : vector<1x16xf32>
    %cst_25 = arith.constant 2.000000e+02 : f32
    %58 = vector.broadcast %cst_25 : f32 to vector<1x16xf32>
    %59 = arith.divf %57, %58 : vector<1x16xf32>
    %c0_26 = arith.constant 0 : index
    %c0_27 = arith.constant 0 : index
    %60 = vector.load %arg7[%c0_26, %c0_27] : memref<1x16xf32, #tpu.memory_space<vmem>>, vector<1x16xf32>
    %cst_28 = arith.constant 9.99999974E-6 : f32
    %61 = vector.broadcast %cst_28 : f32 to vector<1x16xf32>
    %62 = arith.addf %59, %61 : vector<1x16xf32>
    %63 = math.rsqrt %62 : vector<1x16xf32>
    %64 = arith.mulf %60, %63 : vector<1x16xf32>
    %c0_29 = arith.constant 0 : index
    %c0_30 = arith.constant 0 : index
    %65 = vector.load %arg8[%c0_29, %c0_30] : memref<1x16xf32, #tpu.memory_space<vmem>>, vector<1x16xf32>
    %66 = arith.mulf %32, %64 : vector<1x16xf32>
    %67 = arith.subf %65, %66 : vector<1x16xf32>
    %68 = vector.broadcast %64 : vector<1x16xf32> to vector<50x16xf32>
    %69 = arith.mulf %5, %68 : vector<50x16xf32>
    %70 = vector.broadcast %67 : vector<1x16xf32> to vector<50x16xf32>
    %71 = arith.addf %69, %70 : vector<50x16xf32>
    %72 = arith.negf %71 : vector<50x16xf32>
    %73 = math.exp %72 : vector<50x16xf32>
    %cst_31 = arith.constant 1.000000e+00 : f32
    %74 = vector.broadcast %cst_31 : f32 to vector<50x16xf32>
    %75 = arith.addf %74, %73 : vector<50x16xf32>
    %76 = arith.divf %74, %75 : vector<50x16xf32>
    %cst_32 = arith.constant 0.000000e+00 : f32
    %77 = vector.broadcast %cst_32 : f32 to vector<50x16xf32>
    %78 = arith.addf %77, %76 : vector<50x16xf32>
    %79 = vector.broadcast %64 : vector<1x16xf32> to vector<50x16xf32>
    %80 = arith.mulf %9, %79 : vector<50x16xf32>
    %81 = vector.broadcast %67 : vector<1x16xf32> to vector<50x16xf32>
    %82 = arith.addf %80, %81 : vector<50x16xf32>
    %83 = arith.negf %82 : vector<50x16xf32>
    %84 = math.exp %83 : vector<50x16xf32>
    %cst_33 = arith.constant 1.000000e+00 : f32
    %85 = vector.broadcast %cst_33 : f32 to vector<50x16xf32>
    %86 = arith.addf %85, %84 : vector<50x16xf32>
    %87 = arith.divf %85, %86 : vector<50x16xf32>
    %88 = arith.addf %78, %87 : vector<50x16xf32>
    %89 = vector.broadcast %64 : vector<1x16xf32> to vector<50x16xf32>
    %90 = arith.mulf %13, %89 : vector<50x16xf32>
    %91 = vector.broadcast %67 : vector<1x16xf32> to vector<50x16xf32>
    %92 = arith.addf %90, %91 : vector<50x16xf32>
    %93 = arith.negf %92 : vector<50x16xf32>
    %94 = math.exp %93 : vector<50x16xf32>
    %cst_34 = arith.constant 1.000000e+00 : f32
    %95 = vector.broadcast %cst_34 : f32 to vector<50x16xf32>
    %96 = arith.addf %95, %94 : vector<50x16xf32>
    %97 = arith.divf %95, %96 : vector<50x16xf32>
    %98 = arith.addf %88, %97 : vector<50x16xf32>
    %99 = vector.broadcast %64 : vector<1x16xf32> to vector<50x16xf32>
    %100 = arith.mulf %17, %99 : vector<50x16xf32>
    %101 = vector.broadcast %67 : vector<1x16xf32> to vector<50x16xf32>
    %102 = arith.addf %100, %101 : vector<50x16xf32>
    %103 = arith.negf %102 : vector<50x16xf32>
    %104 = math.exp %103 : vector<50x16xf32>
    %cst_35 = arith.constant 1.000000e+00 : f32
    %105 = vector.broadcast %cst_35 : f32 to vector<50x16xf32>
    %106 = arith.addf %105, %104 : vector<50x16xf32>
    %107 = arith.divf %105, %106 : vector<50x16xf32>
    %108 = arith.addf %98, %107 : vector<50x16xf32>
    %cst_36 = arith.constant 2.500000e-01 : f32
    %109 = vector.broadcast %cst_36 : f32 to vector<50x16xf32>
    %110 = arith.mulf %109, %108 : vector<50x16xf32>
    %c0_37 = arith.constant 0 : index
    %c0_38 = arith.constant 0 : index
    %111 = vector.load %arg9[%c0_37, %c0_38] : memref<50x16xf32, #tpu.memory_space<vmem>>, vector<50x16xf32>
    tpu.vector_store %arg9[%c0_37, %c0_38], %110 {strides = array<i32>} : memref<50x16xf32, #tpu.memory_space<vmem>>, vector<50x16xf32>,
    return
  }
  func.func @transform_0(%arg0: i32) -> (i32, i32) {
    %c0_i32 = arith.constant 0 : i32
    %c0_i32_0 = arith.constant 0 : i32
    %c0_i32_1 = arith.constant 0 : i32
    return %c0_i32, %c0_i32_0 : i32, i32
  }
  func.func @transform_1(%arg0: i32) -> (i32, i32) {
    %c0_i32 = arith.constant 0 : i32
    %c0_i32_0 = arith.constant 0 : i32
    %c0_i32_1 = arith.constant 0 : i32
    return %c0_i32, %c0_i32_0 : i32, i32
  }
  func.func @transform_2(%arg0: i32) -> (i32, i32) {
    %c0_i32 = arith.constant 0 : i32
    %c0_i32_0 = arith.constant 0 : i32
    %c0_i32_1 = arith.constant 0 : i32
    return %c0_i32, %c0_i32_0 : i32, i32
  }
  func.func @transform_3(%arg0: i32) -> (i32, i32) {
    %c0_i32 = arith.constant 0 : i32
    %c0_i32_0 = arith.constant 0 : i32
    %c0_i32_1 = arith.constant 0 : i32
    return %c0_i32, %c0_i32_0 : i32, i32
  }
  func.func @transform_4(%arg0: i32) -> (i32, i32) {
    %c0_i32 = arith.constant 0 : i32
    %c0_i32_0 = arith.constant 0 : i32
    %c0_i32_1 = arith.constant 0 : i32
    return %c0_i32, %c0_i32_0 : i32, i32
  }
  func.func @transform_5(%arg0: i32) -> (i32, i32) {
    %c0_i32 = arith.constant 0 : i32
    %c0_i32_0 = arith.constant 0 : i32
    %c0_i32_1 = arith.constant 0 : i32
    return %c0_i32, %c0_i32_0 : i32, i32
  }
  func.func @transform_6(%arg0: i32) -> (i32, i32) {
    %c0_i32 = arith.constant 0 : i32
    %c0_i32_0 = arith.constant 0 : i32
    %c0_i32_1 = arith.constant 0 : i32
    return %c0_i32, %c0_i32_0 : i32, i32
  }
  func.func @transform_7(%arg0: i32) -> (i32, i32) {
    %c0_i32 = arith.constant 0 : i32
    %c0_i32_0 = arith.constant 0 : i32
    %c0_i32_1 = arith.constant 0 : i32
    return %c0_i32, %c0_i32_0 : i32, i32
  }
  func.func @transform_8(%arg0: i32) -> (i32, i32) {
    %c0_i32 = arith.constant 0 : i32
    %c0_i32_0 = arith.constant 0 : i32
    %c0_i32_1 = arith.constant 0 : i32
    return %c0_i32, %c0_i32_0 : i32, i32
  }
}

module attributes {stable_mosaic.version = 11 : i64} {
  func.func @fc_fused_kernel(%arg0: i32, %arg1: memref<2x400xbf16, #tpu.memory_space<vmem>>, %arg2: memref<400x120xbf16, #tpu.memory_space<vmem>>, %arg3: memref<1x120xf32, #tpu.memory_space<vmem>>, %arg4: memref<1x120xf32, #tpu.memory_space<vmem>>, %arg5: memref<1x120xf32, #tpu.memory_space<vmem>>, %arg6: memref<120x84xbf16, #tpu.memory_space<vmem>>, %arg7: memref<1x84xf32, #tpu.memory_space<vmem>>, %arg8: memref<1x84xf32, #tpu.memory_space<vmem>>, %arg9: memref<1x84xf32, #tpu.memory_space<vmem>>, %arg10: memref<84x10xbf16, #tpu.memory_space<vmem>>, %arg11: memref<1x10xf32, #tpu.memory_space<vmem>>, %arg12: memref<2x10xf32, #tpu.memory_space<vmem>>) attributes {dimension_semantics = [#tpu.dimension_semantics<arbitrary>], iteration_bounds = array<i64: 1>, scalar_prefetch = 0 : i64, scratch_operands = 0 : i64, tpu.core_type = #tpu.core_type<tc>, window_params = [{pipeline_mode = #tpu.pipeline_mode<synchronous>, transform_indices = @transform_0, window_bounds = array<i64: 2, 400>}, {pipeline_mode = #tpu.pipeline_mode<synchronous>, transform_indices = @transform_1, window_bounds = array<i64: 400, 120>}, {pipeline_mode = #tpu.pipeline_mode<synchronous>, transform_indices = @transform_2, window_bounds = array<i64: 1, 120>}, {pipeline_mode = #tpu.pipeline_mode<synchronous>, transform_indices = @transform_3, window_bounds = array<i64: 1, 120>}, {pipeline_mode = #tpu.pipeline_mode<synchronous>, transform_indices = @transform_4, window_bounds = array<i64: 1, 120>}, {pipeline_mode = #tpu.pipeline_mode<synchronous>, transform_indices = @transform_5, window_bounds = array<i64: 120, 84>}, {pipeline_mode = #tpu.pipeline_mode<synchronous>, transform_indices = @transform_6, window_bounds = array<i64: 1, 84>}, {pipeline_mode = #tpu.pipeline_mode<synchronous>, transform_indices = @transform_7, window_bounds = array<i64: 1, 84>}, {pipeline_mode = #tpu.pipeline_mode<synchronous>, transform_indices = @transform_8, window_bounds = array<i64: 1, 84>}, {pipeline_mode = #tpu.pipeline_mode<synchronous>, transform_indices = @transform_9, window_bounds = array<i64: 84, 10>}, {pipeline_mode = #tpu.pipeline_mode<synchronous>, transform_indices = @transform_10, window_bounds = array<i64: 1, 10>}, {pipeline_mode = #tpu.pipeline_mode<synchronous>, transform_indices = @transform_11, window_bounds = array<i64: 2, 10>}]} {
    %c0 = arith.constant 0 : index
    %c0_0 = arith.constant 0 : index
    %0 = vector.load %arg1[%c0, %c0_0] : memref<2x400xbf16, #tpu.memory_space<vmem>>, vector<2x400xbf16>
    %c0_1 = arith.constant 0 : index
    %c0_2 = arith.constant 0 : index
    %1 = vector.load %arg2[%c0_1, %c0_2] : memref<400x120xbf16, #tpu.memory_space<vmem>>, vector<400x120xbf16>
    %cst = arith.constant dense<0.000000e+00> : vector<2x120xf32>
    %2 = tpu.matmul %0, %1, %cst {dimension_numbers = #tpu.dot_dimension_numbers<[1], [0], [0], [1], [0, 0, 1, 1], [], []>} : vector<2x400xbf16>, vector<400x120xbf16>, vector<2x120xf32> -> vector<2x120xf32>
    %c0_3 = arith.constant 0 : index
    %c0_4 = arith.constant 0 : index
    %3 = vector.load %arg3[%c0_3, %c0_4] : memref<1x120xf32, #tpu.memory_space<vmem>>, vector<1x120xf32>
    %4 = vector.broadcast %3 : vector<1x120xf32> to vector<2x120xf32>
    %5 = arith.addf %2, %4 : vector<2x120xf32>
    %c0_5 = arith.constant 0 : index
    %c0_6 = arith.constant 0 : index
    %6 = vector.load %arg4[%c0_5, %c0_6] : memref<1x120xf32, #tpu.memory_space<vmem>>, vector<1x120xf32>
    %c0_7 = arith.constant 0 : index
    %c0_8 = arith.constant 0 : index
    %7 = vector.load %arg5[%c0_7, %c0_8] : memref<1x120xf32, #tpu.memory_space<vmem>>, vector<1x120xf32>
    %cst_9 = arith.constant dense<0.000000e+00> : vector<120xf32>
    %8 = vector.multi_reduction <add>, %5, %cst_9 [0] : vector<2x120xf32> to vector<120xf32>
    %9 = vector.shape_cast %8 : vector<120xf32> to vector<1x120xf32>
    %cst_10 = arith.constant 2.000000e+00 : f32
    %10 = vector.broadcast %cst_10 : f32 to vector<1x120xf32>
    %11 = arith.divf %9, %10 : vector<1x120xf32>
    %12 = vector.broadcast %11 : vector<1x120xf32> to vector<2x120xf32>
    %13 = arith.subf %5, %12 : vector<2x120xf32>
    %14 = arith.mulf %13, %13 : vector<2x120xf32>
    %cst_11 = arith.constant dense<0.000000e+00> : vector<120xf32>
    %15 = vector.multi_reduction <add>, %14, %cst_11 [0] : vector<2x120xf32> to vector<120xf32>
    %16 = vector.shape_cast %15 : vector<120xf32> to vector<1x120xf32>
    %cst_12 = arith.constant 2.000000e+00 : f32
    %17 = vector.broadcast %cst_12 : f32 to vector<1x120xf32>
    %18 = arith.divf %16, %17 : vector<1x120xf32>
    %cst_13 = arith.constant 9.99999974E-6 : f32
    %19 = vector.broadcast %cst_13 : f32 to vector<1x120xf32>
    %20 = arith.addf %18, %19 : vector<1x120xf32>
    %21 = math.rsqrt %20 : vector<1x120xf32>
    %22 = arith.mulf %6, %21 : vector<1x120xf32>
    %23 = vector.broadcast %22 : vector<1x120xf32> to vector<2x120xf32>
    %24 = arith.mulf %5, %23 : vector<2x120xf32>
    %25 = arith.mulf %11, %22 : vector<1x120xf32>
    %26 = arith.subf %7, %25 : vector<1x120xf32>
    %27 = vector.broadcast %26 : vector<1x120xf32> to vector<2x120xf32>
    %28 = arith.addf %24, %27 : vector<2x120xf32>
    %29 = arith.negf %28 : vector<2x120xf32>
    %30 = math.exp %29 : vector<2x120xf32>
    %cst_14 = arith.constant 1.000000e+00 : f32
    %31 = vector.broadcast %cst_14 : f32 to vector<2x120xf32>
    %32 = arith.addf %31, %30 : vector<2x120xf32>
    %33 = arith.divf %31, %32 : vector<2x120xf32>
    %34 = arith.truncf %33 : vector<2x120xf32> to vector<2x120xbf16>
    %c0_15 = arith.constant 0 : index
    %c0_16 = arith.constant 0 : index
    %35 = vector.load %arg6[%c0_15, %c0_16] : memref<120x84xbf16, #tpu.memory_space<vmem>>, vector<120x84xbf16>
    %cst_17 = arith.constant dense<0.000000e+00> : vector<2x84xf32>
    %36 = tpu.matmul %34, %35, %cst_17 {dimension_numbers = #tpu.dot_dimension_numbers<[1], [0], [0], [1], [0, 0, 1, 1], [], []>} : vector<2x120xbf16>, vector<120x84xbf16>, vector<2x84xf32> -> vector<2x84xf32>
    %c0_18 = arith.constant 0 : index
    %c0_19 = arith.constant 0 : index
    %37 = vector.load %arg7[%c0_18, %c0_19] : memref<1x84xf32, #tpu.memory_space<vmem>>, vector<1x84xf32>
    %38 = vector.broadcast %37 : vector<1x84xf32> to vector<2x84xf32>
    %39 = arith.addf %36, %38 : vector<2x84xf32>
    %c0_20 = arith.constant 0 : index
    %c0_21 = arith.constant 0 : index
    %40 = vector.load %arg8[%c0_20, %c0_21] : memref<1x84xf32, #tpu.memory_space<vmem>>, vector<1x84xf32>
    %c0_22 = arith.constant 0 : index
    %c0_23 = arith.constant 0 : index
    %41 = vector.load %arg9[%c0_22, %c0_23] : memref<1x84xf32, #tpu.memory_space<vmem>>, vector<1x84xf32>
    %cst_24 = arith.constant dense<0.000000e+00> : vector<84xf32>
    %42 = vector.multi_reduction <add>, %39, %cst_24 [0] : vector<2x84xf32> to vector<84xf32>
    %43 = vector.shape_cast %42 : vector<84xf32> to vector<1x84xf32>
    %cst_25 = arith.constant 2.000000e+00 : f32
    %44 = vector.broadcast %cst_25 : f32 to vector<1x84xf32>
    %45 = arith.divf %43, %44 : vector<1x84xf32>
    %46 = vector.broadcast %45 : vector<1x84xf32> to vector<2x84xf32>
    %47 = arith.subf %39, %46 : vector<2x84xf32>
    %48 = arith.mulf %47, %47 : vector<2x84xf32>
    %cst_26 = arith.constant dense<0.000000e+00> : vector<84xf32>
    %49 = vector.multi_reduction <add>, %48, %cst_26 [0] : vector<2x84xf32> to vector<84xf32>
    %50 = vector.shape_cast %49 : vector<84xf32> to vector<1x84xf32>
    %cst_27 = arith.constant 2.000000e+00 : f32
    %51 = vector.broadcast %cst_27 : f32 to vector<1x84xf32>
    %52 = arith.divf %50, %51 : vector<1x84xf32>
    %cst_28 = arith.constant 9.99999974E-6 : f32
    %53 = vector.broadcast %cst_28 : f32 to vector<1x84xf32>
    %54 = arith.addf %52, %53 : vector<1x84xf32>
    %55 = math.rsqrt %54 : vector<1x84xf32>
    %56 = arith.mulf %40, %55 : vector<1x84xf32>
    %57 = vector.broadcast %56 : vector<1x84xf32> to vector<2x84xf32>
    %58 = arith.mulf %39, %57 : vector<2x84xf32>
    %59 = arith.mulf %45, %56 : vector<1x84xf32>
    %60 = arith.subf %41, %59 : vector<1x84xf32>
    %61 = vector.broadcast %60 : vector<1x84xf32> to vector<2x84xf32>
    %62 = arith.addf %58, %61 : vector<2x84xf32>
    %63 = arith.negf %62 : vector<2x84xf32>
    %64 = math.exp %63 : vector<2x84xf32>
    %cst_29 = arith.constant 1.000000e+00 : f32
    %65 = vector.broadcast %cst_29 : f32 to vector<2x84xf32>
    %66 = arith.addf %65, %64 : vector<2x84xf32>
    %67 = arith.divf %65, %66 : vector<2x84xf32>
    %68 = arith.truncf %67 : vector<2x84xf32> to vector<2x84xbf16>
    %c0_30 = arith.constant 0 : index
    %c0_31 = arith.constant 0 : index
    %69 = vector.load %arg10[%c0_30, %c0_31] : memref<84x10xbf16, #tpu.memory_space<vmem>>, vector<84x10xbf16>
    %cst_32 = arith.constant dense<0.000000e+00> : vector<2x10xf32>
    %70 = tpu.matmul %68, %69, %cst_32 {dimension_numbers = #tpu.dot_dimension_numbers<[1], [0], [0], [1], [0, 0, 1, 1], [], []>} : vector<2x84xbf16>, vector<84x10xbf16>, vector<2x10xf32> -> vector<2x10xf32>
    %c0_33 = arith.constant 0 : index
    %c0_34 = arith.constant 0 : index
    %71 = vector.load %arg11[%c0_33, %c0_34] : memref<1x10xf32, #tpu.memory_space<vmem>>, vector<1x10xf32>
    %72 = vector.broadcast %71 : vector<1x10xf32> to vector<2x10xf32>
    %73 = arith.addf %70, %72 : vector<2x10xf32>
    %c0_35 = arith.constant 0 : index
    %c0_36 = arith.constant 0 : index
    %74 = vector.load %arg12[%c0_35, %c0_36] : memref<2x10xf32, #tpu.memory_space<vmem>>, vector<2x10xf32>
    tpu.vector_store %arg12[%c0_35, %c0_36], %73 {strides = array<i32>} : memref<2x10xf32, #tpu.memory_space<vmem>>, vector<2x10xf32>,
    return
  }
  func.func @transform_0(%arg0: i32) -> (i32, i32) {
    %c0_i32 = arith.constant 0 : i32
    %c0_i32_0 = arith.constant 0 : i32
    %c0_i32_1 = arith.constant 0 : i32
    return %c0_i32, %c0_i32_0 : i32, i32
  }
  func.func @transform_1(%arg0: i32) -> (i32, i32) {
    %c0_i32 = arith.constant 0 : i32
    %c0_i32_0 = arith.constant 0 : i32
    %c0_i32_1 = arith.constant 0 : i32
    return %c0_i32, %c0_i32_0 : i32, i32
  }
  func.func @transform_2(%arg0: i32) -> (i32, i32) {
    %c0_i32 = arith.constant 0 : i32
    %c0_i32_0 = arith.constant 0 : i32
    %c0_i32_1 = arith.constant 0 : i32
    return %c0_i32, %c0_i32_0 : i32, i32
  }
  func.func @transform_3(%arg0: i32) -> (i32, i32) {
    %c0_i32 = arith.constant 0 : i32
    %c0_i32_0 = arith.constant 0 : i32
    %c0_i32_1 = arith.constant 0 : i32
    return %c0_i32, %c0_i32_0 : i32, i32
  }
  func.func @transform_4(%arg0: i32) -> (i32, i32) {
    %c0_i32 = arith.constant 0 : i32
    %c0_i32_0 = arith.constant 0 : i32
    %c0_i32_1 = arith.constant 0 : i32
    return %c0_i32, %c0_i32_0 : i32, i32
  }
  func.func @transform_5(%arg0: i32) -> (i32, i32) {
    %c0_i32 = arith.constant 0 : i32
    %c0_i32_0 = arith.constant 0 : i32
    %c0_i32_1 = arith.constant 0 : i32
    return %c0_i32, %c0_i32_0 : i32, i32
  }
  func.func @transform_6(%arg0: i32) -> (i32, i32) {
    %c0_i32 = arith.constant 0 : i32
    %c0_i32_0 = arith.constant 0 : i32
    %c0_i32_1 = arith.constant 0 : i32
    return %c0_i32, %c0_i32_0 : i32, i32
  }
  func.func @transform_7(%arg0: i32) -> (i32, i32) {
    %c0_i32 = arith.constant 0 : i32
    %c0_i32_0 = arith.constant 0 : i32
    %c0_i32_1 = arith.constant 0 : i32
    return %c0_i32, %c0_i32_0 : i32, i32
  }
  func.func @transform_8(%arg0: i32) -> (i32, i32) {
    %c0_i32 = arith.constant 0 : i32
    %c0_i32_0 = arith.constant 0 : i32
    %c0_i32_1 = arith.constant 0 : i32
    return %c0_i32, %c0_i32_0 : i32, i32
  }
  func.func @transform_9(%arg0: i32) -> (i32, i32) {
    %c0_i32 = arith.constant 0 : i32
    %c0_i32_0 = arith.constant 0 : i32
    %c0_i32_1 = arith.constant 0 : i32
    return %c0_i32, %c0_i32_0 : i32, i32
  }
  func.func @transform_10(%arg0: i32) -> (i32, i32) {
    %c0_i32 = arith.constant 0 : i32
    %c0_i32_0 = arith.constant 0 : i32
    %c0_i32_1 = arith.constant 0 : i32
    return %c0_i32, %c0_i32_0 : i32, i32
  }
  func.func @transform_11(%arg0: i32) -> (i32, i32) {
    %c0_i32 = arith.constant 0 : i32
    %c0_i32_0 = arith.constant 0 : i32
    %c0_i32_1 = arith.constant 0 : i32
    return %c0_i32, %c0_i32_0 : i32, i32
  }
}

</mosaic_0001>

<bundles_post_ra>
// kernel: lenet_bn_forward.3
= control target key start
LH: loop header
LB: loop body
LE: loop exit
PB: predicated region body
PF: predicated region fallthrough
CT: control target
= control target key end

     0   :  { %vm300_vm0 = vcmask 1043456   ;;  %vm301_vm1 = vcmask 1044480   ;;  %v12239_v0 = vmov 0.0   ;;  %v6905_v2 = vmov 65535   ;;  %s12230_s4 = inlined_call_operand.vmem [shape: bf16[25,6], index: 4, kind: input, shape index: {}]   ;;  %s12231_s0 = inlined_call_operand.vmem [shape: bf16[392,25], index: 0, kind: input, shape index: {}]   ;;  %s12232_s1 = inlined_call_operand.vmem [shape: bf16[392,25], index: 1, kind: input, shape index: {}]   ;;  %s12233_s2 = inlined_call_operand.vmem [shape: bf16[392,25], index: 2, kind: input, shape index: {}]   ;;  %s12234_s3 = inlined_call_operand.vmem [shape: bf16[392,25], index: 3, kind: input, shape index: {}]   ;;  %s12235_s5 = inlined_call_operand.vmem [shape: f32[1,6], index: 5, kind: input, shape index: {}]   ;;  %s12236_s6 = inlined_call_operand.vmem [shape: f32[1,6], index: 6, kind: input, shape index: {}]   ;;  %s12237_s7 = inlined_call_operand.vmem [shape: f32[1,6], index: 7, kind: input, shape index: {}]   ;;  %s12238_s8 = inlined_call_operand.vmem [shape: f32[392,6], index: 8, kind: output, shape index: {}]  }
   0x1   :  { %5596 = vmatprep.subr.bf16.mxu0 %v12239_v0  ;;  %5700 = vmatprep.subr.bf16.mxu1 %v12239_v0  ;;  %v6015_v1 = vld [vmem:[%s12230_s4] sm:$0xff]   ;;  %v302_v3 = vsel %vm300_vm0, 4294967295, %v6905_v2  ;;  %v6016_v4 = vld [vmem:[%s12230_s4 + $0x8] sm:$0x1f]   ;;  %vm6906_vm2 = vmmov 0   ;;  %vm224_vm3 = vcmask 203776  }
   0x2   :  { %5597 = vmatpush3.bf16.msra.mxu0 %v6015_v1  ;;  %5701 = vmatpush3.bf16.msra.mxu1 %v6015_v1  ;;  %v303_v5 = vsel %vm301_vm1, %v302_v3, 0  ;;  %v6017_v7 = vld [vmem:[%s12231_s0] sm:$0xff]   ;;  %v6019_v9 = vld [vmem:[%s12231_s0 + $0x8] sm:$0xff]   ;;  %v6021_v11 = vld [vmem:[%s12231_s0 + $0x10] sm:$0xff]   ;;  %vm1976_vm4 = vcmask 48128  }
   0x3   :  { %5598 = vmatprep.subr.bf16.mxu0 %v12239_v0  ;;  %5702 = vmatprep.subr.bf16.mxu1 %v12239_v0  ;;  %v305_v6 = vand.u32 %v6016_v4, %v303_v5  ;;  %v6018_v8 = vld [vmem:[%s12232_s1] sm:$0xff]   ;;  %v6020_v10 = vld [vmem:[%s12232_s1 + $0x8] sm:$0xff]   ;;  %v6022_v12 = vld [vmem:[%s12232_s1 + $0x10] sm:$0xff]  }
   0x4   :  { %5600 = vmatprep.mubr.msk.bf16.mxu0 %vm6906_vm2, %v12239_v0  ;;  %5704 = vmatprep.mubr.msk.bf16.mxu1 %vm6906_vm2, %v12239_v0  ;;  %v6023_v13 = vld [vmem:[%s12231_s0 + $0x18] sm:$0xff]   ;;  %v6025_v15 = vld [vmem:[%s12231_s0 + $0x20] sm:$0xff]   ;;  %v6027_v17 = vld [vmem:[%s12231_s0 + $0x28] sm:$0xff]  }
   0x5   :  { %v6024_v14 = vld [vmem:[%s12232_s1 + $0x18] sm:$0xff]   ;;  %v6026_v16 = vld [vmem:[%s12232_s1 + $0x20] sm:$0xff]   ;;  %v6028_v18 = vld [vmem:[%s12232_s1 + $0x28] sm:$0xff]  }
   0x6   :  { %5599 = vmatpush3.bf16.msra.mxu0 %v305_v6  ;;  %5703 = vmatpush3.bf16.msra.mxu1 %v305_v6  ;;  %v6029_v19 = vld [vmem:[%s12231_s0 + $0x30] sm:$0xff]   ;;  %v6031_v21 = vld [vmem:[%s12231_s0 + $0x38] sm:$0xff]   ;;  %v6033_v23 = vld [vmem:[%s12231_s0 + $0x40] sm:$0xff]  }
   0x7   :  { %5804 = vmatprep.subr.bf16.mxu0 %v12239_v0  ;;  %5908 = vmatprep.subr.bf16.mxu1 %v12239_v0  ;;  %v6030_v20 = vld [vmem:[%s12232_s1 + $0x30] sm:$0xff]   ;;  %v6032_v22 = vld [vmem:[%s12232_s1 + $0x38] sm:$0xff]   ;;  %v6034_v24 = vld [vmem:[%s12232_s1 + $0x40] sm:$0xff]  }
   0x8   :  { %v6035_v25 = vld [vmem:[%s12231_s0 + $0x48] sm:$0xff]   ;;  %v6037_v27 = vld [vmem:[%s12231_s0 + $0x50] sm:$0xff]   ;;  %v6039_v29 = vld [vmem:[%s12231_s0 + $0x58] sm:$0xff]  }
   0x9   :  { %5601 = vmatmul.mubr.msk.bf16.vlgmr.msra.gmra.mrb[0].mxu0 %vm224_vm3, %v6017_v7  ;;  %5705 = vmatmul.mubr.msk.bf16.vlgmr.msra.gmra.mrb[0].mxu1 %vm224_vm3, %v6018_v8  ;;  %v6036_v26 = vld [vmem:[%s12232_s1 + $0x48] sm:$0xff]   ;;  %v6038_v28 = vld [vmem:[%s12232_s1 + $0x50] sm:$0xff]   ;;  %v6040_v30 = vld [vmem:[%s12232_s1 + $0x58] sm:$0xff]  }
   0xa   :  { %5805 = vmatpush3.bf16.msra.mxu0 %v6015_v1  ;;  %5909 = vmatpush3.bf16.msra.mxu1 %v6015_v1  ;;  %v6041_v31 = vld [vmem:[%s12231_s0 + $0x60] sm:$0xff]   ;;  %v6043_v33 = vld [vmem:[%s12231_s0 + $0x68] sm:$0xff]   ;;  %v6045_v35 = vld [vmem:[%s12231_s0 + $0x70] sm:$0xff]  }
   0xb   :  { %5604 = vmatprep.mubr.msk.bf16.mxu0 %vm6906_vm2, %v12239_v0  ;;  %5708 = vmatprep.mubr.msk.bf16.mxu1 %vm6906_vm2, %v12239_v0  ;;  %v6042_v32 = vld [vmem:[%s12232_s1 + $0x60] sm:$0xff]   ;;  %v6044_v34 = vld [vmem:[%s12232_s1 + $0x68] sm:$0xff]   ;;  %v6046_v36 = vld [vmem:[%s12232_s1 + $0x70] sm:$0xff]  }
   0xc   :  { %5806 = vmatprep.subr.bf16.mxu0 %v12239_v0  ;;  %5910 = vmatprep.subr.bf16.mxu1 %v12239_v0  ;;  %v6047_v37 = vld [vmem:[%s12231_s0 + $0x78] sm:$0xff]   ;;  %v6049_v39 = vld [vmem:[%s12231_s0 + $0x80] sm:$0xff]   ;;  %v6051_v41 = vld [vmem:[%s12231_s0 + $0x88] sm:$0xff]  }
   0xd   :  { %v6048_v38 = vld [vmem:[%s12232_s1 + $0x78] sm:$0xff]   ;;  %v6050_v40 = vld [vmem:[%s12232_s1 + $0x80] sm:$0xff]   ;;  %v6052_v42 = vld [vmem:[%s12232_s1 + $0x88] sm:$0xff]  }
   0xe   :  { %5807 = vmatpush3.bf16.msra.mxu0 %v305_v6  ;;  %5911 = vmatpush3.bf16.msra.mxu1 %v305_v6  ;;  %v6053_v43 = vld [vmem:[%s12231_s0 + $0x90] sm:$0xff]   ;;  %v6055_v45 = vld [vmem:[%s12231_s0 + $0x98] sm:$0xff]   ;;  %v6057_v47 = vld [vmem:[%s12231_s0 + $0xa0] sm:$0xff]  }
   0xf   :  { %v6054_v44 = vld [vmem:[%s12232_s1 + $0x90] sm:$0xff]   ;;  %v6056_v46 = vld [vmem:[%s12232_s1 + $0x98] sm:$0xff]   ;;  %v6058_v48 = vld [vmem:[%s12232_s1 + $0xa0] sm:$0xff]  }
  0x10   :  { %v6059_v49 = vld [vmem:[%s12231_s0 + $0xa8] sm:$0xff]   ;;  %v6061_v51 = vld [vmem:[%s12231_s0 + $0xb0] sm:$0xff]   ;;  %v6063_v53 = vld [vmem:[%s12231_s0 + $0xb8] sm:$0xff]  }
  0x11   :  { %5605 = vmatmul.mubr.msk.bf16.gmra.mrb[4].mxu0 %vm224_vm3, %v6019_v9  ;;  %5709 = vmatmul.mubr.msk.bf16.gmra.mrb[4].mxu1 %vm224_vm3, %v6020_v10  ;;  %v6060_v50 = vld [vmem:[%s12232_s1 + $0xa8] sm:$0xff]   ;;  %v6062_v52 = vld [vmem:[%s12232_s1 + $0xb0] sm:$0xff]   ;;  %v6064_v54 = vld [vmem:[%s12232_s1 + $0xb8] sm:$0xff]  }
  0x12   :  { %5608 = vmatprep.mubr.msk.bf16.mxu0 %vm6906_vm2, %v12239_v0  ;;  %5712 = vmatprep.mubr.msk.bf16.mxu1 %vm6906_vm2, %v12239_v0  ;;  %v6065_v55 = vld [vmem:[%s12231_s0 + $0xc0] ss:$0 sps:$4 sm:$0xff]   ;;  %v6069_v59 = vld [vmem:[%s12233_s2 + $0x8] sm:$0xff]   ;;  %v6071_v2 = vld [vmem:[%s12233_s2 + $0x10] sm:$0xff]  }
  0x13   :  { %v6066_v56 = vld [vmem:[%s12232_s1 + $0xc0] ss:$0 sps:$4 sm:$0xff]   ;;  %v6070_v60 = vld [vmem:[%s12234_s3 + $0x8] sm:$0xff]   ;;  %v6072_v3 = vld [vmem:[%s12234_s3 + $0x10] sm:$0xff]  }
  0x14   :  { %v6067_v57 = vld [vmem:[%s12233_s2] sm:$0xff]  }
  0x15   :  { %v6068_v58 = vld [vmem:[%s12234_s3] sm:$0xff]  }
  0x19   :  { %5609 = vmatmul.mubr.msk.bf16.gmra.mrb[8].mxu0 %vm224_vm3, %v6021_v11  ;;  %5713 = vmatmul.mubr.msk.bf16.gmra.mrb[8].mxu1 %vm224_vm3, %v6022_v12  ;;  %v6073_v12 = vld [vmem:[%s12233_s2 + $0x18] sm:$0xff]  }
  0x1a   :  { %5612 = vmatprep.mubr.msk.bf16.mxu0 %vm6906_vm2, %v12239_v0  ;;  %5716 = vmatprep.mubr.msk.bf16.mxu1 %vm6906_vm2, %v12239_v0 }
  0x21   :  { %5613 = vmatmul.mubr.msk.bf16.gmra.mrb[12].mxu0 %vm224_vm3, %v6023_v13  ;;  %5717 = vmatmul.mubr.msk.bf16.gmra.mrb[12].mxu1 %vm224_vm3, %v6024_v14  ;;  %v6074_v13 = vld [vmem:[%s12234_s3 + $0x18] sm:$0xff]  }
  0x22   :  { %5616 = vmatprep.mubr.msk.bf16.mxu0 %vm6906_vm2, %v12239_v0  ;;  %5720 = vmatprep.mubr.msk.bf16.mxu1 %vm6906_vm2, %v12239_v0 }
  0x29   :  { %5617 = vmatmul.mubr.msk.bf16.gmra.mrb[16].mxu0 %vm224_vm3, %v6025_v15  ;;  %5721 = vmatmul.mubr.msk.bf16.gmra.mrb[16].mxu1 %vm224_vm3, %v6026_v16 }
  0x2a   :  { %5620 = vmatprep.mubr.msk.bf16.mxu0 %vm6906_vm2, %v12239_v0  ;;  %5724 = vmatprep.mubr.msk.bf16.mxu1 %vm6906_vm2, %v12239_v0 }
  0x31   :  { %5621 = vmatmul.mubr.msk.bf16.gmra.mrb[20].mxu0 %vm224_vm3, %v6027_v17  ;;  %5725 = vmatmul.mubr.msk.bf16.gmra.mrb[20].mxu1 %vm224_vm3, %v6028_v18 }
  0x32   :  { %5624 = vmatprep.mubr.msk.bf16.mxu0 %vm6906_vm2, %v12239_v0  ;;  %5728 = vmatprep.mubr.msk.bf16.mxu1 %vm6906_vm2, %v12239_v0 }
  0x39   :  { %5625 = vmatmul.mubr.msk.bf16.gmra.mrb[24].mxu0 %vm224_vm3, %v6029_v19  ;;  %5729 = vmatmul.mubr.msk.bf16.gmra.mrb[24].mxu1 %vm224_vm3, %v6030_v20 }
  0x3a   :  { %5628 = vmatprep.mubr.msk.bf16.mxu0 %vm6906_vm2, %v12239_v0  ;;  %5732 = vmatprep.mubr.msk.bf16.mxu1 %vm6906_vm2, %v12239_v0 }
  0x41   :  { %5629 = vmatmul.mubr.msk.bf16.gmra.mrb[28].mxu0 %vm224_vm3, %v6031_v21  ;;  %5733 = vmatmul.mubr.msk.bf16.gmra.mrb[28].mxu1 %vm224_vm3, %v6032_v22  ;;  %v6075_v22 = vld [vmem:[%s12233_s2 + $0x20] sm:$0xff]  }
  0x42   :  { %5632 = vmatprep.mubr.msk.bf16.mxu0 %vm6906_vm2, %v12239_v0  ;;  %5736 = vmatprep.mubr.msk.bf16.mxu1 %vm6906_vm2, %v12239_v0 }
  0x49   :  { %5633 = vmatmul.mubr.msk.bf16.gmra.mrb[32].mxu0 %vm224_vm3, %v6033_v23  ;;  %5737 = vmatmul.mubr.msk.bf16.gmra.mrb[32].mxu1 %vm224_vm3, %v6034_v24  ;;  %v6076_v23 = vld [vmem:[%s12234_s3 + $0x20] sm:$0xff]  }
  0x4a   :  { %5636 = vmatprep.mubr.msk.bf16.mxu0 %vm6906_vm2, %v12239_v0  ;;  %5740 = vmatprep.mubr.msk.bf16.mxu1 %vm6906_vm2, %v12239_v0 }
  0x51   :  { %5637 = vmatmul.mubr.msk.bf16.gmra.mrb[36].mxu0 %vm224_vm3, %v6035_v25  ;;  %5741 = vmatmul.mubr.msk.bf16.gmra.mrb[36].mxu1 %vm224_vm3, %v6036_v26 }
  0x52   :  { %5640 = vmatprep.mubr.msk.bf16.mxu0 %vm6906_vm2, %v12239_v0  ;;  %5744 = vmatprep.mubr.msk.bf16.mxu1 %vm6906_vm2, %v12239_v0 }
  0x59   :  { %5641 = vmatmul.mubr.msk.bf16.gmra.mrb[40].mxu0 %vm224_vm3, %v6037_v27  ;;  %5745 = vmatmul.mubr.msk.bf16.gmra.mrb[40].mxu1 %vm224_vm3, %v6038_v28 }
  0x5a   :  { %5644 = vmatprep.mubr.msk.bf16.mxu0 %vm6906_vm2, %v12239_v0  ;;  %5748 = vmatprep.mubr.msk.bf16.mxu1 %vm6906_vm2, %v12239_v0 }
  0x61   :  { %5645 = vmatmul.mubr.msk.bf16.gmra.mrb[44].mxu0 %vm224_vm3, %v6039_v29  ;;  %5749 = vmatmul.mubr.msk.bf16.gmra.mrb[44].mxu1 %vm224_vm3, %v6040_v30 }
  0x62   :  { %5648 = vmatprep.mubr.msk.bf16.mxu0 %vm6906_vm2, %v12239_v0  ;;  %5752 = vmatprep.mubr.msk.bf16.mxu1 %vm6906_vm2, %v12239_v0 }
  0x69   :  { %5649 = vmatmul.mubr.msk.bf16.gmra.mrb[48].mxu0 %vm224_vm3, %v6041_v31  ;;  %5753 = vmatmul.mubr.msk.bf16.gmra.mrb[48].mxu1 %vm224_vm3, %v6042_v32  ;;  %v6077_v32 = vld [vmem:[%s12233_s2 + $0x28] sm:$0xff]  }
  0x6a   :  { %5652 = vmatprep.mubr.msk.bf16.mxu0 %vm6906_vm2, %v12239_v0  ;;  %5756 = vmatprep.mubr.msk.bf16.mxu1 %vm6906_vm2, %v12239_v0 }
  0x71   :  { %5653 = vmatmul.mubr.msk.bf16.gmra.mrb[52].mxu0 %vm224_vm3, %v6043_v33  ;;  %5757 = vmatmul.mubr.msk.bf16.gmra.mrb[52].mxu1 %vm224_vm3, %v6044_v34  ;;  %v6078_v33 = vld [vmem:[%s12234_s3 + $0x28] sm:$0xff]  }
  0x72   :  { %5656 = vmatprep.mubr.msk.bf16.mxu0 %vm6906_vm2, %v12239_v0  ;;  %5760 = vmatprep.mubr.msk.bf16.mxu1 %vm6906_vm2, %v12239_v0 }
  0x79   :  { %5657 = vmatmul.mubr.msk.bf16.gmra.mrb[56].mxu0 %vm224_vm3, %v6045_v35  ;;  %5761 = vmatmul.mubr.msk.bf16.gmra.mrb[56].mxu1 %vm224_vm3, %v6046_v36 }
  0x7a   :  { %5660 = vmatprep.mubr.msk.bf16.mxu0 %vm6906_vm2, %v12239_v0  ;;  %5764 = vmatprep.mubr.msk.bf16.mxu1 %vm6906_vm2, %v12239_v0 }
  0x81   :  { %5661 = vmatmul.mubr.msk.bf16.gmra.mrb[60].mxu0 %vm224_vm3, %v6047_v37  ;;  %5765 = vmatmul.mubr.msk.bf16.gmra.mrb[60].mxu1 %vm224_vm3, %v6048_v38 }
  0x82   :  { %5664 = vmatprep.mubr.msk.bf16.mxu0 %vm6906_vm2, %v12239_v0  ;;  %5768 = vmatprep.mubr.msk.bf16.mxu1 %vm6906_vm2, %v12239_v0 }
  0x89   :  { %5665 = vmatmul.mubr.msk.bf16.gmra.mrb[64].mxu0 %vm224_vm3, %v6049_v39  ;;  %5769 = vmatmul.mubr.msk.bf16.gmra.mrb[64].mxu1 %vm224_vm3, %v6050_v40 }
  0x8a   :  { %5668 = vmatprep.mubr.msk.bf16.mxu0 %vm6906_vm2, %v12239_v0  ;;  %5772 = vmatprep.mubr.msk.bf16.mxu1 %vm6906_vm2, %v12239_v0 }
  0x91   :  { %5669 = vmatmul.mubr.msk.bf16.gmra.mrb[68].mxu0 %vm224_vm3, %v6051_v41  ;;  %5773 = vmatmul.mubr.msk.bf16.gmra.mrb[68].mxu1 %vm224_vm3, %v6052_v42  ;;  %v6079_v42 = vld [vmem:[%s12233_s2 + $0x30] sm:$0xff]  }
  0x92   :  { %5672 = vmatprep.mubr.msk.bf16.mxu0 %vm6906_vm2, %v12239_v0  ;;  %5776 = vmatprep.mubr.msk.bf16.mxu1 %vm6906_vm2, %v12239_v0 }
  0x99   :  { %5673 = vmatmul.mubr.msk.bf16.gmra.mrb[72].mxu0 %vm224_vm3, %v6053_v43  ;;  %5777 = vmatmul.mubr.msk.bf16.gmra.mrb[72].mxu1 %vm224_vm3, %v6054_v44  ;;  %v6080_v43 = vld [vmem:[%s12234_s3 + $0x30] sm:$0xff]  }
  0x9a   :  { %5676 = vmatprep.mubr.msk.bf16.mxu0 %vm6906_vm2, %v12239_v0  ;;  %5780 = vmatprep.mubr.msk.bf16.mxu1 %vm6906_vm2, %v12239_v0 }
  0xa1   :  { %5677 = vmatmul.mubr.msk.bf16.gmra.mrb[76].mxu0 %vm224_vm3, %v6055_v45  ;;  %5781 = vmatmul.mubr.msk.bf16.gmra.mrb[76].mxu1 %vm224_vm3, %v6056_v46 }
  0xa2   :  { %5680 = vmatprep.mubr.msk.bf16.mxu0 %vm6906_vm2, %v12239_v0  ;;  %5784 = vmatprep.mubr.msk.bf16.mxu1 %vm6906_vm2, %v12239_v0 }
  0xa9   :  { %5681 = vmatmul.mubr.msk.bf16.gmra.mrb[80].mxu0 %vm224_vm3, %v6057_v47  ;;  %5785 = vmatmul.mubr.msk.bf16.gmra.mrb[80].mxu1 %vm224_vm3, %v6058_v48 }
  0xaa   :  { %5684 = vmatprep.mubr.msk.bf16.mxu0 %vm6906_vm2, %v12239_v0  ;;  %5788 = vmatprep.mubr.msk.bf16.mxu1 %vm6906_vm2, %v12239_v0 }
  0xb1   :  { %5685 = vmatmul.mubr.msk.bf16.gmra.mrb[84].mxu0 %vm224_vm3, %v6059_v49  ;;  %5789 = vmatmul.mubr.msk.bf16.gmra.mrb[84].mxu1 %vm224_vm3, %v6060_v50 }
  0xb2   :  { %5688 = vmatprep.mubr.msk.bf16.mxu0 %vm6906_vm2, %v12239_v0  ;;  %5792 = vmatprep.mubr.msk.bf16.mxu1 %vm6906_vm2, %v12239_v0 }
  0xb9   :  { %5689 = vmatmul.mubr.msk.bf16.gmra.mrb[88].mxu0 %vm224_vm3, %v6061_v51  ;;  %5793 = vmatmul.mubr.msk.bf16.gmra.mrb[88].mxu1 %vm224_vm3, %v6062_v52  ;;  %v6081_v52 = vld [vmem:[%s12233_s2 + $0x38] sm:$0xff]  }
  0xba   :  { %5692 = vmatprep.mubr.msk.bf16.mxu0 %vm6906_vm2, %v12239_v0  ;;  %5796 = vmatprep.mubr.msk.bf16.mxu1 %vm6906_vm2, %v12239_v0 }
  0xc1   :  { %5693 = vmatmul.mubr.msk.bf16.gmra.mrb[92].mxu0 %vm224_vm3, %v6063_v53  ;;  %5797 = vmatmul.mubr.msk.bf16.gmra.mrb[92].mxu1 %vm224_vm3, %v6064_v54  ;;  %v6082_v53 = vld [vmem:[%s12234_s3 + $0x38] sm:$0xff]  }
  0xc2   :  { %5696 = vmatprep.mubr.msk.bf16.mxu0 %vm6906_vm2, %v12239_v0  ;;  %5800 = vmatprep.mubr.msk.bf16.mxu1 %vm6906_vm2, %v12239_v0 }
  0xc9   :  { %5697 = vmatmul.mubr.msk.bf16.gmra.mrb[96].mxu0 %vm224_vm3, %v6065_v55  ;;  %5801 = vmatmul.mubr.msk.bf16.gmra.mrb[96].mxu1 %vm224_vm3, %v6066_v56 }
  0xca   :  { %5808 = vmatprep.mubr.msk.bf16.mxu0 %vm6906_vm2, %v12239_v0  ;;  %5912 = vmatprep.mubr.msk.bf16.mxu1 %vm6906_vm2, %v12239_v0 }
  0xd1   :  { %5809 = vmatmul.mubr.msk.bf16.vlgmr.msra.gmra.mrb[100].mxu0 %vm224_vm3, %v6067_v57  ;;  %5913 = vmatmul.mubr.msk.bf16.vlgmr.msra.gmra.mrb[100].mxu1 %vm224_vm3, %v6068_v58 }
  0xd2   :  { %5812 = vmatprep.mubr.msk.bf16.mxu0 %vm6906_vm2, %v12239_v0  ;;  %5916 = vmatprep.mubr.msk.bf16.mxu1 %vm6906_vm2, %v12239_v0 }
  0xd9   :  { %5813 = vmatmul.mubr.msk.bf16.gmra.mrb[104].mxu0 %vm224_vm3, %v6069_v59  ;;  %5917 = vmatmul.mubr.msk.bf16.gmra.mrb[104].mxu1 %vm224_vm3, %v6070_v60 }
  0xda   :  { %5816 = vmatprep.mubr.msk.bf16.mxu0 %vm6906_vm2, %v12239_v0  ;;  %5920 = vmatprep.mubr.msk.bf16.mxu1 %vm6906_vm2, %v12239_v0 }
  0xdc   :  { %v7294_v61 = vpop.f32.mrb[0].mxu0  ;;  %v7296_v62 = vpop.f32.mrb[0].mxu1 }
  0xdd   :  { %v5602_v63 = vpop.f32.mrb[1].mxu0  ;;  %v5706_v1 = vpop.f32.mrb[1].mxu1 }
  0xde   :  { %v7304_v4 = vpop.f32.mrb[2].mxu0  ;;  %v7306_v5 = vpop.f32.mrb[2].mxu1  ;;  %v6083_v1 = vld [vmem:[%s12233_s2 + $0x40] sm:$0xff]  }
  0xdf   :  { %v5603_v6 = vpop.f32.mrb[3].mxu0  ;;  %v5707_v7 = vpop.f32.mrb[3].mxu1 }
  0xe1   :  { %5817 = vmatmul.mubr.msk.bf16.gmra.mrb[108].mxu0 %vm224_vm3, %v6071_v2  ;;  %5921 = vmatmul.mubr.msk.bf16.gmra.mrb[108].mxu1 %vm224_vm3, %v6072_v3  ;;  %v6084_v2 = vld [vmem:[%s12234_s3 + $0x40] sm:$0xff]  }
  0xe2   :  { %5820 = vmatprep.mubr.msk.bf16.mxu0 %vm6906_vm2, %v12239_v0  ;;  %5924 = vmatprep.mubr.msk.bf16.mxu1 %vm6906_vm2, %v12239_v0 }
  0xe4   :  { %v7314_v8 = vpop.f32.mrb[4].mxu0  ;;  %v7316_v9 = vpop.f32.mrb[4].mxu1 }
  0xe5   :  { %v5606_v10 = vpop.f32.mrb[5].mxu0  ;;  %v5710_v11 = vpop.f32.mrb[5].mxu1 }
  0xe6   :  { %v7324_v14 = vpop.f32.mrb[6].mxu0  ;;  %v7326_v15 = vpop.f32.mrb[6].mxu1 }
  0xe7   :  { %v5607_v16 = vpop.f32.mrb[7].mxu0  ;;  %v5711_v17 = vpop.f32.mrb[7].mxu1 }
  0xe8   :  { %v6085_v17 = vld [vmem:[%s12233_s2 + $0x48] sm:$0xff]  }
  0xe9   :  { %5821 = vmatmul.mubr.msk.bf16.gmra.mrb[112].mxu0 %vm224_vm3, %v6073_v12  ;;  %5925 = vmatmul.mubr.msk.bf16.gmra.mrb[112].mxu1 %vm224_vm3, %v6074_v13 }
  0xea   :  { %5824 = vmatprep.mubr.msk.bf16.mxu0 %vm6906_vm2, %v12239_v0  ;;  %5928 = vmatprep.mubr.msk.bf16.mxu1 %vm6906_vm2, %v12239_v0 }
  0xec   :  { %v7334_v18 = vpop.f32.mrb[8].mxu0  ;;  %v7336_v19 = vpop.f32.mrb[8].mxu1 }
  0xed   :  { %v5610_v20 = vpop.f32.mrb[9].mxu0  ;;  %v5714_v21 = vpop.f32.mrb[9].mxu1 }
  0xee   :  { %v7344_v24 = vpop.f32.mrb[10].mxu0  ;;  %v7346_v25 = vpop.f32.mrb[10].mxu1  ;;  %v6086_v20 = vld [vmem:[%s12234_s3 + $0x48] sm:$0xff]  }
  0xef   :  { %v5611_v26 = vpop.f32.mrb[11].mxu0  ;;  %v5715_v27 = vpop.f32.mrb[11].mxu1 }
  0xf1   :  { %5825 = vmatmul.mubr.msk.bf16.gmra.mrb[116].mxu0 %vm224_vm3, %v6075_v22  ;;  %5929 = vmatmul.mubr.msk.bf16.gmra.mrb[116].mxu1 %vm224_vm3, %v6076_v23 }
  0xf2   :  { %5828 = vmatprep.mubr.msk.bf16.mxu0 %vm6906_vm2, %v12239_v0  ;;  %5932 = vmatprep.mubr.msk.bf16.mxu1 %vm6906_vm2, %v12239_v0 }
  0xf4   :  { %v7354_v28 = vpop.f32.mrb[12].mxu0  ;;  %v7356_v29 = vpop.f32.mrb[12].mxu1 }
  0xf5   :  { %v5614_v30 = vpop.f32.mrb[13].mxu0  ;;  %v5718_v31 = vpop.f32.mrb[13].mxu1 }
  0xf6   :  { %v7364_v34 = vpop.f32.mrb[14].mxu0  ;;  %v7366_v35 = vpop.f32.mrb[14].mxu1 }
  0xf7   :  { %v5615_v36 = vpop.f32.mrb[15].mxu0  ;;  %v5719_v37 = vpop.f32.mrb[15].mxu1 }
  0xf8   :  { %v6088_v36 = vld [vmem:[%s12234_s3 + $0x50] sm:$0xff]  }
  0xf9   :  { %5829 = vmatmul.mubr.msk.bf16.gmra.mrb[120].mxu0 %vm224_vm3, %v6077_v32  ;;  %5933 = vmatmul.mubr.msk.bf16.gmra.mrb[120].mxu1 %vm224_vm3, %v6078_v33  ;;  %v6087_v33 = vld [vmem:[%s12233_s2 + $0x50] sm:$0xff]  }
  0xfa   :  { %5832 = vmatprep.mubr.msk.bf16.mxu0 %vm6906_vm2, %v12239_v0  ;;  %5936 = vmatprep.mubr.msk.bf16.mxu1 %vm6906_vm2, %v12239_v0 }
  0xfc   :  { %v7374_v38 = vpop.f32.mrb[16].mxu0  ;;  %v7376_v39 = vpop.f32.mrb[16].mxu1 }
  0xfd   :  { %v5618_v40 = vpop.f32.mrb[17].mxu0  ;;  %v5722_v41 = vpop.f32.mrb[17].mxu1 }
  0xfe   :  { %v7384_v44 = vpop.f32.mrb[18].mxu0  ;;  %v7386_v45 = vpop.f32.mrb[18].mxu1 }
  0xff   :  { %v5619_v46 = vpop.f32.mrb[19].mxu0  ;;  %v5723_v47 = vpop.f32.mrb[19].mxu1 }
 0x101   :  { %5833 = vmatmul.mubr.msk.bf16.gmra.mrb[124].mxu0 %vm224_vm3, %v6079_v42  ;;  %5937 = vmatmul.mubr.msk.bf16.gmra.mrb[124].mxu1 %vm224_vm3, %v6080_v43 }
 0x102   :  { %5836 = vmatprep.mubr.msk.bf16.mxu0 %vm6906_vm2, %v12239_v0  ;;  %5940 = vmatprep.mubr.msk.bf16.mxu1 %vm6906_vm2, %v12239_v0 }
 0x104   :  { %v7394_v48 = vpop.f32.mrb[20].mxu0  ;;  %v7396_v49 = vpop.f32.mrb[20].mxu1 }
 0x105   :  { %v5622_v50 = vpop.f32.mrb[21].mxu0  ;;  %v5726_v51 = vpop.f32.mrb[21].mxu1 }
 0x106   :  { %v7404_v54 = vpop.f32.mrb[22].mxu0  ;;  %v7406_v55 = vpop.f32.mrb[22].mxu1  ;;  %v6089_v51 = vld [vmem:[%s12233_s2 + $0x58] sm:$0xff]  }
 0x107   :  { %v5623_v56 = vpop.f32.mrb[23].mxu0  ;;  %v5727_v57 = vpop.f32.mrb[23].mxu1 }
 0x109   :  { %5837 = vmatmul.mubr.msk.bf16.gmra.mrb[128].mxu0 %vm224_vm3, %v6081_v52  ;;  %5941 = vmatmul.mubr.msk.bf16.gmra.mrb[128].mxu1 %vm224_vm3, %v6082_v53  ;;  %v6090_v52 = vld [vmem:[%s12234_s3 + $0x58] sm:$0xff]  }
 0x10a   :  { %5840 = vmatprep.mubr.msk.bf16.mxu0 %vm6906_vm2, %v12239_v0  ;;  %5944 = vmatprep.mubr.msk.bf16.mxu1 %vm6906_vm2, %v12239_v0 }
 0x10c   :  { %v7414_v58 = vpop.f32.mrb[24].mxu0  ;;  %v7416_v59 = vpop.f32.mrb[24].mxu1 }
 0x10d   :  { %v5626_v60 = vpop.f32.mrb[25].mxu0  ;;  %v5730_v63 = vpop.f32.mrb[25].mxu1 }
 0x10e   :  { %v7424_v3 = vpop.f32.mrb[26].mxu0  ;;  %v7426_v6 = vpop.f32.mrb[26].mxu1 }
 0x10f   :  { %12597 = vst [vmem:[#allocation2_spill] sm:$0xff] %v7424_v3  ;;  %12598 = vst [vmem:[#allocation3_spill] sm:$0xff] %v7426_v6  ;;  %v5627_v7 = vpop.f32.mrb[27].mxu0  ;;  %v5731_v10 = vpop.f32.mrb[27].mxu1 }
 0x110   :  { %v6091_v10 = vld [vmem:[%s12233_s2 + $0x60] sm:$0xff]  }
 0x111   :  { %5841 = vmatmul.mubr.msk.bf16.gmra.mrb[132].mxu0 %vm224_vm3, %v6083_v1  ;;  %5945 = vmatmul.mubr.msk.bf16.gmra.mrb[132].mxu1 %vm224_vm3, %v6084_v2 }
 0x112   :  { %5844 = vmatprep.mubr.msk.bf16.mxu0 %vm6906_vm2, %v12239_v0  ;;  %5948 = vmatprep.mubr.msk.bf16.mxu1 %vm6906_vm2, %v12239_v0 }
 0x114   :  { %v7434_v11 = vpop.f32.mrb[28].mxu0  ;;  %v7436_v12 = vpop.f32.mrb[28].mxu1 }
 0x115   :  { %12599 = vst [vmem:[#allocation4_spill] sm:$0xff] %v7434_v11  ;;  %12600 = vst [vmem:[#allocation5_spill] sm:$0xff] %v7436_v12  ;;  %v5630_v13 = vpop.f32.mrb[29].mxu0  ;;  %v5734_v16 = vpop.f32.mrb[29].mxu1 }
 0x116   :  { %v7444_v21 = vpop.f32.mrb[30].mxu0  ;;  %v7446_v22 = vpop.f32.mrb[30].mxu1  ;;  %v6092_v13 = vld [vmem:[%s12234_s3 + $0x60] sm:$0xff]  }
 0x117   :  { %12601 = vst [vmem:[#allocation6_spill] sm:$0xff] %v7444_v21  ;;  %12602 = vst [vmem:[#allocation7_spill] sm:$0xff] %v7446_v22  ;;  %v5631_v23 = vpop.f32.mrb[31].mxu0  ;;  %v5735_v26 = vpop.f32.mrb[31].mxu1 }
 0x119   :  { %5845 = vmatmul.mubr.msk.bf16.gmra.mrb[136].mxu0 %vm224_vm3, %v6085_v17  ;;  %5949 = vmatmul.mubr.msk.bf16.gmra.mrb[136].mxu1 %vm224_vm3, %v6086_v20 }
 0x11a   :  { %5848 = vmatprep.mubr.msk.bf16.mxu0 %vm6906_vm2, %v12239_v0  ;;  %5952 = vmatprep.mubr.msk.bf16.mxu1 %vm6906_vm2, %v12239_v0 }
 0x11c   :  { %v7454_v27 = vpop.f32.mrb[32].mxu0  ;;  %v7456_v30 = vpop.f32.mrb[32].mxu1 }
 0x11d   :  { %12603 = vst [vmem:[#allocation8_spill] sm:$0xff] %v7454_v27  ;;  %12604 = vst [vmem:[#allocation9_spill] sm:$0xff] %v7456_v30  ;;  %v5634_v31 = vpop.f32.mrb[33].mxu0  ;;  %v5738_v32 = vpop.f32.mrb[33].mxu1 }
 0x11e   :  { %v7464_v37 = vpop.f32.mrb[34].mxu0  ;;  %v7466_v40 = vpop.f32.mrb[34].mxu1 }
 0x11f   :  { %12605 = vst [vmem:[#allocation10_spill] sm:$0xff] %v7464_v37  ;;  %12606 = vst [vmem:[#allocation11_spill] sm:$0xff] %v7466_v40  ;;  %v5635_v41 = vpop.f32.mrb[35].mxu0  ;;  %v5739_v42 = vpop.f32.mrb[35].mxu1 }
 0x120   :  { %v6094_v41 = vld [vmem:[%s12234_s3 + $0x68] sm:$0xff]  }
 0x121   :  { %5849 = vmatmul.mubr.msk.bf16.gmra.mrb[140].mxu0 %vm224_vm3, %v6087_v33  ;;  %5953 = vmatmul.mubr.msk.bf16.gmra.mrb[140].mxu1 %vm224_vm3, %v6088_v36  ;;  %v6093_v36 = vld [vmem:[%s12233_s2 + $0x68] sm:$0xff]  }
 0x122   :  { %5852 = vmatprep.mubr.msk.bf16.mxu0 %vm6906_vm2, %v12239_v0  ;;  %5956 = vmatprep.mubr.msk.bf16.mxu1 %vm6906_vm2, %v12239_v0 }
 0x124   :  { %v7474_v43 = vpop.f32.mrb[36].mxu0  ;;  %v7476_v46 = vpop.f32.mrb[36].mxu1 }
 0x125   :  { %12607 = vst [vmem:[#allocation12_spill] sm:$0xff] %v7474_v43  ;;  %12608 = vst [vmem:[#allocation13_spill] sm:$0xff] %v7476_v46  ;;  %v5638_v47 = vpop.f32.mrb[37].mxu0  ;;  %v5742_v50 = vpop.f32.mrb[37].mxu1 }
 0x126   :  { %v7484_v53 = vpop.f32.mrb[38].mxu0  ;;  %v7486_v56 = vpop.f32.mrb[38].mxu1 }
 0x127   :  { %12609 = vst [vmem:[#allocation14_spill] sm:$0xff] %v7484_v53  ;;  %12610 = vst [vmem:[#allocation15_spill] sm:$0xff] %v7486_v56  ;;  %v5639_v57 = vpop.f32.mrb[39].mxu0  ;;  %v5743_v60 = vpop.f32.mrb[39].mxu1 }
 0x129   :  { %5853 = vmatmul.mubr.msk.bf16.gmra.mrb[144].mxu0 %vm224_vm3, %v6089_v51  ;;  %5957 = vmatmul.mubr.msk.bf16.gmra.mrb[144].mxu1 %vm224_vm3, %v6090_v52 }
 0x12a   :  { %5856 = vmatprep.mubr.msk.bf16.mxu0 %vm6906_vm2, %v12239_v0  ;;  %5960 = vmatprep.mubr.msk.bf16.mxu1 %vm6906_vm2, %v12239_v0 }
 0x12c   :  { %v7494_v63 = vpop.f32.mrb[40].mxu0  ;;  %v7496_v1 = vpop.f32.mrb[40].mxu1 }
 0x12d   :  { %12611 = vst [vmem:[#allocation16_spill] sm:$0xff] %v7494_v63  ;;  %12612 = vst [vmem:[#allocation17_spill] sm:$0xff] %v7496_v1  ;;  %v5642_v2 = vpop.f32.mrb[41].mxu0  ;;  %v5746_v7 = vpop.f32.mrb[41].mxu1 }
 0x12e   :  { %v7504_v16 = vpop.f32.mrb[42].mxu0  ;;  %v7506_v17 = vpop.f32.mrb[42].mxu1  ;;  %v6095_v7 = vld [vmem:[%s12233_s2 + $0x70] sm:$0xff]  }
 0x12f   :  { %12613 = vst [vmem:[#allocation18_spill] sm:$0xff] %v7504_v16  ;;  %12614 = vst [vmem:[#allocation19_spill] sm:$0xff] %v7506_v17  ;;  %v5643_v20 = vpop.f32.mrb[43].mxu0  ;;  %v5747_v23 = vpop.f32.mrb[43].mxu1 }
 0x131   :  { %5857 = vmatmul.mubr.msk.bf16.gmra.mrb[148].mxu0 %vm224_vm3, %v6091_v10  ;;  %5961 = vmatmul.mubr.msk.bf16.gmra.mrb[148].mxu1 %vm224_vm3, %v6092_v13  ;;  %v6096_v10 = vld [vmem:[%s12234_s3 + $0x70] sm:$0xff]  }
 0x132   :  { %5860 = vmatprep.mubr.msk.bf16.mxu0 %vm6906_vm2, %v12239_v0  ;;  %5964 = vmatprep.mubr.msk.bf16.mxu1 %vm6906_vm2, %v12239_v0 }
 0x134   :  { %v7514_v26 = vpop.f32.mrb[44].mxu0  ;;  %v7516_v31 = vpop.f32.mrb[44].mxu1 }
 0x135   :  { %12615 = vst [vmem:[#allocation20_spill] sm:$0xff] %v7514_v26  ;;  %12616 = vst [vmem:[#allocation21_spill] sm:$0xff] %v7516_v31  ;;  %v5646_v32 = vpop.f32.mrb[45].mxu0  ;;  %v5750_v33 = vpop.f32.mrb[45].mxu1 }
 0x136   :  { %v7524_v42 = vpop.f32.mrb[46].mxu0  ;;  %v7526_v47 = vpop.f32.mrb[46].mxu1 }
 0x137   :  { %12617 = vst [vmem:[#allocation22_spill] sm:$0xff] %v7524_v42  ;;  %12618 = vst [vmem:[#allocation23_spill] sm:$0xff] %v7526_v47  ;;  %v5647_v50 = vpop.f32.mrb[47].mxu0  ;;  %v5751_v51 = vpop.f32.mrb[47].mxu1 }
 0x138   :  { %v6097_v51 = vld [vmem:[%s12233_s2 + $0x78] sm:$0xff]  }
 0x139   :  { %5861 = vmatmul.mubr.msk.bf16.gmra.mrb[152].mxu0 %vm224_vm3, %v6093_v36  ;;  %5965 = vmatmul.mubr.msk.bf16.gmra.mrb[152].mxu1 %vm224_vm3, %v6094_v41 }
 0x13a   :  { %5864 = vmatprep.mubr.msk.bf16.mxu0 %vm6906_vm2, %v12239_v0  ;;  %5968 = vmatprep.mubr.msk.bf16.mxu1 %vm6906_vm2, %v12239_v0 }
 0x13c   :  { %v7534_v52 = vpop.f32.mrb[48].mxu0  ;;  %v7536_v57 = vpop.f32.mrb[48].mxu1 }
 0x13d   :  { %12619 = vst [vmem:[#allocation24_spill] sm:$0xff] %v7534_v52  ;;  %12620 = vst [vmem:[#allocation25_spill] sm:$0xff] %v7536_v57  ;;  %v5650_v60 = vpop.f32.mrb[49].mxu0  ;;  %v5754_v2 = vpop.f32.mrb[49].mxu1 }
 0x13e   :  { %v7544_v13 = vpop.f32.mrb[50].mxu0  ;;  %v7546_v20 = vpop.f32.mrb[50].mxu1  ;;  %v6098_v60 = vld [vmem:[%s12234_s3 + $0x78] sm:$0xff]  }
 0x13f   :  { %12621 = vst [vmem:[#allocation26_spill] sm:$0xff] %v7544_v13  ;;  %12622 = vst [vmem:[#allocation27_spill] sm:$0xff] %v7546_v20  ;;  %v5651_v23 = vpop.f32.mrb[51].mxu0  ;;  %v5755_v32 = vpop.f32.mrb[51].mxu1 }
 0x141   :  { %5865 = vmatmul.mubr.msk.bf16.gmra.mrb[156].mxu0 %vm224_vm3, %v6095_v7  ;;  %5969 = vmatmul.mubr.msk.bf16.gmra.mrb[156].mxu1 %vm224_vm3, %v6096_v10 }
 0x142   :  { %5868 = vmatprep.mubr.msk.bf16.mxu0 %vm6906_vm2, %v12239_v0  ;;  %5972 = vmatprep.mubr.msk.bf16.mxu1 %vm6906_vm2, %v12239_v0 }
 0x144   :  { %v7554_v33 = vpop.f32.mrb[52].mxu0  ;;  %v7556_v36 = vpop.f32.mrb[52].mxu1 }
 0x145   :  { %12623 = vst [vmem:[#allocation28_spill] sm:$0xff] %v7554_v33  ;;  %12624 = vst [vmem:[#allocation29_spill] sm:$0xff] %v7556_v36  ;;  %v5654_v41 = vpop.f32.mrb[53].mxu0  ;;  %v5758_v50 = vpop.f32.mrb[53].mxu1 }
 0x146   :  { %v7564_v2 = vpop.f32.mrb[54].mxu0  ;;  %v7566_v7 = vpop.f32.mrb[54].mxu1 }
 0x147   :  { %12625 = vst [vmem:[#allocation30_spill] sm:$0xff] %v7564_v2  ;;  %12626 = vst [vmem:[#allocation31_spill] sm:$0xff] %v7566_v7  ;;  %v5655_v10 = vpop.f32.mrb[55].mxu0  ;;  %v5759_v23 = vpop.f32.mrb[55].mxu1 }
 0x148   :  { %v6099_v10 = vld [vmem:[%s12233_s2 + $0x80] sm:$0xff]  }
 0x149   :  { %5869 = vmatmul.mubr.msk.bf16.gmra.mrb[160].mxu0 %vm224_vm3, %v6097_v51  ;;  %5973 = vmatmul.mubr.msk.bf16.gmra.mrb[160].mxu1 %vm224_vm3, %v6098_v60  ;;  %v6100_v51 = vld [vmem:[%s12234_s3 + $0x80] sm:$0xff]  }
 0x14a   :  { %5872 = vmatprep.mubr.msk.bf16.mxu0 %vm6906_vm2, %v12239_v0  ;;  %5976 = vmatprep.mubr.msk.bf16.mxu1 %vm6906_vm2, %v12239_v0 }
 0x14c   :  { %v7574_v32 = vpop.f32.mrb[56].mxu0  ;;  %v7576_v41 = vpop.f32.mrb[56].mxu1 }
 0x14d   :  { %12627 = vst [vmem:[#allocation32_spill] sm:$0xff] %v7574_v32  ;;  %12628 = vst [vmem:[#allocation33_spill] sm:$0xff] %v7576_v41  ;;  %v5658_v50 = vpop.f32.mrb[57].mxu0  ;;  %v5762_v2 = vpop.f32.mrb[57].mxu1 }
 0x14e   :  { %v7584_v60 = vpop.f32.mrb[58].mxu0  ;;  %v7586_v23 = vpop.f32.mrb[58].mxu1  ;;  %v12631_v50 = vmov 0.0  }
 0x14f   :  { %12629 = vst [vmem:[#allocation34_spill] sm:$0xff] %v7584_v60  ;;  %12630 = vst [vmem:[#allocation35_spill] sm:$0xff] %v7586_v23  ;;  %v5659_v7 = vpop.f32.mrb[59].mxu0  ;;  %v5763_v0 = vpop.f32.mrb[59].mxu1 }
 0x150   :  { %v6101_v0 = vld [vmem:[%s12233_s2 + $0x88] sm:$0xff]  }
 0x151   :  { %5873 = vmatmul.mubr.msk.bf16.gmra.mrb[164].mxu0 %vm224_vm3, %v6099_v10  ;;  %5977 = vmatmul.mubr.msk.bf16.gmra.mrb[164].mxu1 %vm224_vm3, %v6100_v51  ;;  %v6102_v7 = vld [vmem:[%s12234_s3 + $0x88] sm:$0xff]  }
 0x152   :  { %5876 = vmatprep.mubr.msk.bf16.mxu0 %vm6906_vm2, %v12631_v50  ;;  %5980 = vmatprep.mubr.msk.bf16.mxu1 %vm6906_vm2, %v12631_v50 }
 0x154   :  { %v7594_v2 = vpop.f32.mrb[60].mxu0  ;;  %v7596_v41 = vpop.f32.mrb[60].mxu1 }
 0x155   :  { %12632 = vst [vmem:[#allocation36_spill] sm:$0xff] %v7594_v2  ;;  %12633 = vst [vmem:[#allocation37_spill] sm:$0xff] %v7596_v41  ;;  %v5662_v32 = vpop.f32.mrb[61].mxu0  ;;  %v5766_v60 = vpop.f32.mrb[61].mxu1 }
 0x156   :  { %v7604_v10 = vpop.f32.mrb[62].mxu0  ;;  %v7606_v51 = vpop.f32.mrb[62].mxu1 }
 0x157   :  { %12634 = vst [vmem:[#allocation38_spill] sm:$0xff] %v7604_v10  ;;  %12635 = vst [vmem:[#allocation39_spill] sm:$0xff] %v7606_v51  ;;  %v5663_v23 = vpop.f32.mrb[63].mxu0  ;;  %v5767_v36 = vpop.f32.mrb[63].mxu1 }
 0x158   :  { %v6103_v36 = vld [vmem:[%s12233_s2 + $0x90] sm:$0xff]  }
 0x159   :  { %5877 = vmatmul.mubr.msk.bf16.gmra.mrb[168].mxu0 %vm224_vm3, %v6101_v0  ;;  %5981 = vmatmul.mubr.msk.bf16.gmra.mrb[168].mxu1 %vm224_vm3, %v6102_v7  ;;  %v6104_v23 = vld [vmem:[%s12234_s3 + $0x90] sm:$0xff]  }
 0x15a   :  { %5880 = vmatprep.mubr.msk.bf16.mxu0 %vm6906_vm2, %v12631_v50  ;;  %5984 = vmatprep.mubr.msk.bf16.mxu1 %vm6906_vm2, %v12631_v50 }
 0x15c   :  { %v7614_v32 = vpop.f32.mrb[64].mxu0  ;;  %v7616_v60 = vpop.f32.mrb[64].mxu1 }
 0x15d   :  { %12636 = vst [vmem:[#allocation40_spill] sm:$0xff] %v7614_v32  ;;  %12637 = vst [vmem:[#allocation41_spill] sm:$0xff] %v7616_v60  ;;  %v5666_v41 = vpop.f32.mrb[65].mxu0  ;;  %v5770_v10 = vpop.f32.mrb[65].mxu1 }
 0x15e   :  { %v7624_v0 = vpop.f32.mrb[66].mxu0  ;;  %v7626_v7 = vpop.f32.mrb[66].mxu1 }
 0x15f   :  { %12638 = vst [vmem:[#allocation42_spill] sm:$0xff] %v7624_v0  ;;  %12639 = vst [vmem:[#allocation43_spill] sm:$0xff] %v7626_v7  ;;  %v5667_v51 = vpop.f32.mrb[67].mxu0  ;;  %v5771_v2 = vpop.f32.mrb[67].mxu1 }
 0x160   :  { %v6105_v2 = vld [vmem:[%s12233_s2 + $0x98] sm:$0xff]  }
 0x161   :  { %5881 = vmatmul.mubr.msk.bf16.gmra.mrb[172].mxu0 %vm224_vm3, %v6103_v36  ;;  %5985 = vmatmul.mubr.msk.bf16.gmra.mrb[172].mxu1 %vm224_vm3, %v6104_v23  ;;  %v6106_v51 = vld [vmem:[%s12234_s3 + $0x98] sm:$0xff]  }
 0x162   :  { %5884 = vmatprep.mubr.msk.bf16.mxu0 %vm6906_vm2, %v12631_v50  ;;  %5988 = vmatprep.mubr.msk.bf16.mxu1 %vm6906_vm2, %v12631_v50 }
 0x164   :  { %v7634_v41 = vpop.f32.mrb[68].mxu0  ;;  %v7636_v10 = vpop.f32.mrb[68].mxu1 }
 0x165   :  { %12640 = vst [vmem:[#allocation44_spill] sm:$0xff] %v7634_v41  ;;  %12641 = vst [vmem:[#allocation45_spill] sm:$0xff] %v7636_v10  ;;  %v5670_v60 = vpop.f32.mrb[69].mxu0  ;;  %v5774_v0 = vpop.f32.mrb[69].mxu1 }
 0x166   :  { %v7644_v36 = vpop.f32.mrb[70].mxu0  ;;  %v7646_v23 = vpop.f32.mrb[70].mxu1 }
 0x167   :  { %12642 = vst [vmem:[#allocation46_spill] sm:$0xff] %v7644_v36  ;;  %12643 = vst [vmem:[#allocation47_spill] sm:$0xff] %v7646_v23  ;;  %v5671_v7 = vpop.f32.mrb[71].mxu0  ;;  %v5775_v32 = vpop.f32.mrb[71].mxu1 }
 0x168   :  { %v6107_v32 = vld [vmem:[%s12233_s2 + $0xa0] sm:$0xff]  }
 0x169   :  { %5885 = vmatmul.mubr.msk.bf16.gmra.mrb[176].mxu0 %vm224_vm3, %v6105_v2  ;;  %5989 = vmatmul.mubr.msk.bf16.gmra.mrb[176].mxu1 %vm224_vm3, %v6106_v51  ;;  %v6108_v7 = vld [vmem:[%s12234_s3 + $0xa0] sm:$0xff]  }
 0x16a   :  { %5888 = vmatprep.mubr.msk.bf16.mxu0 %vm6906_vm2, %v12631_v50  ;;  %5992 = vmatprep.mubr.msk.bf16.mxu1 %vm6906_vm2, %v12631_v50 }
 0x16c   :  { %v7654_v60 = vpop.f32.mrb[72].mxu0  ;;  %v7656_v0 = vpop.f32.mrb[72].mxu1 }
 0x16d   :  { %12644 = vst [vmem:[#allocation48_spill] sm:$0xff] %v7654_v60  ;;  %12645 = vst [vmem:[#allocation49_spill] sm:$0xff] %v7656_v0  ;;  %v5674_v10 = vpop.f32.mrb[73].mxu0  ;;  %v5778_v36 = vpop.f32.mrb[73].mxu1 }
 0x16e   :  { %v7664_v2 = vpop.f32.mrb[74].mxu0  ;;  %v7666_v51 = vpop.f32.mrb[74].mxu1 }
 0x16f   :  { %12646 = vst [vmem:[#allocation50_spill] sm:$0xff] %v7664_v2  ;;  %12647 = vst [vmem:[#allocation51_spill] sm:$0xff] %v7666_v51  ;;  %v5675_v23 = vpop.f32.mrb[75].mxu0  ;;  %v5779_v41 = vpop.f32.mrb[75].mxu1 }
 0x170   :  { %v6109_v41 = vld [vmem:[%s12233_s2 + $0xa8] sm:$0xff]  }
 0x171   :  { %5889 = vmatmul.mubr.msk.bf16.gmra.mrb[180].mxu0 %vm224_vm3, %v6107_v32  ;;  %5993 = vmatmul.mubr.msk.bf16.gmra.mrb[180].mxu1 %vm224_vm3, %v6108_v7  ;;  %v6110_v23 = vld [vmem:[%s12234_s3 + $0xa8] sm:$0xff]  }
 0x172   :  { %5892 = vmatprep.mubr.msk.bf16.mxu0 %vm6906_vm2, %v12631_v50  ;;  %5996 = vmatprep.mubr.msk.bf16.mxu1 %vm6906_vm2, %v12631_v50 }
 0x174   :  { %v7674_v10 = vpop.f32.mrb[76].mxu0  ;;  %v7676_v36 = vpop.f32.mrb[76].mxu1 }
 0x175   :  { %12648 = vst [vmem:[#allocation52_spill] sm:$0xff] %v7674_v10  ;;  %12649 = vst [vmem:[#allocation53_spill] sm:$0xff] %v7676_v36  ;;  %v5678_v0 = vpop.f32.mrb[77].mxu0  ;;  %v5782_v2 = vpop.f32.mrb[77].mxu1 }
 0x176   :  { %v7684_v32 = vpop.f32.mrb[78].mxu0  ;;  %v7686_v7 = vpop.f32.mrb[78].mxu1 }
 0x177   :  { %12650 = vst [vmem:[#allocation54_spill] sm:$0xff] %v7684_v32  ;;  %12651 = vst [vmem:[#allocation55_spill] sm:$0xff] %v7686_v7  ;;  %v5679_v51 = vpop.f32.mrb[79].mxu0  ;;  %v5783_v60 = vpop.f32.mrb[79].mxu1 }
 0x178   :  { %v6111_v60 = vld [vmem:[%s12233_s2 + $0xb0] sm:$0xff]  }
 0x179   :  { %5893 = vmatmul.mubr.msk.bf16.gmra.mrb[184].mxu0 %vm224_vm3, %v6109_v41  ;;  %5997 = vmatmul.mubr.msk.bf16.gmra.mrb[184].mxu1 %vm224_vm3, %v6110_v23  ;;  %v6112_v51 = vld [vmem:[%s12234_s3 + $0xb0] sm:$0xff]  }
 0x17a   :  { %5896 = vmatprep.mubr.msk.bf16.mxu0 %vm6906_vm2, %v12631_v50  ;;  %6000 = vmatprep.mubr.msk.bf16.mxu1 %vm6906_vm2, %v12631_v50 }
 0x17c   :  { %v7694_v0 = vpop.f32.mrb[80].mxu0  ;;  %v7696_v2 = vpop.f32.mrb[80].mxu1 }
 0x17d   :  { %12652 = vst [vmem:[#allocation56_spill] sm:$0xff] %v7694_v0  ;;  %12653 = vst [vmem:[#allocation57_spill] sm:$0xff] %v7696_v2  ;;  %v5682_v36 = vpop.f32.mrb[81].mxu0  ;;  %v5786_v32 = vpop.f32.mrb[81].mxu1 }
 0x17e   :  { %v7704_v41 = vpop.f32.mrb[82].mxu0  ;;  %v7706_v23 = vpop.f32.mrb[82].mxu1 }
 0x17f   :  { %12654 = vst [vmem:[#allocation58_spill] sm:$0xff] %v7704_v41  ;;  %12655 = vst [vmem:[#allocation59_spill] sm:$0xff] %v7706_v23  ;;  %v5683_v7 = vpop.f32.mrb[83].mxu0  ;;  %v5787_v10 = vpop.f32.mrb[83].mxu1 }
 0x180   :  { %v6113_v10 = vld [vmem:[%s12233_s2 + $0xb8] sm:$0xff]  }
 0x181   :  { %5897 = vmatmul.mubr.msk.bf16.gmra.mrb[188].mxu0 %vm224_vm3, %v6111_v60  ;;  %6001 = vmatmul.mubr.msk.bf16.gmra.mrb[188].mxu1 %vm224_vm3, %v6112_v51  ;;  %v6114_v7 = vld [vmem:[%s12234_s3 + $0xb8] sm:$0xff]  }
 0x182   :  { %5900 = vmatprep.mubr.msk.bf16.mxu0 %vm6906_vm2, %v12631_v50  ;;  %6004 = vmatprep.mubr.msk.bf16.mxu1 %vm6906_vm2, %v12631_v50 }
 0x184   :  { %v7714_v36 = vpop.f32.mrb[84].mxu0  ;;  %v7716_v32 = vpop.f32.mrb[84].mxu1 }
 0x185   :  { %12656 = vst [vmem:[#allocation60_spill] sm:$0xff] %v7714_v36  ;;  %12657 = vst [vmem:[#allocation61_spill] sm:$0xff] %v7716_v32  ;;  %v5686_v2 = vpop.f32.mrb[85].mxu0  ;;  %v5790_v41 = vpop.f32.mrb[85].mxu1 }
 0x186   :  { %v7724_v60 = vpop.f32.mrb[86].mxu0  ;;  %v7726_v51 = vpop.f32.mrb[86].mxu1 }
 0x187   :  { %12658 = vst [vmem:[#allocation62_spill] sm:$0xff] %v7724_v60  ;;  %12659 = vst [vmem:[#allocation63_spill] sm:$0xff] %v7726_v51  ;;  %v5687_v23 = vpop.f32.mrb[87].mxu0  ;;  %v5791_v0 = vpop.f32.mrb[87].mxu1 }
 0x188   :  { %v6115_v0 = vld [vmem:[%s12233_s2 + $0xc0] ss:$0 sps:$4 sm:$0xff]  }
 0x189   :  { %5901 = vmatmul.mubr.msk.bf16.gmra.mrb[192].mxu0 %vm224_vm3, %v6113_v10  ;;  %6005 = vmatmul.mubr.msk.bf16.gmra.mrb[192].mxu1 %vm224_vm3, %v6114_v7  ;;  %v6116_v23 = vld [vmem:[%s12234_s3 + $0xc0] ss:$0 sps:$4 sm:$0xff]  }
 0x18a   :  { %5904 = vmatprep.mubr.msk.bf16.mxu0 %vm6906_vm2, %v12631_v50  ;;  %6008 = vmatprep.mubr.msk.bf16.mxu1 %vm6906_vm2, %v12631_v50 }
 0x18c   :  { %v7734_v2 = vpop.f32.mrb[88].mxu0  ;;  %v7736_v41 = vpop.f32.mrb[88].mxu1 }
 0x18d   :  { %12660 = vst [vmem:[#allocation64_spill] sm:$0xff] %v7734_v2  ;;  %12661 = vst [vmem:[#allocation65_spill] sm:$0xff] %v7736_v41  ;;  %v5690_v32 = vpop.f32.mrb[89].mxu0  ;;  %v5794_v60 = vpop.f32.mrb[89].mxu1 }
 0x18e   :  { %v7744_v10 = vpop.f32.mrb[90].mxu0  ;;  %v7746_v7 = vpop.f32.mrb[90].mxu1 }
 0x18f   :  { %12662 = vst [vmem:[#allocation66_spill] sm:$0xff] %v7744_v10  ;;  %12663 = vst [vmem:[#allocation67_spill] sm:$0xff] %v7746_v7  ;;  %v5691_v51 = vpop.f32.mrb[91].mxu0  ;;  %v5795_v50 = vpop.f32.mrb[91].mxu1 }
 0x191   :  { %5905 = vmatmul.mubr.msk.bf16.gmra.mrb[196].mxu0 %vm224_vm3, %v6115_v0  ;;  %6009 = vmatmul.mubr.msk.bf16.gmra.mrb[196].mxu1 %vm224_vm3, %v6116_v23 }
 0x194   :  { %v7750_v32 = vpop.f32.mrb[92].mxu0  ;;  %v7752_v60 = vpop.f32.mrb[92].mxu1 }
 0x195   :  { %12664 = vst [vmem:[#allocation68_spill] sm:$0xff] %v7750_v32  ;;  %12665 = vst [vmem:[#allocation69_spill] sm:$0xff] %v7752_v60  ;;  %v5694_v41 = vpop.f32.mrb[93].mxu0  ;;  %v5798_v2 = vpop.f32.mrb[93].mxu1 }
 0x196   :  { %v7754_v36 = vpop.f32.mrb[94].mxu0  ;;  %v7756_v33 = vpop.f32.mrb[94].mxu1 }
 0x197   :  { %12666 = vst [vmem:[#allocation70_spill] sm:$0xff] %v7754_v36  ;;  %12667 = vst [vmem:[#allocation71_spill] sm:$0xff] %v7756_v33  ;;  %v5695_v20 = vpop.f32.mrb[95].mxu0  ;;  %v5799_v10 = vpop.f32.mrb[95].mxu1 }
 0x19c   :  { %v7758_v13 = vpop.f32.mrb[96].mxu0  ;;  %v7760_v51 = vpop.f32.mrb[96].mxu1 }
 0x19d   :  { %12668 = vst [vmem:[#allocation72_spill] sm:$0xff] %v7758_v13  ;;  %12669 = vst [vmem:[#allocation73_spill] sm:$0xff] %v7760_v51  ;;  %v5698_v50 = vpop.f32.mrb[97].mxu0  ;;  %v5802_v0 = vpop.f32.mrb[97].mxu1 }
 0x19e   :  { %v536_v7 = vpop.f32.mrb[98].mxu0  ;;  %v1015_v23 = vpop.f32.mrb[98].mxu1 }
 0x19f   :  { %v5699_v57 = vpop.f32.mrb[99].mxu0  ;;  %v5803_v32 = vpop.f32.mrb[99].mxu1 }
 0x1a4   :  { %v7762_v52 = vpop.f32.mrb[100].mxu0  ;;  %v7764_v41 = vpop.f32.mrb[100].mxu1 }
 0x1a5   :  { %v5810_v2 = vpop.f32.mrb[101].mxu0  ;;  %v5914_v36 = vpop.f32.mrb[101].mxu1 }
 0x1a6   :  { %v7766_v60 = vpop.f32.mrb[102].mxu0  ;;  %v7768_v20 = vpop.f32.mrb[102].mxu1 }
 0x1a7   :  { %v5811_v10 = vpop.f32.mrb[103].mxu0  ;;  %v5915_v13 = vpop.f32.mrb[103].mxu1 }
 0x1ac   :  { %v7770_v33 = vpop.f32.mrb[104].mxu0  ;;  %v7772_v50 = vpop.f32.mrb[104].mxu1 }
 0x1ad   :  { %v5814_v7 = vpop.f32.mrb[105].mxu0  ;;  %v5918_v0 = vpop.f32.mrb[105].mxu1 }
 0x1ae   :  { %v7774_v57 = vpop.f32.mrb[106].mxu0  ;;  %v7776_v32 = vpop.f32.mrb[106].mxu1 }
 0x1af   :  { %v5815_v23 = vpop.f32.mrb[107].mxu0  ;;  %v5919_v51 = vpop.f32.mrb[107].mxu1 }
 0x1b4   :  { %v7778_v2 = vpop.f32.mrb[108].mxu0  ;;  %v7780_v36 = vpop.f32.mrb[108].mxu1 }
 0x1b5   :  { %v5818_v47 = vpop.f32.mrb[109].mxu0  ;;  %v5922_v42 = vpop.f32.mrb[109].mxu1 }
 0x1b6   :  { %v7782_v10 = vpop.f32.mrb[110].mxu0  ;;  %v7784_v13 = vpop.f32.mrb[110].mxu1 }
 0x1b7   :  { %v5819_v31 = vpop.f32.mrb[111].mxu0  ;;  %v5923_v26 = vpop.f32.mrb[111].mxu1 }
 0x1bc   :  { %v7786_v7 = vpop.f32.mrb[112].mxu0  ;;  %v7788_v0 = vpop.f32.mrb[112].mxu1 }
 0x1bd   :  { %v5822_v17 = vpop.f32.mrb[113].mxu0  ;;  %v5926_v16 = vpop.f32.mrb[113].mxu1 }
 0x1be   :  { %v7790_v23 = vpop.f32.mrb[114].mxu0  ;;  %v7792_v51 = vpop.f32.mrb[114].mxu1 }
 0x1bf   :  { %v5823_v1 = vpop.f32.mrb[115].mxu0  ;;  %v5927_v63 = vpop.f32.mrb[115].mxu1 }
 0x1c4   :  { %v7794_v47 = vpop.f32.mrb[116].mxu0  ;;  %v7796_v42 = vpop.f32.mrb[116].mxu1 }
 0x1c5   :  { %v5826_v56 = vpop.f32.mrb[117].mxu0  ;;  %v5930_v53 = vpop.f32.mrb[117].mxu1 }
 0x1c6   :  { %v7798_v31 = vpop.f32.mrb[118].mxu0  ;;  %v7800_v26 = vpop.f32.mrb[118].mxu1 }
 0x1c7   :  { %v5827_v46 = vpop.f32.mrb[119].mxu0  ;;  %v5931_v43 = vpop.f32.mrb[119].mxu1 }
 0x1cc   :  { %v7802_v17 = vpop.f32.mrb[120].mxu0  ;;  %v7804_v16 = vpop.f32.mrb[120].mxu1 }
 0x1cd   :  { %v5830_v40 = vpop.f32.mrb[121].mxu0  ;;  %v5934_v37 = vpop.f32.mrb[121].mxu1 }
 0x1ce   :  { %v7806_v1 = vpop.f32.mrb[122].mxu0  ;;  %v7808_v63 = vpop.f32.mrb[122].mxu1 }
 0x1cf   :  { %12670 = vst [vmem:[#allocation74_spill] sm:$0xff] %v7808_v63  ;;  %v5831_v30 = vpop.f32.mrb[123].mxu0  ;;  %v5935_v27 = vpop.f32.mrb[123].mxu1 }
 0x1d4   :  { %v7810_v56 = vpop.f32.mrb[124].mxu0  ;;  %v7812_v53 = vpop.f32.mrb[124].mxu1 }
 0x1d5   :  { %12671 = vst [vmem:[#allocation75_spill] sm:$0xff] %v7812_v53  ;;  %v5834_v22 = vpop.f32.mrb[125].mxu0  ;;  %v5938_v21 = vpop.f32.mrb[125].mxu1 }
 0x1d6   :  { %v7814_v46 = vpop.f32.mrb[126].mxu0  ;;  %v7816_v43 = vpop.f32.mrb[126].mxu1  ;;  %v7829_v21 = vld [vmem:[%s12235_s5] ss:$0 sm:$0xff] }
 0x1d7   :  { %v5835_v12 = vpop.f32.mrb[127].mxu0  ;;  %v5939_v11 = vpop.f32.mrb[127].mxu1 }
 0x1d8   :  { %v7833_v11 = vadd.f32 %v7829_v21, %v7304_v4  ;;  %v7837_v12 = vadd.f32 %v7829_v21, %v7294_v61  ;;  %v7853_v4 = vadd.f32 %v7829_v21, %v7314_v8 }
 0x1da   :  { %12674 = vst [vmem:[#allocation78_spill] sm:$0xff] %v7833_v11  ;;  %12675 = vst [vmem:[#allocation79_spill] sm:$0xff] %v7837_v12  ;;  %v1977_v8 = vsel %vm1976_vm4, %v7837_v12, 0.0  ;;  %v1980_v12 = vsel %vm1976_vm4, %v7853_v4, 0.0 }
 0x1db   :  { %12680 = vst [vmem:[#allocation84_spill] sm:$0xff] %v7853_v4 }
 0x1dc   :  { %v7818_v40 = vpop.f32.mrb[128].mxu0  ;;  %v7820_v37 = vpop.f32.mrb[128].mxu1 }
 0x1dd   :  { %12672 = vst [vmem:[#allocation76_spill] sm:$0xff] %v7820_v37  ;;  %v5838_v6 = vpop.f32.mrb[129].mxu0  ;;  %v5942_v63 = vpop.f32.mrb[129].mxu1  ;;  %v7877_v37 = vadd.f32 %v7829_v21, %v7762_v52 }
 0x1de   :  { %v7822_v30 = vpop.f32.mrb[130].mxu0  ;;  %v7824_v27 = vpop.f32.mrb[130].mxu1  ;;  %v7841_v6 = vadd.f32 %v7829_v21, %v7296_v62  ;;  %v7859_v62 = vadd.f32 %v7829_v21, %v7316_v9 }
 0x1df   :  { %12673 = vst [vmem:[#allocation77_spill] sm:$0xff] %v7824_v27  ;;  %v5839_v3 = vpop.f32.mrb[131].mxu0  ;;  %v5943_v53 = vpop.f32.mrb[131].mxu1  ;;  %v1978_v27 = vsel %vm1976_vm4, %v7833_v11, 0.0  ;;  %12685 = vst [vmem:[#allocation89_spill] sm:$0xff] %v7877_v37 }
 0x1e0   :  { %12676 = vst [vmem:[#allocation80_spill] sm:$0xff] %v7841_v6  ;;  %v7845_v3 = vadd.f32 %v7829_v21, %v7306_v5  ;;  %12681 = vst [vmem:[#allocation85_spill] sm:$0xff] %v7859_v62  ;;  %v7863_v5 = vadd.f32 %v7829_v21, %v7766_v60  ;;  %v2081_v11 = vsel %vm1976_vm4, %v7841_v6, 0.0  ;;  %v7881_v60 = vadd.f32 %v7829_v21, %v7770_v33 }
 0x1e2   :  { %12677 = vst [vmem:[#allocation81_spill] sm:$0xff] %v7845_v3  ;;  %12682 = vst [vmem:[#allocation86_spill] sm:$0xff] %v7863_v5  ;;  %v2082_v9 = vsel %vm1976_vm4, %v7845_v3, 0.0  ;;  %v7893_v3 = vadd.f32 %v7829_v21, %v7326_v15  ;;  %v2186_v52 = vsel %vm1976_vm4, %v7863_v5, 0.0  ;;  %v2185_v15 = vsel %vm1976_vm4, %v7877_v37, 0.0 }
 0x1e3   :  { %12686 = vst [vmem:[#allocation90_spill] sm:$0xff] %v7881_v60  ;;  %v2083_v33 = vadd.f32 %v2082_v9, %v2081_v11  ;;  %v2188_v11 = vsel %vm1976_vm4, %v7881_v60, 0.0  ;;  %v2187_v6 = vadd.f32 %v2186_v52, %v2185_v15  ;;  %v7931_v60 = vadd.f32 %v7829_v21, %v7772_v50 }
 0x1e4   :  { %v7847_v22 = vpop.f32.mrb[132].mxu0  ;;  %v7849_v63 = vpop.f32.mrb[132].mxu1  ;;  %12688 = vst [vmem:[#allocation92_spill] sm:$0xff] %v7893_v3 }
 0x1e5   :  { %12678 = vst [vmem:[#allocation82_spill] sm:$0xff] %v7847_v22  ;;  %12679 = vst [vmem:[#allocation83_spill] sm:$0xff] %v7849_v63  ;;  %v5842_v53 = vpop.f32.mrb[133].mxu0  ;;  %v5946_v61 = vpop.f32.mrb[133].mxu1  ;;  %v2189_v50 = vadd.f32 %v2188_v11, %v2187_v6  ;;  %v7965_v6 = vadd.f32 %v7829_v21, %v7356_v29  ;;  %v7971_v11 = vadd.f32 %v7829_v21, %v7776_v32 }
 0x1e6   :  { %v7865_v22 = vpop.f32.mrb[134].mxu0  ;;  %v7867_v63 = vpop.f32.mrb[134].mxu1  ;;  %12695 = vst [vmem:[#allocation99_spill] sm:$0xff] %v7931_v60  ;;  %v7985_v32 = vadd.f32 %v7829_v21, %v7780_v36  ;;  %v8001_v36 = vadd.f32 %v7829_v21, %v7364_v34  ;;  %v8017_v34 = vadd.f32 %v7829_v21, %v7374_v38  ;;  %v8033_v38 = vadd.f32 %v7829_v21, %v7790_v23 }
 0x1e7   :  { %12683 = vst [vmem:[#allocation87_spill] sm:$0xff] %v7865_v22  ;;  %12684 = vst [vmem:[#allocation88_spill] sm:$0xff] %v7867_v63  ;;  %v5843_v53 = vpop.f32.mrb[135].mxu0  ;;  %v5947_v61 = vpop.f32.mrb[135].mxu1  ;;  %v1979_v63 = vadd.f32 %v1978_v27, %v1977_v8  ;;  %v7899_v27 = vadd.f32 %v7829_v21, %v7334_v18  ;;  %v7903_v8 = vadd.f32 %v7829_v21, %v7336_v19  ;;  %v2086_v22 = vsel %vm1976_vm4, %v7893_v3, 0.0 }
 0x1e8   :  { %v2084_v53 = vsel %vm1976_vm4, %v7859_v62, 0.0  ;;  %v7889_v61 = vadd.f32 %v7829_v21, %v7324_v14  ;;  %v7907_v14 = vadd.f32 %v7829_v21, %v7764_v41  ;;  %v7913_v62 = vadd.f32 %v7829_v21, %v7768_v20  ;;  %12700 = vst [vmem:[#allocation104_spill] sm:$0xff] %v7965_v6  ;;  %12701 = vst [vmem:[#allocation105_spill] sm:$0xff] %v7971_v11 }
 0x1e9   :  { %12689 = vst [vmem:[#allocation93_spill] sm:$0xff] %v7899_v27  ;;  %12690 = vst [vmem:[#allocation94_spill] sm:$0xff] %v7903_v8  ;;  %v7919_v18 = vadd.f32 %v7829_v21, %v7774_v57  ;;  %v1981_v41 = vadd.f32 %v1980_v12, %v1979_v63  ;;  %v2085_v5 = vadd.f32 %v2084_v53, %v2083_v33  ;;  %v2088_v63 = vsel %vm1976_vm4, %v7903_v8, 0.0 }
 0x1ea   :  { %12687 = vst [vmem:[#allocation91_spill] sm:$0xff] %v7889_v61  ;;  %12691 = vst [vmem:[#allocation95_spill] sm:$0xff] %v7907_v14  ;;  %v1982_v20 = vsel %vm1976_vm4, %v7889_v61, 0.0  ;;  %v7935_v57 = vadd.f32 %v7829_v21, %v7778_v2  ;;  %v7951_v2 = vadd.f32 %v7829_v21, %v7346_v25  ;;  %v2289_v33 = vsel %vm1976_vm4, %v7907_v14, 0.0 }
 0x1eb   :  { %12692 = vst [vmem:[#allocation96_spill] sm:$0xff] %v7913_v62  ;;  %12693 = vst [vmem:[#allocation97_spill] sm:$0xff] %v7919_v18  ;;  %v2290_v15 = vsel %vm1976_vm4, %v7913_v62, 0.0  ;;  %v2190_v8 = vsel %vm1976_vm4, %v7919_v18, 0.0  ;;  %v1983_v3 = vadd.f32 %v1982_v20, %v1981_v41  ;;  %v2292_v25 = vsel %vm1976_vm4, %v7931_v60, 0.0 }
 0x1ec   :  { %v7921_v19 = vpop.f32.mrb[136].mxu0  ;;  %v7923_v9 = vpop.f32.mrb[136].mxu1  ;;  %12696 = vst [vmem:[#allocation100_spill] sm:$0xff] %v7935_v57  ;;  %12698 = vst [vmem:[#allocation102_spill] sm:$0xff] %v7951_v2  ;;  %v2291_v41 = vadd.f32 %v2290_v15, %v2289_v33  ;;  %v2191_v20 = vadd.f32 %v2190_v8, %v2189_v50  ;;  %v7989_v60 = vadd.f32 %v7829_v21, %v7786_v7  ;;  %v2092_v8 = vsel %vm1976_vm4, %v7965_v6, 0.0 }
 0x1ed   :  { %12694 = vst [vmem:[#allocation98_spill] sm:$0xff] %v7923_v9  ;;  %v5846_v4 = vpop.f32.mrb[137].mxu0  ;;  %v5950_v37 = vpop.f32.mrb[137].mxu1  ;;  %12703 = vst [vmem:[#allocation107_spill] sm:$0xff] %v7985_v32  ;;  %v8005_v7 = vadd.f32 %v7829_v21, %v7366_v35  ;;  %v2294_v15 = vsel %vm1976_vm4, %v7971_v11, 0.0  ;;  %v8021_v35 = vadd.f32 %v7829_v21, %v7376_v39  ;;  %v8027_v11 = vadd.f32 %v7829_v21, %v7784_v13 }
 0x1ee   :  { %v7937_v9 = vpop.f32.mrb[138].mxu0  ;;  %v7939_v12 = vpop.f32.mrb[138].mxu1  ;;  %v1984_v37 = vsel %vm1976_vm4, %v7899_v27, 0.0  ;;  %v7947_v4 = vadd.f32 %v7829_v21, %v7344_v24  ;;  %v2087_v27 = vadd.f32 %v2086_v22, %v2085_v5  ;;  %v7961_v24 = vadd.f32 %v7829_v21, %v7354_v28  ;;  %12704 = vst [vmem:[#allocation108_spill] sm:$0xff] %v7989_v60  ;;  %12705 = vst [vmem:[#allocation109_spill] sm:$0xff] %v8001_v36 }
 0x1ef   :  { %v5847_v53 = vpop.f32.mrb[139].mxu0  ;;  %v5951_v52 = vpop.f32.mrb[139].mxu1  ;;  %v7977_v22 = vadd.f32 %v7829_v21, %v7782_v10  ;;  %v1985_v28 = vadd.f32 %v1984_v37, %v1983_v3  ;;  %v2293_v37 = vadd.f32 %v2292_v25, %v2291_v41  ;;  %12706 = vst [vmem:[#allocation110_spill] sm:$0xff] %v8005_v7  ;;  %12707 = vst [vmem:[#allocation111_spill] sm:$0xff] %v8017_v34  ;;  %v1992_v23 = vsel %vm1976_vm4, %v8017_v34, 0.0 }
 0x1f0   :  { %12697 = vst [vmem:[#allocation101_spill] sm:$0xff] %v7947_v4  ;;  %12699 = vst [vmem:[#allocation103_spill] sm:$0xff] %v7961_v24  ;;  %v2192_v53 = vsel %vm1976_vm4, %v7935_v57, 0.0  ;;  %v2089_v5 = vadd.f32 %v2088_v63, %v2087_v27  ;;  %v1986_v29 = vsel %vm1976_vm4, %v7947_v4, 0.0  ;;  %v2090_v52 = vsel %vm1976_vm4, %v7951_v2, 0.0 }
 0x1f1   :  { %12702 = vst [vmem:[#allocation106_spill] sm:$0xff] %v7977_v22  ;;  %v1988_v27 = vsel %vm1976_vm4, %v7961_v24, 0.0  ;;  %v2193_v63 = vadd.f32 %v2192_v53, %v2191_v20  ;;  %v2194_v62 = vsel %vm1976_vm4, %v7977_v22, 0.0  ;;  %v1987_v53 = vadd.f32 %v1986_v29, %v1985_v28  ;;  %12708 = vst [vmem:[#allocation112_spill] sm:$0xff] %v8021_v35 }
 0x1f2   :  { %v2091_v41 = vadd.f32 %v2090_v52, %v2089_v5  ;;  %12709 = vst [vmem:[#allocation113_spill] sm:$0xff] %v8027_v11  ;;  %v2196_v28 = vsel %vm1976_vm4, %v7989_v60, 0.0  ;;  %12710 = vst [vmem:[#allocation114_spill] sm:$0xff] %v8033_v38  ;;  %v2295_v39 = vadd.f32 %v2294_v15, %v2293_v37  ;;  %v8041_v13 = vadd.f32 %v7829_v21, %v7788_v0 }
 0x1f3   :  { %v1989_v5 = vadd.f32 %v1988_v27, %v1987_v53  ;;  %v2195_v52 = vadd.f32 %v2194_v62, %v2193_v63  ;;  %v2096_v62 = vsel %vm1976_vm4, %v8021_v35, 0.0  ;;  %v8053_v37 = vadd.f32 %v7829_v21, %v7384_v44 }
 0x1f4   :  { %v7991_v10 = vpop.f32.mrb[140].mxu0  ;;  %v7993_v3 = vpop.f32.mrb[140].mxu1  ;;  %v2093_v29 = vadd.f32 %v2092_v8, %v2091_v41  ;;  %12711 = vst [vmem:[#allocation115_spill] sm:$0xff] %v8041_v13  ;;  %v8057_v0 = vadd.f32 %v7829_v21, %v7386_v45  ;;  %v2198_v63 = vsel %vm1976_vm4, %v8033_v38, 0.0  ;;  %v8069_v44 = vadd.f32 %v7829_v21, %v7394_v48 }
 0x1f5   :  { %v5850_v50 = vpop.f32.mrb[141].mxu0  ;;  %v5954_v33 = vpop.f32.mrb[141].mxu1  ;;  %v2197_v8 = vadd.f32 %v2196_v28, %v2195_v52  ;;  %12713 = vst [vmem:[#allocation117_spill] sm:$0xff] %v8053_v37  ;;  %v8073_v45 = vadd.f32 %v7829_v21, %v7396_v49  ;;  %v2300_v52 = vsel %vm1976_vm4, %v8041_v13, 0.0  ;;  %v8085_v48 = vadd.f32 %v7829_v21, %v7798_v31 }
 0x1f6   :  { %v8011_v14 = vpop.f32.mrb[142].mxu0  ;;  %v8013_v25 = vpop.f32.mrb[142].mxu1  ;;  %v2296_v33 = vsel %vm1976_vm4, %v7985_v32, 0.0  ;;  %v8045_v32 = vadd.f32 %v7829_v21, %v7794_v47  ;;  %12714 = vst [vmem:[#allocation118_spill] sm:$0xff] %v8057_v0  ;;  %v2298_v47 = vsel %vm1976_vm4, %v8027_v11, 0.0  ;;  %12715 = vst [vmem:[#allocation119_spill] sm:$0xff] %v8069_v44  ;;  %v8079_v11 = vadd.f32 %v7829_v21, %v7792_v51 }
 0x1f7   :  { %v5851_v20 = vpop.f32.mrb[143].mxu0  ;;  %v5955_v50 = vpop.f32.mrb[143].mxu1  ;;  %v2297_v27 = vadd.f32 %v2296_v33, %v2295_v39  ;;  %12716 = vst [vmem:[#allocation120_spill] sm:$0xff] %v8073_v45  ;;  %12718 = vst [vmem:[#allocation122_spill] sm:$0xff] %v8085_v48  ;;  %v1994_v51 = vsel %vm1976_vm4, %v8053_v37, 0.0  ;;  %v8097_v31 = vadd.f32 %v7829_v21, %v7796_v42  ;;  %v8101_v60 = vadd.f32 %v7829_v21, %v7802_v17 }
 0x1f8   :  { %v1990_v20 = vsel %vm1976_vm4, %v8001_v36, 0.0  ;;  %v2094_v50 = vsel %vm1976_vm4, %v8005_v7, 0.0  ;;  %12712 = vst [vmem:[#allocation116_spill] sm:$0xff] %v8045_v32  ;;  %12717 = vst [vmem:[#allocation121_spill] sm:$0xff] %v8079_v11  ;;  %v8113_v42 = vadd.f32 %v7829_v21, %v7406_v55  ;;  %v2302_v17 = vsel %vm1976_vm4, %v8079_v11, 0.0 }
 0x1f9   :  { %v1991_v41 = vadd.f32 %v1990_v20, %v1989_v5  ;;  %v2095_v33 = vadd.f32 %v2094_v50, %v2093_v29  ;;  %v2200_v5 = vsel %vm1976_vm4, %v8045_v32, 0.0  ;;  %v2098_v32 = vsel %vm1976_vm4, %v8057_v0, 0.0  ;;  %12719 = vst [vmem:[#allocation123_spill] sm:$0xff] %v8097_v31  ;;  %12720 = vst [vmem:[#allocation124_spill] sm:$0xff] %v8101_v60 }
 0x1fa   :  { %12722 = vst [vmem:[#allocation126_spill] sm:$0xff] %v8113_v42  ;;  %v2304_v55 = vsel %vm1976_vm4, %v8097_v31, 0.0  ;;  %v2102_v31 = vsel %vm1976_vm4, %v8113_v42, 0.0  ;;  %v8153_v11 = vadd.f32 %v7829_v21, %v7810_v56  ;;  %v12731_v56 = vld [vmem:[#allocation3_spill] sm:$0xff]  ;;  %v12755_v42 = vld [vmem:[#allocation82_spill] sm:$0xff] }
 0x1fb   :  { %v1993_v20 = vadd.f32 %v1992_v23, %v1991_v41  ;;  %v2097_v50 = vadd.f32 %v2096_v62, %v2095_v33  ;;  %v1996_v23 = vsel %vm1976_vm4, %v8069_v44, 0.0  ;;  %v8121_v41 = vadd.f32 %v7829_v21, %v7414_v58 }
 0x1fc   :  { %v8063_v15 = vpop.f32.mrb[144].mxu0  ;;  %v8065_v53 = vpop.f32.mrb[144].mxu1  ;;  %v8131_v33 = vadd.f32 %v7829_v21, %v7800_v26  ;;  %12728 = vst [vmem:[#allocation132_spill] sm:$0xff] %v8153_v11 }
 0x1fd   :  { %v5854_v28 = vpop.f32.mrb[145].mxu0  ;;  %v5958_v39 = vpop.f32.mrb[145].mxu1  ;;  %12723 = vst [vmem:[#allocation127_spill] sm:$0xff] %v8121_v41 }
 0x1fe   :  { %v8087_v29 = vpop.f32.mrb[146].mxu0  ;;  %v8089_v49 = vpop.f32.mrb[146].mxu1  ;;  %v2299_v28 = vadd.f32 %v2298_v47, %v2297_v27  ;;  %v2199_v39 = vadd.f32 %v2198_v63, %v2197_v8  ;;  %v8109_v27 = vadd.f32 %v7829_v21, %v7404_v54  ;;  %v2202_v8 = vsel %vm1976_vm4, %v8085_v48, 0.0  ;;  %12725 = vst [vmem:[#allocation129_spill] sm:$0xff] %v8131_v33 }
 0x1ff   :  { %v5855_v13 = vpop.f32.mrb[147].mxu0  ;;  %v5959_v38 = vpop.f32.mrb[147].mxu1  ;;  %v1995_v47 = vadd.f32 %v1994_v51, %v1993_v20  ;;  %v2099_v63 = vadd.f32 %v2098_v32, %v2097_v50  ;;  %v8125_v54 = vadd.f32 %v7829_v21, %v7416_v59  ;;  %v8137_v32 = vadd.f32 %v7829_v21, %v7806_v1 }
 0x200   :  { %v2100_v38 = vsel %vm1976_vm4, %v8073_v45, 0.0  ;;  %v2301_v13 = vadd.f32 %v2300_v52, %v2299_v28  ;;  %v2201_v62 = vadd.f32 %v2200_v5, %v2199_v39  ;;  %12721 = vst [vmem:[#allocation125_spill] sm:$0xff] %v8109_v27  ;;  %v2204_v52 = vsel %vm1976_vm4, %v8101_v60, 0.0 }
 0x201   :  { %12724 = vst [vmem:[#allocation128_spill] sm:$0xff] %v8125_v54  ;;  %12726 = vst [vmem:[#allocation130_spill] sm:$0xff] %v8137_v32  ;;  %v1997_v59 = vadd.f32 %v1996_v23, %v1995_v47  ;;  %v2101_v20 = vadd.f32 %v2100_v38, %v2099_v63  ;;  %v1998_v26 = vsel %vm1976_vm4, %v8109_v27, 0.0  ;;  %v8149_v1 = vadd.f32 %v7829_v21, %v7804_v16  ;;  %v12729_v16 = vld [vmem:[#allocation2_spill] sm:$0xff] }
 0x202   :  { %v2303_v50 = vadd.f32 %v2302_v17, %v2301_v13  ;;  %v2203_v28 = vadd.f32 %v2202_v8, %v2201_v62  ;;  %v2000_v13 = vsel %vm1976_vm4, %v8121_v41, 0.0  ;;  %v2104_v62 = vsel %vm1976_vm4, %v8125_v54, 0.0 }
 0x203   :  { %12727 = vst [vmem:[#allocation131_spill] sm:$0xff] %v8149_v1  ;;  %v2306_v60 = vsel %vm1976_vm4, %v8131_v33, 0.0  ;;  %v2206_v48 = vsel %vm1976_vm4, %v8137_v32, 0.0  ;;  %v1999_v22 = vadd.f32 %v1998_v26, %v1997_v59  ;;  %v2103_v57 = vadd.f32 %v2102_v31, %v2101_v20  ;;  %v12740_v33 = vld [vmem:[#allocation75_spill] sm:$0xff] }
 0x204   :  { %v8139_v58 = vpop.f32.mrb[148].mxu0  ;;  %v8141_v5 = vpop.f32.mrb[148].mxu1  ;;  %v2305_v17 = vadd.f32 %v2304_v55, %v2303_v50  ;;  %v2205_v8 = vadd.f32 %v2204_v52, %v2203_v28  ;;  %v12733_v55 = vld [vmem:[#allocation4_spill] sm:$0xff]  ;;  %v12735_v50 = vld [vmem:[#allocation5_spill] sm:$0xff]  ;;  %v8193_v31 = vadd.f32 %v7829_v21, %v7814_v46 }
 0x205   :  { %v5858_v39 = vpop.f32.mrb[149].mxu0  ;;  %v5962_v51 = vpop.f32.mrb[149].mxu1  ;;  %v8177_v52 = vadd.f32 %v7829_v21, %v12733_v55  ;;  %v8181_v28 = vadd.f32 %v7829_v21, %v12735_v50  ;;  %v2001_v59 = vadd.f32 %v2000_v13, %v1999_v22  ;;  %v2105_v20 = vadd.f32 %v2104_v62, %v2103_v57 }
 0x206   :  { %v8155_v23 = vpop.f32.mrb[150].mxu0  ;;  %v8157_v38 = vpop.f32.mrb[150].mxu1  ;;  %v8165_v39 = vadd.f32 %v7829_v21, %v12729_v16  ;;  %v8169_v51 = vadd.f32 %v7829_v21, %v12731_v56  ;;  %v2208_v56 = vsel %vm1976_vm4, %v8153_v11, 0.0  ;;  %12739 = vst [vmem:[#allocation133_spill] sm:$0xff] %v8193_v31  ;;  %v2307_v26 = vadd.f32 %v2306_v60, %v2305_v17 }
 0x207   :  { %v5859_v47 = vpop.f32.mrb[151].mxu0  ;;  %v5963_v63 = vpop.f32.mrb[151].mxu1  ;;  %12734 = vst [vmem:[#allocation4_spill] sm:$0xff] %v8177_v52  ;;  %12736 = vst [vmem:[#allocation5_spill] sm:$0xff] %v8181_v28  ;;  %v2207_v55 = vadd.f32 %v2206_v48, %v2205_v8  ;;  %v8205_v11 = vadd.f32 %v7829_v21, %v7818_v40  ;;  %v2004_v60 = vsel %vm1976_vm4, %v8177_v52, 0.0  ;;  %v2108_v57 = vsel %vm1976_vm4, %v8181_v28, 0.0 }
 0x208   :  { %12730 = vst [vmem:[#allocation2_spill] sm:$0xff] %v8165_v39  ;;  %12732 = vst [vmem:[#allocation3_spill] sm:$0xff] %v8169_v51  ;;  %v2308_v47 = vsel %vm1976_vm4, %v8149_v1, 0.0  ;;  %v12737_v63 = vld [vmem:[#allocation74_spill] sm:$0xff]  ;;  %v2002_v50 = vsel %vm1976_vm4, %v8165_v39, 0.0  ;;  %v2106_v1 = vsel %vm1976_vm4, %v8169_v51, 0.0  ;;  %v8317_v52 = vadd.f32 %v7829_v21, %v7921_v19 }
 0x209   :  { %v8187_v16 = vadd.f32 %v7829_v21, %v12737_v63  ;;  %v8201_v63 = vadd.f32 %v7829_v21, %v12740_v33  ;;  %12742 = vst [vmem:[#allocation134_spill] sm:$0xff] %v8205_v11  ;;  %v2309_v48 = vadd.f32 %v2308_v47, %v2307_v26  ;;  %v2209_v13 = vadd.f32 %v2208_v56, %v2207_v55  ;;  %v12743_v33 = vld [vmem:[#allocation6_spill] sm:$0xff]  ;;  %v12745_v40 = vld [vmem:[#allocation7_spill] sm:$0xff]  ;;  %v12747_v55 = vld [vmem:[#allocation8_spill] sm:$0xff] }
 0x20a   :  { %v8217_v8 = vadd.f32 %v7829_v21, %v12743_v33  ;;  %v8221_v32 = vadd.f32 %v7829_v21, %v12745_v40  ;;  %v2210_v51 = vsel %vm1976_vm4, %v8193_v31, 0.0  ;;  %v2003_v56 = vadd.f32 %v2002_v50, %v2001_v59  ;;  %12771 = vst [vmem:[#allocation137_spill] sm:$0xff] %v8317_v52 }
 0x20b   :  { %12738 = vst [vmem:[#allocation74_spill] sm:$0xff] %v8187_v16  ;;  %12741 = vst [vmem:[#allocation75_spill] sm:$0xff] %v8201_v63  ;;  %v2310_v18 = vsel %vm1976_vm4, %v8187_v16, 0.0  ;;  %v2107_v26 = vadd.f32 %v2106_v1, %v2105_v20  ;;  %v2312_v16 = vsel %vm1976_vm4, %v8201_v63, 0.0  ;;  %v8243_v31 = vadd.f32 %v7829_v21, %v7816_v43  ;;  %v12753_v63 = vld [vmem:[#allocation76_spill] sm:$0xff] }
 0x20c   :  { %v8207_v46 = vpop.f32.mrb[152].mxu0  ;;  %v8209_v22 = vpop.f32.mrb[152].mxu1  ;;  %12744 = vst [vmem:[#allocation6_spill] sm:$0xff] %v8217_v8  ;;  %12746 = vst [vmem:[#allocation7_spill] sm:$0xff] %v8221_v32  ;;  %v2212_v1 = vsel %vm1976_vm4, %v8205_v11, 0.0  ;;  %v8249_v59 = vadd.f32 %v7829_v21, %v7822_v30  ;;  %v2005_v20 = vadd.f32 %v2004_v60, %v2003_v56  ;;  %v8257_v43 = vadd.f32 %v7829_v21, %v12753_v63 }
 0x20d   :  { %v5862_v62 = vpop.f32.mrb[153].mxu0  ;;  %v5966_v17 = vpop.f32.mrb[153].mxu1  ;;  %12751 = vst [vmem:[#allocation135_spill] sm:$0xff] %v8243_v31  ;;  %v2109_v50 = vadd.f32 %v2108_v57, %v2107_v26  ;;  %v8261_v11 = vadd.f32 %v7829_v21, %v12755_v42  ;;  %v12757_v57 = vld [vmem:[#allocation10_spill] sm:$0xff]  ;;  %v2314_v42 = vsel %vm1976_vm4, %v8243_v31, 0.0 }
 0x20e   :  { %v8227_v54 = vpop.f32.mrb[154].mxu0  ;;  %v8229_v47 = vpop.f32.mrb[154].mxu1  ;;  %v8233_v62 = vadd.f32 %v7829_v21, %v12747_v55  ;;  %v12749_v17 = vld [vmem:[#allocation9_spill] sm:$0xff]  ;;  %12752 = vst [vmem:[#allocation136_spill] sm:$0xff] %v8249_v59  ;;  %v2311_v55 = vadd.f32 %v2310_v18, %v2309_v48  ;;  %12754 = vst [vmem:[#allocation76_spill] sm:$0xff] %v8257_v43  ;;  %v8269_v48 = vadd.f32 %v7829_v21, %v12757_v57  ;;  %v2214_v56 = vsel %vm1976_vm4, %v8249_v59, 0.0 }
 0x20f   :  { %v8237_v33 = vadd.f32 %v7829_v21, %v12749_v17  ;;  %v5863_v40 = vpop.f32.mrb[155].mxu0  ;;  %v5967_v28 = vpop.f32.mrb[155].mxu1  ;;  %v2211_v17 = vadd.f32 %v2210_v51, %v2209_v13  ;;  %12756 = vst [vmem:[#allocation82_spill] sm:$0xff] %v8261_v11  ;;  %v12759_v13 = vld [vmem:[#allocation11_spill] sm:$0xff]  ;;  %v12763_v57 = vld [vmem:[#allocation13_spill] sm:$0xff]  ;;  %v2316_v31 = vsel %vm1976_vm4, %v8257_v43, 0.0 }
 0x210   :  { %12748 = vst [vmem:[#allocation8_spill] sm:$0xff] %v8233_v62  ;;  %v2006_v28 = vsel %vm1976_vm4, %v8217_v8, 0.0  ;;  %v2110_v40 = vsel %vm1976_vm4, %v8221_v32, 0.0  ;;  %v2008_v30 = vsel %vm1976_vm4, %v8233_v62, 0.0  ;;  %v2313_v51 = vadd.f32 %v2312_v16, %v2311_v55  ;;  %12758 = vst [vmem:[#allocation10_spill] sm:$0xff] %v8269_v48  ;;  %v12761_v55 = vld [vmem:[#allocation12_spill] sm:$0xff] }
 0x211   :  { %12750 = vst [vmem:[#allocation9_spill] sm:$0xff] %v8237_v33  ;;  %v2112_v18 = vsel %vm1976_vm4, %v8237_v33, 0.0  ;;  %v2213_v60 = vadd.f32 %v2212_v1, %v2211_v17  ;;  %v8273_v63 = vadd.f32 %v7829_v21, %v12759_v13  ;;  %v2007_v16 = vadd.f32 %v2006_v28, %v2005_v20  ;;  %v12765_v59 = vld [vmem:[#allocation77_spill] sm:$0xff]  ;;  %v12769_v8 = vld [vmem:[#allocation83_spill] sm:$0xff] }
 0x212   :  { %v2111_v1 = vadd.f32 %v2110_v40, %v2109_v50  ;;  %v8285_v17 = vadd.f32 %v7829_v21, %v12761_v55  ;;  %v8289_v13 = vadd.f32 %v7829_v21, %v12763_v57  ;;  %v8295_v0 = vadd.f32 %v7829_v21, %v12765_v59  ;;  %v12767_v50 = vld [vmem:[#allocation87_spill] sm:$0xff] }
 0x213   :  { %12760 = vst [vmem:[#allocation11_spill] sm:$0xff] %v8273_v63  ;;  %v2216_v20 = vsel %vm1976_vm4, %v8261_v11, 0.0  ;;  %v8301_v28 = vadd.f32 %v7829_v21, %v12767_v50  ;;  %v2315_v57 = vadd.f32 %v2314_v42, %v2313_v51  ;;  %v2215_v35 = vadd.f32 %v2214_v56, %v2213_v60  ;;  %v12772_v51 = vld [vmem:[#allocation14_spill] sm:$0xff]  ;;  %v12774_v42 = vld [vmem:[#allocation15_spill] sm:$0xff] }
 0x214   :  { %v8279_v26 = vpop.f32.mrb[156].mxu0  ;;  %v8281_v32 = vpop.f32.mrb[156].mxu1  ;;  %12762 = vst [vmem:[#allocation12_spill] sm:$0xff] %v8285_v17  ;;  %12764 = vst [vmem:[#allocation13_spill] sm:$0xff] %v8289_v13  ;;  %v2010_v59 = vsel %vm1976_vm4, %v8269_v48, 0.0  ;;  %v2114_v11 = vsel %vm1976_vm4, %v8273_v63, 0.0  ;;  %v8313_v50 = vadd.f32 %v7829_v21, %v12769_v8  ;;  %v8325_v60 = vadd.f32 %v7829_v21, %v12772_v51 }
 0x215   :  { %v5866_v33 = vpop.f32.mrb[157].mxu0  ;;  %v5970_v45 = vpop.f32.mrb[157].mxu1  ;;  %12766 = vst [vmem:[#allocation77_spill] sm:$0xff] %v8295_v0  ;;  %12768 = vst [vmem:[#allocation87_spill] sm:$0xff] %v8301_v28  ;;  %v8329_v8 = vadd.f32 %v7829_v21, %v12774_v42  ;;  %v2318_v19 = vsel %vm1976_vm4, %v8295_v0, 0.0  ;;  %v2218_v56 = vsel %vm1976_vm4, %v8301_v28, 0.0  ;;  %v8369_v48 = vadd.f32 %v7829_v21, %v7991_v10 }
 0x216   :  { %v8303_v40 = vpop.f32.mrb[158].mxu0  ;;  %v8305_v55 = vpop.f32.mrb[158].mxu1  ;;  %v2009_v33 = vadd.f32 %v2008_v30, %v2007_v16  ;;  %v2113_v45 = vadd.f32 %v2112_v18, %v2111_v1  ;;  %12770 = vst [vmem:[#allocation83_spill] sm:$0xff] %v8313_v50  ;;  %v2012_v30 = vsel %vm1976_vm4, %v8285_v17, 0.0  ;;  %v2217_v18 = vadd.f32 %v2216_v20, %v2215_v35  ;;  %12773 = vst [vmem:[#allocation14_spill] sm:$0xff] %v8325_v60  ;;  %v12776_v63 = vld [vmem:[#allocation16_spill] sm:$0xff] }
 0x217   :  { %v5867_v43 = vpop.f32.mrb[159].mxu0  ;;  %v5971_v62 = vpop.f32.mrb[159].mxu1  ;;  %12775 = vst [vmem:[#allocation15_spill] sm:$0xff] %v8329_v8  ;;  %v12778_v35 = vld [vmem:[#allocation17_spill] sm:$0xff]  ;;  %v12780_v51 = vld [vmem:[#allocation88_spill] sm:$0xff]  ;;  %v2220_v0 = vsel %vm1976_vm4, %v8317_v52, 0.0 }
 0x218   :  { %v2116_v62 = vsel %vm1976_vm4, %v8289_v13, 0.0  ;;  %v2317_v43 = vadd.f32 %v2316_v31, %v2315_v57  ;;  %v2011_v16 = vadd.f32 %v2010_v59, %v2009_v33  ;;  %v2115_v1 = vadd.f32 %v2114_v11, %v2113_v45  ;;  %v12783_v17 = vld [vmem:[#allocation98_spill] sm:$0xff]  ;;  %12785 = vst [vmem:[#allocation139_spill] sm:$0xff] %v8369_v48  ;;  %v12788_v10 = vld [vmem:[#allocation19_spill] sm:$0xff] }
 0x219   :  { %v8337_v31 = vadd.f32 %v7829_v21, %v12776_v63  ;;  %v8341_v20 = vadd.f32 %v7829_v21, %v12778_v35  ;;  %v2320_v57 = vsel %vm1976_vm4, %v8313_v50, 0.0  ;;  %v8347_v42 = vadd.f32 %v7829_v21, %v12780_v51 }
 0x21a   :  { %v8353_v11 = vadd.f32 %v7829_v21, %v7937_v9  ;;  %v2013_v45 = vadd.f32 %v2012_v30, %v2011_v16  ;;  %v2117_v59 = vadd.f32 %v2116_v62, %v2115_v1  ;;  %v2319_v35 = vadd.f32 %v2318_v19, %v2317_v43 }
 0x21b   :  { %12777 = vst [vmem:[#allocation16_spill] sm:$0xff] %v8337_v31  ;;  %12779 = vst [vmem:[#allocation17_spill] sm:$0xff] %v8341_v20  ;;  %v2219_v28 = vadd.f32 %v2218_v56, %v2217_v18  ;;  %v2014_v51 = vsel %vm1976_vm4, %v8325_v60, 0.0  ;;  %v2118_v52 = vsel %vm1976_vm4, %v8329_v8, 0.0  ;;  %v8365_v9 = vadd.f32 %v7829_v21, %v12783_v17  ;;  %v12786_v17 = vld [vmem:[#allocation18_spill] sm:$0xff] }
 0x21c   :  { %12781 = vst [vmem:[#allocation88_spill] sm:$0xff] %v8347_v42  ;;  %12782 = vst [vmem:[#allocation138_spill] sm:$0xff] %v8353_v11  ;;  %v8355_v63 = vpop.f32.mrb[160].mxu0  ;;  %v8357_v33 = vpop.f32.mrb[160].mxu1  ;;  %v2321_v43 = vadd.f32 %v2320_v57, %v2319_v35  ;;  %v8381_v16 = vadd.f32 %v7829_v21, %v12786_v17  ;;  %v8385_v1 = vadd.f32 %v7829_v21, %v12788_v10  ;;  %v2322_v8 = vsel %vm1976_vm4, %v8347_v42, 0.0  ;;  %v12790_v57 = vld [vmem:[#allocation20_spill] sm:$0xff] }
 0x21d   :  { %v5870_v50 = vpop.f32.mrb[161].mxu0  ;;  %v5974_v13 = vpop.f32.mrb[161].mxu1  ;;  %12784 = vst [vmem:[#allocation98_spill] sm:$0xff] %v8365_v9  ;;  %v2221_v18 = vadd.f32 %v2220_v0, %v2219_v28  ;;  %v2015_v60 = vadd.f32 %v2014_v51, %v2013_v45  ;;  %v8393_v0 = vadd.f32 %v7829_v21, %v12790_v57  ;;  %v12792_v28 = vld [vmem:[#allocation21_spill] sm:$0xff]  ;;  %v2224_v17 = vsel %vm1976_vm4, %v8369_v48, 0.0 }
 0x21e   :  { %v8371_v30 = vpop.f32.mrb[162].mxu0  ;;  %v8373_v62 = vpop.f32.mrb[162].mxu1  ;;  %v2016_v13 = vsel %vm1976_vm4, %v8337_v31, 0.0  ;;  %v2120_v50 = vsel %vm1976_vm4, %v8341_v20, 0.0  ;;  %12787 = vst [vmem:[#allocation18_spill] sm:$0xff] %v8381_v16  ;;  %12789 = vst [vmem:[#allocation19_spill] sm:$0xff] %v8385_v1  ;;  %v2119_v20 = vadd.f32 %v2118_v52, %v2117_v59  ;;  %v8397_v35 = vadd.f32 %v7829_v21, %v12792_v28 }
 0x21f   :  { %v5871_v19 = vpop.f32.mrb[163].mxu0  ;;  %v5975_v56 = vpop.f32.mrb[163].mxu1  ;;  %v2222_v31 = vsel %vm1976_vm4, %v8353_v11, 0.0  ;;  %12791 = vst [vmem:[#allocation20_spill] sm:$0xff] %v8393_v0  ;;  %v8409_v52 = vadd.f32 %v7829_v21, %v8011_v14  ;;  %v2017_v45 = vadd.f32 %v2016_v13, %v2015_v60  ;;  %v2323_v51 = vadd.f32 %v2322_v8, %v2321_v43 }
 0x220   :  { %12793 = vst [vmem:[#allocation21_spill] sm:$0xff] %v8397_v35  ;;  %v2324_v19 = vsel %vm1976_vm4, %v8365_v9, 0.0  ;;  %v8403_v56 = vadd.f32 %v7829_v21, %v7939_v12  ;;  %v2121_v59 = vadd.f32 %v2120_v50, %v2119_v20  ;;  %v2223_v10 = vadd.f32 %v2222_v31, %v2221_v18 }
 0x221   :  { %12795 = vst [vmem:[#allocation141_spill] sm:$0xff] %v8409_v52  ;;  %v2018_v57 = vsel %vm1976_vm4, %v8381_v16, 0.0  ;;  %v2122_v28 = vsel %vm1976_vm4, %v8385_v1, 0.0  ;;  %v8417_v12 = vadd.f32 %v7829_v21, %v7993_v3  ;;  %v8421_v9 = vadd.f32 %v7829_v21, %v8063_v15  ;;  %v12798_v3 = vld [vmem:[#allocation22_spill] sm:$0xff]  ;;  %v12800_v15 = vld [vmem:[#allocation23_spill] sm:$0xff] }
 0x222   :  { %12794 = vst [vmem:[#allocation140_spill] sm:$0xff] %v8403_v56  ;;  %v2020_v8 = vsel %vm1976_vm4, %v8393_v0, 0.0  ;;  %v2124_v31 = vsel %vm1976_vm4, %v8397_v35, 0.0  ;;  %v2325_v20 = vadd.f32 %v2324_v19, %v2323_v51  ;;  %v2225_v13 = vadd.f32 %v2224_v17, %v2223_v10  ;;  %v12802_v10 = vld [vmem:[#allocation24_spill] sm:$0xff] }
 0x223   :  { %12796 = vst [vmem:[#allocation142_spill] sm:$0xff] %v8417_v12  ;;  %12797 = vst [vmem:[#allocation143_spill] sm:$0xff] %v8421_v9  ;;  %v8433_v18 = vadd.f32 %v7829_v21, %v12798_v3  ;;  %v8437_v42 = vadd.f32 %v7829_v21, %v12800_v15  ;;  %v2326_v48 = vsel %vm1976_vm4, %v8403_v56, 0.0  ;;  %v2226_v11 = vsel %vm1976_vm4, %v8409_v52, 0.0 }
 0x224   :  { %v8423_v14 = vpop.f32.mrb[164].mxu0  ;;  %v8425_v60 = vpop.f32.mrb[164].mxu1  ;;  %v2019_v17 = vadd.f32 %v2018_v57, %v2017_v45  ;;  %v2123_v51 = vadd.f32 %v2122_v28, %v2121_v59  ;;  %v2328_v56 = vsel %vm1976_vm4, %v8417_v12, 0.0  ;;  %v8459_v52 = vadd.f32 %v7829_v21, %v8013_v25 }
 0x225   :  { %v5874_v50 = vpop.f32.mrb[165].mxu0  ;;  %v5978_v43 = vpop.f32.mrb[165].mxu1  ;;  %12799 = vst [vmem:[#allocation22_spill] sm:$0xff] %v8433_v18  ;;  %12801 = vst [vmem:[#allocation23_spill] sm:$0xff] %v8437_v42  ;;  %v2228_v45 = vsel %vm1976_vm4, %v8421_v9, 0.0  ;;  %v8465_v59 = vadd.f32 %v7829_v21, %v8087_v29  ;;  %v8473_v25 = vadd.f32 %v7829_v21, %v8065_v53  ;;  %v8477_v12 = vadd.f32 %v7829_v21, %v8139_v58 }
 0x226   :  { %v8443_v1 = vpop.f32.mrb[166].mxu0  ;;  %v8445_v19 = vpop.f32.mrb[166].mxu1  ;;  %v8449_v50 = vadd.f32 %v7829_v21, %v12802_v10  ;;  %v12804_v43 = vld [vmem:[#allocation25_spill] sm:$0xff]  ;;  %12806 = vst [vmem:[#allocation144_spill] sm:$0xff] %v8459_v52  ;;  %v2021_v57 = vadd.f32 %v2020_v8, %v2019_v17  ;;  %v2125_v28 = vadd.f32 %v2124_v31, %v2123_v51  ;;  %v2327_v10 = vadd.f32 %v2326_v48, %v2325_v20  ;;  %v12810_v31 = vld [vmem:[#allocation26_spill] sm:$0xff] }
 0x227   :  { %v8453_v3 = vadd.f32 %v7829_v21, %v12804_v43  ;;  %v5875_v15 = vpop.f32.mrb[167].mxu0  ;;  %v5979_v35 = vpop.f32.mrb[167].mxu1  ;;  %12807 = vst [vmem:[#allocation145_spill] sm:$0xff] %v8465_v59  ;;  %v2227_v43 = vadd.f32 %v2226_v11, %v2225_v13  ;;  %12808 = vst [vmem:[#allocation146_spill] sm:$0xff] %v8473_v25  ;;  %v8485_v20 = vadd.f32 %v7829_v21, %v12810_v31  ;;  %v12812_v13 = vld [vmem:[#allocation27_spill] sm:$0xff]  ;;  %v2330_v58 = vsel %vm1976_vm4, %v8459_v52, 0.0 }
 0x228   :  { %12803 = vst [vmem:[#allocation24_spill] sm:$0xff] %v8449_v50  ;;  %v2022_v35 = vsel %vm1976_vm4, %v8433_v18, 0.0  ;;  %v2126_v15 = vsel %vm1976_vm4, %v8437_v42, 0.0  ;;  %12809 = vst [vmem:[#allocation147_spill] sm:$0xff] %v8477_v12  ;;  %v2024_v29 = vsel %vm1976_vm4, %v8449_v50, 0.0  ;;  %v2329_v11 = vadd.f32 %v2328_v56, %v2327_v10  ;;  %v12814_v10 = vld [vmem:[#allocation28_spill] sm:$0xff] }
 0x229   :  { %12805 = vst [vmem:[#allocation25_spill] sm:$0xff] %v8453_v3  ;;  %v2128_v48 = vsel %vm1976_vm4, %v8453_v3, 0.0  ;;  %v2229_v8 = vadd.f32 %v2228_v45, %v2227_v43  ;;  %12811 = vst [vmem:[#allocation26_spill] sm:$0xff] %v8485_v20  ;;  %v8489_v53 = vadd.f32 %v7829_v21, %v12812_v13  ;;  %v2230_v17 = vsel %vm1976_vm4, %v8465_v59, 0.0  ;;  %v12816_v31 = vld [vmem:[#allocation29_spill] sm:$0xff] }
 0x22a   :  { %v2023_v56 = vadd.f32 %v2022_v35, %v2021_v57  ;;  %v2127_v45 = vadd.f32 %v2126_v15, %v2125_v28  ;;  %v8501_v43 = vadd.f32 %v7829_v21, %v12814_v10  ;;  %v8505_v13 = vadd.f32 %v7829_v21, %v12816_v31 }
 0x22b   :  { %12813 = vst [vmem:[#allocation27_spill] sm:$0xff] %v8489_v53  ;;  %v2332_v52 = vsel %vm1976_vm4, %v8473_v25, 0.0  ;;  %v8511_v59 = vadd.f32 %v7829_v21, %v8089_v49  ;;  %v2232_v57 = vsel %vm1976_vm4, %v8477_v12, 0.0  ;;  %v8517_v28 = vadd.f32 %v7829_v21, %v8155_v23 }
 0x22c   :  { %v8495_v51 = vpop.f32.mrb[168].mxu0  ;;  %v8497_v9 = vpop.f32.mrb[168].mxu1  ;;  %12815 = vst [vmem:[#allocation28_spill] sm:$0xff] %v8501_v43  ;;  %12817 = vst [vmem:[#allocation29_spill] sm:$0xff] %v8505_v13  ;;  %v2331_v10 = vadd.f32 %v2330_v58, %v2329_v11  ;;  %v2231_v31 = vadd.f32 %v2230_v17, %v2229_v8  ;;  %v2026_v49 = vsel %vm1976_vm4, %v8485_v20, 0.0  ;;  %v2130_v12 = vsel %vm1976_vm4, %v8489_v53, 0.0 }
 0x22d   :  { %v5878_v3 = vpop.f32.mrb[169].mxu0  ;;  %v5982_v42 = vpop.f32.mrb[169].mxu1  ;;  %12818 = vst [vmem:[#allocation148_spill] sm:$0xff] %v8511_v59  ;;  %12819 = vst [vmem:[#allocation149_spill] sm:$0xff] %v8517_v28  ;;  %v8529_v23 = vadd.f32 %v7829_v21, %v8141_v5  ;;  %v8533_v18 = vadd.f32 %v7829_v21, %v8207_v46  ;;  %v12822_v11 = vld [vmem:[#allocation30_spill] sm:$0xff]  ;;  %v12824_v58 = vld [vmem:[#allocation31_spill] sm:$0xff] }
 0x22e   :  { %v8519_v35 = vpop.f32.mrb[170].mxu0  ;;  %v8521_v15 = vpop.f32.mrb[170].mxu1  ;;  %v2025_v3 = vadd.f32 %v2024_v29, %v2023_v56  ;;  %v2129_v42 = vadd.f32 %v2128_v48, %v2127_v45  ;;  %v2028_v29 = vsel %vm1976_vm4, %v8501_v43, 0.0  ;;  %v2233_v48 = vadd.f32 %v2232_v57, %v2231_v31  ;;  %v12826_v53 = vld [vmem:[#allocation32_spill] sm:$0xff]  ;;  %v12828_v57 = vld [vmem:[#allocation33_spill] sm:$0xff] }
 0x22f   :  { %v5879_v25 = vpop.f32.mrb[171].mxu0  ;;  %v5983_v50 = vpop.f32.mrb[171].mxu1  ;;  %12820 = vst [vmem:[#allocation150_spill] sm:$0xff] %v8529_v23  ;;  %12821 = vst [vmem:[#allocation151_spill] sm:$0xff] %v8533_v18  ;;  %v8541_v8 = vadd.f32 %v7829_v21, %v12822_v11  ;;  %v8545_v5 = vadd.f32 %v7829_v21, %v12824_v58  ;;  %v2334_v46 = vsel %vm1976_vm4, %v8511_v59, 0.0  ;;  %v2234_v17 = vsel %vm1976_vm4, %v8517_v28, 0.0 }
 0x230   :  { %v2132_v50 = vsel %vm1976_vm4, %v8505_v13, 0.0  ;;  %v2333_v25 = vadd.f32 %v2332_v52, %v2331_v10  ;;  %v2027_v56 = vadd.f32 %v2026_v49, %v2025_v3  ;;  %v2131_v45 = vadd.f32 %v2130_v12, %v2129_v42 }
 0x231   :  { %12823 = vst [vmem:[#allocation30_spill] sm:$0xff] %v8541_v8  ;;  %12825 = vst [vmem:[#allocation31_spill] sm:$0xff] %v8545_v5  ;;  %v8553_v52 = vadd.f32 %v7829_v21, %v12826_v53  ;;  %v8557_v10 = vadd.f32 %v7829_v21, %v12828_v57  ;;  %v2336_v31 = vsel %vm1976_vm4, %v8529_v23, 0.0  ;;  %v8563_v11 = vadd.f32 %v7829_v21, %v8157_v38 }
 0x232   :  { %v2236_v58 = vsel %vm1976_vm4, %v8533_v18, 0.0  ;;  %v8569_v12 = vadd.f32 %v7829_v21, %v8227_v54  ;;  %v2029_v42 = vadd.f32 %v2028_v29, %v2027_v56  ;;  %v2133_v49 = vadd.f32 %v2132_v50, %v2131_v45 }
 0x233   :  { %12827 = vst [vmem:[#allocation32_spill] sm:$0xff] %v8553_v52  ;;  %12829 = vst [vmem:[#allocation33_spill] sm:$0xff] %v8557_v10  ;;  %v2335_v57 = vadd.f32 %v2334_v46, %v2333_v25  ;;  %v2235_v59 = vadd.f32 %v2234_v17, %v2233_v48  ;;  %v2030_v38 = vsel %vm1976_vm4, %v8541_v8, 0.0  ;;  %v2134_v18 = vsel %vm1976_vm4, %v8545_v5, 0.0 }
 0x234   :  { %12830 = vst [vmem:[#allocation152_spill] sm:$0xff] %v8563_v11  ;;  %12831 = vst [vmem:[#allocation153_spill] sm:$0xff] %v8569_v12  ;;  %v8571_v53 = vpop.f32.mrb[172].mxu0  ;;  %v8573_v3 = vpop.f32.mrb[172].mxu1  ;;  %v8581_v54 = vadd.f32 %v7829_v21, %v8209_v22  ;;  %v8585_v13 = vadd.f32 %v7829_v21, %v8279_v26  ;;  %v12834_v22 = vld [vmem:[#allocation34_spill] sm:$0xff]  ;;  %v12836_v26 = vld [vmem:[#allocation35_spill] sm:$0xff]  ;;  %v2031_v8 = vadd.f32 %v2030_v38, %v2029_v42 }
 0x235   :  { %v5882_v23 = vpop.f32.mrb[173].mxu0  ;;  %v5986_v28 = vpop.f32.mrb[173].mxu1  ;;  %v2337_v25 = vadd.f32 %v2336_v31, %v2335_v57  ;;  %v2237_v48 = vadd.f32 %v2236_v58, %v2235_v59  ;;  %v8597_v56 = vadd.f32 %v7829_v21, %v12834_v22  ;;  %v8601_v45 = vadd.f32 %v7829_v21, %v12836_v26  ;;  %v12838_v31 = vld [vmem:[#allocation36_spill] sm:$0xff]  ;;  %v12840_v58 = vld [vmem:[#allocation37_spill] sm:$0xff] }
 0x236   :  { %12832 = vst [vmem:[#allocation154_spill] sm:$0xff] %v8581_v54  ;;  %12833 = vst [vmem:[#allocation155_spill] sm:$0xff] %v8585_v13  ;;  %v8587_v29 = vpop.f32.mrb[174].mxu0  ;;  %v8589_v50 = vpop.f32.mrb[174].mxu1  ;;  %v2032_v28 = vsel %vm1976_vm4, %v8553_v52, 0.0  ;;  %v2136_v23 = vsel %vm1976_vm4, %v8557_v10, 0.0  ;;  %v2135_v10 = vadd.f32 %v2134_v18, %v2133_v49  ;;  %v8609_v59 = vadd.f32 %v7829_v21, %v12838_v31 }
 0x237   :  { %v5883_v46 = vpop.f32.mrb[175].mxu0  ;;  %v5987_v17 = vpop.f32.mrb[175].mxu1  ;;  %12835 = vst [vmem:[#allocation34_spill] sm:$0xff] %v8597_v56  ;;  %12837 = vst [vmem:[#allocation35_spill] sm:$0xff] %v8601_v45  ;;  %v2338_v5 = vsel %vm1976_vm4, %v8563_v11, 0.0  ;;  %v2238_v52 = vsel %vm1976_vm4, %v8569_v12, 0.0  ;;  %v8613_v57 = vadd.f32 %v7829_v21, %v12840_v58  ;;  %v8625_v18 = vadd.f32 %v7829_v21, %v8303_v40 }
 0x238   :  { %12839 = vst [vmem:[#allocation36_spill] sm:$0xff] %v8609_v59  ;;  %v2340_v46 = vsel %vm1976_vm4, %v8581_v54, 0.0  ;;  %v8619_v17 = vadd.f32 %v7829_v21, %v8229_v47  ;;  %v2240_v22 = vsel %vm1976_vm4, %v8585_v13, 0.0  ;;  %v2033_v42 = vadd.f32 %v2032_v28, %v2031_v8 }
 0x239   :  { %12841 = vst [vmem:[#allocation37_spill] sm:$0xff] %v8613_v57  ;;  %12843 = vst [vmem:[#allocation157_spill] sm:$0xff] %v8625_v18  ;;  %v2137_v49 = vadd.f32 %v2136_v23, %v2135_v10  ;;  %v2339_v38 = vadd.f32 %v2338_v5, %v2337_v25  ;;  %v2239_v26 = vadd.f32 %v2238_v52, %v2237_v48  ;;  %v2034_v31 = vsel %vm1976_vm4, %v8597_v56, 0.0 }
 0x23a   :  { %12842 = vst [vmem:[#allocation156_spill] sm:$0xff] %v8619_v17  ;;  %v2138_v58 = vsel %vm1976_vm4, %v8601_v45, 0.0  ;;  %v8633_v47 = vadd.f32 %v7829_v21, %v8281_v32  ;;  %v8637_v54 = vadd.f32 %v7829_v21, %v8355_v63  ;;  %v2036_v5 = vsel %vm1976_vm4, %v8609_v59, 0.0  ;;  %v12846_v32 = vld [vmem:[#allocation38_spill] sm:$0xff]  ;;  %v12848_v63 = vld [vmem:[#allocation39_spill] sm:$0xff] }
 0x23b   :  { %v2140_v52 = vsel %vm1976_vm4, %v8613_v57, 0.0  ;;  %v2341_v10 = vadd.f32 %v2340_v46, %v2339_v38  ;;  %v2241_v28 = vadd.f32 %v2240_v22, %v2239_v26  ;;  %v8649_v48 = vadd.f32 %v7829_v21, %v12846_v32  ;;  %v12850_v26 = vld [vmem:[#allocation40_spill] sm:$0xff] }
 0x23c   :  { %12844 = vst [vmem:[#allocation158_spill] sm:$0xff] %v8633_v47  ;;  %12845 = vst [vmem:[#allocation159_spill] sm:$0xff] %v8637_v54  ;;  %v8639_v40 = vpop.f32.mrb[176].mxu0  ;;  %v8641_v8 = vpop.f32.mrb[176].mxu1  ;;  %v8653_v11 = vadd.f32 %v7829_v21, %v12848_v63  ;;  %v2342_v13 = vsel %vm1976_vm4, %v8619_v17, 0.0  ;;  %v2242_v12 = vsel %vm1976_vm4, %v8625_v18, 0.0  ;;  %v2035_v22 = vadd.f32 %v2034_v31, %v2033_v42 }
 0x23d   :  { %v5886_v23 = vpop.f32.mrb[177].mxu0  ;;  %v5990_v25 = vpop.f32.mrb[177].mxu1  ;;  %12847 = vst [vmem:[#allocation38_spill] sm:$0xff] %v8649_v48  ;;  %v2139_v38 = vadd.f32 %v2138_v58, %v2137_v49  ;;  %v2344_v17 = vsel %vm1976_vm4, %v8633_v47, 0.0  ;;  %v8675_v18 = vadd.f32 %v7829_v21, %v8305_v55  ;;  %v2244_v42 = vsel %vm1976_vm4, %v8637_v54, 0.0 }
 0x23e   :  { %12849 = vst [vmem:[#allocation39_spill] sm:$0xff] %v8653_v11  ;;  %v8659_v45 = vpop.f32.mrb[178].mxu0  ;;  %v8661_v46 = vpop.f32.mrb[178].mxu1  ;;  %v8665_v23 = vadd.f32 %v7829_v21, %v12850_v26  ;;  %v12852_v25 = vld [vmem:[#allocation41_spill] sm:$0xff]  ;;  %v8681_v49 = vadd.f32 %v7829_v21, %v8371_v30  ;;  %v2037_v31 = vadd.f32 %v2036_v5, %v2035_v22  ;;  %v2343_v26 = vadd.f32 %v2342_v13, %v2341_v10 }
 0x23f   :  { %v8669_v32 = vadd.f32 %v7829_v21, %v12852_v25  ;;  %v5887_v63 = vpop.f32.mrb[179].mxu0  ;;  %v5991_v57 = vpop.f32.mrb[179].mxu1  ;;  %12854 = vst [vmem:[#allocation160_spill] sm:$0xff] %v8675_v18  ;;  %v2141_v58 = vadd.f32 %v2140_v52, %v2139_v38  ;;  %v2243_v25 = vadd.f32 %v2242_v12, %v2241_v28  ;;  %v8689_v55 = vadd.f32 %v7829_v21, %v8357_v33  ;;  %v12858_v52 = vld [vmem:[#allocation42_spill] sm:$0xff]  ;;  %v12860_v28 = vld [vmem:[#allocation43_spill] sm:$0xff] }
 0x240   :  { %12851 = vst [vmem:[#allocation40_spill] sm:$0xff] %v8665_v23  ;;  %12855 = vst [vmem:[#allocation161_spill] sm:$0xff] %v8681_v49  ;;  %v2038_v57 = vsel %vm1976_vm4, %v8649_v48, 0.0  ;;  %v2142_v63 = vsel %vm1976_vm4, %v8653_v11, 0.0  ;;  %v8693_v47 = vadd.f32 %v7829_v21, %v8423_v14  ;;  %v2040_v30 = vsel %vm1976_vm4, %v8665_v23, 0.0 }
 0x241   :  { %12853 = vst [vmem:[#allocation41_spill] sm:$0xff] %v8669_v32  ;;  %12856 = vst [vmem:[#allocation162_spill] sm:$0xff] %v8689_v55  ;;  %v2144_v13 = vsel %vm1976_vm4, %v8669_v32, 0.0  ;;  %v2345_v12 = vadd.f32 %v2344_v17, %v2343_v26  ;;  %v2245_v5 = vadd.f32 %v2244_v42, %v2243_v25  ;;  %v8701_v10 = vadd.f32 %v7829_v21, %v12858_v52  ;;  %v12862_v26 = vld [vmem:[#allocation44_spill] sm:$0xff]  ;;  %v12864_v52 = vld [vmem:[#allocation45_spill] sm:$0xff] }
 0x242   :  { %12857 = vst [vmem:[#allocation163_spill] sm:$0xff] %v8693_v47  ;;  %v8705_v33 = vadd.f32 %v7829_v21, %v12860_v28  ;;  %v2346_v14 = vsel %vm1976_vm4, %v8675_v18, 0.0  ;;  %v2246_v22 = vsel %vm1976_vm4, %v8681_v49, 0.0  ;;  %v2039_v17 = vadd.f32 %v2038_v57, %v2037_v31 }
 0x243   :  { %12859 = vst [vmem:[#allocation42_spill] sm:$0xff] %v8701_v10  ;;  %v2143_v42 = vadd.f32 %v2142_v63, %v2141_v58  ;;  %v8717_v25 = vadd.f32 %v7829_v21, %v12862_v26  ;;  %v8721_v28 = vadd.f32 %v7829_v21, %v12864_v52  ;;  %v2348_v18 = vsel %vm1976_vm4, %v8689_v55, 0.0 }
 0x244   :  { %12861 = vst [vmem:[#allocation43_spill] sm:$0xff] %v8705_v33  ;;  %v8711_v38 = vpop.f32.mrb[180].mxu0  ;;  %v8713_v54 = vpop.f32.mrb[180].mxu1  ;;  %v8727_v49 = vadd.f32 %v7829_v21, %v8373_v62  ;;  %v2248_v31 = vsel %vm1976_vm4, %v8693_v47, 0.0  ;;  %v8733_v58 = vadd.f32 %v7829_v21, %v8443_v1  ;;  %v2347_v26 = vadd.f32 %v2346_v14, %v2345_v12  ;;  %v12870_v12 = vld [vmem:[#allocation46_spill] sm:$0xff]  ;;  %v12872_v14 = vld [vmem:[#allocation47_spill] sm:$0xff] }
 0x245   :  { %12863 = vst [vmem:[#allocation44_spill] sm:$0xff] %v8717_v25  ;;  %12865 = vst [vmem:[#allocation45_spill] sm:$0xff] %v8721_v28  ;;  %v5890_v32 = vpop.f32.mrb[181].mxu0  ;;  %v5994_v11 = vpop.f32.mrb[181].mxu1  ;;  %v2247_v52 = vadd.f32 %v2246_v22, %v2245_v5  ;;  %v2042_v62 = vsel %vm1976_vm4, %v8701_v10, 0.0  ;;  %v2146_v47 = vsel %vm1976_vm4, %v8705_v33, 0.0  ;;  %v8745_v1 = vadd.f32 %v7829_v21, %v8425_v60 }
 0x246   :  { %12866 = vst [vmem:[#allocation164_spill] sm:$0xff] %v8727_v49  ;;  %12867 = vst [vmem:[#allocation165_spill] sm:$0xff] %v8733_v58  ;;  %v8735_v57 = vpop.f32.mrb[182].mxu0  ;;  %v8737_v63 = vpop.f32.mrb[182].mxu1  ;;  %v2041_v32 = vadd.f32 %v2040_v30, %v2039_v17  ;;  %v2145_v11 = vadd.f32 %v2144_v13, %v2143_v42  ;;  %v8749_v48 = vadd.f32 %v7829_v21, %v8495_v51  ;;  %v2044_v30 = vsel %vm1976_vm4, %v8717_v25, 0.0  ;;  %v12874_v33 = vld [vmem:[#allocation48_spill] sm:$0xff] }
 0x247   :  { %v5891_v55 = vpop.f32.mrb[183].mxu0  ;;  %v5995_v23 = vpop.f32.mrb[183].mxu1  ;;  %12868 = vst [vmem:[#allocation166_spill] sm:$0xff] %v8745_v1  ;;  %v2249_v13 = vadd.f32 %v2248_v31, %v2247_v52  ;;  %v8757_v5 = vadd.f32 %v7829_v21, %v12870_v12  ;;  %v8761_v60 = vadd.f32 %v7829_v21, %v12872_v14  ;;  %v2350_v51 = vsel %vm1976_vm4, %v8727_v49, 0.0  ;;  %v12876_v31 = vld [vmem:[#allocation49_spill] sm:$0xff] }
 0x248   :  { %12869 = vst [vmem:[#allocation167_spill] sm:$0xff] %v8749_v48  ;;  %v2148_v23 = vsel %vm1976_vm4, %v8721_v28, 0.0  ;;  %v2349_v55 = vadd.f32 %v2348_v18, %v2347_v26  ;;  %v2250_v22 = vsel %vm1976_vm4, %v8733_v58, 0.0  ;;  %v2043_v17 = vadd.f32 %v2042_v62, %v2041_v32  ;;  %v8780_v12 = vld [vmem:[%s12235_s5] ss:$0 sm:$0xff] }
 0x249   :  { %12871 = vst [vmem:[#allocation46_spill] sm:$0xff] %v8757_v5  ;;  %12873 = vst [vmem:[#allocation47_spill] sm:$0xff] %v8761_v60  ;;  %v2147_v42 = vadd.f32 %v2146_v47, %v2145_v11  ;;  %v8769_v18 = vadd.f32 %v7829_v21, %v12874_v33  ;;  %v8773_v26 = vadd.f32 %v7829_v21, %v12876_v31  ;;  %v2352_v52 = vsel %vm1976_vm4, %v8745_v1, 0.0 }
 0x24a   :  { %v8784_v32 = vadd.f32 %v8780_v12, %v8445_v19  ;;  %v2252_v47 = vsel %vm1976_vm4, %v8749_v48, 0.0  ;;  %v8790_v33 = vadd.f32 %v8780_v12, %v8519_v35  ;;  %v2045_v62 = vadd.f32 %v2044_v30, %v2043_v17 }
 0x24b   :  { %12875 = vst [vmem:[#allocation48_spill] sm:$0xff] %v8769_v18  ;;  %12877 = vst [vmem:[#allocation49_spill] sm:$0xff] %v8773_v26  ;;  %v2149_v14 = vadd.f32 %v2148_v23, %v2147_v42  ;;  %v2351_v31 = vadd.f32 %v2350_v51, %v2349_v55  ;;  %v2251_v1 = vadd.f32 %v2250_v22, %v2249_v13  ;;  %v2046_v19 = vsel %vm1976_vm4, %v8757_v5, 0.0 }
 0x24c   :  { %12878 = vst [vmem:[#allocation168_spill] sm:$0xff] %v8784_v32  ;;  %12879 = vst [vmem:[#allocation169_spill] sm:$0xff] %v8790_v33  ;;  %v8792_v21 = vpop.f32.mrb[184].mxu0  ;;  %v8794_v11 = vpop.f32.mrb[184].mxu1  ;;  %v2150_v48 = vsel %vm1976_vm4, %v8761_v60, 0.0  ;;  %v8802_v35 = vadd.f32 %v8780_v12, %v8497_v9  ;;  %v8806_v28 = vadd.f32 %v8780_v12, %v8571_v53  ;;  %v12882_v9 = vld [vmem:[#allocation50_spill] sm:$0xff]  ;;  %v2047_v5 = vadd.f32 %v2046_v19, %v2045_v62 }
 0x24d   :  { %v5894_v49 = vpop.f32.mrb[185].mxu0  ;;  %v5998_v58 = vpop.f32.mrb[185].mxu1  ;;  %v2353_v55 = vadd.f32 %v2352_v52, %v2351_v31  ;;  %v2253_v13 = vadd.f32 %v2252_v47, %v2251_v1  ;;  %v8818_v17 = vadd.f32 %v8780_v12, %v12882_v9  ;;  %v12884_v53 = vld [vmem:[#allocation51_spill] sm:$0xff]  ;;  %v2354_v60 = vsel %vm1976_vm4, %v8784_v32, 0.0  ;;  %v12886_v52 = vld [vmem:[#allocation52_spill] sm:$0xff]  ;;  %v12888_v47 = vld [vmem:[#allocation53_spill] sm:$0xff] }
 0x24e   :  { %12880 = vst [vmem:[#allocation170_spill] sm:$0xff] %v8802_v35  ;;  %12881 = vst [vmem:[#allocation171_spill] sm:$0xff] %v8806_v28  ;;  %v8808_v30 = vpop.f32.mrb[186].mxu0  ;;  %v8810_v23 = vpop.f32.mrb[186].mxu1  ;;  %v2048_v49 = vsel %vm1976_vm4, %v8769_v18, 0.0  ;;  %v2152_v58 = vsel %vm1976_vm4, %v8773_v26, 0.0  ;;  %v8822_v42 = vadd.f32 %v8780_v12, %v12884_v53  ;;  %v2151_v26 = vadd.f32 %v2150_v48, %v2149_v14 }
 0x24f   :  { %v5895_v51 = vpop.f32.mrb[187].mxu0  ;;  %v5999_v22 = vpop.f32.mrb[187].mxu1  ;;  %12883 = vst [vmem:[#allocation50_spill] sm:$0xff] %v8818_v17  ;;  %v2254_v18 = vsel %vm1976_vm4, %v8790_v33, 0.0  ;;  %v8830_v1 = vadd.f32 %v8780_v12, %v12886_v52  ;;  %v8834_v31 = vadd.f32 %v8780_v12, %v12888_v47  ;;  %v2256_v9 = vsel %vm1976_vm4, %v8806_v28, 0.0 }
 0x250   :  { %12885 = vst [vmem:[#allocation51_spill] sm:$0xff] %v8822_v42  ;;  %v2356_v51 = vsel %vm1976_vm4, %v8802_v35, 0.0  ;;  %v8840_v22 = vadd.f32 %v8780_v12, %v8521_v15  ;;  %v8846_v48 = vadd.f32 %v8780_v12, %v8587_v29  ;;  %v2049_v62 = vadd.f32 %v2048_v49, %v2047_v5 }
 0x251   :  { %12887 = vst [vmem:[#allocation52_spill] sm:$0xff] %v8830_v1  ;;  %12889 = vst [vmem:[#allocation53_spill] sm:$0xff] %v8834_v31  ;;  %v2153_v14 = vadd.f32 %v2152_v58, %v2151_v26  ;;  %v2355_v19 = vadd.f32 %v2354_v60, %v2353_v55  ;;  %v2255_v53 = vadd.f32 %v2254_v18, %v2253_v13  ;;  %v2050_v52 = vsel %vm1976_vm4, %v8818_v17, 0.0 }
 0x252   :  { %12890 = vst [vmem:[#allocation172_spill] sm:$0xff] %v8840_v22  ;;  %12891 = vst [vmem:[#allocation173_spill] sm:$0xff] %v8846_v48  ;;  %v2154_v47 = vsel %vm1976_vm4, %v8822_v42, 0.0  ;;  %v8854_v15 = vadd.f32 %v8780_v12, %v8573_v3  ;;  %v8858_v35 = vadd.f32 %v8780_v12, %v8639_v40  ;;  %v2052_v60 = vsel %vm1976_vm4, %v8830_v1, 0.0  ;;  %v12894_v3 = vld [vmem:[#allocation54_spill] sm:$0xff]  ;;  %v12896_v40 = vld [vmem:[#allocation55_spill] sm:$0xff] }
 0x253   :  { %v2156_v18 = vsel %vm1976_vm4, %v8834_v31, 0.0  ;;  %v2357_v26 = vadd.f32 %v2356_v51, %v2355_v19  ;;  %v2257_v49 = vadd.f32 %v2256_v9, %v2255_v53  ;;  %v8870_v13 = vadd.f32 %v8780_v12, %v12894_v3  ;;  %v12898_v53 = vld [vmem:[#allocation56_spill] sm:$0xff] }
 0x254   :  { %12892 = vst [vmem:[#allocation174_spill] sm:$0xff] %v8854_v15  ;;  %12893 = vst [vmem:[#allocation175_spill] sm:$0xff] %v8858_v35  ;;  %v8860_v29 = vpop.f32.mrb[188].mxu0  ;;  %v8862_v5 = vpop.f32.mrb[188].mxu1  ;;  %v8874_v32 = vadd.f32 %v8780_v12, %v12896_v40  ;;  %v2358_v28 = vsel %vm1976_vm4, %v8840_v22, 0.0  ;;  %v2258_v33 = vsel %vm1976_vm4, %v8846_v48, 0.0  ;;  %v2051_v9 = vadd.f32 %v2050_v52, %v2049_v62 }
 0x255   :  { %v5898_v58 = vpop.f32.mrb[189].mxu0  ;;  %v6002_v55 = vpop.f32.mrb[189].mxu1  ;;  %12895 = vst [vmem:[#allocation54_spill] sm:$0xff] %v8870_v13  ;;  %v2155_v19 = vadd.f32 %v2154_v47, %v2153_v14  ;;  %v2360_v22 = vsel %vm1976_vm4, %v8854_v15, 0.0  ;;  %v8896_v48 = vadd.f32 %v8780_v12, %v8589_v50  ;;  %v2260_v62 = vsel %vm1976_vm4, %v8858_v35, 0.0 }
 0x256   :  { %12897 = vst [vmem:[#allocation55_spill] sm:$0xff] %v8874_v32  ;;  %v8880_v42 = vpop.f32.mrb[190].mxu0  ;;  %v8882_v51 = vpop.f32.mrb[190].mxu1  ;;  %v8886_v58 = vadd.f32 %v8780_v12, %v12898_v53  ;;  %v12900_v55 = vld [vmem:[#allocation57_spill] sm:$0xff]  ;;  %v8902_v14 = vadd.f32 %v8780_v12, %v8659_v45  ;;  %v2053_v52 = vadd.f32 %v2052_v60, %v2051_v9  ;;  %v2359_v53 = vadd.f32 %v2358_v28, %v2357_v26 }
 0x257   :  { %v8890_v3 = vadd.f32 %v8780_v12, %v12900_v55  ;;  %v5899_v40 = vpop.f32.mrb[191].mxu0  ;;  %v6003_v31 = vpop.f32.mrb[191].mxu1  ;;  %12902 = vst [vmem:[#allocation176_spill] sm:$0xff] %v8896_v48  ;;  %v2157_v47 = vadd.f32 %v2156_v18, %v2155_v19  ;;  %v2259_v55 = vadd.f32 %v2258_v33, %v2257_v49  ;;  %v8910_v50 = vadd.f32 %v8780_v12, %v8641_v8  ;;  %v12906_v18 = vld [vmem:[#allocation58_spill] sm:$0xff]  ;;  %v12908_v49 = vld [vmem:[#allocation59_spill] sm:$0xff] }
 0x258   :  { %12899 = vst [vmem:[#allocation56_spill] sm:$0xff] %v8886_v58  ;;  %12903 = vst [vmem:[#allocation177_spill] sm:$0xff] %v8902_v14  ;;  %v2054_v31 = vsel %vm1976_vm4, %v8870_v13, 0.0  ;;  %v2158_v40 = vsel %vm1976_vm4, %v8874_v32, 0.0  ;;  %v8914_v15 = vadd.f32 %v8780_v12, %v8711_v38  ;;  %v2056_v45 = vsel %vm1976_vm4, %v8886_v58, 0.0 }
 0x259   :  { %12901 = vst [vmem:[#allocation57_spill] sm:$0xff] %v8890_v3  ;;  %12904 = vst [vmem:[#allocation178_spill] sm:$0xff] %v8910_v50  ;;  %v2160_v28 = vsel %vm1976_vm4, %v8890_v3, 0.0  ;;  %v2361_v33 = vadd.f32 %v2360_v22, %v2359_v53  ;;  %v2261_v60 = vadd.f32 %v2260_v62, %v2259_v55  ;;  %v8922_v26 = vadd.f32 %v8780_v12, %v12906_v18  ;;  %v12910_v53 = vld [vmem:[#allocation60_spill] sm:$0xff]  ;;  %v12912_v18 = vld [vmem:[#allocation61_spill] sm:$0xff] }
 0x25a   :  { %12905 = vst [vmem:[#allocation179_spill] sm:$0xff] %v8914_v15  ;;  %v8926_v8 = vadd.f32 %v8780_v12, %v12908_v49  ;;  %v2362_v38 = vsel %vm1976_vm4, %v8896_v48, 0.0  ;;  %v2262_v9 = vsel %vm1976_vm4, %v8902_v14, 0.0  ;;  %v2055_v22 = vadd.f32 %v2054_v31, %v2053_v52 }
 0x25b   :  { %12907 = vst [vmem:[#allocation58_spill] sm:$0xff] %v8922_v26  ;;  %v2159_v62 = vadd.f32 %v2158_v40, %v2157_v47  ;;  %v8938_v55 = vadd.f32 %v8780_v12, %v12910_v53  ;;  %v8942_v49 = vadd.f32 %v8780_v12, %v12912_v18  ;;  %v2364_v48 = vsel %vm1976_vm4, %v8910_v50, 0.0 }
 0x25c   :  { %12909 = vst [vmem:[#allocation59_spill] sm:$0xff] %v8926_v8  ;;  %v8932_v19 = vpop.f32.mrb[192].mxu0  ;;  %v8934_v35 = vpop.f32.mrb[192].mxu1  ;;  %v8948_v14 = vadd.f32 %v8780_v12, %v8661_v46  ;;  %v2264_v52 = vsel %vm1976_vm4, %v8914_v15, 0.0  ;;  %v8954_v47 = vadd.f32 %v8780_v12, %v8735_v57  ;;  %v2363_v53 = vadd.f32 %v2362_v38, %v2361_v33  ;;  %v12918_v33 = vld [vmem:[#allocation62_spill] sm:$0xff]  ;;  %v12920_v38 = vld [vmem:[#allocation63_spill] sm:$0xff] }
 0x25d   :  { %12911 = vst [vmem:[#allocation60_spill] sm:$0xff] %v8938_v55  ;;  %12913 = vst [vmem:[#allocation61_spill] sm:$0xff] %v8942_v49  ;;  %v5902_v3 = vpop.f32.mrb[193].mxu0  ;;  %v6006_v32 = vpop.f32.mrb[193].mxu1  ;;  %v2263_v18 = vadd.f32 %v2262_v9, %v2261_v60  ;;  %v2058_v46 = vsel %vm1976_vm4, %v8922_v26, 0.0  ;;  %v2162_v15 = vsel %vm1976_vm4, %v8926_v8, 0.0  ;;  %v8966_v57 = vadd.f32 %v8780_v12, %v8713_v54 }
 0x25e   :  { %12914 = vst [vmem:[#allocation180_spill] sm:$0xff] %v8948_v14  ;;  %12915 = vst [vmem:[#allocation181_spill] sm:$0xff] %v8954_v47  ;;  %v8956_v31 = vpop.f32.mrb[194].mxu0  ;;  %v8958_v40 = vpop.f32.mrb[194].mxu1  ;;  %v2057_v3 = vadd.f32 %v2056_v45, %v2055_v22  ;;  %v2161_v32 = vadd.f32 %v2160_v28, %v2159_v62  ;;  %v8970_v13 = vadd.f32 %v8780_v12, %v8792_v21  ;;  %v2060_v45 = vsel %vm1976_vm4, %v8938_v55, 0.0  ;;  %v12922_v8 = vld [vmem:[#allocation64_spill] sm:$0xff] }
 0x25f   :  { %v5903_v50 = vpop.f32.mrb[195].mxu0  ;;  %v6007_v58 = vpop.f32.mrb[195].mxu1  ;;  %12916 = vst [vmem:[#allocation182_spill] sm:$0xff] %v8966_v57  ;;  %v2265_v28 = vadd.f32 %v2264_v52, %v2263_v18  ;;  %v8978_v60 = vadd.f32 %v8780_v12, %v12918_v33  ;;  %v8982_v54 = vadd.f32 %v8780_v12, %v12920_v38  ;;  %v2366_v21 = vsel %vm1976_vm4, %v8948_v14, 0.0  ;;  %v12924_v52 = vld [vmem:[#allocation65_spill] sm:$0xff] }
 0x260   :  { %12917 = vst [vmem:[#allocation183_spill] sm:$0xff] %v8970_v13  ;;  %v2164_v58 = vsel %vm1976_vm4, %v8942_v49, 0.0  ;;  %v2365_v50 = vadd.f32 %v2364_v48, %v2363_v53  ;;  %v2266_v9 = vsel %vm1976_vm4, %v8954_v47, 0.0  ;;  %v2059_v22 = vadd.f32 %v2058_v46, %v2057_v3 }
 0x261   :  { %12919 = vst [vmem:[#allocation62_spill] sm:$0xff] %v8978_v60  ;;  %12921 = vst [vmem:[#allocation63_spill] sm:$0xff] %v8982_v54  ;;  %v2163_v62 = vadd.f32 %v2162_v15, %v2161_v32  ;;  %v8990_v48 = vadd.f32 %v8780_v12, %v12922_v8  ;;  %v8994_v53 = vadd.f32 %v8780_v12, %v12924_v52  ;;  %v2368_v18 = vsel %vm1976_vm4, %v8966_v57, 0.0 }
 0x262   :  { %v9000_v33 = vadd.f32 %v8780_v12, %v8737_v63  ;;  %v2268_v38 = vsel %vm1976_vm4, %v8970_v13, 0.0  ;;  %v9006_v15 = vadd.f32 %v8780_v12, %v8808_v30  ;;  %v2061_v32 = vadd.f32 %v2060_v45, %v2059_v22  ;;  %v12930_v22 = vld [vmem:[#allocation66_spill] sm:$0xff] }
 0x263   :  { %12923 = vst [vmem:[#allocation64_spill] sm:$0xff] %v8990_v48  ;;  %12925 = vst [vmem:[#allocation65_spill] sm:$0xff] %v8994_v53  ;;  %v2165_v46 = vadd.f32 %v2164_v58, %v2163_v62  ;;  %v2367_v52 = vadd.f32 %v2366_v21, %v2365_v50  ;;  %v2267_v14 = vadd.f32 %v2266_v9, %v2265_v28  ;;  %v2062_v63 = vsel %vm1976_vm4, %v8978_v60, 0.0  ;;  %v12932_v62 = vld [vmem:[#allocation67_spill] sm:$0xff] }
 0x264   :  { %12926 = vst [vmem:[#allocation184_spill] sm:$0xff] %v9000_v33  ;;  %12927 = vst [vmem:[#allocation185_spill] sm:$0xff] %v9006_v15  ;;  %v9008_v8 = vpop.f32.mrb[196].mxu0  ;;  %v9010_v3 = vpop.f32.mrb[196].mxu1  ;;  %v2166_v13 = vsel %vm1976_vm4, %v8982_v54, 0.0  ;;  %v9018_v30 = vadd.f32 %v8780_v12, %v8794_v11  ;;  %v9022_v49 = vadd.f32 %v8780_v12, %v8860_v29  ;;  %v9030_v11 = vadd.f32 %v8780_v12, %v12930_v22 }
 0x265   :  { %v5906_v57 = vpop.f32.mrb[197].mxu0  ;;  %v6010_v47 = vpop.f32.mrb[197].mxu1  ;;  %v2369_v50 = vadd.f32 %v2368_v18, %v2367_v52  ;;  %v2269_v28 = vadd.f32 %v2268_v38, %v2267_v14  ;;  %v9034_v29 = vadd.f32 %v8780_v12, %v12932_v62  ;;  %v2063_v54 = vadd.f32 %v2062_v63, %v2061_v32  ;;  %v12934_v18 = vld [vmem:[#allocation68_spill] sm:$0xff]  ;;  %v12936_v38 = vld [vmem:[#allocation69_spill] sm:$0xff] }
 0x266   :  { %12928 = vst [vmem:[#allocation186_spill] sm:$0xff] %v9018_v30  ;;  %12929 = vst [vmem:[#allocation187_spill] sm:$0xff] %v9022_v49  ;;  %v1494_v45 = vpop.f32.mrb[198].mxu0  ;;  %v1973_v58 = vpop.f32.mrb[198].mxu1  ;;  %v2064_v57 = vsel %vm1976_vm4, %v8990_v48, 0.0  ;;  %v2168_v47 = vsel %vm1976_vm4, %v8994_v53, 0.0  ;;  %v2167_v53 = vadd.f32 %v2166_v13, %v2165_v46  ;;  %v9042_v14 = vadd.f32 %v8780_v12, %v12934_v18 }
 0x267   :  { %v5907_v21 = vpop.f32.mrb[199].mxu0  ;;  %v6011_v9 = vpop.f32.mrb[199].mxu1  ;;  %12931 = vst [vmem:[#allocation66_spill] sm:$0xff] %v9030_v11  ;;  %12933 = vst [vmem:[#allocation67_spill] sm:$0xff] %v9034_v29  ;;  %v2370_v45 = vsel %vm1976_vm4, %v9000_v33, 0.0  ;;  %v2270_v58 = vsel %vm1976_vm4, %v9006_v15, 0.0  ;;  %v9046_v52 = vadd.f32 %v8780_v12, %v12936_v38  ;;  %v9058_v13 = vadd.f32 %v8780_v12, %v8880_v42 }
 0x268   :  { %12935 = vst [vmem:[#allocation68_spill] sm:$0xff] %v9042_v14  ;;  %v2372_v21 = vsel %vm1976_vm4, %v9018_v30, 0.0  ;;  %v9052_v9 = vadd.f32 %v8780_v12, %v8810_v23  ;;  %v2272_v22 = vsel %vm1976_vm4, %v9022_v49, 0.0  ;;  %v2065_v32 = vadd.f32 %v2064_v57, %v2063_v54  ;;  %v12946_v49 = vld [vmem:[#allocation72_spill] sm:$0xff] }
 0x269   :  { %12937 = vst [vmem:[#allocation69_spill] sm:$0xff] %v9046_v52  ;;  %12939 = vst [vmem:[#allocation189_spill] sm:$0xff] %v9058_v13  ;;  %v2169_v46 = vadd.f32 %v2168_v47, %v2167_v53  ;;  %v2371_v63 = vadd.f32 %v2370_v45, %v2369_v50  ;;  %v2271_v62 = vadd.f32 %v2270_v58, %v2269_v28  ;;  %v2066_v18 = vsel %vm1976_vm4, %v9030_v11, 0.0  ;;  %v12942_v47 = vld [vmem:[#allocation70_spill] sm:$0xff]  ;;  %v12944_v28 = vld [vmem:[#allocation71_spill] sm:$0xff] }
 0x26a   :  { %12938 = vst [vmem:[#allocation188_spill] sm:$0xff] %v9052_v9  ;;  %v2170_v38 = vsel %vm1976_vm4, %v9034_v29, 0.0  ;;  %v9066_v23 = vadd.f32 %v8780_v12, %v8862_v5  ;;  %v9070_v30 = vadd.f32 %v8780_v12, %v8932_v19  ;;  %v2068_v42 = vsel %vm1976_vm4, %v9042_v14, 0.0 }
 0x26b   :  { %v2172_v54 = vsel %vm1976_vm4, %v9046_v52, 0.0  ;;  %v2373_v53 = vadd.f32 %v2372_v21, %v2371_v63  ;;  %v2273_v57 = vadd.f32 %v2272_v22, %v2271_v62  ;;  %v9078_v50 = vadd.f32 %v8780_v12, %v12942_v47  ;;  %v12948_v22 = vld [vmem:[#allocation73_spill] sm:$0xff] }
 0x26c   :  { %12940 = vst [vmem:[#allocation190_spill] sm:$0xff] %v9066_v23  ;;  %12941 = vst [vmem:[#allocation191_spill] sm:$0xff] %v9070_v30  ;;  %v9082_v5 = vadd.f32 %v8780_v12, %v12944_v28  ;;  %v2374_v19 = vsel %vm1976_vm4, %v9052_v9, 0.0  ;;  %v2274_v45 = vsel %vm1976_vm4, %v9058_v13, 0.0  ;;  %v2067_v58 = vadd.f32 %v2066_v18, %v2065_v32 }
 0x26d   :  { %12943 = vst [vmem:[#allocation70_spill] sm:$0xff] %v9078_v50  ;;  %v2171_v33 = vadd.f32 %v2170_v38, %v2169_v46  ;;  %v9090_v21 = vadd.f32 %v8780_v12, %v12946_v49  ;;  %v9094_v63 = vadd.f32 %v8780_v12, %v12948_v22  ;;  %v2376_v62 = vsel %vm1976_vm4, %v9066_v23, 0.0 }
 0x26e   :  { %12945 = vst [vmem:[#allocation71_spill] sm:$0xff] %v9082_v5  ;;  %v9100_v47 = vadd.f32 %v8780_v12, %v8882_v51  ;;  %v2276_v28 = vsel %vm1976_vm4, %v9070_v30, 0.0  ;;  %v9106_v32 = vadd.f32 %v8780_v12, %v8956_v31  ;;  %v2069_v49 = vadd.f32 %v2068_v42, %v2067_v58 }
 0x26f   :  { %12947 = vst [vmem:[#allocation72_spill] sm:$0xff] %v9090_v21  ;;  %12949 = vst [vmem:[#allocation73_spill] sm:$0xff] %v9094_v63  ;;  %v2173_v46 = vadd.f32 %v2172_v54, %v2171_v33  ;;  %v2375_v18 = vadd.f32 %v2374_v19, %v2373_v53  ;;  %v2275_v38 = vadd.f32 %v2274_v45, %v2273_v57  ;;  %v2070_v22 = vsel %vm1976_vm4, %v9078_v50, 0.0 }
 0x270   :  { %12950 = vst [vmem:[#allocation192_spill] sm:$0xff] %v9100_v47  ;;  %12951 = vst [vmem:[#allocation193_spill] sm:$0xff] %v9106_v32  ;;  %v2174_v23 = vsel %vm1976_vm4, %v9082_v5, 0.0  ;;  %v9114_v51 = vadd.f32 %v8780_v12, %v8934_v35  ;;  %v9118_v9 = vadd.f32 %v8780_v12, %v9008_v8  ;;  %v2072_v33 = vsel %vm1976_vm4, %v9090_v21, 0.0 }
 0x271   :  { %v2377_v31 = vadd.f32 %v2376_v62, %v2375_v18  ;;  %v2277_v30 = vadd.f32 %v2276_v28, %v2275_v38  ;;  %v2176_v42 = vsel %vm1976_vm4, %v9094_v63, 0.0  ;;  %v2378_v54 = vsel %vm1976_vm4, %v9100_v47, 0.0 }
 0x272   :  { %12952 = vst [vmem:[#allocation194_spill] sm:$0xff] %v9114_v51  ;;  %12953 = vst [vmem:[#allocation195_spill] sm:$0xff] %v9118_v9  ;;  %v2278_v53 = vsel %vm1976_vm4, %v9106_v32, 0.0  ;;  %v2071_v35 = vadd.f32 %v2070_v22, %v2069_v49  ;;  %v2175_v57 = vadd.f32 %v2174_v23, %v2173_v46  ;;  %v2380_v8 = vsel %vm1976_vm4, %v9114_v51, 0.0 }
 0x273   :  { %v9132_v19 = vadd.f32 %v8780_v12, %v8958_v40  ;;  %v2280_v45 = vsel %vm1976_vm4, %v9118_v9, 0.0  ;;  %v2379_v28 = vadd.f32 %v2378_v54, %v2377_v31  ;;  %v2279_v18 = vadd.f32 %v2278_v53, %v2277_v30 }
 0x274   :  { %v2073_v58 = vadd.f32 %v2072_v33, %v2071_v35  ;;  %v2177_v62 = vadd.f32 %v2176_v42, %v2175_v57  ;;  %v9138_v38 = vadd.f32 %v8780_v12, %v9010_v3 }
 0x275   :  { %12954 = vst [vmem:[#allocation196_spill] sm:$0xff] %v9132_v19  ;;  %v2381_v49 = vadd.f32 %v2380_v8, %v2379_v28  ;;  %v2281_v23 = vadd.f32 %v2280_v45, %v2279_v18  ;;  %v2382_v46 = vsel %vm1976_vm4, %v9132_v19, 0.0 }
 0x276   :  { %12955 = vst [vmem:[#allocation197_spill] sm:$0xff] %v9138_v38  ;;  %v2074_v22 = vrot.slane %v2073_v58, 4  ;;  %v2178_v51 = vrot.slane %v2177_v62, 4  ;;  %v2384_v40 = vsel %vm1976_vm4, %v9138_v38, 0.0 }
 0x277   :  { %v2383_v47 = vadd.f32 %v2382_v46, %v2381_v49  ;;  %v2282_v9 = vrot.slane %v2281_v23, 4 }
 0x278   :  { %v2075_v33 = vadd.f32 %v2074_v22, %v2073_v58  ;;  %v2179_v42 = vadd.f32 %v2178_v51, %v2177_v62  ;;  %v12956_v22 = vld [vmem:[#allocation79_spill] sm:$0xff] }
 0x279   :  { %v2385_v31 = vadd.f32 %v2384_v40, %v2383_v47  ;;  %v2283_v30 = vadd.f32 %v2282_v9, %v2281_v23 }
 0x27a   :  { %v2076_v54 = vrot.slane %v2075_v33, 2  ;;  %v2180_v53 = vrot.slane %v2179_v42, 2 }
 0x27b   :  { %v2386_v12 = vrot.slane %v2385_v31, 4  ;;  %v2284_v3 = vrot.slane %v2283_v30, 2 }
 0x27c   :  { %v2077_v35 = vadd.f32 %v2076_v54, %v2075_v33  ;;  %v2181_v57 = vadd.f32 %v2180_v53, %v2179_v42  ;;  %v12957_v33 = vld [vmem:[#allocation78_spill] sm:$0xff]  ;;  %v12958_v54 = vld [vmem:[#allocation84_spill] sm:$0xff] }
 0x27d   :  { %v2387_v8 = vadd.f32 %v2386_v12, %v2385_v31  ;;  %v2285_v45 = vadd.f32 %v2284_v3, %v2283_v30  ;;  %v12959_v3 = vld [vmem:[#allocation93_spill] sm:$0xff] }
 0x27e   :  { %v2078_v28 = vrot.slane %v2077_v35, 1  ;;  %v2182_v18 = vrot.slane %v2181_v57, 1 }
 0x27f   :  { %v2388_v19 = vrot.slane %v2387_v8, 2  ;;  %v2286_v32 = vrot.slane %v2285_v45, 1 }
 0x280   :  { %v2079_v13 = vadd.f32 %v2078_v28, %v2077_v35  ;;  %v2183_v38 = vadd.f32 %v2182_v18, %v2181_v57 }
 0x281   :  { %v2389_v49 = vadd.f32 %v2388_v19, %v2387_v8  ;;  %v2287_v46 = vadd.f32 %v2286_v32, %v2285_v45 }
 0x282   :  { %v2184_v58 = vadd.f32 %v2183_v38, %v2079_v13 }
 0x283   :  { %v2390_v51 = vrot.slane %v2389_v49, 1 }
 0x284   :  { %v2288_v47 = vadd.f32 %v2287_v46, %v2184_v58  ;;  %v12960_v58 = vld [vmem:[#allocation80_spill] sm:$0xff] }
 0x285   :  { %v2391_v9 = vadd.f32 %v2390_v51, %v2389_v49 }
 0x287   :  { %v2392_v62 = vadd.f32 %v2391_v9, %v2288_v47  ;;  %v12961_v47 = vld [vmem:[#allocation81_spill] sm:$0xff] }
 0x289   :  { %v9144_v23 = vmul.f32 0.0006377551, %v2392_v62 }
 0x28b   :  { %v2395_v40 = vsub.f32 %v12956_v22, %v9144_v23  ;;  %v2396_v42 = vsub.f32 %v12957_v33, %v9144_v23  ;;  %v2397_v53 = vsub.f32 %v12958_v54, %v9144_v23  ;;  %v2398_v19 = vsub.f32 %v7889_v61, %v9144_v23 }
 0x28c   :  { %v2399_v35 = vsub.f32 %v12959_v3, %v9144_v23  ;;  %v2400_v28 = vsub.f32 %v7947_v4, %v9144_v23  ;;  %v2597_v51 = vsub.f32 %v12960_v58, %v9144_v23  ;;  %v2598_v9 = vsub.f32 %v12961_v47, %v9144_v23 }
 0x28d   :  { %v2444_v31 = vmul.f32 %v2395_v40, %v2395_v40  ;;  %v2445_v30 = vmul.f32 %v2396_v42, %v2396_v42  ;;  %v2446_v38 = vmul.f32 %v2397_v53, %v2397_v53  ;;  %v2447_v57 = vmul.f32 %v2398_v19, %v2398_v19 }
 0x28e   :  { %v2448_v18 = vmul.f32 %v2399_v35, %v2399_v35  ;;  %v2401_v62 = vsub.f32 %v7961_v24, %v9144_v23  ;;  %v2449_v40 = vmul.f32 %v2400_v28, %v2400_v28  ;;  %v2646_v19 = vmul.f32 %v2597_v51, %v2597_v51 }
 0x28f   :  { %v2493_v32 = vsel %vm1976_vm4, %v2444_v31, 0.0  ;;  %v2494_v13 = vsel %vm1976_vm4, %v2445_v30, 0.0  ;;  %v2496_v8 = vsel %vm1976_vm4, %v2446_v38, 0.0  ;;  %v2498_v49 = vsel %vm1976_vm4, %v2447_v57, 0.0  ;;  %v12962_v30 = vld [vmem:[#allocation85_spill] sm:$0xff] }
 0x290   :  { %v2495_v12 = vadd.f32 %v2494_v13, %v2493_v32  ;;  %v2500_v42 = vsel %vm1976_vm4, %v2448_v18, 0.0  ;;  %v2599_v53 = vsub.f32 %v12962_v30, %v9144_v23  ;;  %v12963_v32 = vld [vmem:[#allocation92_spill] sm:$0xff]  ;;  %v2647_v38 = vmul.f32 %v2598_v9, %v2598_v9 }
 0x291   :  { %v2600_v13 = vsub.f32 %v12963_v32, %v9144_v23  ;;  %v2450_v35 = vmul.f32 %v2401_v62, %v2401_v62  ;;  %v2502_v57 = vsel %vm1976_vm4, %v2449_v40, 0.0  ;;  %v2695_v51 = vsel %vm1976_vm4, %v2646_v19, 0.0 }
 0x292   :  { %v2497_v45 = vadd.f32 %v2496_v8, %v2495_v12  ;;  %v2402_v12 = vsub.f32 %v8001_v36, %v9144_v23  ;;  %v2648_v18 = vmul.f32 %v2599_v53, %v2599_v53  ;;  %v2696_v9 = vsel %vm1976_vm4, %v2647_v38, 0.0 }
 0x293   :  { %v2404_v62 = vsub.f32 %v8053_v37, %v9144_v23  ;;  %v2603_v53 = vsub.f32 %v7965_v6, %v9144_v23  ;;  %v2406_v19 = vsub.f32 %v8109_v27, %v9144_v23  ;;  %v9196_v38 = vsub.f32 %v8121_v41, %v9144_v23 }
 0x294   :  { %v2499_v46 = vadd.f32 %v2498_v49, %v2497_v45  ;;  %v12964_v45 = vld [vmem:[#allocation94_spill] sm:$0xff]  ;;  %v2403_v49 = vsub.f32 %v8017_v34, %v9144_v23  ;;  %v2451_v40 = vmul.f32 %v2402_v12, %v2402_v12  ;;  %v2698_v30 = vsel %vm1976_vm4, %v2648_v18, 0.0 }
 0x295   :  { %v2601_v28 = vsub.f32 %v12964_v45, %v9144_v23  ;;  %v2652_v58 = vmul.f32 %v2603_v53, %v2603_v53 }
 0x296   :  { %v2501_v31 = vadd.f32 %v2500_v42, %v2499_v46  ;;  %v2602_v46 = vsub.f32 %v7951_v2, %v9144_v23  ;;  %v2649_v42 = vmul.f32 %v2600_v13, %v2600_v13  ;;  %v2405_v13 = vsub.f32 %v8069_v44, %v9144_v23 }
 0x297   :  { %v2650_v32 = vmul.f32 %v2601_v28, %v2601_v28  ;;  %v2506_v6 = vsel %vm1976_vm4, %v2451_v40, 0.0 }
 0x298   :  { %v2503_v8 = vadd.f32 %v2502_v57, %v2501_v31  ;;  %v2504_v31 = vsel %vm1976_vm4, %v2450_v35, 0.0  ;;  %v2697_v57 = vadd.f32 %v2696_v9, %v2695_v51  ;;  %v9200_v35 = vsub.f32 %v8165_v39, %v9144_v23  ;;  %v12965_v51 = vld [vmem:[#allocation4_spill] sm:$0xff] }
 0x299   :  { %v2651_v28 = vmul.f32 %v2602_v46, %v2602_v46  ;;  %v2700_v18 = vsel %vm1976_vm4, %v2649_v42, 0.0  ;;  %v9207_v9 = vsub.f32 %v12965_v51, %v9144_v23  ;;  %v2702_v39 = vsel %vm1976_vm4, %v2650_v32, 0.0  ;;  %v12967_v46 = vld [vmem:[#allocation8_spill] sm:$0xff]  ;;  %v12968_v42 = vld [vmem:[#allocation10_spill] sm:$0xff] }
 0x29a   :  { %v2505_v45 = vadd.f32 %v2504_v31, %v2503_v8  ;;  %v2699_v12 = vadd.f32 %v2698_v30, %v2697_v57  ;;  %v2604_v8 = vsub.f32 %v8005_v7, %v9144_v23  ;;  %v2452_v31 = vmul.f32 %v2403_v49, %v2403_v49  ;;  %v12966_v30 = vld [vmem:[#allocation6_spill] sm:$0xff]  ;;  %v12969_v49 = vld [vmem:[#allocation112_spill] sm:$0xff] }
 0x29b   :  { %v9212_v57 = vsub.f32 %v12966_v30, %v9144_v23  ;;  %v9217_v7 = vsub.f32 %v12967_v46, %v9144_v23  ;;  %v9221_v51 = vsub.f32 %v12968_v42, %v9144_v23  ;;  %v2605_v40 = vsub.f32 %v12969_v49, %v9144_v23  ;;  %v12972_v46 = vld [vmem:[#allocation16_spill] sm:$0xff] }
 0x29c   :  { %v2701_v2 = vadd.f32 %v2700_v18, %v2699_v12  ;;  %v2507_v47 = vadd.f32 %v2506_v6, %v2505_v45  ;;  %v12970_v18 = vld [vmem:[#allocation12_spill] sm:$0xff]  ;;  %v12971_v6 = vld [vmem:[#allocation14_spill] sm:$0xff]  ;;  %v2653_v32 = vmul.f32 %v2604_v8, %v2604_v8  ;;  %v2704_v53 = vsel %vm1976_vm4, %v2651_v28, 0.0 }
 0x29d   :  { %v9227_v30 = vsub.f32 %v12970_v18, %v9144_v23  ;;  %v9231_v45 = vsub.f32 %v12971_v6, %v9144_v23  ;;  %v9236_v41 = vsub.f32 %v12972_v46, %v9144_v23  ;;  %v2453_v42 = vmul.f32 %v2404_v62, %v2404_v62  ;;  %v12973_v28 = vld [vmem:[#allocation22_spill] sm:$0xff] }
 0x29e   :  { %v2703_v12 = vadd.f32 %v2702_v39, %v2701_v2  ;;  %v2508_v27 = vsel %vm1976_vm4, %v2452_v31, 0.0  ;;  %v9241_v2 = vsub.f32 %v8381_v16, %v9144_v23  ;;  %v9245_v39 = vsub.f32 %v8393_v0, %v9144_v23  ;;  %v12974_v62 = vld [vmem:[#allocation118_spill] sm:$0xff] }
 0x29f   :  { %v2509_v6 = vadd.f32 %v2508_v27, %v2507_v47  ;;  %v2706_v8 = vsel %vm1976_vm4, %v2652_v58, 0.0  ;;  %v9250_v18 = vsub.f32 %v12973_v28, %v9144_v23  ;;  %v2606_v46 = vsub.f32 %v12974_v62, %v9144_v23  ;;  %v12976_v47 = vld [vmem:[#allocation30_spill] sm:$0xff]  ;;  %v12977_v62 = vld [vmem:[#allocation32_spill] sm:$0xff] }
 0x2a0   :  { %v2705_v49 = vadd.f32 %v2704_v53, %v2703_v12  ;;  %v2654_v31 = vmul.f32 %v2605_v40, %v2605_v40  ;;  %v12975_v53 = vld [vmem:[#allocation24_spill] sm:$0xff]  ;;  %v9260_v0 = vsub.f32 %v8485_v20, %v9144_v23  ;;  %v9264_v27 = vsub.f32 %v8501_v43, %v9144_v23 }
 0x2a1   :  { %v9256_v16 = vsub.f32 %v12975_v53, %v9144_v23  ;;  %v2708_v58 = vsel %vm1976_vm4, %v2653_v32, 0.0  ;;  %v9269_v28 = vsub.f32 %v12976_v47, %v9144_v23  ;;  %v2454_v40 = vmul.f32 %v2405_v13, %v2405_v13  ;;  %v12978_v32 = vld [vmem:[#allocation38_spill] sm:$0xff]  ;;  %v12979_v47 = vld [vmem:[#allocation120_spill] sm:$0xff] }
 0x2a2   :  { %v2707_v12 = vadd.f32 %v2706_v8, %v2705_v49  ;;  %v2510_v49 = vsel %vm1976_vm4, %v2453_v42, 0.0  ;;  %v2423_v53 = vsub.f32 %v12977_v62, %v9144_v23  ;;  %v2424_v20 = vsub.f32 %v8597_v56, %v9144_v23 }
 0x2a3   :  { %v2425_v43 = vsub.f32 %v8609_v59, %v9144_v23  ;;  %v2511_v44 = vadd.f32 %v2510_v49, %v2509_v6  ;;  %v2426_v37 = vsub.f32 %v12978_v32, %v9144_v23  ;;  %v2607_v34 = vsub.f32 %v12979_v47, %v9144_v23  ;;  %v12981_v6 = vld [vmem:[#allocation46_spill] sm:$0xff]  ;;  %v12982_v32 = vld [vmem:[#allocation48_spill] sm:$0xff] }
 0x2a4   :  { %v2709_v8 = vadd.f32 %v2708_v58, %v2707_v12  ;;  %v2655_v13 = vmul.f32 %v2606_v46, %v2606_v46  ;;  %v2710_v42 = vsel %vm1976_vm4, %v2654_v31, 0.0  ;;  %v12980_v12 = vld [vmem:[#allocation40_spill] sm:$0xff]  ;;  %v2428_v62 = vsub.f32 %v8701_v10, %v9144_v23  ;;  %v12983_v10 = vld [vmem:[#allocation54_spill] sm:$0xff] }
 0x2a5   :  { %v2427_v58 = vsub.f32 %v12980_v12, %v9144_v23  ;;  %v2429_v56 = vsub.f32 %v8717_v25, %v9144_v23  ;;  %v2430_v49 = vsub.f32 %v12981_v6, %v9144_v23  ;;  %v2431_v36 = vsub.f32 %v12982_v32, %v9144_v23  ;;  %v12985_v6 = vld [vmem:[#allocation126_spill] sm:$0xff] }
 0x2a6   :  { %v2711_v59 = vadd.f32 %v2710_v42, %v2709_v8  ;;  %v2455_v47 = vmul.f32 %v2406_v19, %v2406_v19  ;;  %v2512_v46 = vsel %vm1976_vm4, %v2454_v40, 0.0  ;;  %v2432_v31 = vsub.f32 %v8818_v17, %v9144_v23  ;;  %v12984_v8 = vld [vmem:[#allocation56_spill] sm:$0xff] }
 0x2a7   :  { %v2433_v12 = vsub.f32 %v8830_v1, %v9144_v23  ;;  %v2434_v24 = vsub.f32 %v12983_v10, %v9144_v23  ;;  %v2513_v25 = vadd.f32 %v2512_v46, %v2511_v44  ;;  %v2435_v42 = vsub.f32 %v12984_v8, %v9144_v23 }
 0x2a8   :  { %v2608_v4 = vsub.f32 %v12985_v6, %v9144_v23  ;;  %v2656_v32 = vmul.f32 %v2607_v34, %v2607_v34  ;;  %v2712_v19 = vsel %vm1976_vm4, %v2655_v13, 0.0  ;;  %v2436_v40 = vsub.f32 %v8922_v26, %v9144_v23 }
 0x2a9   :  { %v2437_v17 = vsub.f32 %v8938_v55, %v9144_v23  ;;  %v2438_v1 = vsub.f32 %v8978_v60, %v9144_v23  ;;  %v2713_v10 = vadd.f32 %v2712_v19, %v2711_v59  ;;  %v2439_v44 = vsub.f32 %v8990_v48, %v9144_v23 }
 0x2aa   :  { %v2440_v46 = vsub.f32 %v9030_v11, %v9144_v23  ;;  %v2456_v34 = vmul.f32 %v9196_v38, %v9196_v38  ;;  %v2514_v13 = vsel %vm1976_vm4, %v2455_v47, 0.0  ;;  %v2441_v6 = vsub.f32 %v9042_v14, %v9144_v23  ;;  %v12986_v11 = vld [vmem:[#allocation128_spill] sm:$0xff] }
 0x2ab   :  { %v2442_v55 = vsub.f32 %v9078_v50, %v9144_v23  ;;  %v2443_v59 = vsub.f32 %v9090_v21, %v9144_v23  ;;  %v2515_v19 = vadd.f32 %v2514_v13, %v2513_v25  ;;  %v2457_v48 = vmul.f32 %v9200_v35, %v9200_v35 }
 0x2ac   :  { %v2609_v60 = vsub.f32 %v12986_v11, %v9144_v23  ;;  %v2657_v26 = vmul.f32 %v2608_v4, %v2608_v4  ;;  %v2714_v38 = vsel %vm1976_vm4, %v2656_v32, 0.0  ;;  %v2458_v47 = vmul.f32 %v9207_v9, %v9207_v9 }
 0x2ad   :  { %v2459_v14 = vmul.f32 %v9212_v57, %v9212_v57  ;;  %v2460_v50 = vmul.f32 %v9217_v7, %v9217_v7  ;;  %v2715_v21 = vadd.f32 %v2714_v38, %v2713_v10  ;;  %v2461_v25 = vmul.f32 %v9221_v51, %v9221_v51 }
 0x2ae   :  { %v2462_v35 = vmul.f32 %v9227_v30, %v9227_v30  ;;  %v2463_v4 = vmul.f32 %v9231_v45, %v9231_v45  ;;  %v2516_v32 = vsel %vm1976_vm4, %v2456_v34, 0.0  ;;  %v2464_v9 = vmul.f32 %v9236_v41, %v9236_v41  ;;  %v12987_v30 = vld [vmem:[#allocation3_spill] sm:$0xff] }
 0x2af   :  { %v2465_v57 = vmul.f32 %v9241_v2, %v9241_v2  ;;  %v2466_v7 = vmul.f32 %v9245_v39, %v9245_v39  ;;  %v2517_v10 = vadd.f32 %v2516_v32, %v2515_v19  ;;  %v2467_v51 = vmul.f32 %v9250_v18, %v9250_v18 }
 0x2b0   :  { %v2610_v13 = vsub.f32 %v12987_v30, %v9144_v23  ;;  %v2658_v38 = vmul.f32 %v2609_v60, %v2609_v60  ;;  %v2716_v45 = vsel %vm1976_vm4, %v2657_v26, 0.0  ;;  %v2468_v34 = vmul.f32 %v9256_v16, %v9256_v16  ;;  %v12988_v16 = vld [vmem:[#allocation5_spill] sm:$0xff] }
 0x2b1   :  { %v2469_v41 = vmul.f32 %v9260_v0, %v9260_v0  ;;  %v2470_v2 = vmul.f32 %v9264_v27, %v9264_v27  ;;  %v2717_v39 = vadd.f32 %v2716_v45, %v2715_v21  ;;  %v2471_v19 = vmul.f32 %v9269_v28, %v9269_v28 }
 0x2b2   :  { %v2472_v18 = vmul.f32 %v2423_v53, %v2423_v53  ;;  %v2473_v32 = vmul.f32 %v2424_v20, %v2424_v20  ;;  %v2518_v30 = vsel %vm1976_vm4, %v2457_v48, 0.0  ;;  %v2474_v60 = vmul.f32 %v2425_v43, %v2425_v43 }
 0x2b3   :  { %v2475_v11 = vmul.f32 %v2426_v37, %v2426_v37  ;;  %v2476_v26 = vmul.f32 %v2427_v58, %v2427_v58  ;;  %v2519_v8 = vadd.f32 %v2518_v30, %v2517_v10  ;;  %v2477_v3 = vmul.f32 %v2428_v62, %v2428_v62 }
 0x2b4   :  { %v2611_v61 = vsub.f32 %v12988_v16, %v9144_v23  ;;  %v2659_v0 = vmul.f32 %v2610_v13, %v2610_v13  ;;  %v2718_v54 = vsel %vm1976_vm4, %v2658_v38, 0.0  ;;  %v2478_v27 = vmul.f32 %v2429_v56, %v2429_v56  ;;  %v12989_v56 = vld [vmem:[#allocation7_spill] sm:$0xff]  ;;  %v12992_v38 = vld [vmem:[#allocation89_spill] sm:$0xff] }
 0x2b5   :  { %v2479_v21 = vmul.f32 %v2430_v49, %v2430_v49  ;;  %v2480_v45 = vmul.f32 %v2431_v36, %v2431_v36  ;;  %v2719_v33 = vadd.f32 %v2718_v54, %v2717_v39  ;;  %v2481_v28 = vmul.f32 %v2432_v31, %v2432_v31 }
 0x2b6   :  { %v9365_v53 = vmul.f32 %v2433_v12, %v2433_v12  ;;  %v9367_v20 = vmul.f32 %v2434_v24, %v2434_v24  ;;  %v2520_v37 = vsel %vm1976_vm4, %v2458_v47, 0.0  ;;  %v2484_v43 = vmul.f32 %v2435_v42, %v2435_v42 }
 0x2b7   :  { %v9370_v48 = vmul.f32 %v2436_v40, %v2436_v40  ;;  %v9372_v62 = vmul.f32 %v2437_v17, %v2437_v17  ;;  %v2521_v58 = vadd.f32 %v2520_v37, %v2519_v8  ;;  %v9374_v10 = vmul.f32 %v2438_v1, %v2438_v1 }
 0x2b8   :  { %v2612_v49 = vsub.f32 %v12989_v56, %v9144_v23  ;;  %v2660_v36 = vmul.f32 %v2611_v61, %v2611_v61  ;;  %v2720_v54 = vsel %vm1976_vm4, %v2659_v0, 0.0  ;;  %v9379_v12 = vmul.f32 %v2439_v44, %v2439_v44  ;;  %v12993_v0 = vld [vmem:[#allocation86_spill] sm:$0xff] }
 0x2b9   :  { %v9381_v24 = vmul.f32 %v2440_v46, %v2440_v46  ;;  %v9383_v31 = vmul.f32 %v2441_v6, %v2441_v6  ;;  %v2721_v42 = vadd.f32 %v2720_v54, %v2719_v33  ;;  %v9385_v40 = vmul.f32 %v2442_v55, %v2442_v55  ;;  %v12991_v33 = vld [vmem:[#allocation9_spill] sm:$0xff]  ;;  %v12995_v54 = vld [vmem:[#allocation90_spill] sm:$0xff] }
 0x2ba   :  { %v9387_v17 = vmul.f32 %v2443_v59, %v2443_v59  ;;  %v2522_v1 = vsel %vm1976_vm4, %v2459_v14, 0.0  ;;  %v2524_v8 = vsel %vm1976_vm4, %v2460_v50, 0.0  ;;  %v2526_v61 = vsel %vm1976_vm4, %v2461_v25, 0.0 }
 0x2bb   :  { %v2523_v47 = vadd.f32 %v2522_v1, %v2521_v58  ;;  %v2528_v30 = vsel %vm1976_vm4, %v2462_v35, 0.0  ;;  %v2530_v44 = vsel %vm1976_vm4, %v2463_v4, 0.0  ;;  %v9395_v46 = vsel %vm1976_vm4, %v2464_v9, 0.0 }
 0x2bc   :  { %12990 = vst [vmem:[#allocation198_spill] sm:$0xff] %v9387_v17  ;;  %v2613_v55 = vsub.f32 %v12991_v33, %v9144_v23  ;;  %v2661_v6 = vmul.f32 %v2612_v49, %v2612_v49  ;;  %v2722_v59 = vsel %vm1976_vm4, %v2660_v36, 0.0  ;;  %v9401_v14 = vsel %vm1976_vm4, %v2465_v57, 0.0 }
 0x2bd   :  { %v9404_v50 = vsel %vm1976_vm4, %v2466_v7, 0.0  ;;  %v9407_v25 = vsel %vm1976_vm4, %v2467_v51, 0.0  ;;  %v2723_v35 = vadd.f32 %v2722_v59, %v2721_v42  ;;  %v9410_v4 = vsel %vm1976_vm4, %v2468_v34, 0.0 }
 0x2be   :  { %v9413_v9 = vsel %vm1976_vm4, %v2469_v41, 0.0  ;;  %v9416_v13 = vsel %vm1976_vm4, %v2470_v2, 0.0  ;;  %v2799_v57 = vsub.f32 %v12992_v38, %v9144_v23  ;;  %v2525_v39 = vadd.f32 %v2524_v8, %v2523_v47  ;;  %v12994_v41 = vld [vmem:[#allocation11_spill] sm:$0xff] }
 0x2bf   :  { %v9421_v7 = vsel %vm1976_vm4, %v2471_v19, 0.0  ;;  %v9424_v51 = vsel %vm1976_vm4, %v2472_v18, 0.0  ;;  %v2800_v34 = vsub.f32 %v12993_v0, %v9144_v23  ;;  %v9429_v37 = vsel %vm1976_vm4, %v2473_v32, 0.0 }
 0x2c0   :  { %v2614_v2 = vsub.f32 %v12994_v41, %v9144_v23  ;;  %v2662_v58 = vmul.f32 %v2613_v55, %v2613_v55  ;;  %v2724_v49 = vsel %vm1976_vm4, %v2661_v6, 0.0  ;;  %v9435_v36 = vsel %vm1976_vm4, %v2474_v60, 0.0 }
 0x2c1   :  { %v9438_v19 = vsel %vm1976_vm4, %v2475_v11, 0.0  ;;  %v2725_v18 = vadd.f32 %v2724_v49, %v2723_v35  ;;  %v2801_v42 = vsub.f32 %v12995_v54, %v9144_v23  ;;  %v9443_v1 = vsel %vm1976_vm4, %v2476_v26, 0.0  ;;  %v12996_v11 = vld [vmem:[#allocation97_spill] sm:$0xff] }
 0x2c2   :  { %v9446_v32 = vsel %vm1976_vm4, %v2477_v3, 0.0  ;;  %v9449_v8 = vsel %vm1976_vm4, %v2478_v27, 0.0  ;;  %v2848_v47 = vmul.f32 %v2799_v57, %v2799_v57  ;;  %v2527_v55 = vadd.f32 %v2526_v61, %v2525_v39  ;;  %v12997_v26 = vld [vmem:[#allocation13_spill] sm:$0xff] }
 0x2c3   :  { %v9452_v60 = vsel %vm1976_vm4, %v2479_v21, 0.0  ;;  %v2802_v6 = vsub.f32 %v12996_v11, %v9144_v23  ;;  %v2849_v59 = vmul.f32 %v2800_v34, %v2800_v34  ;;  %v9457_v35 = vsel %vm1976_vm4, %v2480_v45, 0.0  ;;  %v12998_v21 = vld [vmem:[#allocation100_spill] sm:$0xff] }
 0x2c4   :  { %v2615_v49 = vsub.f32 %v12997_v26, %v9144_v23  ;;  %v2663_v3 = vmul.f32 %v2614_v2, %v2614_v2  ;;  %v2726_v54 = vsel %vm1976_vm4, %v2662_v58, 0.0  ;;  %v9463_v27 = vsel %vm1976_vm4, %v2481_v28, 0.0 }
 0x2c5   :  { %v2727_v61 = vadd.f32 %v2726_v54, %v2725_v18  ;;  %v2803_v57 = vsub.f32 %v12998_v21, %v9144_v23  ;;  %v2850_v39 = vmul.f32 %v2801_v42, %v2801_v42  ;;  %v9469_v34 = vsel %vm1976_vm4, %v9365_v53, 0.0  ;;  %v12999_v18 = vld [vmem:[#allocation106_spill] sm:$0xff]  ;;  %v13000_v21 = vld [vmem:[#allocation15_spill] sm:$0xff] }
 0x2c6   :  { %v9473_v45 = vsel %vm1976_vm4, %v9367_v20, 0.0  ;;  %v9476_v2 = vsel %vm1976_vm4, %v2484_v43, 0.0  ;;  %v2897_v58 = vsel %vm1976_vm4, %v2848_v47, 0.0  ;;  %v2529_v28 = vadd.f32 %v2528_v30, %v2527_v55  ;;  %v13001_v43 = vld [vmem:[#allocation108_spill] sm:$0xff] }
 0x2c7   :  { %v2804_v54 = vsub.f32 %v12999_v18, %v9144_v23  ;;  %v2851_v11 = vmul.f32 %v2802_v6, %v2802_v6  ;;  %v2898_v42 = vsel %vm1976_vm4, %v2849_v59, 0.0  ;;  %v2616_v53 = vsub.f32 %v13000_v21, %v9144_v23  ;;  %v13004_v18 = vld [vmem:[#allocation116_spill] sm:$0xff] }
 0x2c8   :  { %v2664_v0 = vmul.f32 %v2615_v49, %v2615_v49  ;;  %v2728_v38 = vsel %vm1976_vm4, %v2663_v3, 0.0  ;;  %v2899_v20 = vadd.f32 %v2898_v42, %v2897_v58  ;;  %v2805_v41 = vsub.f32 %v13001_v43, %v9144_v23  ;;  %v13002_v49 = vld [vmem:[#allocation114_spill] sm:$0xff] }
 0x2c9   :  { %v2729_v26 = vadd.f32 %v2728_v38, %v2727_v61  ;;  %v2852_v33 = vmul.f32 %v2803_v57, %v2803_v57  ;;  %v2900_v30 = vsel %vm1976_vm4, %v2850_v39, 0.0  ;;  %v9490_v47 = vsel %vm1976_vm4, %v9370_v48, 0.0  ;;  %v13003_v39 = vld [vmem:[#allocation17_spill] sm:$0xff] }
 0x2ca   :  { %v9494_v55 = vsel %vm1976_vm4, %v9372_v62, 0.0  ;;  %v9498_v6 = vsel %vm1976_vm4, %v9374_v10, 0.0  ;;  %v2901_v59 = vadd.f32 %v2900_v30, %v2899_v20  ;;  %v2531_v38 = vadd.f32 %v2530_v44, %v2529_v28 }
 0x2cb   :  { %v2806_v3 = vsub.f32 %v13002_v49, %v9144_v23  ;;  %v2853_v61 = vmul.f32 %v2804_v54, %v2804_v54  ;;  %v2902_v57 = vsel %vm1976_vm4, %v2851_v11, 0.0  ;;  %v2617_v48 = vsub.f32 %v13003_v39, %v9144_v23 }
 0x2cc   :  { %v2665_v58 = vmul.f32 %v2616_v53, %v2616_v53  ;;  %v2730_v42 = vsel %vm1976_vm4, %v2664_v0, 0.0  ;;  %v2903_v62 = vadd.f32 %v2902_v57, %v2901_v59  ;;  %v2807_v10 = vsub.f32 %v13004_v18, %v9144_v23  ;;  %v13007_v53 = vld [vmem:[#allocation122_spill] sm:$0xff] }
 0x2cd   :  { %v2731_v43 = vadd.f32 %v2730_v42, %v2729_v26  ;;  %v2854_v21 = vmul.f32 %v2805_v41, %v2805_v41  ;;  %v2904_v44 = vsel %vm1976_vm4, %v2852_v33, 0.0  ;;  %v9511_v28 = vsel %vm1976_vm4, %v9379_v12, 0.0  ;;  %v13008_v12 = vld [vmem:[#allocation19_spill] sm:$0xff] }
 0x2ce   :  { %v9515_v11 = vsel %vm1976_vm4, %v9381_v24, 0.0  ;;  %v9519_v54 = vsel %vm1976_vm4, %v9383_v31, 0.0  ;;  %v2905_v0 = vadd.f32 %v2904_v44, %v2903_v62  ;;  %v2533_v26 = vadd.f32 %v9395_v46, %v2531_v38  ;;  %v13009_v31 = vld [vmem:[#allocation124_spill] sm:$0xff]  ;;  %v13012_v44 = vld [vmem:[#allocation23_spill] sm:$0xff] }
 0x2cf   :  { %13005 = vst [vmem:[#allocation199_spill] sm:$0xff] %v9515_v11  ;;  %13006 = vst [vmem:[#allocation200_spill] sm:$0xff] %v9519_v54  ;;  %v2808_v41 = vsub.f32 %v13007_v53, %v9144_v23  ;;  %v2855_v20 = vmul.f32 %v2806_v3, %v2806_v3  ;;  %v2906_v33 = vsel %vm1976_vm4, %v2853_v61, 0.0  ;;  %v2618_v30 = vsub.f32 %v13008_v12, %v9144_v23  ;;  %v13011_v3 = vld [vmem:[#allocation21_spill] sm:$0xff]  ;;  %v13015_v12 = vld [vmem:[#allocation132_spill] sm:$0xff] }
 0x2d0   :  { %v2666_v59 = vmul.f32 %v2617_v48, %v2617_v48  ;;  %v2732_v24 = vsel %vm1976_vm4, %v2665_v58, 0.0  ;;  %v2907_v57 = vadd.f32 %v2906_v33, %v2905_v0  ;;  %v2809_v18 = vsub.f32 %v13009_v31, %v9144_v23 }
 0x2d1   :  { %v2733_v42 = vadd.f32 %v2732_v24, %v2731_v43  ;;  %v2856_v62 = vmul.f32 %v2807_v10, %v2807_v10  ;;  %v2908_v46 = vsel %vm1976_vm4, %v2854_v21, 0.0  ;;  %v9533_v38 = vsel %vm1976_vm4, %v9385_v40, 0.0  ;;  %v13013_v43 = vld [vmem:[#allocation130_spill] sm:$0xff]  ;;  %v13014_v21 = vld [vmem:[#allocation25_spill] sm:$0xff] }
 0x2d2   :  { %13010 = vst [vmem:[#allocation201_spill] sm:$0xff] %v9533_v38  ;;  %v2619_v61 = vsub.f32 %v13011_v3, %v9144_v23  ;;  %v2620_v48 = vsub.f32 %v13012_v44, %v9144_v23  ;;  %v2909_v53 = vadd.f32 %v2908_v46, %v2907_v57  ;;  %v2535_v58 = vadd.f32 %v9401_v14, %v2533_v26  ;;  %v13016_v26 = vld [vmem:[#allocation27_spill] sm:$0xff] }
 0x2d3   :  { %v2810_v0 = vsub.f32 %v13013_v43, %v9144_v23  ;;  %v2857_v33 = vmul.f32 %v2808_v41, %v2808_v41  ;;  %v2910_v10 = vsel %vm1976_vm4, %v2855_v20, 0.0  ;;  %v2621_v24 = vsub.f32 %v13014_v21, %v9144_v23  ;;  %v13017_v41 = vld [vmem:[#allocation29_spill] sm:$0xff]  ;;  %v13018_v43 = vld [vmem:[#allocation31_spill] sm:$0xff] }
 0x2d4   :  { %v2667_v40 = vmul.f32 %v2618_v30, %v2618_v30  ;;  %v2734_v31 = vsel %vm1976_vm4, %v2666_v59, 0.0  ;;  %v2911_v49 = vadd.f32 %v2910_v10, %v2909_v53  ;;  %v2811_v44 = vsub.f32 %v13015_v12, %v9144_v23  ;;  %v13020_v10 = vld [vmem:[#allocation33_spill] sm:$0xff] }
 0x2d5   :  { %v2735_v3 = vadd.f32 %v2734_v31, %v2733_v42  ;;  %v2858_v57 = vmul.f32 %v2809_v18, %v2809_v18  ;;  %v2912_v14 = vsel %vm1976_vm4, %v2856_v62, 0.0  ;;  %v2622_v46 = vsub.f32 %v13016_v26, %v9144_v23  ;;  %v13019_v42 = vld [vmem:[#allocation133_spill] sm:$0xff] }
 0x2d6   :  { %v9553_v20 = vsub.f32 %v13017_v41, %v9144_v23  ;;  %v9557_v30 = vsub.f32 %v13018_v43, %v9144_v23  ;;  %v2913_v59 = vadd.f32 %v2912_v14, %v2911_v49  ;;  %v2537_v53 = vadd.f32 %v9404_v50, %v2535_v58  ;;  %v13021_v43 = vld [vmem:[#allocation134_spill] sm:$0xff]  ;;  %v13022_v58 = vld [vmem:[#allocation35_spill] sm:$0xff] }
 0x2d7   :  { %v2812_v31 = vsub.f32 %v13019_v42, %v9144_v23  ;;  %v2859_v18 = vmul.f32 %v2810_v0, %v2810_v0  ;;  %v2914_v62 = vsel %vm1976_vm4, %v2857_v33, 0.0  ;;  %v9565_v12 = vsub.f32 %v13020_v10, %v9144_v23  ;;  %v13023_v33 = vld [vmem:[#allocation37_spill] sm:$0xff] }
 0x2d8   :  { %v2668_v26 = vmul.f32 %v2619_v61, %v2619_v61  ;;  %v2736_v41 = vsel %vm1976_vm4, %v2667_v40, 0.0  ;;  %v2915_v21 = vadd.f32 %v2914_v62, %v2913_v59  ;;  %v2813_v49 = vsub.f32 %v13021_v43, %v9144_v23  ;;  %v13024_v61 = vld [vmem:[#allocation39_spill] sm:$0xff]  ;;  %v13026_v62 = vld [vmem:[#allocation41_spill] sm:$0xff] }
 0x2d9   :  { %v2737_v39 = vadd.f32 %v2736_v41, %v2735_v3  ;;  %v2860_v14 = vmul.f32 %v2811_v44, %v2811_v44  ;;  %v2916_v50 = vsel %vm1976_vm4, %v2858_v57, 0.0  ;;  %v9573_v0 = vsub.f32 %v13022_v58, %v9144_v23  ;;  %v13025_v41 = vld [vmem:[#allocation136_spill] sm:$0xff] }
 0x2da   :  { %v9577_v42 = vsub.f32 %v13023_v33, %v9144_v23  ;;  %v9581_v10 = vsub.f32 %v13024_v61, %v9144_v23  ;;  %v2917_v40 = vadd.f32 %v2916_v50, %v2915_v21  ;;  %v2539_v3 = vadd.f32 %v9407_v25, %v2537_v53  ;;  %v13027_v61 = vld [vmem:[#allocation82_spill] sm:$0xff]  ;;  %v13028_v53 = vld [vmem:[#allocation43_spill] sm:$0xff] }
 0x2db   :  { %v2814_v44 = vsub.f32 %v13025_v41, %v9144_v23  ;;  %v2861_v59 = vmul.f32 %v2812_v31, %v2812_v31  ;;  %v2918_v57 = vsel %vm1976_vm4, %v2859_v18, 0.0  ;;  %v9589_v43 = vsub.f32 %v13026_v62, %v9144_v23  ;;  %v13029_v18 = vld [vmem:[#allocation45_spill] sm:$0xff] }
 0x2dc   :  { %v2669_v58 = vmul.f32 %v2620_v48, %v2620_v48  ;;  %v2738_v33 = vsel %vm1976_vm4, %v2668_v26, 0.0  ;;  %v2919_v56 = vadd.f32 %v2918_v57, %v2917_v40  ;;  %v2815_v21 = vsub.f32 %v13027_v61, %v9144_v23  ;;  %v13030_v48 = vld [vmem:[#allocation47_spill] sm:$0xff]  ;;  %v13032_v57 = vld [vmem:[#allocation49_spill] sm:$0xff] }
 0x2dd   :  { %v2739_v16 = vadd.f32 %v2738_v33, %v2737_v39  ;;  %v2862_v50 = vmul.f32 %v2813_v49, %v2813_v49  ;;  %v2920_v25 = vsel %vm1976_vm4, %v2860_v14, 0.0  ;;  %v9597_v31 = vsub.f32 %v13028_v53, %v9144_v23  ;;  %v13031_v33 = vld [vmem:[#allocation87_spill] sm:$0xff] }
 0x2de   :  { %v9601_v41 = vsub.f32 %v13029_v18, %v9144_v23  ;;  %v9605_v62 = vsub.f32 %v13030_v48, %v9144_v23  ;;  %v2921_v26 = vadd.f32 %v2920_v25, %v2919_v56  ;;  %v2541_v39 = vadd.f32 %v9410_v4, %v2539_v3  ;;  %v13033_v48 = vld [vmem:[#allocation137_spill] sm:$0xff]  ;;  %v13034_v3 = vld [vmem:[#allocation51_spill] sm:$0xff] }
 0x2df   :  { %v2816_v49 = vsub.f32 %v13031_v33, %v9144_v23  ;;  %v2863_v40 = vmul.f32 %v2814_v44, %v2814_v44  ;;  %v2922_v14 = vsel %vm1976_vm4, %v2861_v59, 0.0  ;;  %v9613_v61 = vsub.f32 %v13032_v57, %v9144_v23  ;;  %v13035_v59 = vld [vmem:[#allocation53_spill] sm:$0xff] }
 0x2e0   :  { %v2670_v53 = vmul.f32 %v2621_v24, %v2621_v24  ;;  %v2740_v18 = vsel %vm1976_vm4, %v2669_v58, 0.0  ;;  %v2923_v22 = vadd.f32 %v2922_v14, %v2921_v26  ;;  %v2817_v56 = vsub.f32 %v13033_v48, %v9144_v23  ;;  %v13036_v24 = vld [vmem:[#allocation55_spill] sm:$0xff]  ;;  %v13038_v14 = vld [vmem:[#allocation57_spill] sm:$0xff] }
 0x2e1   :  { %v2741_v17 = vadd.f32 %v2740_v18, %v2739_v16  ;;  %v2864_v25 = vmul.f32 %v2815_v21, %v2815_v21  ;;  %v2924_v4 = vsel %vm1976_vm4, %v2862_v50, 0.0  ;;  %v9621_v44 = vsub.f32 %v13034_v3, %v9144_v23  ;;  %v13037_v18 = vld [vmem:[#allocation138_spill] sm:$0xff] }
 0x2e2   :  { %v9625_v33 = vsub.f32 %v13035_v59, %v9144_v23  ;;  %v9629_v57 = vsub.f32 %v13036_v24, %v9144_v23  ;;  %v2925_v58 = vadd.f32 %v2924_v4, %v2923_v22  ;;  %v2543_v16 = vadd.f32 %v9413_v9, %v2541_v39  ;;  %v13039_v24 = vld [vmem:[#allocation139_spill] sm:$0xff] }
 0x2e3   :  { %v2818_v21 = vsub.f32 %v13037_v18, %v9144_v23  ;;  %v2865_v26 = vmul.f32 %v2816_v49, %v2816_v49  ;;  %v2926_v50 = vsel %vm1976_vm4, %v2863_v40, 0.0  ;;  %v9637_v48 = vsub.f32 %v13038_v14, %v9144_v23  ;;  %v13040_v39 = vld [vmem:[#allocation59_spill] sm:$0xff]  ;;  %v13041_v40 = vld [vmem:[#allocation61_spill] sm:$0xff] }
 0x2e4   :  { %v2671_v3 = vmul.f32 %v2622_v46, %v2622_v46  ;;  %v2742_v59 = vsel %vm1976_vm4, %v2670_v53, 0.0  ;;  %v2927_v38 = vadd.f32 %v2926_v50, %v2925_v58  ;;  %v2819_v22 = vsub.f32 %v13039_v24, %v9144_v23  ;;  %v13042_v46 = vld [vmem:[#allocation63_spill] sm:$0xff]  ;;  %v13044_v50 = vld [vmem:[#allocation65_spill] sm:$0xff] }
 0x2e5   :  { %v2743_v54 = vadd.f32 %v2742_v59, %v2741_v17  ;;  %v2866_v4 = vmul.f32 %v2817_v56, %v2817_v56  ;;  %v2928_v9 = vsel %vm1976_vm4, %v2864_v25, 0.0  ;;  %v9645_v49 = vsub.f32 %v13040_v39, %v9144_v23  ;;  %v13043_v59 = vld [vmem:[#allocation141_spill] sm:$0xff] }
 0x2e6   :  { %v9649_v18 = vsub.f32 %v13041_v40, %v9144_v23  ;;  %v9653_v14 = vsub.f32 %v13042_v46, %v9144_v23  ;;  %v2929_v53 = vadd.f32 %v2928_v9, %v2927_v38  ;;  %v2545_v17 = vadd.f32 %v9416_v13, %v2543_v16  ;;  %v13045_v38 = vld [vmem:[#allocation143_spill] sm:$0xff] }
 0x2e7   :  { %v2820_v56 = vsub.f32 %v13043_v59, %v9144_v23  ;;  %v2867_v58 = vmul.f32 %v2818_v21, %v2818_v21  ;;  %v2930_v25 = vsel %vm1976_vm4, %v2865_v26, 0.0  ;;  %v9661_v24 = vsub.f32 %v13044_v50, %v9144_v23  ;;  %v13062_v50 = vld [vmem:[#allocation121_spill] sm:$0xff] }
 0x2e8   :  { %v2672_v40 = vmul.f32 %v9553_v20, %v9553_v20  ;;  %v2744_v39 = vsel %vm1976_vm4, %v2671_v3, 0.0  ;;  %v2931_v46 = vadd.f32 %v2930_v25, %v2929_v53  ;;  %v2821_v13 = vsub.f32 %v13045_v38, %v9144_v23 }
 0x2e9   :  { %v2745_v11 = vadd.f32 %v2744_v39, %v2743_v54  ;;  %v2868_v16 = vmul.f32 %v2819_v22, %v2819_v22  ;;  %v2932_v9 = vsel %vm1976_vm4, %v2866_v4, 0.0  ;;  %v9671_v21 = vsub.f32 %v9034_v29, %v9144_v23  ;;  %v13046_v39 = vld [vmem:[#allocation145_spill] sm:$0xff] }
 0x2ea   :  { %v9675_v26 = vsub.f32 %v9046_v52, %v9144_v23  ;;  %v9679_v20 = vsub.f32 %v9082_v5, %v9144_v23  ;;  %v2933_v3 = vadd.f32 %v2932_v9, %v2931_v46  ;;  %v2547_v54 = vadd.f32 %v9421_v7, %v2545_v17  ;;  %v13047_v46 = vld [vmem:[#allocation147_spill] sm:$0xff] }
 0x2eb   :  { %v2822_v22 = vsub.f32 %v13046_v39, %v9144_v23  ;;  %v2869_v53 = vmul.f32 %v2820_v56, %v2820_v56  ;;  %v2934_v4 = vsel %vm1976_vm4, %v2867_v58, 0.0  ;;  %v9687_v25 = vsub.f32 %v9094_v63, %v9144_v23 }
 0x2ec   :  { %v2673_v38 = vmul.f32 %v9557_v30, %v9557_v30  ;;  %v2746_v59 = vsel %vm1976_vm4, %v2672_v40, 0.0  ;;  %v2935_v5 = vadd.f32 %v2934_v4, %v2933_v3  ;;  %v2823_v7 = vsub.f32 %v13047_v46, %v9144_v23  ;;  %v13051_v46 = vld [vmem:[#allocation96_spill] sm:$0xff] }
 0x2ed   :  { %v2747_v52 = vadd.f32 %v2746_v59, %v2745_v11  ;;  %v2870_v17 = vmul.f32 %v2821_v13, %v2821_v13  ;;  %v2936_v9 = vsel %vm1976_vm4, %v2868_v16, 0.0  ;;  %v2674_v56 = vmul.f32 %v9565_v12, %v9565_v12  ;;  %v13048_v11 = vld [vmem:[#allocation149_spill] sm:$0xff] }
 0x2ee   :  { %v2675_v58 = vmul.f32 %v9573_v0, %v9573_v0  ;;  %v2676_v39 = vmul.f32 %v9577_v42, %v9577_v42  ;;  %v2937_v30 = vadd.f32 %v2936_v9, %v2935_v5  ;;  %v2549_v40 = vadd.f32 %v9424_v51, %v2547_v54  ;;  %v13049_v5 = vld [vmem:[#allocation151_spill] sm:$0xff] }
 0x2ef   :  { %v2824_v59 = vsub.f32 %v13048_v11, %v9144_v23  ;;  %v2871_v3 = vmul.f32 %v2822_v22, %v2822_v22  ;;  %v2938_v13 = vsel %vm1976_vm4, %v2869_v53, 0.0  ;;  %v2677_v16 = vmul.f32 %v9581_v10, %v9581_v10  ;;  %v13050_v11 = vld [vmem:[#allocation95_spill] sm:$0xff] }
 0x2f0   :  { %v9709_v12 = vmul.f32 %v9589_v43, %v9589_v43  ;;  %v2748_v0 = vsel %vm1976_vm4, %v2673_v38, 0.0  ;;  %v2939_v4 = vadd.f32 %v2938_v13, %v2937_v30  ;;  %v2825_v51 = vsub.f32 %v13049_v5, %v9144_v23  ;;  %v13052_v38 = vld [vmem:[#allocation153_spill] sm:$0xff] }
 0x2f1   :  { %v2749_v42 = vadd.f32 %v2748_v0, %v2747_v52  ;;  %v2872_v54 = vmul.f32 %v2823_v7, %v2823_v7  ;;  %v2940_v9 = vsel %vm1976_vm4, %v2870_v17, 0.0  ;;  %v2750_v22 = vsel %vm1976_vm4, %v2674_v56, 0.0  ;;  %v13053_v0 = vld [vmem:[#allocation99_spill] sm:$0xff] }
 0x2f2   :  { %v2941_v53 = vadd.f32 %v2940_v9, %v2939_v4  ;;  %v3001_v10 = vsub.f32 %v13050_v11, %v9144_v23  ;;  %v3002_v43 = vsub.f32 %v13051_v46, %v9144_v23  ;;  %v2551_v63 = vadd.f32 %v9429_v37, %v2549_v40  ;;  %v13054_v11 = vld [vmem:[#allocation155_spill] sm:$0xff] }
 0x2f3   :  { %v2826_v52 = vsub.f32 %v13052_v38, %v9144_v23  ;;  %v2873_v30 = vmul.f32 %v2824_v59, %v2824_v59  ;;  %v2942_v13 = vsel %vm1976_vm4, %v2871_v3, 0.0  ;;  %v2752_v7 = vsel %vm1976_vm4, %v2675_v58, 0.0  ;;  %v13055_v59 = vld [vmem:[#allocation105_spill] sm:$0xff] }
 0x2f4   :  { %v2754_v17 = vsel %vm1976_vm4, %v2676_v39, 0.0  ;;  %v2943_v56 = vadd.f32 %v2942_v13, %v2941_v53  ;;  %v3003_v4 = vsub.f32 %v13053_v0, %v9144_v23  ;;  %v2751_v9 = vadd.f32 %v2750_v22, %v2749_v42  ;;  %v13056_v39 = vld [vmem:[#allocation157_spill] sm:$0xff]  ;;  %v13057_v22 = vld [vmem:[#allocation159_spill] sm:$0xff] }
 0x2f5   :  { %v2827_v46 = vsub.f32 %v13054_v11, %v9144_v23  ;;  %v2874_v5 = vmul.f32 %v2825_v51, %v2825_v51  ;;  %v2944_v37 = vsel %vm1976_vm4, %v2872_v54, 0.0  ;;  %v3004_v38 = vsub.f32 %v13055_v59, %v9144_v23  ;;  %v13058_v54 = vld [vmem:[#allocation107_spill] sm:$0xff] }
 0x2f6   :  { %v2945_v40 = vadd.f32 %v2944_v37, %v2943_v56  ;;  %v3050_v3 = vmul.f32 %v3001_v10, %v3001_v10  ;;  %v3051_v29 = vmul.f32 %v3002_v43, %v3002_v43  ;;  %v2553_v58 = vadd.f32 %v9435_v36, %v2551_v63  ;;  %v13059_v63 = vld [vmem:[#allocation113_spill] sm:$0xff] }
 0x2f7   :  { %v2828_v53 = vsub.f32 %v13056_v39, %v9144_v23  ;;  %v2875_v13 = vmul.f32 %v2826_v52, %v2826_v52  ;;  %v2946_v42 = vsel %vm1976_vm4, %v2873_v30, 0.0  ;;  %v2829_v0 = vsub.f32 %v13057_v22, %v9144_v23  ;;  %v13060_v22 = vld [vmem:[#allocation161_spill] sm:$0xff] }
 0x2f8   :  { %v2947_v51 = vadd.f32 %v2946_v42, %v2945_v40  ;;  %v3005_v56 = vsub.f32 %v13058_v54, %v9144_v23  ;;  %v3052_v37 = vmul.f32 %v3003_v4, %v3003_v4  ;;  %v2753_v11 = vadd.f32 %v2752_v7, %v2751_v9 }
 0x2f9   :  { %v2876_v59 = vmul.f32 %v2827_v46, %v2827_v46  ;;  %v2948_v10 = vsel %vm1976_vm4, %v2874_v5, 0.0  ;;  %v3006_v36 = vsub.f32 %v13059_v63, %v9144_v23  ;;  %v3053_v39 = vmul.f32 %v3004_v38, %v3004_v38  ;;  %v13061_v46 = vld [vmem:[#allocation115_spill] sm:$0xff] }
 0x2fa   :  { %v2949_v43 = vadd.f32 %v2948_v10, %v2947_v51  ;;  %v3099_v52 = vsel %vm1976_vm4, %v3050_v3, 0.0  ;;  %v3100_v30 = vsel %vm1976_vm4, %v3051_v29, 0.0  ;;  %v2830_v40 = vsub.f32 %v13060_v22, %v9144_v23 }
 0x2fb   :  { %v2877_v42 = vmul.f32 %v2828_v53, %v2828_v53  ;;  %v2950_v54 = vsel %vm1976_vm4, %v2875_v13, 0.0  ;;  %v3101_v4 = vadd.f32 %v3100_v30, %v3099_v52  ;;  %v3007_v5 = vsub.f32 %v13061_v46, %v9144_v23  ;;  %v13064_v30 = vld [vmem:[#allocation163_spill] sm:$0xff] }
 0x2fc   :  { %v2951_v7 = vadd.f32 %v2950_v54, %v2949_v43  ;;  %v3054_v9 = vmul.f32 %v3005_v56, %v3005_v56  ;;  %v3102_v63 = vsel %vm1976_vm4, %v3052_v37, 0.0  ;;  %v2755_v51 = vadd.f32 %v2754_v17, %v2753_v11  ;;  %v13063_v11 = vld [vmem:[#allocation123_spill] sm:$0xff] }
 0x2fd   :  { %v2878_v38 = vmul.f32 %v2829_v0, %v2829_v0  ;;  %v2952_v3 = vsel %vm1976_vm4, %v2876_v59, 0.0  ;;  %v3103_v10 = vadd.f32 %v3102_v63, %v3101_v4  ;;  %v3008_v22 = vsub.f32 %v13062_v50, %v9144_v23 }
 0x2fe   :  { %v2953_v29 = vadd.f32 %v2952_v3, %v2951_v7  ;;  %v3055_v53 = vmul.f32 %v3006_v36, %v3006_v36  ;;  %v3104_v13 = vsel %vm1976_vm4, %v3053_v39, 0.0  ;;  %v2555_v54 = vadd.f32 %v9438_v19, %v2553_v58 }
 0x2ff   :  { %v2756_v43 = vsel %vm1976_vm4, %v2677_v16, 0.0  ;;  %v2954_v56 = vsel %vm1976_vm4, %v2877_v42, 0.0  ;;  %v3105_v52 = vadd.f32 %v3104_v13, %v3103_v10  ;;  %v3009_v17 = vsub.f32 %v13063_v11, %v9144_v23  ;;  %v13065_v16 = vld [vmem:[#allocation129_spill] sm:$0xff] }
 0x300   :  { %v2955_v37 = vadd.f32 %v2954_v56, %v2953_v29  ;;  %v3056_v0 = vmul.f32 %v3007_v5, %v3007_v5  ;;  %v3106_v59 = vsel %vm1976_vm4, %v3054_v9, 0.0  ;;  %v2757_v63 = vadd.f32 %v2756_v43, %v2755_v51 }
 0x301   :  { %v2831_v36 = vsub.f32 %v13064_v30, %v9144_v23  ;;  %v2879_v4 = vmul.f32 %v2830_v40, %v2830_v40  ;;  %v3107_v39 = vadd.f32 %v3106_v59, %v3105_v52  ;;  %v2956_v19 = vsel %vm1976_vm4, %v2878_v38, 0.0  ;;  %v13066_v40 = vld [vmem:[#allocation131_spill] sm:$0xff] }
 0x302   :  { %v3010_v58 = vsub.f32 %v13065_v16, %v9144_v23  ;;  %v3057_v42 = vmul.f32 %v3008_v22, %v3008_v22  ;;  %v3108_v7 = vsel %vm1976_vm4, %v3055_v53, 0.0  ;;  %v2679_v3 = vmul.f32 %v9597_v31, %v9597_v31  ;;  %v13067_v22 = vld [vmem:[#allocation165_spill] sm:$0xff] }
 0x303   :  { %v2758_v5 = vsel %vm1976_vm4, %v9709_v12, 0.0  ;;  %v2957_v9 = vadd.f32 %v2956_v19, %v2955_v37  ;;  %v3109_v51 = vadd.f32 %v3108_v7, %v3107_v39  ;;  %v2557_v10 = vadd.f32 %v9443_v1, %v2555_v54  ;;  %v13068_v12 = vld [vmem:[#allocation74_spill] sm:$0xff] }
 0x304   :  { %v3011_v29 = vsub.f32 %v13066_v40, %v9144_v23  ;;  %v3058_v38 = vmul.f32 %v3009_v17, %v3009_v17  ;;  %v3110_v13 = vsel %vm1976_vm4, %v3056_v0, 0.0  ;;  %v2759_v43 = vadd.f32 %v2758_v5, %v2757_v63 }
 0x305   :  { %v2832_v53 = vsub.f32 %v13067_v22, %v9144_v23  ;;  %v2880_v56 = vmul.f32 %v2831_v36, %v2831_v36  ;;  %v3111_v52 = vadd.f32 %v3110_v13, %v3109_v51  ;;  %v2958_v31 = vsel %vm1976_vm4, %v2879_v4, 0.0  ;;  %v13069_v36 = vld [vmem:[#allocation75_spill] sm:$0xff] }
 0x306   :  { %v3012_v37 = vsub.f32 %v13068_v12, %v9144_v23  ;;  %v3059_v59 = vmul.f32 %v3010_v58, %v3010_v58  ;;  %v3112_v1 = vsel %vm1976_vm4, %v3057_v42, 0.0  ;;  %v2680_v54 = vmul.f32 %v9601_v41, %v9601_v41  ;;  %v13070_v58 = vld [vmem:[#allocation167_spill] sm:$0xff] }
 0x307   :  { %v2760_v17 = vsel %vm1976_vm4, %v2679_v3, 0.0  ;;  %v2959_v0 = vadd.f32 %v2958_v31, %v2957_v9  ;;  %v3113_v63 = vadd.f32 %v3112_v1, %v3111_v52  ;;  %v2559_v39 = vadd.f32 %v9446_v32, %v2557_v10  ;;  %v13071_v3 = vld [vmem:[#allocation135_spill] sm:$0xff] }
 0x308   :  { %v3013_v19 = vsub.f32 %v13069_v36, %v9144_v23  ;;  %v3060_v7 = vmul.f32 %v3011_v29, %v3011_v29  ;;  %v3114_v4 = vsel %vm1976_vm4, %v3058_v38, 0.0  ;;  %v2761_v5 = vadd.f32 %v2760_v17, %v2759_v43 }
 0x309   :  { %v2833_v51 = vsub.f32 %v13070_v58, %v9144_v23  ;;  %v2881_v42 = vmul.f32 %v2832_v53, %v2832_v53  ;;  %v3115_v13 = vadd.f32 %v3114_v4, %v3113_v63  ;;  %v2960_v41 = vsel %vm1976_vm4, %v2880_v56, 0.0  ;;  %v13072_v53 = vld [vmem:[#allocation76_spill] sm:$0xff] }
 0x30a   :  { %v3014_v9 = vsub.f32 %v13071_v3, %v9144_v23  ;;  %v3061_v52 = vmul.f32 %v3012_v37, %v3012_v37  ;;  %v3116_v32 = vsel %vm1976_vm4, %v3059_v59, 0.0  ;;  %v2681_v10 = vmul.f32 %v9605_v62, %v9605_v62  ;;  %v13073_v37 = vld [vmem:[#allocation169_spill] sm:$0xff] }
 0x30b   :  { %v2762_v29 = vsel %vm1976_vm4, %v2680_v54, 0.0  ;;  %v2961_v38 = vadd.f32 %v2960_v41, %v2959_v0  ;;  %v3117_v43 = vadd.f32 %v3116_v32, %v3115_v13  ;;  %v2561_v31 = vadd.f32 %v9449_v8, %v2559_v39  ;;  %v13074_v54 = vld [vmem:[#allocation77_spill] sm:$0xff] }
 0x30c   :  { %v3015_v1 = vsub.f32 %v13072_v53, %v9144_v23  ;;  %v3062_v17 = vmul.f32 %v3013_v19, %v3013_v19  ;;  %v3118_v56 = vsel %vm1976_vm4, %v3060_v7, 0.0  ;;  %v2763_v63 = vadd.f32 %v2762_v29, %v2761_v5 }
 0x30d   :  { %v2834_v4 = vsub.f32 %v13073_v37, %v9144_v23  ;;  %v2882_v59 = vmul.f32 %v2833_v51, %v2833_v51  ;;  %v3119_v3 = vadd.f32 %v3118_v56, %v3117_v43  ;;  %v2962_v62 = vsel %vm1976_vm4, %v2881_v42, 0.0  ;;  %v13075_v51 = vld [vmem:[#allocation83_spill] sm:$0xff] }
 0x30e   :  { %v3016_v0 = vsub.f32 %v13074_v54, %v9144_v23  ;;  %v3063_v13 = vmul.f32 %v3014_v9, %v3014_v9  ;;  %v3120_v8 = vsel %vm1976_vm4, %v3061_v52, 0.0  ;;  %v2682_v39 = vmul.f32 %v9613_v61, %v9613_v61  ;;  %v13076_v9 = vld [vmem:[#allocation171_spill] sm:$0xff] }
 0x30f   :  { %v2764_v19 = vsel %vm1976_vm4, %v2681_v10, 0.0  ;;  %v2963_v7 = vadd.f32 %v2962_v62, %v2961_v38  ;;  %v3121_v5 = vadd.f32 %v3120_v8, %v3119_v3  ;;  %v2563_v41 = vadd.f32 %v9452_v60, %v2561_v31  ;;  %v13077_v10 = vld [vmem:[#allocation88_spill] sm:$0xff] }
 0x310   :  { %v3017_v32 = vsub.f32 %v13075_v51, %v9144_v23  ;;  %v3064_v29 = vmul.f32 %v3015_v1, %v3015_v1  ;;  %v3122_v42 = vsel %vm1976_vm4, %v3062_v17, 0.0  ;;  %v2765_v43 = vadd.f32 %v2764_v19, %v2763_v63 }
 0x311   :  { %v2835_v56 = vsub.f32 %v13076_v9, %v9144_v23  ;;  %v2883_v52 = vmul.f32 %v2834_v4, %v2834_v4  ;;  %v3123_v54 = vadd.f32 %v3122_v42, %v3121_v5  ;;  %v2964_v61 = vsel %vm1976_vm4, %v2882_v59, 0.0  ;;  %v13078_v4 = vld [vmem:[#allocation98_spill] sm:$0xff] }
 0x312   :  { %v3018_v38 = vsub.f32 %v13077_v10, %v9144_v23  ;;  %v3065_v3 = vmul.f32 %v3016_v0, %v3016_v0  ;;  %v3124_v60 = vsel %vm1976_vm4, %v3063_v13, 0.0  ;;  %v2683_v31 = vmul.f32 %v9621_v44, %v9621_v44  ;;  %v13079_v0 = vld [vmem:[#allocation173_spill] sm:$0xff] }
 0x313   :  { %v2766_v1 = vsel %vm1976_vm4, %v2682_v39, 0.0  ;;  %v2965_v17 = vadd.f32 %v2964_v61, %v2963_v7  ;;  %v3125_v63 = vadd.f32 %v3124_v60, %v3123_v54  ;;  %v2565_v62 = vadd.f32 %v9457_v35, %v2563_v41  ;;  %v13080_v39 = vld [vmem:[#allocation140_spill] sm:$0xff]  ;;  %v13081_v61 = vld [vmem:[#allocation175_spill] sm:$0xff] }
 0x314   :  { %v3019_v8 = vsub.f32 %v13078_v4, %v9144_v23  ;;  %v3066_v19 = vmul.f32 %v3017_v32, %v3017_v32  ;;  %v3126_v59 = vsel %vm1976_vm4, %v3064_v29, 0.0  ;;  %v2767_v5 = vadd.f32 %v2766_v1, %v2765_v43 }
 0x315   :  { %v2836_v42 = vsub.f32 %v13079_v0, %v9144_v23  ;;  %v2884_v13 = vmul.f32 %v2835_v56, %v2835_v56  ;;  %v3127_v10 = vadd.f32 %v3126_v59, %v3125_v63  ;;  %v2966_v44 = vsel %vm1976_vm4, %v2883_v52, 0.0  ;;  %v13082_v56 = vld [vmem:[#allocation142_spill] sm:$0xff] }
 0x316   :  { %v3020_v7 = vsub.f32 %v13080_v39, %v9144_v23  ;;  %v3067_v54 = vmul.f32 %v3018_v38, %v3018_v38  ;;  %v3128_v35 = vsel %vm1976_vm4, %v3065_v3, 0.0  ;;  %v2684_v41 = vmul.f32 %v9625_v33, %v9625_v33 }
 0x317   :  { %v2768_v32 = vsel %vm1976_vm4, %v2683_v31, 0.0  ;;  %v2967_v29 = vadd.f32 %v2966_v44, %v2965_v17  ;;  %v3129_v43 = vadd.f32 %v3128_v35, %v3127_v10  ;;  %v2837_v60 = vsub.f32 %v13081_v61, %v9144_v23  ;;  %v13083_v31 = vld [vmem:[#allocation144_spill] sm:$0xff] }
 0x318   :  { %v3021_v1 = vsub.f32 %v13082_v56, %v9144_v23  ;;  %v3068_v52 = vmul.f32 %v3019_v8, %v3019_v8  ;;  %v3130_v63 = vsel %vm1976_vm4, %v3066_v19, 0.0  ;;  %v2567_v38 = vadd.f32 %v9463_v27, %v2565_v62  ;;  %v13084_v27 = vld [vmem:[#allocation177_spill] sm:$0xff] }
 0x319   :  { %v2769_v59 = vadd.f32 %v2768_v32, %v2767_v5  ;;  %v2885_v3 = vmul.f32 %v2836_v42, %v2836_v42  ;;  %v3131_v39 = vadd.f32 %v3130_v63, %v3129_v43  ;;  %v2968_v33 = vsel %vm1976_vm4, %v2884_v13, 0.0  ;;  %v13085_v5 = vld [vmem:[#allocation146_spill] sm:$0xff] }
 0x31a   :  { %v3022_v17 = vsub.f32 %v13083_v31, %v9144_v23  ;;  %v3069_v10 = vmul.f32 %v3020_v7, %v3020_v7  ;;  %v3132_v44 = vsel %vm1976_vm4, %v3067_v54, 0.0  ;;  %v2685_v35 = vmul.f32 %v9629_v57, %v9629_v57 }
 0x31b   :  { %v2770_v8 = vsel %vm1976_vm4, %v2684_v41, 0.0  ;;  %v2969_v56 = vadd.f32 %v2968_v33, %v2967_v29  ;;  %v3133_v19 = vadd.f32 %v3132_v44, %v3131_v39  ;;  %v2838_v62 = vsub.f32 %v13084_v27, %v9144_v23  ;;  %v13086_v41 = vld [vmem:[#allocation148_spill] sm:$0xff] }
 0x31c   :  { %v3023_v42 = vsub.f32 %v13085_v5, %v9144_v23  ;;  %v3070_v13 = vmul.f32 %v3021_v1, %v3021_v1  ;;  %v3134_v32 = vsel %vm1976_vm4, %v3068_v52, 0.0  ;;  %v2569_v7 = vadd.f32 %v9469_v34, %v2567_v38  ;;  %v13087_v34 = vld [vmem:[#allocation179_spill] sm:$0xff] }
 0x31d   :  { %v2771_v43 = vadd.f32 %v2770_v8, %v2769_v59  ;;  %v2886_v54 = vmul.f32 %v2837_v60, %v2837_v60  ;;  %v3135_v63 = vadd.f32 %v3134_v32, %v3133_v19  ;;  %v2970_v57 = vsel %vm1976_vm4, %v2885_v3, 0.0  ;;  %v13088_v60 = vld [vmem:[#allocation150_spill] sm:$0xff] }
 0x31e   :  { %v3024_v29 = vsub.f32 %v13086_v41, %v9144_v23  ;;  %v3071_v39 = vmul.f32 %v3022_v17, %v3022_v17  ;;  %v3136_v33 = vsel %vm1976_vm4, %v3069_v10, 0.0  ;;  %v2686_v44 = vmul.f32 %v9637_v48, %v9637_v48 }
 0x31f   :  { %v2772_v1 = vsel %vm1976_vm4, %v2685_v35, 0.0  ;;  %v2971_v5 = vadd.f32 %v2970_v57, %v2969_v56  ;;  %v3137_v52 = vadd.f32 %v3136_v33, %v3135_v63  ;;  %v2839_v38 = vsub.f32 %v13087_v34, %v9144_v23  ;;  %v13089_v35 = vld [vmem:[#allocation152_spill] sm:$0xff] }
 0x320   :  { %v3025_v59 = vsub.f32 %v13088_v60, %v9144_v23  ;;  %v3072_v3 = vmul.f32 %v3023_v42, %v3023_v42  ;;  %v3138_v8 = vsel %vm1976_vm4, %v3070_v13, 0.0  ;;  %v2571_v17 = vadd.f32 %v9473_v45, %v2569_v7  ;;  %v13090_v45 = vld [vmem:[#allocation181_spill] sm:$0xff] }
 0x321   :  { %v2773_v19 = vadd.f32 %v2772_v1, %v2771_v43  ;;  %v2887_v10 = vmul.f32 %v2838_v62, %v2838_v62  ;;  %v3139_v32 = vadd.f32 %v3138_v8, %v3137_v52  ;;  %v2972_v48 = vsel %vm1976_vm4, %v2886_v54, 0.0  ;;  %v13091_v62 = vld [vmem:[#allocation154_spill] sm:$0xff] }
 0x322   :  { %v3026_v56 = vsub.f32 %v13089_v35, %v9144_v23  ;;  %v3073_v63 = vmul.f32 %v3024_v29, %v3024_v29  ;;  %v3140_v57 = vsel %vm1976_vm4, %v3071_v39, 0.0  ;;  %v2687_v33 = vmul.f32 %v9645_v49, %v9645_v49 }
 0x323   :  { %v2774_v42 = vsel %vm1976_vm4, %v2686_v44, 0.0  ;;  %v2973_v60 = vadd.f32 %v2972_v48, %v2971_v5  ;;  %v3141_v13 = vadd.f32 %v3140_v57, %v3139_v32  ;;  %v2840_v7 = vsub.f32 %v13090_v45, %v9144_v23  ;;  %v13092_v44 = vld [vmem:[#allocation156_spill] sm:$0xff] }
 0x324   :  { %v3027_v43 = vsub.f32 %v13091_v62, %v9144_v23  ;;  %v3074_v54 = vmul.f32 %v3025_v59, %v3025_v59  ;;  %v3142_v1 = vsel %vm1976_vm4, %v3072_v3, 0.0  ;;  %v2573_v29 = vadd.f32 %v9476_v2, %v2571_v17  ;;  %v13093_v2 = vld [vmem:[#allocation183_spill] sm:$0xff] }
 0x325   :  { %v2775_v52 = vadd.f32 %v2774_v42, %v2773_v19  ;;  %v2888_v39 = vmul.f32 %v2839_v38, %v2839_v38  ;;  %v3143_v8 = vadd.f32 %v3142_v1, %v3141_v13  ;;  %v2974_v49 = vsel %vm1976_vm4, %v2887_v10, 0.0  ;;  %v13094_v38 = vld [vmem:[#allocation158_spill] sm:$0xff] }
 0x326   :  { %v3028_v5 = vsub.f32 %v13092_v44, %v9144_v23  ;;  %v3075_v32 = vmul.f32 %v3026_v56, %v3026_v56  ;;  %v3144_v48 = vsel %vm1976_vm4, %v3073_v63, 0.0  ;;  %v2688_v57 = vmul.f32 %v9649_v18, %v9649_v18 }
 0x327   :  { %v2776_v59 = vsel %vm1976_vm4, %v2687_v33, 0.0  ;;  %v2975_v62 = vadd.f32 %v2974_v49, %v2973_v60  ;;  %v3145_v3 = vadd.f32 %v3144_v48, %v3143_v8  ;;  %v2841_v17 = vsub.f32 %v13093_v2, %v9144_v23  ;;  %v13095_v33 = vld [vmem:[#allocation160_spill] sm:$0xff] }
 0x328   :  { %v3029_v19 = vsub.f32 %v13094_v38, %v9144_v23  ;;  %v3076_v10 = vmul.f32 %v3027_v43, %v3027_v43  ;;  %v3146_v42 = vsel %vm1976_vm4, %v3074_v54, 0.0  ;;  %v2575_v56 = vadd.f32 %v9490_v47, %v2573_v29 }
 0x329   :  { %v2777_v13 = vadd.f32 %v2776_v59, %v2775_v52  ;;  %v2889_v63 = vmul.f32 %v2840_v7, %v2840_v7  ;;  %v3147_v1 = vadd.f32 %v3146_v42, %v3145_v3  ;;  %v2976_v18 = vsel %vm1976_vm4, %v2888_v39, 0.0  ;;  %v13096_v7 = vld [vmem:[#allocation162_spill] sm:$0xff] }
 0x32a   :  { %v3030_v60 = vsub.f32 %v13095_v33, %v9144_v23  ;;  %v3077_v8 = vmul.f32 %v3028_v5, %v3028_v5  ;;  %v3148_v49 = vsel %vm1976_vm4, %v3075_v32, 0.0  ;;  %v2689_v48 = vmul.f32 %v9653_v14, %v9653_v14 }
 0x32b   :  { %v2778_v43 = vsel %vm1976_vm4, %v2688_v57, 0.0  ;;  %v2977_v38 = vadd.f32 %v2976_v18, %v2975_v62  ;;  %v3149_v54 = vadd.f32 %v3148_v49, %v3147_v1  ;;  %v2842_v47 = vsub.f32 %v9006_v15, %v9144_v23  ;;  %v13097_v57 = vld [vmem:[#allocation164_spill] sm:$0xff] }
 0x32c   :  { %v3031_v29 = vsub.f32 %v13096_v7, %v9144_v23  ;;  %v3078_v52 = vmul.f32 %v3029_v19, %v3029_v19  ;;  %v3150_v39 = vsel %vm1976_vm4, %v3076_v10, 0.0  ;;  %v2577_v5 = vadd.f32 %v9494_v55, %v2575_v56  ;;  %v13098_v55 = vld [vmem:[#allocation187_spill] sm:$0xff] }
 0x32d   :  { %v2779_v59 = vadd.f32 %v2778_v43, %v2777_v13  ;;  %v2890_v32 = vmul.f32 %v2841_v17, %v2841_v17  ;;  %v3151_v3 = vadd.f32 %v3150_v39, %v3149_v54  ;;  %v2978_v14 = vsel %vm1976_vm4, %v2889_v63, 0.0  ;;  %v13099_v17 = vld [vmem:[#allocation166_spill] sm:$0xff] }
 0x32e   :  { %v3032_v62 = vsub.f32 %v13097_v57, %v9144_v23  ;;  %v3079_v42 = vmul.f32 %v3030_v60, %v3030_v60  ;;  %v3152_v1 = vsel %vm1976_vm4, %v3077_v8, 0.0  ;;  %v2690_v18 = vmul.f32 %v9661_v24, %v9661_v24 }
 0x32f   :  { %v2780_v19 = vsel %vm1976_vm4, %v2689_v48, 0.0  ;;  %v2979_v49 = vadd.f32 %v2978_v14, %v2977_v38  ;;  %v3153_v10 = vadd.f32 %v3152_v1, %v3151_v3  ;;  %v2843_v56 = vsub.f32 %v13098_v55, %v9144_v23  ;;  %v13100_v48 = vld [vmem:[#allocation168_spill] sm:$0xff] }
 0x330   :  { %v3033_v13 = vsub.f32 %v13099_v17, %v9144_v23  ;;  %v3080_v63 = vmul.f32 %v3031_v29, %v3031_v29  ;;  %v3154_v43 = vsel %vm1976_vm4, %v3078_v52, 0.0  ;;  %v2579_v60 = vadd.f32 %v9498_v6, %v2577_v5  ;;  %v13101_v6 = vld [vmem:[#allocation189_spill] sm:$0xff] }
 0x331   :  { %v2781_v54 = vadd.f32 %v2780_v19, %v2779_v59  ;;  %v2891_v8 = vmul.f32 %v2842_v47, %v2842_v47  ;;  %v3155_v39 = vadd.f32 %v3154_v43, %v3153_v10  ;;  %v2980_v24 = vsel %vm1976_vm4, %v2890_v32, 0.0  ;;  %v13102_v47 = vld [vmem:[#allocation170_spill] sm:$0xff] }
 0x332   :  { %v3034_v38 = vsub.f32 %v13100_v48, %v9144_v23  ;;  %v3081_v3 = vmul.f32 %v3032_v62, %v3032_v62  ;;  %v3156_v14 = vsel %vm1976_vm4, %v3079_v42, 0.0  ;;  %v2691_v1 = vmul.f32 %v9671_v21, %v9671_v21 }
 0x333   :  { %v2782_v29 = vsel %vm1976_vm4, %v2690_v18, 0.0  ;;  %v2981_v17 = vadd.f32 %v2980_v24, %v2979_v49  ;;  %v3157_v52 = vadd.f32 %v3156_v14, %v3155_v39  ;;  %v2844_v5 = vsub.f32 %v13101_v6, %v9144_v23  ;;  %v13103_v18 = vld [vmem:[#allocation172_spill] sm:$0xff] }
 0x334   :  { %v3035_v59 = vsub.f32 %v13102_v47, %v9144_v23  ;;  %v3082_v32 = vmul.f32 %v3033_v13, %v3033_v13  ;;  %v3158_v19 = vsel %vm1976_vm4, %v3080_v63, 0.0  ;;  %v2581_v62 = vadd.f32 %v9511_v28, %v2579_v60  ;;  %v13104_v28 = vld [vmem:[#allocation191_spill] sm:$0xff] }
 0x335   :  { %v2783_v10 = vadd.f32 %v2782_v29, %v2781_v54  ;;  %v2892_v42 = vmul.f32 %v2843_v56, %v2843_v56  ;;  %v3159_v43 = vadd.f32 %v3158_v19, %v3157_v52  ;;  %v2982_v21 = vsel %vm1976_vm4, %v2891_v8, 0.0  ;;  %v13105_v56 = vld [vmem:[#allocation174_spill] sm:$0xff]  ;;  %v13106_v52 = vld [vmem:[#allocation199_spill] sm:$0xff] }
 0x336   :  { %v3036_v49 = vsub.f32 %v13103_v18, %v9144_v23  ;;  %v3083_v39 = vmul.f32 %v3034_v38, %v3034_v38  ;;  %v3160_v24 = vsel %vm1976_vm4, %v3081_v3, 0.0  ;;  %v2692_v14 = vmul.f32 %v9675_v26, %v9675_v26 }
 0x337   :  { %v2784_v13 = vsel %vm1976_vm4, %v2691_v1, 0.0  ;;  %v2983_v47 = vadd.f32 %v2982_v21, %v2981_v17  ;;  %v3161_v63 = vadd.f32 %v3160_v24, %v3159_v43  ;;  %v2845_v60 = vsub.f32 %v13104_v28, %v9144_v23  ;;  %v13107_v1 = vld [vmem:[#allocation176_spill] sm:$0xff] }
 0x338   :  { %v3037_v54 = vsub.f32 %v13105_v56, %v9144_v23  ;;  %v3084_v8 = vmul.f32 %v3035_v59, %v3035_v59  ;;  %v3162_v29 = vsel %vm1976_vm4, %v3082_v32, 0.0  ;;  %v2583_v38 = vadd.f32 %v13106_v52, %v2581_v62  ;;  %v13108_v62 = vld [vmem:[#allocation193_spill] sm:$0xff] }
 0x339   :  { %v2785_v19 = vadd.f32 %v2784_v13, %v2783_v10  ;;  %v2893_v3 = vmul.f32 %v2844_v5, %v2844_v5  ;;  %v3163_v18 = vadd.f32 %v3162_v29, %v3161_v63  ;;  %v2984_v26 = vsel %vm1976_vm4, %v2892_v42, 0.0  ;;  %v13109_v5 = vld [vmem:[#allocation178_spill] sm:$0xff]  ;;  %v13110_v29 = vld [vmem:[#allocation200_spill] sm:$0xff] }
 0x33a   :  { %v3038_v17 = vsub.f32 %v13107_v1, %v9144_v23  ;;  %v3085_v43 = vmul.f32 %v3036_v49, %v3036_v49  ;;  %v3164_v21 = vsel %vm1976_vm4, %v3083_v39, 0.0  ;;  %v2693_v24 = vmul.f32 %v9679_v20, %v9679_v20 }
 0x33b   :  { %v2786_v59 = vsel %vm1976_vm4, %v2692_v14, 0.0  ;;  %v2985_v56 = vadd.f32 %v2984_v26, %v2983_v47  ;;  %v3165_v32 = vadd.f32 %v3164_v21, %v3163_v18  ;;  %v2846_v10 = vsub.f32 %v13108_v62, %v9144_v23  ;;  %v13111_v14 = vld [vmem:[#allocation180_spill] sm:$0xff] }
 0x33c   :  { %v3039_v13 = vsub.f32 %v13109_v5, %v9144_v23  ;;  %v3086_v42 = vmul.f32 %v3037_v54, %v3037_v54  ;;  %v3166_v63 = vsel %vm1976_vm4, %v3084_v8, 0.0  ;;  %v2585_v49 = vadd.f32 %v13110_v29, %v2583_v38  ;;  %v13112_v38 = vld [vmem:[#allocation195_spill] sm:$0xff] }
 0x33d   :  { %v2787_v52 = vadd.f32 %v2786_v59, %v2785_v19  ;;  %v2894_v39 = vmul.f32 %v2845_v60, %v2845_v60  ;;  %v3167_v1 = vadd.f32 %v3166_v63, %v3165_v32  ;;  %v2986_v20 = vsel %vm1976_vm4, %v2893_v3, 0.0  ;;  %v13113_v60 = vld [vmem:[#allocation182_spill] sm:$0xff]  ;;  %v13114_v63 = vld [vmem:[#allocation201_spill] sm:$0xff] }
 0x33e   :  { %v3040_v47 = vsub.f32 %v13111_v14, %v9144_v23  ;;  %v3087_v18 = vmul.f32 %v3038_v17, %v3038_v17  ;;  %v3168_v26 = vsel %vm1976_vm4, %v3085_v43, 0.0  ;;  %v2694_v21 = vmul.f32 %v9687_v25, %v9687_v25 }
 0x33f   :  { %v2788_v54 = vsel %vm1976_vm4, %v2693_v24, 0.0  ;;  %v2987_v5 = vadd.f32 %v2986_v20, %v2985_v56  ;;  %v3169_v8 = vadd.f32 %v3168_v26, %v3167_v1  ;;  %v2847_v19 = vsub.f32 %v13112_v38, %v9144_v23  ;;  %v13115_v24 = vld [vmem:[#allocation184_spill] sm:$0xff]  ;;  %v13116_v26 = vld [vmem:[#allocation198_spill] sm:$0xff] }
 0x340   :  { %v3041_v59 = vsub.f32 %v13113_v60, %v9144_v23  ;;  %v3088_v3 = vmul.f32 %v3039_v13, %v3039_v13  ;;  %v3170_v32 = vsel %vm1976_vm4, %v3086_v42, 0.0  ;;  %v2587_v17 = vadd.f32 %v13114_v63, %v2585_v49  ;;  %v13117_v49 = vld [vmem:[#allocation186_spill] sm:$0xff] }
 0x341   :  { %v2789_v29 = vadd.f32 %v2788_v54, %v2787_v52  ;;  %v2895_v43 = vmul.f32 %v2846_v10, %v2846_v10  ;;  %v3171_v14 = vadd.f32 %v3170_v32, %v3169_v8  ;;  %v2988_v25 = vsel %vm1976_vm4, %v2894_v39, 0.0 }
 0x342   :  { %v3042_v56 = vsub.f32 %v13115_v24, %v9144_v23  ;;  %v3089_v1 = vmul.f32 %v3040_v47, %v3040_v47  ;;  %v3172_v20 = vsel %vm1976_vm4, %v3087_v18, 0.0  ;;  %v2588_v48 = vsel %vm1976_vm4, %v13116_v26, 0.0  ;;  %v13118_v18 = vld [vmem:[#allocation188_spill] sm:$0xff] }
 0x343   :  { %v2989_v60 = vadd.f32 %v2988_v25, %v2987_v5  ;;  %v3173_v13 = vadd.f32 %v3172_v20, %v3171_v14  ;;  %v2790_v42 = vsel %vm1976_vm4, %v2694_v21, 0.0  ;;  %v3043_v52 = vsub.f32 %v13117_v49, %v9144_v23  ;;  %v13119_v25 = vld [vmem:[#allocation190_spill] sm:$0xff] }
 0x344   :  { %v3090_v10 = vmul.f32 %v3041_v59, %v3041_v59  ;;  %v3174_v54 = vsel %vm1976_vm4, %v3088_v3, 0.0  ;;  %v2589_v39 = vadd.f32 %v2588_v48, %v2587_v17  ;;  %v2791_v8 = vadd.f32 %v2790_v42, %v2789_v29 }
 0x345   :  { %v2896_v32 = vmul.f32 %v2847_v19, %v2847_v19  ;;  %v3175_v63 = vadd.f32 %v3174_v54, %v3173_v13  ;;  %v2990_v47 = vsel %vm1976_vm4, %v2895_v43, 0.0  ;;  %v3044_v24 = vsub.f32 %v13118_v18, %v9144_v23  ;;  %v13120_v43 = vld [vmem:[#allocation192_spill] sm:$0xff]  ;;  %v13121_v54 = vld [vmem:[#allocation194_spill] sm:$0xff] }
 0x346   :  { %v3091_v26 = vmul.f32 %v3042_v56, %v3042_v56  ;;  %v3176_v5 = vsel %vm1976_vm4, %v3089_v1, 0.0  ;;  %v2991_v14 = vadd.f32 %v2990_v47, %v2989_v60  ;;  %v3045_v20 = vsub.f32 %v13119_v25, %v9144_v23 }
 0x347   :  { %v3177_v21 = vadd.f32 %v3176_v5, %v3175_v63  ;;  %v3092_v59 = vmul.f32 %v3043_v52, %v3043_v52  ;;  %v3178_v3 = vsel %vm1976_vm4, %v3090_v10, 0.0  ;;  %v2590_v48 = vrot.slane %v2589_v39, 4 }
 0x348   :  { %v2792_v17 = vrot.slane %v2791_v8, 4  ;;  %v2992_v29 = vsel %vm1976_vm4, %v2896_v32, 0.0  ;;  %v3046_v13 = vsub.f32 %v13120_v43, %v9144_v23  ;;  %v3093_v42 = vmul.f32 %v3044_v24, %v3044_v24 }
 0x349   :  { %v3179_v19 = vadd.f32 %v3178_v3, %v3177_v21  ;;  %v3180_v56 = vsel %vm1976_vm4, %v3091_v26, 0.0  ;;  %v2993_v1 = vadd.f32 %v2992_v29, %v2991_v14  ;;  %v3047_v63 = vsub.f32 %v13121_v54, %v9144_v23  ;;  %v13122_v21 = vld [vmem:[#allocation196_spill] sm:$0xff]  ;;  %v13123_v26 = vld [vmem:[#allocation197_spill] sm:$0xff] }
 0x34a   :  { %v3094_v47 = vmul.f32 %v3045_v20, %v3045_v20  ;;  %v3182_v52 = vsel %vm1976_vm4, %v3092_v59, 0.0  ;;  %v2591_v10 = vadd.f32 %v2590_v48, %v2589_v39  ;;  %v2793_v5 = vadd.f32 %v2792_v17, %v2791_v8 }
 0x34b   :  { %v3181_v60 = vadd.f32 %v3180_v56, %v3179_v19  ;;  %v3048_v32 = vsub.f32 %v13122_v21, %v9144_v23  ;;  %v3095_v3 = vmul.f32 %v3046_v13, %v3046_v13  ;;  %v3184_v43 = vsel %vm1976_vm4, %v3093_v42, 0.0 }
 0x34c   :  { %v2994_v24 = vrot.slane %v2993_v1, 4  ;;  %v3049_v14 = vsub.f32 %v13123_v26, %v9144_v23  ;;  %v3096_v19 = vmul.f32 %v3047_v63, %v3047_v63  ;;  %v3186_v29 = vsel %vm1976_vm4, %v3094_v47, 0.0 }
 0x34d   :  { %v3183_v25 = vadd.f32 %v3182_v52, %v3181_v60  ;;  %v2592_v20 = vrot.slane %v2591_v10, 2  ;;  %v2794_v56 = vrot.slane %v2793_v5, 2  ;;  %v3097_v39 = vmul.f32 %v3048_v32, %v3048_v32 }
 0x34e   :  { %v3188_v8 = vsel %vm1976_vm4, %v3095_v3, 0.0  ;;  %v2995_v48 = vadd.f32 %v2994_v24, %v2993_v1  ;;  %v3098_v60 = vmul.f32 %v3049_v14, %v3049_v14  ;;  %v3190_v13 = vsel %vm1976_vm4, %v3096_v19, 0.0 }
 0x34f   :  { %v3185_v18 = vadd.f32 %v3184_v43, %v3183_v25  ;;  %v2593_v42 = vadd.f32 %v2592_v20, %v2591_v10  ;;  %v2795_v52 = vadd.f32 %v2794_v56, %v2793_v5  ;;  %v3192_v43 = vsel %vm1976_vm4, %v3097_v39, 0.0 }
 0x350   :  { %v2996_v26 = vrot.slane %v2995_v48, 2  ;;  %v3194_v47 = vsel %vm1976_vm4, %v3098_v60, 0.0 }
 0x351   :  { %v3187_v59 = vadd.f32 %v3186_v29, %v3185_v18  ;;  %v2594_v21 = vrot.slane %v2593_v42, 1  ;;  %v2796_v54 = vrot.slane %v2795_v52, 1 }
 0x352   :  { %v2997_v32 = vadd.f32 %v2996_v26, %v2995_v48  ;;  %v3204_v26 = vld [vmem:[%s12236_s6] sm:$0x1] }
 0x353   :  { %v3189_v17 = vadd.f32 %v3188_v8, %v3187_v59  ;;  %v2595_v3 = vadd.f32 %v2594_v21, %v2593_v42  ;;  %v2797_v1 = vadd.f32 %v2796_v54, %v2795_v52  ;;  %v3212_v21 = vlaneseq  ;;  %v3208_v52 = vld [vmem:[%s12237_s7] sm:$0x1] }
 0x354   :  { %v2998_v14 = vrot.slane %v2997_v32, 1 }
 0x355   :  { %v3191_v25 = vadd.f32 %v3190_v13, %v3189_v17  ;;  %v2798_v19 = vadd.f32 %v2797_v1, %v2595_v3  ;;  %v3213_v48 = vshrl.u32 %v3212_v21, 7  ;;  %v13126_v1 = vld [vmem:[#allocation84_spill] sm:$0xff] }
 0x356   :  { %v2999_v5 = vadd.f32 %v2998_v14, %v2997_v32 }
 0x357   :  { %v3193_v63 = vadd.f32 %v3192_v43, %v3191_v25  ;;  %v3214_v25 = vsub.s32 0, %v3213_v48 }
 0x358   :  { %v3000_v56 = vadd.f32 %v2999_v5, %v2798_v19 }
 0x359   :  { %v3195_v18 = vadd.f32 %v3194_v47, %v3193_v63 }
 0x35b   :  { %v3196_v29 = vrot.slane %v3195_v18, 4 }
 0x35d   :  { %v3197_v24 = vadd.f32 %v3196_v29, %v3195_v18  ;;  %v13124_v18 = vld [vmem:[#allocation79_spill] sm:$0xff]  ;;  %v13125_v29 = vld [vmem:[#allocation78_spill] sm:$0xff] }
 0x35f   :  { %v3198_v59 = vrot.slane %v3197_v24, 2 }
 0x361   :  { %v3199_v10 = vadd.f32 %v3198_v59, %v3197_v24  ;;  %v13128_v59 = vld [vmem:[#allocation93_spill] sm:$0xff] }
 0x363   :  { %v3200_v20 = vrot.slane %v3199_v10, 1 }
 0x365   :  { %v3201_v39 = vadd.f32 %v3200_v20, %v3199_v10 }
 0x367   :  { %v3202_v8 = vadd.f32 %v3201_v39, %v3000_v56  ;;  %v13129_v56 = vld [vmem:[#allocation101_spill] sm:$0xff] }
 0x369   :  { %v3203_v17 = vmul.f32 0.0006377551, %v3202_v8 }
 0x36b   :  { %v3205_v13 = vadd.f32 1e-05, %v3203_v17  ;;  %v13130_v17 = vld [vmem:[#allocation103_spill] sm:$0xff] }
 0x36d   :  { %6117 = vrsqrt.f32 %v3205_v13 }
 0x377   :  { %v6118_v60 = vpop.eup %6117 }
 0x378   :  { %v3207_v54 = vmul.f32 %v6118_v60, %v3204_v26  ;;  %v13131_v26 = vld [vmem:[#allocation109_spill] sm:$0xff] }
 0x37a   :  { %v3209_v42 = vmul.f32 %v3207_v54, %v9144_v23  ;;  %v10014_v63 = vrot.slane %v3207_v54, %v3214_v25  ;;  %v13127_v23 = vld [vmem:[#allocation91_spill] sm:$0xff] }
 0x37b   :  { %v13132_v54 = vld [vmem:[#allocation111_spill] sm:$0xff] }
 0x37c   :  { %v3210_v43 = vsub.f32 %v3208_v52, %v3209_v42  ;;  %v3217_v32 = vmul.f32 %v10014_v63, %v13124_v18  ;;  %v3218_v3 = vmul.f32 %v10014_v63, %v13125_v29  ;;  %v3219_v24 = vmul.f32 %v10014_v63, %v13126_v1 }
 0x37d   :  { %v3220_v14 = vmul.f32 %v10014_v63, %v13127_v23  ;;  %v3221_v19 = vmul.f32 %v10014_v63, %v13128_v59  ;;  %v3222_v39 = vmul.f32 %v10014_v63, %v13129_v56  ;;  %v3223_v13 = vmul.f32 %v10014_v63, %v13130_v17 }
 0x37e   :  { %v10016_v47 = vrot.slane %v3210_v43, %v3214_v25  ;;  %v3224_v21 = vmul.f32 %v10014_v63, %v13131_v26  ;;  %v3225_v48 = vmul.f32 %v10014_v63, %v13132_v54  ;;  %v13138_v54 = vld [vmem:[#allocation4_spill] sm:$0xff] }
 0x380   :  { %v3272_v10 = vadd.f32 %v10016_v47, %v3217_v32  ;;  %v3273_v5 = vadd.f32 %v10016_v47, %v3218_v3  ;;  %v3274_v20 = vadd.f32 %v10016_v47, %v3219_v24  ;;  %v3275_v8 = vadd.f32 %v10016_v47, %v3220_v14  ;;  %v13133_v32 = vld [vmem:[#allocation117_spill] sm:$0xff]  ;;  %v13134_v24 = vld [vmem:[#allocation119_spill] sm:$0xff] }
 0x381   :  { %v3276_v60 = vadd.f32 %v10016_v47, %v3221_v19  ;;  %v3277_v42 = vadd.f32 %v10016_v47, %v3222_v39  ;;  %v3278_v52 = vadd.f32 %v10016_v47, %v3223_v13  ;;  %v3226_v29 = vmul.f32 %v10014_v63, %v13133_v32  ;;  %v13135_v19 = vld [vmem:[#allocation125_spill] sm:$0xff]  ;;  %v13137_v13 = vld [vmem:[#allocation2_spill] sm:$0xff] }
 0x382   :  { %v5292_v25 = vmul.f32 -1.442695, %v3272_v10  ;;  %v5293_v43 = vmul.f32 -1.442695, %v3273_v5  ;;  %v5294_v18 = vmul.f32 -1.442695, %v3274_v20  ;;  %v3279_v3 = vadd.f32 %v10016_v47, %v3224_v21 }
 0x383   :  { %v5295_v1 = vmul.f32 -1.442695, %v3275_v8  ;;  %v3227_v23 = vmul.f32 %v10014_v63, %v13134_v24  ;;  %v3280_v14 = vadd.f32 %v10016_v47, %v3225_v48  ;;  %v5296_v59 = vmul.f32 -1.442695, %v3276_v60  ;;  %v13136_v20 = vld [vmem:[#allocation127_spill] sm:$0xff] }
 0x384   :  { %6119 = vpow2.f32 %v5292_v25  ;;  %v3228_v56 = vmul.f32 %v10014_v63, %v13135_v19  ;;  %v3281_v10 = vadd.f32 %v10016_v47, %v3226_v29  ;;  %v5297_v5 = vmul.f32 -1.442695, %v3277_v42  ;;  %v13140_v29 = vld [vmem:[#allocation8_spill] sm:$0xff] }
 0x385   :  { %6121 = vpow2.f32 %v5293_v43  ;;  %v3229_v39 = vmul.f32 %v10014_v63, %v13136_v20  ;;  %v3282_v17 = vadd.f32 %v10016_v47, %v3227_v23  ;;  %v5298_v8 = vmul.f32 -1.442695, %v3278_v52  ;;  %v13139_v43 = vld [vmem:[#allocation6_spill] sm:$0xff] }
 0x386   :  { %6123 = vpow2.f32 %v5294_v18  ;;  %v3230_v26 = vmul.f32 %v10014_v63, %v13137_v13  ;;  %v3283_v21 = vadd.f32 %v10016_v47, %v3228_v56  ;;  %v5299_v60 = vmul.f32 -1.442695, %v3279_v3  ;;  %v13141_v23 = vld [vmem:[#allocation10_spill] sm:$0xff]  ;;  %v13142_v56 = vld [vmem:[#allocation12_spill] sm:$0xff] }
 0x387   :  { %6125 = vpow2.f32 %v5295_v1  ;;  %v3231_v48 = vmul.f32 %v10014_v63, %v13138_v54  ;;  %v3284_v25 = vadd.f32 %v10016_v47, %v3229_v39  ;;  %v5300_v42 = vmul.f32 -1.442695, %v3280_v14  ;;  %v13143_v39 = vld [vmem:[#allocation14_spill] sm:$0xff]  ;;  %v13144_v54 = vld [vmem:[#allocation16_spill] sm:$0xff] }
 0x388   :  { %6127 = vpow2.f32 %v5296_v59  ;;  %v3232_v32 = vmul.f32 %v10014_v63, %v13139_v43  ;;  %v3285_v18 = vadd.f32 %v10016_v47, %v3230_v26  ;;  %v5301_v52 = vmul.f32 -1.442695, %v3281_v10 }
 0x389   :  { %6129 = vpow2.f32 %v5297_v5  ;;  %v3233_v24 = vmul.f32 %v10014_v63, %v13140_v29  ;;  %v3286_v1 = vadd.f32 %v10016_v47, %v3231_v48  ;;  %v5302_v3 = vmul.f32 -1.442695, %v3282_v17 }
 0x38a   :  { %6131 = vpow2.f32 %v5298_v8  ;;  %v3234_v19 = vmul.f32 %v10014_v63, %v13141_v23  ;;  %v3287_v59 = vadd.f32 %v10016_v47, %v3232_v32  ;;  %v5303_v14 = vmul.f32 -1.442695, %v3283_v21 }
 0x38b   :  { %6133 = vpow2.f32 %v5299_v60  ;;  %v3235_v20 = vmul.f32 %v10014_v63, %v13142_v56  ;;  %v3288_v5 = vadd.f32 %v10016_v47, %v3233_v24  ;;  %v5304_v10 = vmul.f32 -1.442695, %v3284_v25 }
 0x38c   :  { %6135 = vpow2.f32 %v5300_v42  ;;  %v3236_v13 = vmul.f32 %v10014_v63, %v13143_v39  ;;  %v3289_v8 = vadd.f32 %v10016_v47, %v3234_v19  ;;  %v5305_v17 = vmul.f32 -1.442695, %v3285_v18  ;;  %v13145_v42 = vld [vmem:[#allocation18_spill] sm:$0xff]  ;;  %v13146_v18 = vld [vmem:[#allocation20_spill] sm:$0xff] }
 0x38d   :  { %6137 = vpow2.f32 %v5301_v52  ;;  %v3237_v60 = vmul.f32 %v10014_v63, %v13144_v54  ;;  %v3290_v21 = vadd.f32 %v10016_v47, %v3235_v20  ;;  %v5306_v48 = vmul.f32 -1.442695, %v3286_v1  ;;  %v13147_v1 = vld [vmem:[#allocation22_spill] sm:$0xff] }
 0x38e   :  { %v10076_v26 = vpop.eup %6119  ;;  %6139 = vpow2.f32 %v5302_v3  ;;  %v3238_v25 = vmul.f32 %v10014_v63, %v13145_v42  ;;  %v3291_v32 = vadd.f32 %v10016_v47, %v3236_v13  ;;  %v5307_v29 = vmul.f32 -1.442695, %v3287_v59  ;;  %v13148_v59 = vld [vmem:[#allocation24_spill] sm:$0xff] }
 0x38f   :  { %v10081_v43 = vpop.eup %6121  ;;  %6141 = vpow2.f32 %v5303_v14  ;;  %v3239_v24 = vmul.f32 %v10014_v63, %v13146_v18  ;;  %v3292_v23 = vadd.f32 %v10016_v47, %v3237_v60  ;;  %v5308_v19 = vmul.f32 -1.442695, %v3288_v5  ;;  %v13149_v5 = vld [vmem:[#allocation26_spill] sm:$0xff] }
 0x390   :  { %v10086_v52 = vpop.eup %6123  ;;  %6143 = vpow2.f32 %v5304_v10  ;;  %v3240_v56 = vmul.f32 %v10014_v63, %v13147_v1  ;;  %v3293_v20 = vadd.f32 %v10016_v47, %v3238_v25  ;;  %v5309_v39 = vmul.f32 -1.442695, %v3289_v8  ;;  %v13150_v8 = vld [vmem:[#allocation28_spill] sm:$0xff] }
 0x391   :  { %v10091_v3 = vpop.eup %6125  ;;  %6145 = vpow2.f32 %v5305_v17  ;;  %v3241_v13 = vmul.f32 %v10014_v63, %v13148_v59  ;;  %v3294_v54 = vadd.f32 %v10016_v47, %v3239_v24  ;;  %v5310_v60 = vmul.f32 -1.442695, %v3290_v21  ;;  %v13151_v21 = vld [vmem:[#allocation30_spill] sm:$0xff] }
 0x392   :  { %v10096_v14 = vpop.eup %6127  ;;  %6147 = vpow2.f32 %v5306_v48  ;;  %v3242_v42 = vmul.f32 %v10014_v63, %v13149_v5  ;;  %v3295_v18 = vadd.f32 %v10016_v47, %v3240_v56  ;;  %v5311_v25 = vmul.f32 -1.442695, %v3291_v32  ;;  %v13152_v32 = vld [vmem:[#allocation32_spill] sm:$0xff] }
 0x393   :  { %v10101_v10 = vpop.eup %6129  ;;  %6149 = vpow2.f32 %v5307_v29  ;;  %v3243_v1 = vmul.f32 %v10014_v63, %v13150_v8  ;;  %v3296_v59 = vadd.f32 %v10016_v47, %v3241_v13  ;;  %v5312_v24 = vmul.f32 -1.442695, %v3292_v23  ;;  %v13153_v23 = vld [vmem:[#allocation34_spill] sm:$0xff] }
 0x394   :  { %v10106_v17 = vpop.eup %6131  ;;  %6151 = vpow2.f32 %v5308_v19  ;;  %v3244_v49 = vmul.f32 %v10014_v63, %v13151_v21  ;;  %v3297_v5 = vadd.f32 %v10016_v47, %v3242_v42  ;;  %v5313_v56 = vmul.f32 -1.442695, %v3293_v20  ;;  %v13154_v20 = vld [vmem:[#allocation36_spill] sm:$0xff] }
 0x395   :  { %v10111_v48 = vpop.eup %6133  ;;  %6153 = vpow2.f32 %v5309_v39  ;;  %v3245_v57 = vmul.f32 %v10014_v63, %v13152_v32  ;;  %v3298_v8 = vadd.f32 %v10016_v47, %v3243_v1  ;;  %v5314_v13 = vmul.f32 -1.442695, %v3294_v54  ;;  %v13155_v54 = vld [vmem:[#allocation38_spill] sm:$0xff] }
 0x396   :  { %v10116_v29 = vpop.eup %6135  ;;  %6155 = vpow2.f32 %v5310_v60  ;;  %v3246_v7 = vmul.f32 %v10014_v63, %v13153_v23  ;;  %v3299_v21 = vadd.f32 %v10016_v47, %v3244_v49  ;;  %v5315_v42 = vmul.f32 -1.442695, %v3295_v18  ;;  %v13156_v18 = vld [vmem:[#allocation40_spill] sm:$0xff] }
 0x397   :  { %v10121_v19 = vpop.eup %6137  ;;  %6157 = vpow2.f32 %v5311_v25  ;;  %v3247_v33 = vmul.f32 %v10014_v63, %v13154_v20  ;;  %v3300_v32 = vadd.f32 %v10016_v47, %v3245_v57  ;;  %v5316_v1 = vmul.f32 -1.442695, %v3296_v59  ;;  %v13157_v59 = vld [vmem:[#allocation42_spill] sm:$0xff] }
 0x398   :  { %v10126_v39 = vpop.eup %6139  ;;  %6159 = vpow2.f32 %v5312_v24  ;;  %v3248_v44 = vmul.f32 %v10014_v63, %v13155_v54  ;;  %v3301_v23 = vadd.f32 %v10016_v47, %v3246_v7  ;;  %v5317_v49 = vmul.f32 -1.442695, %v3297_v5  ;;  %v13158_v5 = vld [vmem:[#allocation44_spill] sm:$0xff] }
 0x399   :  { %v10131_v60 = vpop.eup %6141  ;;  %6161 = vpow2.f32 %v5313_v56  ;;  %v3249_v35 = vmul.f32 %v10014_v63, %v13156_v18  ;;  %v3302_v20 = vadd.f32 %v10016_v47, %v3247_v33  ;;  %v5318_v57 = vmul.f32 -1.442695, %v3298_v8  ;;  %v13159_v8 = vld [vmem:[#allocation46_spill] sm:$0xff] }
 0x39a   :  { %v10136_v25 = vpop.eup %6143  ;;  %6163 = vpow2.f32 %v5314_v13  ;;  %v3250_v41 = vmul.f32 %v10014_v63, %v13157_v59  ;;  %v3303_v54 = vadd.f32 %v10016_v47, %v3248_v44  ;;  %v5319_v7 = vmul.f32 -1.442695, %v3299_v21  ;;  %v13160_v21 = vld [vmem:[#allocation48_spill] sm:$0xff] }
 0x39b   :  { %v10141_v24 = vpop.eup %6145  ;;  %6165 = vpow2.f32 %v5315_v42  ;;  %v3251_v31 = vmul.f32 %v10014_v63, %v13158_v5  ;;  %v3304_v18 = vadd.f32 %v10016_v47, %v3249_v35  ;;  %v5320_v33 = vmul.f32 -1.442695, %v3300_v32  ;;  %v13161_v32 = vld [vmem:[#allocation50_spill] sm:$0xff] }
 0x39c   :  { %v10146_v56 = vpop.eup %6147  ;;  %6167 = vpow2.f32 %v5316_v1  ;;  %v3252_v4 = vmul.f32 %v10014_v63, %v13159_v8  ;;  %v3305_v59 = vadd.f32 %v10016_v47, %v3250_v41  ;;  %v5321_v44 = vmul.f32 -1.442695, %v3301_v23  ;;  %v13162_v23 = vld [vmem:[#allocation52_spill] sm:$0xff] }
 0x39d   :  { %v10151_v13 = vpop.eup %6149  ;;  %6169 = vpow2.f32 %v5317_v49  ;;  %v3253_v51 = vmul.f32 %v10014_v63, %v13160_v21  ;;  %v3306_v5 = vadd.f32 %v10016_v47, %v3251_v31  ;;  %v5322_v35 = vmul.f32 -1.442695, %v3302_v20  ;;  %v13163_v20 = vld [vmem:[#allocation54_spill] sm:$0xff] }
 0x39e   :  { %v10156_v42 = vpop.eup %6151  ;;  %6171 = vpow2.f32 %v5318_v57  ;;  %v3254_v53 = vmul.f32 %v10014_v63, %v13161_v32  ;;  %v3307_v8 = vadd.f32 %v10016_v47, %v3252_v4  ;;  %v5323_v41 = vmul.f32 -1.442695, %v3303_v54  ;;  %v13164_v54 = vld [vmem:[#allocation56_spill] sm:$0xff] }
 0x39f   :  { %v10161_v1 = vpop.eup %6153  ;;  %6173 = vpow2.f32 %v5319_v7  ;;  %v3255_v36 = vmul.f32 %v10014_v63, %v13162_v23  ;;  %v3308_v21 = vadd.f32 %v10016_v47, %v3253_v51  ;;  %v5324_v31 = vmul.f32 -1.442695, %v3304_v18  ;;  %v13165_v18 = vld [vmem:[#allocation58_spill] sm:$0xff] }
 0x3a0   :  { %v10166_v49 = vpop.eup %6155  ;;  %6175 = vpow2.f32 %v5320_v33  ;;  %v3256_v12 = vmul.f32 %v10014_v63, %v13163_v20  ;;  %v3309_v32 = vadd.f32 %v10016_v47, %v3254_v53  ;;  %v5325_v4 = vmul.f32 -1.442695, %v3305_v59  ;;  %v13166_v59 = vld [vmem:[#allocation60_spill] sm:$0xff] }
 0x3a1   :  { %v10171_v57 = vpop.eup %6157  ;;  %6177 = vpow2.f32 %v5321_v44  ;;  %v3257_v40 = vmul.f32 %v10014_v63, %v13164_v54  ;;  %v3310_v23 = vadd.f32 %v10016_v47, %v3255_v36  ;;  %v5326_v51 = vmul.f32 -1.442695, %v3306_v5  ;;  %v13167_v5 = vld [vmem:[#allocation62_spill] sm:$0xff] }
 0x3a2   :  { %v10176_v7 = vpop.eup %6159  ;;  %6179 = vpow2.f32 %v5322_v35  ;;  %v3258_v16 = vmul.f32 %v10014_v63, %v13165_v18  ;;  %v3311_v20 = vadd.f32 %v10016_v47, %v3256_v12  ;;  %v5327_v53 = vmul.f32 -1.442695, %v3307_v8  ;;  %v13168_v8 = vld [vmem:[#allocation64_spill] sm:$0xff] }
 0x3a3   :  { %v10181_v33 = vpop.eup %6161  ;;  %6181 = vpow2.f32 %v5323_v41  ;;  %v3259_v11 = vmul.f32 %v10014_v63, %v13166_v59  ;;  %v3312_v54 = vadd.f32 %v10016_v47, %v3257_v40  ;;  %v5328_v36 = vmul.f32 -1.442695, %v3308_v21  ;;  %v13169_v21 = vld [vmem:[#allocation66_spill] sm:$0xff] }
 0x3a4   :  { %v10186_v44 = vpop.eup %6163  ;;  %6183 = vpow2.f32 %v5324_v31  ;;  %v3260_v50 = vmul.f32 %v10014_v63, %v13167_v5  ;;  %v3313_v18 = vadd.f32 %v10016_v47, %v3258_v16  ;;  %v5329_v12 = vmul.f32 -1.442695, %v3309_v32  ;;  %v13170_v32 = vld [vmem:[#allocation68_spill] sm:$0xff] }
 0x3a5   :  { %v10191_v35 = vpop.eup %6165  ;;  %6185 = vpow2.f32 %v5325_v4  ;;  %v3261_v46 = vmul.f32 %v10014_v63, %v13168_v8  ;;  %v3314_v59 = vadd.f32 %v10016_v47, %v3259_v11  ;;  %v5330_v40 = vmul.f32 -1.442695, %v3310_v23  ;;  %v13171_v23 = vld [vmem:[#allocation70_spill] sm:$0xff] }
 0x3a6   :  { %v10196_v41 = vpop.eup %6167  ;;  %6187 = vpow2.f32 %v5326_v51  ;;  %v3262_v38 = vmul.f32 %v10014_v63, %v13169_v21  ;;  %v3315_v5 = vadd.f32 %v10016_v47, %v3260_v50  ;;  %v5331_v16 = vmul.f32 -1.442695, %v3311_v20  ;;  %v13172_v20 = vld [vmem:[#allocation72_spill] sm:$0xff] }
 0x3a7   :  { %v10201_v31 = vpop.eup %6169  ;;  %6189 = vpow2.f32 %v5327_v53  ;;  %v3263_v62 = vmul.f32 %v10014_v63, %v13170_v32  ;;  %v3316_v8 = vadd.f32 %v10016_v47, %v3261_v46  ;;  %v5332_v11 = vmul.f32 -1.442695, %v3312_v54 }
 0x3a8   :  { %v10206_v4 = vpop.eup %6171  ;;  %6191 = vpow2.f32 %v5328_v36  ;;  %v3264_v28 = vmul.f32 %v10014_v63, %v13171_v23  ;;  %v3317_v21 = vadd.f32 %v10016_v47, %v3262_v38  ;;  %v5333_v50 = vmul.f32 -1.442695, %v3313_v18 }
 0x3a9   :  { %v10211_v51 = vpop.eup %6173  ;;  %6193 = vpow2.f32 %v5329_v12  ;;  %v3265_v6 = vmul.f32 %v10014_v63, %v13172_v20  ;;  %v3318_v32 = vadd.f32 %v10016_v47, %v3263_v62  ;;  %v5334_v46 = vmul.f32 -1.442695, %v3314_v59 }
 0x3aa   :  { %v10216_v53 = vpop.eup %6175  ;;  %6195 = vpow2.f32 %v5330_v40  ;;  %v3319_v54 = vadd.f32 %v10016_v47, %v3264_v28  ;;  %v5335_v55 = vmul.f32 -1.442695, %v3315_v5  ;;  %v5336_v18 = vmul.f32 -1.442695, %v3316_v8 }
 0x3ab   :  { %v10221_v36 = vpop.eup %6177  ;;  %6197 = vpow2.f32 %v5331_v16  ;;  %v3320_v38 = vadd.f32 %v10016_v47, %v3265_v6  ;;  %v5337_v20 = vmul.f32 -1.442695, %v3317_v21  ;;  %v5338_v62 = vmul.f32 -1.442695, %v3318_v32 }
 0x3ac   :  { %v10224_v23 = vpop.eup %6179  ;;  %6199 = vpow2.f32 %v5332_v11  ;;  %v5339_v28 = vmul.f32 -1.442695, %v3319_v54  ;;  %v3468_v6 = vadd.f32 1.0, %v10076_v26  ;;  %v3469_v11 = vadd.f32 1.0, %v10081_v43 }
 0x3ad   :  { %v10227_v12 = vpop.eup %6181  ;;  %6201 = vpow2.f32 %v5333_v50  ;;  %v5340_v5 = vmul.f32 -1.442695, %v3320_v38  ;;  %v3471_v32 = vadd.f32 1.0, %v10091_v3  ;;  %v3472_v54 = vadd.f32 1.0, %v10096_v14 }
 0x3ae   :  { %v10229_v15 = vpop.eup %6183  ;;  %6203 = vpow2.f32 %v5334_v46  ;;  %v3473_v38 = vadd.f32 1.0, %v10101_v10  ;;  %v3476_v14 = vadd.f32 1.0, %v10116_v29  ;;  %v3477_v10 = vadd.f32 1.0, %v10121_v19 }
 0x3af   :  { %v10231_v59 = vpop.eup %6185  ;;  %6205 = vpow2.f32 %v5335_v55  ;;  %v3470_v55 = vadd.f32 1.0, %v10086_v52  ;;  %v3480_v29 = vadd.f32 1.0, %v10136_v25  ;;  %v3481_v19 = vadd.f32 1.0, %v10141_v24 }
 0x3b0   :  { %v10233_v40 = vpop.eup %6187  ;;  %6207 = vpow2.f32 %v5336_v18  ;;  %v3474_v18 = vadd.f32 1.0, %v10106_v17  ;;  %v3478_v17 = vadd.f32 1.0, %v10126_v39  ;;  %v3482_v39 = vadd.f32 1.0, %v10146_v56 }
 0x3b1   :  { %v10235_v16 = vpop.eup %6189  ;;  %6209 = vpow2.f32 %v5337_v20  ;;  %v3475_v20 = vadd.f32 1.0, %v10111_v48  ;;  %v3479_v48 = vadd.f32 1.0, %v10131_v60  ;;  %v3483_v60 = vadd.f32 1.0, %v10151_v13 }
 0x3b2   :  { %v10238_v8 = vpop.eup %6191  ;;  %6211 = vpow2.f32 %v5338_v62  ;;  %v3484_v25 = vadd.f32 1.0, %v10156_v42  ;;  %v3485_v24 = vadd.f32 1.0, %v10161_v1  ;;  %v3486_v56 = vadd.f32 1.0, %v10166_v49 }
 0x3b3   :  { %v10241_v21 = vpop.eup %6193  ;;  %6213 = vpow2.f32 %v5339_v28  ;;  %v3487_v13 = vadd.f32 1.0, %v10171_v57  ;;  %v3488_v42 = vadd.f32 1.0, %v10176_v7  ;;  %v3489_v1 = vadd.f32 1.0, %v10181_v33 }
 0x3b4   :  { %v10244_v50 = vpop.eup %6195  ;;  %6215 = vpow2.f32 %v5340_v5  ;;  %v3490_v49 = vadd.f32 1.0, %v10186_v44  ;;  %v3491_v57 = vadd.f32 1.0, %v10191_v35  ;;  %v3492_v7 = vadd.f32 1.0, %v10196_v41 }
 0x3b5   :  { %v10247_v46 = vpop.eup %6197  ;;  %6217 = vrcp.f32 %v3468_v6  ;;  %v3493_v33 = vadd.f32 1.0, %v10201_v31  ;;  %v3494_v44 = vadd.f32 1.0, %v10206_v4  ;;  %v3495_v35 = vadd.f32 1.0, %v10211_v51 }
 0x3b6   :  { %v10250_v26 = vpop.eup %6199  ;;  %6219 = vrcp.f32 %v3469_v11  ;;  %v3496_v41 = vadd.f32 1.0, %v10216_v53  ;;  %v3497_v31 = vadd.f32 1.0, %v10221_v36  ;;  %v3498_v4 = vadd.f32 1.0, %v10224_v23 }
 0x3b7   :  { %v10253_v43 = vpop.eup %6201  ;;  %6221 = vrcp.f32 %v3470_v55  ;;  %v3499_v51 = vadd.f32 1.0, %v10227_v12  ;;  %v3500_v53 = vadd.f32 1.0, %v10229_v15  ;;  %v3501_v36 = vadd.f32 1.0, %v10231_v59 }
 0x3b8   :  { %v10256_v52 = vpop.eup %6203  ;;  %6223 = vrcp.f32 %v3471_v32  ;;  %v3502_v23 = vadd.f32 1.0, %v10233_v40  ;;  %v3503_v12 = vadd.f32 1.0, %v10235_v16  ;;  %v3504_v15 = vadd.f32 1.0, %v10238_v8 }
 0x3b9   :  { %v10259_v3 = vpop.eup %6205  ;;  %6225 = vrcp.f32 %v3472_v54  ;;  %v3505_v59 = vadd.f32 1.0, %v10241_v21  ;;  %v3506_v40 = vadd.f32 1.0, %v10244_v50  ;;  %v3507_v16 = vadd.f32 1.0, %v10247_v46 }
 0x3ba   :  { %v10262_v62 = vpop.eup %6207  ;;  %6227 = vrcp.f32 %v3473_v38  ;;  %v3508_v8 = vadd.f32 1.0, %v10250_v26  ;;  %v3509_v21 = vadd.f32 1.0, %v10253_v43  ;;  %v3510_v50 = vadd.f32 1.0, %v10256_v52  ;;  %v13205_v43 = vld [vmem:[#allocation81_spill] sm:$0xff] }
 0x3bb   :  { %v10265_v28 = vpop.eup %6209  ;;  %6229 = vrcp.f32 %v3474_v18  ;;  %v3511_v46 = vadd.f32 1.0, %v10259_v3 }
 0x3bc   :  { %v10268_v5 = vpop.eup %6211  ;;  %6231 = vrcp.f32 %v3475_v20  ;;  %v3513_v52 = vadd.f32 1.0, %v10265_v28 }
 0x3bd   :  { %v10271_v6 = vpop.eup %6213  ;;  %6233 = vrcp.f32 %v3476_v14 }
 0x3be   :  { %v10274_v11 = vpop.eup %6215  ;;  %6235 = vrcp.f32 %v3477_v10  ;;  %v3515_v28 = vadd.f32 1.0, %v10271_v6  ;;  %v13215_v6 = vld [vmem:[#allocation104_spill] sm:$0xff] }
 0x3bf   :  { %v10277_v55 = vpop.eup %6217  ;;  %6237 = vrcp.f32 %v3478_v17 }
 0x3c0   :  { %13173 = vst [vmem:[#allocation163_spill] sm:$0xff] %v10277_v55  ;;  %v10280_v32 = vpop.eup %6219  ;;  %6239 = vrcp.f32 %v3479_v48 }
 0x3c1   :  { %13174 = vst [vmem:[#allocation165_spill] sm:$0xff] %v10280_v32  ;;  %v10283_v54 = vpop.eup %6221  ;;  %6241 = vrcp.f32 %v3480_v29 }
 0x3c2   :  { %13175 = vst [vmem:[#allocation167_spill] sm:$0xff] %v10283_v54  ;;  %v10286_v38 = vpop.eup %6223  ;;  %6243 = vrcp.f32 %v3481_v19 }
 0x3c3   :  { %13176 = vst [vmem:[#allocation169_spill] sm:$0xff] %v10286_v38  ;;  %v10289_v18 = vpop.eup %6225  ;;  %6245 = vrcp.f32 %v3482_v39 }
 0x3c4   :  { %13177 = vst [vmem:[#allocation171_spill] sm:$0xff] %v10289_v18  ;;  %v10292_v20 = vpop.eup %6227  ;;  %6247 = vrcp.f32 %v3483_v60 }
 0x3c5   :  { %13178 = vst [vmem:[#allocation173_spill] sm:$0xff] %v10292_v20  ;;  %v10295_v14 = vpop.eup %6229  ;;  %6249 = vrcp.f32 %v3484_v25 }
 0x3c6   :  { %13179 = vst [vmem:[#allocation175_spill] sm:$0xff] %v10295_v14  ;;  %v10298_v10 = vpop.eup %6231  ;;  %6251 = vrcp.f32 %v3485_v24 }
 0x3c7   :  { %13180 = vst [vmem:[#allocation177_spill] sm:$0xff] %v10298_v10  ;;  %v10301_v17 = vpop.eup %6233  ;;  %6253 = vrcp.f32 %v3486_v56 }
 0x3c8   :  { %13181 = vst [vmem:[#allocation179_spill] sm:$0xff] %v10301_v17  ;;  %v10304_v48 = vpop.eup %6235  ;;  %6255 = vrcp.f32 %v3487_v13 }
 0x3c9   :  { %13182 = vst [vmem:[#allocation181_spill] sm:$0xff] %v10304_v48  ;;  %v10307_v29 = vpop.eup %6237  ;;  %6257 = vrcp.f32 %v3488_v42 }
 0x3ca   :  { %13183 = vst [vmem:[#allocation183_spill] sm:$0xff] %v10307_v29  ;;  %v10310_v19 = vpop.eup %6239  ;;  %6259 = vrcp.f32 %v3489_v1 }
 0x3cb   :  { %13184 = vst [vmem:[#allocation199_spill] sm:$0xff] %v10310_v19  ;;  %v10313_v39 = vpop.eup %6241  ;;  %6261 = vrcp.f32 %v3490_v49 }
 0x3cc   :  { %13185 = vst [vmem:[#allocation200_spill] sm:$0xff] %v10313_v39  ;;  %v10316_v60 = vpop.eup %6243  ;;  %6263 = vrcp.f32 %v3491_v57 }
 0x3cd   :  { %13186 = vst [vmem:[#allocation201_spill] sm:$0xff] %v10316_v60  ;;  %v10319_v25 = vpop.eup %6245  ;;  %6265 = vrcp.f32 %v3492_v7 }
 0x3ce   :  { %13187 = vst [vmem:[#allocation198_spill] sm:$0xff] %v10319_v25  ;;  %v10322_v24 = vpop.eup %6247  ;;  %6267 = vrcp.f32 %v3493_v33 }
 0x3cf   :  { %13188 = vst [vmem:[#allocation79_spill] sm:$0xff] %v10322_v24  ;;  %v10325_v56 = vpop.eup %6249  ;;  %6269 = vrcp.f32 %v3494_v44 }
 0x3d0   :  { %13189 = vst [vmem:[#allocation78_spill] sm:$0xff] %v10325_v56  ;;  %v10328_v13 = vpop.eup %6251  ;;  %6271 = vrcp.f32 %v3495_v35 }
 0x3d1   :  { %13190 = vst [vmem:[#allocation84_spill] sm:$0xff] %v10328_v13  ;;  %v10331_v42 = vpop.eup %6253  ;;  %6273 = vrcp.f32 %v3496_v41 }
 0x3d2   :  { %13191 = vst [vmem:[#allocation91_spill] sm:$0xff] %v10331_v42  ;;  %v10334_v1 = vpop.eup %6255  ;;  %6275 = vrcp.f32 %v3497_v31 }
 0x3d3   :  { %13192 = vst [vmem:[#allocation93_spill] sm:$0xff] %v10334_v1  ;;  %v10337_v49 = vpop.eup %6257  ;;  %6277 = vrcp.f32 %v3498_v4 }
 0x3d4   :  { %13193 = vst [vmem:[#allocation101_spill] sm:$0xff] %v10337_v49  ;;  %v10340_v57 = vpop.eup %6259  ;;  %6279 = vrcp.f32 %v3499_v51 }
 0x3d5   :  { %13194 = vst [vmem:[#allocation103_spill] sm:$0xff] %v10340_v57  ;;  %v10343_v7 = vpop.eup %6261  ;;  %6281 = vrcp.f32 %v3500_v53  ;;  %v13203_v53 = vld [vmem:[#allocation80_spill] sm:$0xff] }
 0x3d6   :  { %13195 = vst [vmem:[#allocation109_spill] sm:$0xff] %v10343_v7  ;;  %v10346_v33 = vpop.eup %6263  ;;  %6283 = vrcp.f32 %v3501_v36  ;;  %v3664_v36 = vmul.f32 %v10014_v63, %v13203_v53  ;;  %v3514_v53 = vadd.f32 1.0, %v10268_v5  ;;  %v3516_v5 = vadd.f32 1.0, %v10274_v11 }
 0x3d7   :  { %13196 = vst [vmem:[#allocation111_spill] sm:$0xff] %v10346_v33  ;;  %v10349_v44 = vpop.eup %6265  ;;  %6285 = vrcp.f32 %v3502_v23  ;;  %v3512_v23 = vadd.f32 1.0, %v10262_v62  ;;  %v13209_v62 = vld [vmem:[#allocation92_spill] sm:$0xff] }
 0x3d8   :  { %13197 = vst [vmem:[#allocation117_spill] sm:$0xff] %v10349_v44  ;;  %v10352_v35 = vpop.eup %6267  ;;  %6287 = vrcp.f32 %v3503_v12  ;;  %v3665_v12 = vmul.f32 %v10014_v63, %v13205_v43 }
 0x3d9   :  { %13198 = vst [vmem:[#allocation119_spill] sm:$0xff] %v10352_v35  ;;  %v10355_v41 = vpop.eup %6269  ;;  %6289 = vrcp.f32 %v3504_v15 }
 0x3da   :  { %13199 = vst [vmem:[#allocation125_spill] sm:$0xff] %v10355_v41  ;;  %v10358_v31 = vpop.eup %6271  ;;  %6291 = vrcp.f32 %v3505_v59  ;;  %v13207_v59 = vld [vmem:[#allocation85_spill] sm:$0xff]  ;;  %v3714_v43 = vadd.f32 %v3665_v12, %v10016_v47 }
 0x3db   :  { %13200 = vst [vmem:[#allocation127_spill] sm:$0xff] %v10358_v31  ;;  %v10361_v4 = vpop.eup %6273  ;;  %6293 = vrcp.f32 %v3506_v40  ;;  %v3666_v3 = vmul.f32 %v10014_v63, %v13207_v59  ;;  %v3713_v40 = vadd.f32 %v3664_v36, %v10016_v47 }
 0x3dc   :  { %13201 = vst [vmem:[#allocation2_spill] sm:$0xff] %v10361_v4  ;;  %v10364_v51 = vpop.eup %6275  ;;  %6295 = vrcp.f32 %v3507_v16 }
 0x3dd   :  { %13202 = vst [vmem:[#allocation4_spill] sm:$0xff] %v10364_v51  ;;  %v10369_v26 = vpop.eup %6277  ;;  %6297 = vrcp.f32 %v3508_v8  ;;  %v3667_v8 = vmul.f32 %v10014_v63, %v13209_v62  ;;  %v3715_v36 = vadd.f32 %v3666_v3, %v10016_v47 }
 0x3de   :  { %13204 = vst [vmem:[#allocation6_spill] sm:$0xff] %v10369_v26  ;;  %v10374_v15 = vpop.eup %6279  ;;  %6299 = vrcp.f32 %v3509_v21  ;;  %v13211_v21 = vld [vmem:[#allocation94_spill] sm:$0xff] }
 0x3df   :  { %13206 = vst [vmem:[#allocation8_spill] sm:$0xff] %v10374_v15  ;;  %v10380_v16 = vpop.eup %6281  ;;  %6301 = vrcp.f32 %v3510_v50  ;;  %v3668_v59 = vmul.f32 %v10014_v63, %v13211_v21  ;;  %v13213_v50 = vld [vmem:[#allocation102_spill] sm:$0xff]  ;;  %v3716_v12 = vadd.f32 %v3667_v8, %v10016_v47  ;;  %v13219_v8 = vld [vmem:[#allocation112_spill] sm:$0xff] }
 0x3e0   :  { %13208 = vst [vmem:[#allocation10_spill] sm:$0xff] %v10380_v16  ;;  %v10386_v26 = vpop.eup %6283  ;;  %6303 = vrcp.f32 %v3511_v46  ;;  %v3669_v62 = vmul.f32 %v10014_v63, %v13213_v50  ;;  %v3670_v46 = vmul.f32 %v10014_v63, %v13215_v6  ;;  %v5342_v50 = vmul.f32 -1.442695, %v3714_v43  ;;  %v13223_v43 = vld [vmem:[#allocation120_spill] sm:$0xff] }
 0x3e1   :  { %13210 = vst [vmem:[#allocation12_spill] sm:$0xff] %v10386_v26  ;;  %v10392_v15 = vpop.eup %6285  ;;  %6305 = vrcp.f32 %v3512_v23  ;;  %v3717_v21 = vadd.f32 %v3668_v59, %v10016_v47  ;;  %v5341_v26 = vmul.f32 -1.442695, %v3713_v40  ;;  %v13221_v40 = vld [vmem:[#allocation118_spill] sm:$0xff] }
 0x3e2   :  { %13212 = vst [vmem:[#allocation14_spill] sm:$0xff] %v10392_v15  ;;  %v10398_v16 = vpop.eup %6287  ;;  %6307 = vrcp.f32 %v3513_v52  ;;  %v13217_v15 = vld [vmem:[#allocation110_spill] sm:$0xff]  ;;  %v3718_v23 = vadd.f32 %v3669_v62, %v10016_v47  ;;  %v3672_v52 = vmul.f32 %v10014_v63, %v13219_v8  ;;  %v3719_v6 = vadd.f32 %v3670_v46, %v10016_v47 }
 0x3e3   :  { %13214 = vst [vmem:[#allocation16_spill] sm:$0xff] %v10398_v16  ;;  %v10403_v3 = vpop.eup %6289  ;;  %6309 = vrcp.f32 %v3514_v53  ;;  %v3671_v11 = vmul.f32 %v10014_v63, %v13217_v15  ;;  %v5343_v16 = vmul.f32 -1.442695, %v3715_v36  ;;  %v3673_v53 = vmul.f32 %v10014_v63, %v13221_v40  ;;  %v13225_v36 = vld [vmem:[#allocation126_spill] sm:$0xff] }
 0x3e4   :  { %13216 = vst [vmem:[#allocation18_spill] sm:$0xff] %v10403_v3  ;;  %v10408_v51 = vpop.eup %6291  ;;  %6311 = vrcp.f32 %v3515_v28  ;;  %v5344_v3 = vmul.f32 -1.442695, %v3716_v12  ;;  %v3674_v28 = vmul.f32 %v10014_v63, %v13223_v43  ;;  %v5345_v8 = vmul.f32 -1.442695, %v3717_v21  ;;  %v13227_v12 = vld [vmem:[#allocation128_spill] sm:$0xff] }
 0x3e5   :  { %13218 = vst [vmem:[#allocation20_spill] sm:$0xff] %v10408_v51  ;;  %v10413_v59 = vpop.eup %6293  ;;  %6313 = vrcp.f32 %v3516_v5  ;;  %v3720_v15 = vadd.f32 %v3671_v11, %v10016_v47  ;;  %v3721_v51 = vadd.f32 %v3672_v52, %v10016_v47  ;;  %v3675_v5 = vmul.f32 %v10014_v63, %v13225_v36  ;;  %v13229_v21 = vld [vmem:[#allocation3_spill] sm:$0xff] }
 0x3e6   :  { %13220 = vst [vmem:[#allocation22_spill] sm:$0xff] %v10413_v59  ;;  %v10418_v62 = vpop.eup %6295  ;;  %6315 = vpow2.f32 %v5341_v26  ;;  %v3722_v59 = vadd.f32 %v3673_v53, %v10016_v47  ;;  %v5346_v40 = vmul.f32 -1.442695, %v3718_v23  ;;  %v3723_v43 = vadd.f32 %v3674_v28, %v10016_v47  ;;  %v13231_v23 = vld [vmem:[#allocation5_spill] sm:$0xff] }
 0x3e7   :  { %13222 = vst [vmem:[#allocation24_spill] sm:$0xff] %v10418_v62  ;;  %v10423_v46 = vpop.eup %6297  ;;  %6317 = vpow2.f32 %v5342_v50  ;;  %v3676_v62 = vmul.f32 %v10014_v63, %v13227_v12  ;;  %v5347_v52 = vmul.f32 -1.442695, %v3719_v6  ;;  %v3724_v36 = vadd.f32 %v3675_v5, %v10016_v47  ;;  %v13233_v6 = vld [vmem:[#allocation7_spill] sm:$0xff] }
 0x3e8   :  { %13224 = vst [vmem:[#allocation26_spill] sm:$0xff] %v10423_v46  ;;  %v10428_v11 = vpop.eup %6299  ;;  %6319 = vpow2.f32 %v5343_v16  ;;  %v3677_v46 = vmul.f32 %v10014_v63, %v13229_v21  ;;  %v5348_v53 = vmul.f32 -1.442695, %v3720_v15  ;;  %v5349_v28 = vmul.f32 -1.442695, %v3721_v51  ;;  %v13235_v15 = vld [vmem:[#allocation9_spill] sm:$0xff] }
 0x3e9   :  { %13226 = vst [vmem:[#allocation28_spill] sm:$0xff] %v10428_v11  ;;  %v10433_v26 = vpop.eup %6301  ;;  %6321 = vpow2.f32 %v5344_v3  ;;  %v3678_v11 = vmul.f32 %v10014_v63, %v13231_v23  ;;  %v3725_v12 = vadd.f32 %v3676_v62, %v10016_v47  ;;  %v5350_v5 = vmul.f32 -1.442695, %v3722_v59  ;;  %v13237_v51 = vld [vmem:[#allocation11_spill] sm:$0xff]  ;;  %v13239_v59 = vld [vmem:[#allocation13_spill] sm:$0xff] }
 0x3ea   :  { %13228 = vst [vmem:[#allocation30_spill] sm:$0xff] %v10433_v26  ;;  %v10438_v50 = vpop.eup %6303  ;;  %6323 = vpow2.f32 %v5345_v8  ;;  %v3679_v26 = vmul.f32 %v10014_v63, %v13233_v6  ;;  %v3726_v21 = vadd.f32 %v3677_v46, %v10016_v47  ;;  %v5351_v62 = vmul.f32 -1.442695, %v3723_v43  ;;  %v13241_v43 = vld [vmem:[#allocation15_spill] sm:$0xff] }
 0x3eb   :  { %13230 = vst [vmem:[#allocation32_spill] sm:$0xff] %v10438_v50  ;;  %v10443_v16 = vpop.eup %6305  ;;  %6325 = vpow2.f32 %v5346_v40  ;;  %v3680_v50 = vmul.f32 %v10014_v63, %v13235_v15  ;;  %v3727_v23 = vadd.f32 %v3678_v11, %v10016_v47  ;;  %v5352_v46 = vmul.f32 -1.442695, %v3724_v36  ;;  %v13242_v36 = vld [vmem:[#allocation17_spill] sm:$0xff] }
 0x3ec   :  { %13232 = vst [vmem:[#allocation34_spill] sm:$0xff] %v10443_v16  ;;  %v10448_v3 = vpop.eup %6307  ;;  %6327 = vpow2.f32 %v5347_v52  ;;  %v3681_v16 = vmul.f32 %v10014_v63, %v13237_v51  ;;  %v3728_v6 = vadd.f32 %v3679_v26, %v10016_v47  ;;  %v5353_v11 = vmul.f32 -1.442695, %v3725_v12  ;;  %v13243_v12 = vld [vmem:[#allocation19_spill] sm:$0xff] }
 0x3ed   :  { %13234 = vst [vmem:[#allocation36_spill] sm:$0xff] %v10448_v3  ;;  %v10453_v8 = vpop.eup %6309  ;;  %6329 = vpow2.f32 %v5348_v53  ;;  %v3682_v3 = vmul.f32 %v10014_v63, %v13239_v59  ;;  %v3729_v15 = vadd.f32 %v3680_v50, %v10016_v47  ;;  %v5354_v26 = vmul.f32 -1.442695, %v3726_v21  ;;  %v13244_v21 = vld [vmem:[#allocation21_spill] sm:$0xff] }
 0x3ee   :  { %13236 = vst [vmem:[#allocation38_spill] sm:$0xff] %v10453_v8  ;;  %v10458_v40 = vpop.eup %6311  ;;  %6331 = vpow2.f32 %v5349_v28  ;;  %v3683_v8 = vmul.f32 %v10014_v63, %v13241_v43  ;;  %v3730_v51 = vadd.f32 %v3681_v16, %v10016_v47  ;;  %v5355_v50 = vmul.f32 -1.442695, %v3727_v23  ;;  %v13245_v23 = vld [vmem:[#allocation23_spill] sm:$0xff] }
 0x3ef   :  { %13238 = vst [vmem:[#allocation40_spill] sm:$0xff] %v10458_v40  ;;  %v10463_v52 = vpop.eup %6313  ;;  %6333 = vpow2.f32 %v5350_v5  ;;  %v3684_v40 = vmul.f32 %v10014_v63, %v13242_v36  ;;  %v3731_v59 = vadd.f32 %v3682_v3, %v10016_v47  ;;  %v5356_v16 = vmul.f32 -1.442695, %v3728_v6  ;;  %v13246_v6 = vld [vmem:[#allocation25_spill] sm:$0xff] }
 0x3f0   :  { %13240 = vst [vmem:[#allocation42_spill] sm:$0xff] %v10463_v52  ;;  %v10468_v53 = vpop.eup %6315  ;;  %6335 = vpow2.f32 %v5351_v62  ;;  %v3685_v52 = vmul.f32 %v10014_v63, %v13243_v12  ;;  %v3732_v43 = vadd.f32 %v3683_v8, %v10016_v47  ;;  %v3686_v4 = vmul.f32 %v10014_v63, %v13244_v21 }
 0x3f1   :  { %v10473_v28 = vpop.eup %6317  ;;  %6337 = vpow2.f32 %v5352_v46  ;;  %v3733_v36 = vadd.f32 %v3684_v40, %v10016_v47  ;;  %v5357_v3 = vmul.f32 -1.442695, %v3729_v15  ;;  %v3687_v31 = vmul.f32 %v10014_v63, %v13245_v23  ;;  %v13247_v15 = vld [vmem:[#allocation27_spill] sm:$0xff] }
 0x3f2   :  { %v10478_v5 = vpop.eup %6319  ;;  %6339 = vpow2.f32 %v5353_v11  ;;  %v3734_v12 = vadd.f32 %v3685_v52, %v10016_v47  ;;  %v5358_v8 = vmul.f32 -1.442695, %v3730_v51  ;;  %v3688_v41 = vmul.f32 %v10014_v63, %v13246_v6  ;;  %v13248_v51 = vld [vmem:[#allocation29_spill] sm:$0xff] }
 0x3f3   :  { %v10483_v62 = vpop.eup %6321  ;;  %6341 = vpow2.f32 %v5354_v26  ;;  %v3735_v21 = vadd.f32 %v3686_v4, %v10016_v47  ;;  %v5359_v40 = vmul.f32 -1.442695, %v3731_v59  ;;  %v3689_v35 = vmul.f32 %v10014_v63, %v13247_v15  ;;  %v13249_v59 = vld [vmem:[#allocation31_spill] sm:$0xff] }
 0x3f4   :  { %v10488_v46 = vpop.eup %6323  ;;  %6343 = vpow2.f32 %v5355_v50  ;;  %v3736_v23 = vadd.f32 %v3687_v31, %v10016_v47  ;;  %v5360_v52 = vmul.f32 -1.442695, %v3732_v43  ;;  %v3690_v44 = vmul.f32 %v10014_v63, %v13248_v51  ;;  %v13250_v43 = vld [vmem:[#allocation33_spill] sm:$0xff] }
 0x3f5   :  { %v10493_v11 = vpop.eup %6325  ;;  %6345 = vpow2.f32 %v5356_v16  ;;  %v3737_v6 = vadd.f32 %v3688_v41, %v10016_v47  ;;  %v5361_v4 = vmul.f32 -1.442695, %v3733_v36  ;;  %v3691_v33 = vmul.f32 %v10014_v63, %v13249_v59  ;;  %v13251_v36 = vld [vmem:[#allocation35_spill] sm:$0xff] }
 0x3f6   :  { %v10498_v26 = vpop.eup %6327  ;;  %6347 = vpow2.f32 %v5357_v3  ;;  %v3738_v15 = vadd.f32 %v3689_v35, %v10016_v47  ;;  %v5362_v31 = vmul.f32 -1.442695, %v3734_v12  ;;  %v3692_v7 = vmul.f32 %v10014_v63, %v13250_v43  ;;  %v13252_v12 = vld [vmem:[#allocation37_spill] sm:$0xff] }
 0x3f7   :  { %v10503_v50 = vpop.eup %6329  ;;  %6349 = vpow2.f32 %v5358_v8  ;;  %v3739_v51 = vadd.f32 %v3690_v44, %v10016_v47  ;;  %v5363_v41 = vmul.f32 -1.442695, %v3735_v21  ;;  %v3693_v57 = vmul.f32 %v10014_v63, %v13251_v36  ;;  %v13253_v21 = vld [vmem:[#allocation39_spill] sm:$0xff] }
 0x3f8   :  { %v10508_v16 = vpop.eup %6331  ;;  %6351 = vpow2.f32 %v5359_v40  ;;  %v3740_v59 = vadd.f32 %v3691_v33, %v10016_v47  ;;  %v5364_v35 = vmul.f32 -1.442695, %v3736_v23  ;;  %v3694_v49 = vmul.f32 %v10014_v63, %v13252_v12  ;;  %v13254_v23 = vld [vmem:[#allocation41_spill] sm:$0xff] }
 0x3f9   :  { %v10513_v3 = vpop.eup %6333  ;;  %6353 = vpow2.f32 %v5360_v52  ;;  %v3741_v43 = vadd.f32 %v3692_v7, %v10016_v47  ;;  %v5365_v44 = vmul.f32 -1.442695, %v3737_v6  ;;  %v3695_v1 = vmul.f32 %v10014_v63, %v13253_v21  ;;  %v13255_v6 = vld [vmem:[#allocation43_spill] sm:$0xff] }
 0x3fa   :  { %v10518_v8 = vpop.eup %6335  ;;  %6355 = vpow2.f32 %v5361_v4  ;;  %v3742_v36 = vadd.f32 %v3693_v57, %v10016_v47  ;;  %v5366_v33 = vmul.f32 -1.442695, %v3738_v15  ;;  %v3696_v42 = vmul.f32 %v10014_v63, %v13254_v23  ;;  %v13256_v15 = vld [vmem:[#allocation45_spill] sm:$0xff] }
 0x3fb   :  { %v10523_v40 = vpop.eup %6337  ;;  %6357 = vpow2.f32 %v5362_v31  ;;  %v3743_v12 = vadd.f32 %v3694_v49, %v10016_v47  ;;  %v5367_v7 = vmul.f32 -1.442695, %v3739_v51  ;;  %v3697_v13 = vmul.f32 %v10014_v63, %v13255_v6  ;;  %v13257_v51 = vld [vmem:[#allocation47_spill] sm:$0xff] }
 0x3fc   :  { %v10528_v52 = vpop.eup %6339  ;;  %6359 = vpow2.f32 %v5363_v41  ;;  %v3744_v21 = vadd.f32 %v3695_v1, %v10016_v47  ;;  %v5368_v57 = vmul.f32 -1.442695, %v3740_v59  ;;  %v3698_v56 = vmul.f32 %v10014_v63, %v13256_v15  ;;  %v13258_v59 = vld [vmem:[#allocation49_spill] sm:$0xff] }
 0x3fd   :  { %v10533_v4 = vpop.eup %6341  ;;  %6361 = vpow2.f32 %v5364_v35  ;;  %v3745_v23 = vadd.f32 %v3696_v42, %v10016_v47  ;;  %v5369_v49 = vmul.f32 -1.442695, %v3741_v43  ;;  %v3699_v24 = vmul.f32 %v10014_v63, %v13257_v51  ;;  %v13259_v43 = vld [vmem:[#allocation51_spill] sm:$0xff] }
 0x3fe   :  { %v10538_v31 = vpop.eup %6343  ;;  %6363 = vpow2.f32 %v5365_v44  ;;  %v3746_v6 = vadd.f32 %v3697_v13, %v10016_v47  ;;  %v5370_v1 = vmul.f32 -1.442695, %v3742_v36  ;;  %v3700_v25 = vmul.f32 %v10014_v63, %v13258_v59  ;;  %v13260_v36 = vld [vmem:[#allocation53_spill] sm:$0xff] }
 0x3ff   :  { %v10543_v41 = vpop.eup %6345  ;;  %6365 = vpow2.f32 %v5366_v33  ;;  %v3747_v15 = vadd.f32 %v3698_v56, %v10016_v47  ;;  %v5371_v42 = vmul.f32 -1.442695, %v3743_v12  ;;  %v3701_v60 = vmul.f32 %v10014_v63, %v13259_v43  ;;  %v13261_v12 = vld [vmem:[#allocation55_spill] sm:$0xff] }
 0x400   :  { %v10548_v35 = vpop.eup %6347  ;;  %6367 = vpow2.f32 %v5367_v7  ;;  %v3748_v51 = vadd.f32 %v3699_v24, %v10016_v47  ;;  %v5372_v13 = vmul.f32 -1.442695, %v3744_v21  ;;  %v3702_v39 = vmul.f32 %v10014_v63, %v13260_v36  ;;  %v13262_v21 = vld [vmem:[#allocation57_spill] sm:$0xff] }
 0x401   :  { %v10553_v44 = vpop.eup %6349  ;;  %6369 = vpow2.f32 %v5368_v57  ;;  %v3749_v59 = vadd.f32 %v3700_v25, %v10016_v47  ;;  %v5373_v56 = vmul.f32 -1.442695, %v3745_v23  ;;  %v3703_v19 = vmul.f32 %v10014_v63, %v13261_v12  ;;  %v13263_v23 = vld [vmem:[#allocation59_spill] sm:$0xff] }
 0x402   :  { %v10558_v33 = vpop.eup %6351  ;;  %6371 = vpow2.f32 %v5369_v49  ;;  %v3750_v43 = vadd.f32 %v3701_v60, %v10016_v47  ;;  %v5374_v24 = vmul.f32 -1.442695, %v3746_v6  ;;  %v3704_v29 = vmul.f32 %v10014_v63, %v13262_v21  ;;  %v13264_v6 = vld [vmem:[#allocation61_spill] sm:$0xff] }
 0x403   :  { %v10563_v7 = vpop.eup %6353  ;;  %6373 = vpow2.f32 %v5370_v1  ;;  %v3751_v36 = vadd.f32 %v3702_v39, %v10016_v47  ;;  %v5375_v25 = vmul.f32 -1.442695, %v3747_v15  ;;  %v3705_v48 = vmul.f32 %v10014_v63, %v13263_v23  ;;  %v13265_v15 = vld [vmem:[#allocation63_spill] sm:$0xff] }
 0x404   :  { %v10568_v57 = vpop.eup %6355  ;;  %6375 = vpow2.f32 %v5371_v42  ;;  %v3752_v12 = vadd.f32 %v3703_v19, %v10016_v47  ;;  %v5376_v60 = vmul.f32 -1.442695, %v3748_v51  ;;  %v3706_v17 = vmul.f32 %v10014_v63, %v13264_v6  ;;  %v13266_v51 = vld [vmem:[#allocation65_spill] sm:$0xff] }
 0x405   :  { %v10573_v49 = vpop.eup %6357  ;;  %6377 = vpow2.f32 %v5372_v13  ;;  %v3753_v21 = vadd.f32 %v3704_v29, %v10016_v47  ;;  %v5377_v39 = vmul.f32 -1.442695, %v3749_v59  ;;  %v3707_v10 = vmul.f32 %v10014_v63, %v13265_v15  ;;  %v13267_v59 = vld [vmem:[#allocation67_spill] sm:$0xff] }
 0x406   :  { %v10578_v1 = vpop.eup %6359  ;;  %6379 = vpow2.f32 %v5373_v56  ;;  %v3754_v23 = vadd.f32 %v3705_v48, %v10016_v47  ;;  %v5378_v19 = vmul.f32 -1.442695, %v3750_v43  ;;  %v3708_v14 = vmul.f32 %v10014_v63, %v13266_v51  ;;  %v13268_v43 = vld [vmem:[#allocation69_spill] sm:$0xff] }
 0x407   :  { %v10583_v42 = vpop.eup %6361  ;;  %6381 = vpow2.f32 %v5374_v24  ;;  %v3755_v6 = vadd.f32 %v3706_v17, %v10016_v47  ;;  %v5379_v29 = vmul.f32 -1.442695, %v3751_v36  ;;  %v3709_v20 = vmul.f32 %v10014_v63, %v13267_v59  ;;  %v13269_v36 = vld [vmem:[#allocation71_spill] sm:$0xff] }
 0x408   :  { %v10588_v13 = vpop.eup %6363  ;;  %6383 = vpow2.f32 %v5375_v25  ;;  %v3756_v15 = vadd.f32 %v3707_v10, %v10016_v47  ;;  %v5380_v48 = vmul.f32 -1.442695, %v3752_v12  ;;  %v3710_v18 = vmul.f32 %v10014_v63, %v13268_v43  ;;  %v13270_v12 = vld [vmem:[#allocation73_spill] sm:$0xff] }
 0x409   :  { %v10593_v56 = vpop.eup %6365  ;;  %6385 = vpow2.f32 %v5376_v60  ;;  %v3757_v51 = vadd.f32 %v3708_v14, %v10016_v47  ;;  %v5381_v17 = vmul.f32 -1.442695, %v3753_v21  ;;  %v3711_v38 = vmul.f32 %v10014_v63, %v13269_v36 }
 0x40a   :  { %v10598_v24 = vpop.eup %6367  ;;  %6387 = vpow2.f32 %v5377_v39  ;;  %v3758_v59 = vadd.f32 %v3709_v20, %v10016_v47  ;;  %v5382_v10 = vmul.f32 -1.442695, %v3754_v23  ;;  %v3712_v54 = vmul.f32 %v10014_v63, %v13270_v12 }
 0x40b   :  { %v10603_v25 = vpop.eup %6369  ;;  %6389 = vpow2.f32 %v5378_v19  ;;  %v3759_v43 = vadd.f32 %v3710_v18, %v10016_v47  ;;  %v5383_v14 = vmul.f32 -1.442695, %v3755_v6  ;;  %v3760_v21 = vadd.f32 %v3711_v38, %v10016_v47 }
 0x40c   :  { %v10608_v60 = vpop.eup %6371  ;;  %6391 = vpow2.f32 %v5379_v29  ;;  %v5384_v32 = vmul.f32 -1.442695, %v3756_v15  ;;  %v3761_v20 = vadd.f32 %v3712_v54, %v10016_v47  ;;  %v5385_v23 = vmul.f32 -1.442695, %v3757_v51 }
 0x40d   :  { %v10613_v39 = vpop.eup %6373  ;;  %6393 = vpow2.f32 %v5380_v48  ;;  %v5386_v12 = vmul.f32 -1.442695, %v3758_v59  ;;  %v5387_v18 = vmul.f32 -1.442695, %v3759_v43  ;;  %v5388_v38 = vmul.f32 -1.442695, %v3760_v21 }
 0x40e   :  { %v10616_v36 = vpop.eup %6375  ;;  %6395 = vpow2.f32 %v5381_v17  ;;  %v5389_v15 = vmul.f32 -1.442695, %v3761_v20  ;;  %v3909_v54 = vadd.f32 1.0, %v10468_v53  ;;  %v3910_v17 = vadd.f32 1.0, %v10473_v28 }
 0x40f   :  { %v10619_v19 = vpop.eup %6377  ;;  %6397 = vpow2.f32 %v5382_v10  ;;  %v3912_v43 = vadd.f32 1.0, %v10483_v62  ;;  %v3913_v21 = vadd.f32 1.0, %v10488_v46  ;;  %v3914_v20 = vadd.f32 1.0, %v10493_v11 }
 0x410   :  { %v10621_v55 = vpop.eup %6379  ;;  %6399 = vpow2.f32 %v5383_v14  ;;  %v3917_v46 = vadd.f32 1.0, %v10508_v16  ;;  %v3918_v11 = vadd.f32 1.0, %v10513_v3  ;;  %v3921_v16 = vadd.f32 1.0, %v10528_v52 }
 0x411   :  { %v10623_v6 = vpop.eup %6381  ;;  %6401 = vpow2.f32 %v5384_v32  ;;  %v3911_v32 = vadd.f32 1.0, %v10478_v5  ;;  %v3922_v3 = vadd.f32 1.0, %v10533_v4  ;;  %v3925_v52 = vadd.f32 1.0, %v10548_v35 }
 0x412   :  { %v10625_v29 = vpop.eup %6383  ;;  %6403 = vpow2.f32 %v5385_v23  ;;  %v3915_v23 = vadd.f32 1.0, %v10498_v26  ;;  %v3919_v26 = vadd.f32 1.0, %v10518_v8  ;;  %v3923_v8 = vadd.f32 1.0, %v10538_v31 }
 0x413   :  { %v10627_v48 = vpop.eup %6385  ;;  %6405 = vpow2.f32 %v5386_v12  ;;  %v3916_v12 = vadd.f32 1.0, %v10503_v50  ;;  %v3920_v50 = vadd.f32 1.0, %v10523_v40  ;;  %v3924_v40 = vadd.f32 1.0, %v10543_v41 }
 0x414   :  { %v10630_v51 = vpop.eup %6387  ;;  %6407 = vpow2.f32 %v5387_v18  ;;  %v3926_v4 = vadd.f32 1.0, %v10553_v44  ;;  %v3927_v31 = vadd.f32 1.0, %v10558_v33  ;;  %v3928_v41 = vadd.f32 1.0, %v10563_v7 }
 0x415   :  { %v10633_v59 = vpop.eup %6389  ;;  %6409 = vpow2.f32 %v5388_v38  ;;  %v3929_v35 = vadd.f32 1.0, %v10568_v57  ;;  %v3930_v44 = vadd.f32 1.0, %v10573_v49  ;;  %v3931_v33 = vadd.f32 1.0, %v10578_v1 }
 0x416   :  { %v10636_v10 = vpop.eup %6391  ;;  %6411 = vpow2.f32 %v5389_v15  ;;  %v3932_v7 = vadd.f32 1.0, %v10583_v42  ;;  %v3933_v57 = vadd.f32 1.0, %v10588_v13  ;;  %v3934_v49 = vadd.f32 1.0, %v10593_v56 }
 0x417   :  { %v10639_v14 = vpop.eup %6393  ;;  %6413 = vrcp.f32 %v3909_v54  ;;  %v3935_v1 = vadd.f32 1.0, %v10598_v24  ;;  %v3936_v42 = vadd.f32 1.0, %v10603_v25  ;;  %v3937_v13 = vadd.f32 1.0, %v10608_v60 }
 0x418   :  { %v10642_v53 = vpop.eup %6395  ;;  %6415 = vrcp.f32 %v3910_v17  ;;  %v3938_v56 = vadd.f32 1.0, %v10613_v39  ;;  %v3939_v24 = vadd.f32 1.0, %v10616_v36  ;;  %v3940_v25 = vadd.f32 1.0, %v10619_v19 }
 0x419   :  { %v10645_v28 = vpop.eup %6397  ;;  %6417 = vrcp.f32 %v3911_v32  ;;  %v3941_v60 = vadd.f32 1.0, %v10621_v55  ;;  %v3942_v39 = vadd.f32 1.0, %v10623_v6  ;;  %v3943_v36 = vadd.f32 1.0, %v10625_v29 }
 0x41a   :  { %v10648_v5 = vpop.eup %6399  ;;  %6419 = vrcp.f32 %v3912_v43  ;;  %v3944_v19 = vadd.f32 1.0, %v10627_v48  ;;  %v3945_v55 = vadd.f32 1.0, %v10630_v51  ;;  %v3946_v6 = vadd.f32 1.0, %v10633_v59 }
 0x41b   :  { %v10651_v62 = vpop.eup %6401  ;;  %6421 = vrcp.f32 %v3913_v21  ;;  %v3947_v29 = vadd.f32 1.0, %v10636_v10  ;;  %v3948_v48 = vadd.f32 1.0, %v10639_v14  ;;  %v3949_v51 = vadd.f32 1.0, %v10642_v53 }
 0x41c   :  { %v10654_v18 = vpop.eup %6403  ;;  %6423 = vrcp.f32 %v3914_v20  ;;  %v3950_v59 = vadd.f32 1.0, %v10645_v28  ;;  %v3951_v10 = vadd.f32 1.0, %v10648_v5  ;;  %v3952_v14 = vadd.f32 1.0, %v10651_v62  ;;  %v13292_v28 = vld [vmem:[#allocation86_spill] sm:$0xff] }
 0x41d   :  { %v10657_v38 = vpop.eup %6405  ;;  %6425 = vrcp.f32 %v3915_v23 }
 0x41e   :  { %v10660_v15 = vpop.eup %6407  ;;  %6427 = vrcp.f32 %v3916_v12  ;;  %v3954_v5 = vadd.f32 1.0, %v10657_v38 }
 0x41f   :  { %v10663_v54 = vpop.eup %6409  ;;  %6429 = vrcp.f32 %v3917_v46 }
 0x420   :  { %v10666_v17 = vpop.eup %6411  ;;  %6431 = vrcp.f32 %v3918_v11  ;;  %v3956_v38 = vadd.f32 1.0, %v10663_v54  ;;  %v13302_v54 = vld [vmem:[#allocation108_spill] sm:$0xff] }
 0x421   :  { %v10669_v32 = vpop.eup %6413  ;;  %6433 = vrcp.f32 %v3919_v26 }
 0x422   :  { %v10672_v43 = vpop.eup %6415  ;;  %6435 = vrcp.f32 %v3920_v50 }
 0x423   :  { %v10675_v21 = vpop.eup %6417  ;;  %6437 = vrcp.f32 %v3921_v16 }
 0x424   :  { %v10678_v20 = vpop.eup %6419  ;;  %6439 = vrcp.f32 %v3922_v3 }
 0x425   :  { %v10681_v23 = vpop.eup %6421  ;;  %6441 = vrcp.f32 %v3923_v8 }
 0x426   :  { %v10684_v12 = vpop.eup %6423  ;;  %6443 = vrcp.f32 %v3924_v40 }
 0x427   :  { %v10687_v46 = vpop.eup %6425  ;;  %6445 = vrcp.f32 %v3925_v52 }
 0x428   :  { %v10690_v11 = vpop.eup %6427  ;;  %6447 = vrcp.f32 %v3926_v4 }
 0x429   :  { %v10693_v26 = vpop.eup %6429  ;;  %6449 = vrcp.f32 %v3927_v31 }
 0x42a   :  { %v10696_v50 = vpop.eup %6431  ;;  %6451 = vrcp.f32 %v3928_v41 }
 0x42b   :  { %v10699_v16 = vpop.eup %6433  ;;  %6453 = vrcp.f32 %v3929_v35 }
 0x42c   :  { %v10702_v3 = vpop.eup %6435  ;;  %6455 = vrcp.f32 %v3930_v44 }
 0x42d   :  { %13271 = vst [vmem:[#allocation44_spill] sm:$0xff] %v10702_v3  ;;  %v10705_v8 = vpop.eup %6437  ;;  %6457 = vrcp.f32 %v3931_v33 }
 0x42e   :  { %13272 = vst [vmem:[#allocation46_spill] sm:$0xff] %v10705_v8  ;;  %v10708_v40 = vpop.eup %6439  ;;  %6459 = vrcp.f32 %v3932_v7 }
 0x42f   :  { %13273 = vst [vmem:[#allocation48_spill] sm:$0xff] %v10708_v40  ;;  %v10711_v52 = vpop.eup %6441  ;;  %6461 = vrcp.f32 %v3933_v57 }
 0x430   :  { %13274 = vst [vmem:[#allocation50_spill] sm:$0xff] %v10711_v52  ;;  %v10714_v4 = vpop.eup %6443  ;;  %6463 = vrcp.f32 %v3934_v49 }
 0x431   :  { %13275 = vst [vmem:[#allocation52_spill] sm:$0xff] %v10714_v4  ;;  %v10717_v31 = vpop.eup %6445  ;;  %6465 = vrcp.f32 %v3935_v1 }
 0x432   :  { %13276 = vst [vmem:[#allocation54_spill] sm:$0xff] %v10717_v31  ;;  %v10720_v41 = vpop.eup %6447  ;;  %6467 = vrcp.f32 %v3936_v42 }
 0x433   :  { %13277 = vst [vmem:[#allocation56_spill] sm:$0xff] %v10720_v41  ;;  %v10723_v35 = vpop.eup %6449  ;;  %6469 = vrcp.f32 %v3937_v13 }
 0x434   :  { %13278 = vst [vmem:[#allocation58_spill] sm:$0xff] %v10723_v35  ;;  %v10726_v44 = vpop.eup %6451  ;;  %6471 = vrcp.f32 %v3938_v56 }
 0x435   :  { %13279 = vst [vmem:[#allocation60_spill] sm:$0xff] %v10726_v44  ;;  %v10729_v33 = vpop.eup %6453  ;;  %6473 = vrcp.f32 %v3939_v24 }
 0x436   :  { %13280 = vst [vmem:[#allocation62_spill] sm:$0xff] %v10729_v33  ;;  %v10732_v7 = vpop.eup %6455  ;;  %6475 = vrcp.f32 %v3940_v25 }
 0x437   :  { %13281 = vst [vmem:[#allocation64_spill] sm:$0xff] %v10732_v7  ;;  %v10735_v57 = vpop.eup %6457  ;;  %6477 = vrcp.f32 %v3941_v60  ;;  %v13290_v60 = vld [vmem:[#allocation89_spill] sm:$0xff] }
 0x438   :  { %13282 = vst [vmem:[#allocation66_spill] sm:$0xff] %v10735_v57  ;;  %v10738_v49 = vpop.eup %6459  ;;  %6479 = vrcp.f32 %v3942_v39  ;;  %v4105_v39 = vmul.f32 %v10014_v63, %v13290_v60  ;;  %v3955_v60 = vadd.f32 1.0, %v10660_v15  ;;  %v3957_v15 = vadd.f32 1.0, %v10666_v17 }
 0x439   :  { %13283 = vst [vmem:[#allocation68_spill] sm:$0xff] %v10738_v49  ;;  %v10741_v1 = vpop.eup %6461  ;;  %6481 = vrcp.f32 %v3943_v36  ;;  %v3953_v36 = vadd.f32 1.0, %v10654_v18  ;;  %v13296_v18 = vld [vmem:[#allocation97_spill] sm:$0xff] }
 0x43a   :  { %13284 = vst [vmem:[#allocation70_spill] sm:$0xff] %v10741_v1  ;;  %v10744_v42 = vpop.eup %6463  ;;  %6483 = vrcp.f32 %v3944_v19  ;;  %v4106_v19 = vmul.f32 %v10014_v63, %v13292_v28 }
 0x43b   :  { %13285 = vst [vmem:[#allocation72_spill] sm:$0xff] %v10744_v42  ;;  %v10747_v13 = vpop.eup %6465  ;;  %6485 = vrcp.f32 %v3945_v55 }
 0x43c   :  { %13286 = vst [vmem:[#allocation80_spill] sm:$0xff] %v10747_v13  ;;  %v10750_v56 = vpop.eup %6467  ;;  %6487 = vrcp.f32 %v3946_v6  ;;  %v13294_v6 = vld [vmem:[#allocation90_spill] sm:$0xff]  ;;  %v4155_v28 = vadd.f32 %v4106_v19, %v10016_v47 }
 0x43d   :  { %13287 = vst [vmem:[#allocation81_spill] sm:$0xff] %v10750_v56  ;;  %v10753_v24 = vpop.eup %6469  ;;  %6489 = vrcp.f32 %v3947_v29  ;;  %v4107_v62 = vmul.f32 %v10014_v63, %v13294_v6  ;;  %v4154_v29 = vadd.f32 %v4105_v39, %v10016_v47 }
 0x43e   :  { %13288 = vst [vmem:[#allocation85_spill] sm:$0xff] %v10753_v24  ;;  %v10756_v25 = vpop.eup %6471  ;;  %6491 = vrcp.f32 %v3948_v48 }
 0x43f   :  { %13289 = vst [vmem:[#allocation92_spill] sm:$0xff] %v10756_v25  ;;  %v10761_v53 = vpop.eup %6473  ;;  %6493 = vrcp.f32 %v3949_v51  ;;  %v4108_v51 = vmul.f32 %v10014_v63, %v13296_v18  ;;  %v4156_v39 = vadd.f32 %v4107_v62, %v10016_v47 }
 0x440   :  { %13291 = vst [vmem:[#allocation94_spill] sm:$0xff] %v10761_v53  ;;  %v10766_v55 = vpop.eup %6475  ;;  %6495 = vrcp.f32 %v3950_v59  ;;  %v13298_v59 = vld [vmem:[#allocation100_spill] sm:$0xff] }
 0x441   :  { %13293 = vst [vmem:[#allocation102_spill] sm:$0xff] %v10766_v55  ;;  %v10772_v48 = vpop.eup %6477  ;;  %6497 = vrcp.f32 %v3951_v10  ;;  %v4109_v6 = vmul.f32 %v10014_v63, %v13298_v59  ;;  %v13300_v10 = vld [vmem:[#allocation106_spill] sm:$0xff]  ;;  %v4157_v19 = vadd.f32 %v4108_v51, %v10016_v47  ;;  %v13306_v51 = vld [vmem:[#allocation116_spill] sm:$0xff] }
 0x442   :  { %13295 = vst [vmem:[#allocation104_spill] sm:$0xff] %v10772_v48  ;;  %v10778_v53 = vpop.eup %6479  ;;  %6499 = vrcp.f32 %v3952_v14  ;;  %v4110_v18 = vmul.f32 %v10014_v63, %v13300_v10  ;;  %v4111_v14 = vmul.f32 %v10014_v63, %v13302_v54  ;;  %v5391_v10 = vmul.f32 -1.442695, %v4155_v28  ;;  %v13310_v28 = vld [vmem:[#allocation124_spill] sm:$0xff] }
 0x443   :  { %13297 = vst [vmem:[#allocation110_spill] sm:$0xff] %v10778_v53  ;;  %v10784_v55 = vpop.eup %6481  ;;  %6501 = vrcp.f32 %v3953_v36  ;;  %v4158_v59 = vadd.f32 %v4109_v6, %v10016_v47  ;;  %v5390_v53 = vmul.f32 -1.442695, %v4154_v29  ;;  %v13308_v29 = vld [vmem:[#allocation122_spill] sm:$0xff] }
 0x444   :  { %13299 = vst [vmem:[#allocation112_spill] sm:$0xff] %v10784_v55  ;;  %v10790_v48 = vpop.eup %6483  ;;  %6503 = vrcp.f32 %v3954_v5  ;;  %v13304_v55 = vld [vmem:[#allocation114_spill] sm:$0xff]  ;;  %v4159_v36 = vadd.f32 %v4110_v18, %v10016_v47  ;;  %v4113_v5 = vmul.f32 %v10014_v63, %v13306_v51  ;;  %v4160_v54 = vadd.f32 %v4111_v14, %v10016_v47 }
 0x445   :  { %13301 = vst [vmem:[#allocation118_spill] sm:$0xff] %v10790_v48  ;;  %v10795_v62 = vpop.eup %6485  ;;  %6505 = vrcp.f32 %v3955_v60  ;;  %v4112_v17 = vmul.f32 %v10014_v63, %v13304_v55  ;;  %v5392_v48 = vmul.f32 -1.442695, %v4156_v39  ;;  %v4114_v60 = vmul.f32 %v10014_v63, %v13308_v29  ;;  %v13312_v39 = vld [vmem:[#allocation130_spill] sm:$0xff] }
 0x446   :  { %13303 = vst [vmem:[#allocation120_spill] sm:$0xff] %v10795_v62  ;;  %v10800_v25 = vpop.eup %6487  ;;  %6507 = vrcp.f32 %v3956_v38  ;;  %v5393_v62 = vmul.f32 -1.442695, %v4157_v19  ;;  %v4115_v38 = vmul.f32 %v10014_v63, %v13310_v28  ;;  %v5394_v51 = vmul.f32 -1.442695, %v4158_v59  ;;  %v13314_v19 = vld [vmem:[#allocation132_spill] sm:$0xff] }
 0x447   :  { %13305 = vst [vmem:[#allocation126_spill] sm:$0xff] %v10800_v25  ;;  %v10805_v6 = vpop.eup %6489  ;;  %6509 = vrcp.f32 %v3957_v15  ;;  %v4161_v55 = vadd.f32 %v4112_v17, %v10016_v47  ;;  %v4162_v25 = vadd.f32 %v4113_v5, %v10016_v47  ;;  %v4116_v15 = vmul.f32 %v10014_v63, %v13312_v39  ;;  %v13316_v59 = vld [vmem:[#allocation133_spill] sm:$0xff] }
 0x448   :  { %13307 = vst [vmem:[#allocation128_spill] sm:$0xff] %v10805_v6  ;;  %v10810_v18 = vpop.eup %6491  ;;  %6511 = vpow2.f32 %v5390_v53  ;;  %v4163_v6 = vadd.f32 %v4114_v60, %v10016_v47  ;;  %v5395_v29 = vmul.f32 -1.442695, %v4159_v36  ;;  %v4164_v28 = vadd.f32 %v4115_v38, %v10016_v47  ;;  %v13318_v36 = vld [vmem:[#allocation134_spill] sm:$0xff] }
 0x449   :  { %13309 = vst [vmem:[#allocation3_spill] sm:$0xff] %v10810_v18  ;;  %v10815_v14 = vpop.eup %6493  ;;  %6513 = vpow2.f32 %v5391_v10  ;;  %v4117_v18 = vmul.f32 %v10014_v63, %v13314_v19  ;;  %v5396_v5 = vmul.f32 -1.442695, %v4160_v54  ;;  %v4165_v39 = vadd.f32 %v4116_v15, %v10016_v47  ;;  %v13320_v54 = vld [vmem:[#allocation136_spill] sm:$0xff] }
 0x44a   :  { %13311 = vst [vmem:[#allocation5_spill] sm:$0xff] %v10815_v14  ;;  %v10820_v17 = vpop.eup %6495  ;;  %6515 = vpow2.f32 %v5392_v48  ;;  %v4118_v14 = vmul.f32 %v10014_v63, %v13316_v59  ;;  %v5397_v60 = vmul.f32 -1.442695, %v4161_v55  ;;  %v5398_v38 = vmul.f32 -1.442695, %v4162_v25  ;;  %v13322_v55 = vld [vmem:[#allocation82_spill] sm:$0xff] }
 0x44b   :  { %13313 = vst [vmem:[#allocation7_spill] sm:$0xff] %v10820_v17  ;;  %v10825_v53 = vpop.eup %6497  ;;  %6517 = vpow2.f32 %v5393_v62  ;;  %v4119_v17 = vmul.f32 %v10014_v63, %v13318_v36  ;;  %v4166_v19 = vadd.f32 %v4117_v18, %v10016_v47  ;;  %v5399_v15 = vmul.f32 -1.442695, %v4163_v6  ;;  %v13324_v25 = vld [vmem:[#allocation87_spill] sm:$0xff]  ;;  %v13326_v6 = vld [vmem:[#allocation137_spill] sm:$0xff] }
 0x44c   :  { %13315 = vst [vmem:[#allocation9_spill] sm:$0xff] %v10825_v53  ;;  %v10830_v10 = vpop.eup %6499  ;;  %6519 = vpow2.f32 %v5394_v51  ;;  %v4120_v53 = vmul.f32 %v10014_v63, %v13320_v54  ;;  %v4167_v59 = vadd.f32 %v4118_v14, %v10016_v47  ;;  %v5400_v18 = vmul.f32 -1.442695, %v4164_v28  ;;  %v13328_v28 = vld [vmem:[#allocation138_spill] sm:$0xff] }
 0x44d   :  { %13317 = vst [vmem:[#allocation11_spill] sm:$0xff] %v10830_v10  ;;  %v10835_v48 = vpop.eup %6501  ;;  %6521 = vpow2.f32 %v5395_v29  ;;  %v4121_v10 = vmul.f32 %v10014_v63, %v13322_v55  ;;  %v4168_v36 = vadd.f32 %v4119_v17, %v10016_v47  ;;  %v5401_v14 = vmul.f32 -1.442695, %v4165_v39  ;;  %v13329_v39 = vld [vmem:[#allocation139_spill] sm:$0xff] }
 0x44e   :  { %13319 = vst [vmem:[#allocation13_spill] sm:$0xff] %v10835_v48  ;;  %v10840_v62 = vpop.eup %6503  ;;  %6523 = vpow2.f32 %v5396_v5  ;;  %v4122_v48 = vmul.f32 %v10014_v63, %v13324_v25  ;;  %v4169_v54 = vadd.f32 %v4120_v53, %v10016_v47  ;;  %v5402_v17 = vmul.f32 -1.442695, %v4166_v19  ;;  %v13330_v19 = vld [vmem:[#allocation141_spill] sm:$0xff] }
 0x44f   :  { %13321 = vst [vmem:[#allocation15_spill] sm:$0xff] %v10840_v62  ;;  %v10845_v51 = vpop.eup %6505  ;;  %6525 = vpow2.f32 %v5397_v60  ;;  %v4123_v62 = vmul.f32 %v10014_v63, %v13326_v6  ;;  %v4170_v55 = vadd.f32 %v4121_v10, %v10016_v47  ;;  %v5403_v53 = vmul.f32 -1.442695, %v4167_v59  ;;  %v13331_v59 = vld [vmem:[#allocation143_spill] sm:$0xff] }
 0x450   :  { %13323 = vst [vmem:[#allocation17_spill] sm:$0xff] %v10845_v51  ;;  %v10850_v29 = vpop.eup %6507  ;;  %6527 = vpow2.f32 %v5398_v38  ;;  %v4124_v51 = vmul.f32 %v10014_v63, %v13328_v28  ;;  %v4171_v25 = vadd.f32 %v4122_v48, %v10016_v47  ;;  %v5404_v10 = vmul.f32 -1.442695, %v4168_v36  ;;  %v13332_v36 = vld [vmem:[#allocation145_spill] sm:$0xff] }
 0x451   :  { %13325 = vst [vmem:[#allocation19_spill] sm:$0xff] %v10850_v29  ;;  %v10855_v5 = vpop.eup %6509  ;;  %6529 = vpow2.f32 %v5399_v15  ;;  %v4125_v29 = vmul.f32 %v10014_v63, %v13329_v39  ;;  %v4172_v6 = vadd.f32 %v4123_v62, %v10016_v47  ;;  %v5405_v48 = vmul.f32 -1.442695, %v4169_v54  ;;  %v13333_v54 = vld [vmem:[#allocation147_spill] sm:$0xff] }
 0x452   :  { %13327 = vst [vmem:[#allocation21_spill] sm:$0xff] %v10855_v5  ;;  %v10860_v60 = vpop.eup %6511  ;;  %6531 = vpow2.f32 %v5400_v18  ;;  %v4126_v5 = vmul.f32 %v10014_v63, %v13330_v19  ;;  %v4173_v28 = vadd.f32 %v4124_v51, %v10016_v47  ;;  %v4127_v24 = vmul.f32 %v10014_v63, %v13331_v59 }
 0x453   :  { %v10865_v38 = vpop.eup %6513  ;;  %6533 = vpow2.f32 %v5401_v14  ;;  %v4174_v39 = vadd.f32 %v4125_v29, %v10016_v47  ;;  %v5406_v62 = vmul.f32 -1.442695, %v4170_v55  ;;  %v4128_v56 = vmul.f32 %v10014_v63, %v13332_v36  ;;  %v13334_v55 = vld [vmem:[#allocation149_spill] sm:$0xff] }
 0x454   :  { %v10870_v15 = vpop.eup %6515  ;;  %6535 = vpow2.f32 %v5402_v17  ;;  %v4175_v19 = vadd.f32 %v4126_v5, %v10016_v47  ;;  %v5407_v51 = vmul.f32 -1.442695, %v4171_v25  ;;  %v4129_v13 = vmul.f32 %v10014_v63, %v13333_v54  ;;  %v13335_v25 = vld [vmem:[#allocation151_spill] sm:$0xff] }
 0x455   :  { %v10875_v18 = vpop.eup %6517  ;;  %6537 = vpow2.f32 %v5403_v53  ;;  %v4176_v59 = vadd.f32 %v4127_v24, %v10016_v47  ;;  %v5408_v29 = vmul.f32 -1.442695, %v4172_v6  ;;  %v4130_v42 = vmul.f32 %v10014_v63, %v13334_v55  ;;  %v13336_v6 = vld [vmem:[#allocation153_spill] sm:$0xff] }
 0x456   :  { %v10880_v14 = vpop.eup %6519  ;;  %6539 = vpow2.f32 %v5404_v10  ;;  %v4177_v36 = vadd.f32 %v4128_v56, %v10016_v47  ;;  %v5409_v5 = vmul.f32 -1.442695, %v4173_v28  ;;  %v4131_v1 = vmul.f32 %v10014_v63, %v13335_v25  ;;  %v13337_v28 = vld [vmem:[#allocation155_spill] sm:$0xff] }
 0x457   :  { %v10885_v17 = vpop.eup %6521  ;;  %6541 = vpow2.f32 %v5405_v48  ;;  %v4178_v54 = vadd.f32 %v4129_v13, %v10016_v47  ;;  %v5410_v24 = vmul.f32 -1.442695, %v4174_v39  ;;  %v4132_v49 = vmul.f32 %v10014_v63, %v13336_v6  ;;  %v13338_v39 = vld [vmem:[#allocation157_spill] sm:$0xff] }
 0x458   :  { %v10890_v53 = vpop.eup %6523  ;;  %6543 = vpow2.f32 %v5406_v62  ;;  %v4179_v55 = vadd.f32 %v4130_v42, %v10016_v47  ;;  %v5411_v56 = vmul.f32 -1.442695, %v4175_v19  ;;  %v4133_v57 = vmul.f32 %v10014_v63, %v13337_v28  ;;  %v13339_v19 = vld [vmem:[#allocation159_spill] sm:$0xff] }
 0x459   :  { %v10895_v10 = vpop.eup %6525  ;;  %6545 = vpow2.f32 %v5407_v51  ;;  %v4180_v25 = vadd.f32 %v4131_v1, %v10016_v47  ;;  %v5412_v13 = vmul.f32 -1.442695, %v4176_v59  ;;  %v4134_v7 = vmul.f32 %v10014_v63, %v13338_v39  ;;  %v13340_v59 = vld [vmem:[#allocation161_spill] sm:$0xff] }
 0x45a   :  { %v10900_v48 = vpop.eup %6527  ;;  %6547 = vpow2.f32 %v5408_v29  ;;  %v4181_v6 = vadd.f32 %v4132_v49, %v10016_v47  ;;  %v5413_v42 = vmul.f32 -1.442695, %v4177_v36  ;;  %v4135_v33 = vmul.f32 %v10014_v63, %v13339_v19 }
 0x45b   :  { %v10905_v62 = vpop.eup %6529  ;;  %6549 = vpow2.f32 %v5409_v5  ;;  %v4182_v28 = vadd.f32 %v4133_v57, %v10016_v47  ;;  %v5414_v1 = vmul.f32 -1.442695, %v4178_v54  ;;  %v4136_v44 = vmul.f32 %v10014_v63, %v13340_v59 }
 0x45c   :  { %v10910_v51 = vpop.eup %6531  ;;  %6551 = vpow2.f32 %v5410_v24  ;;  %v4183_v39 = vadd.f32 %v4134_v7, %v10016_v47  ;;  %v5415_v49 = vmul.f32 -1.442695, %v4179_v55  ;;  %v4137_v36 = vmul.f32 %v10014_v63, %v13064_v30 }
 0x45d   :  { %v10915_v29 = vpop.eup %6533  ;;  %6553 = vpow2.f32 %v5411_v56  ;;  %v4184_v19 = vadd.f32 %v4135_v33, %v10016_v47  ;;  %v5416_v57 = vmul.f32 -1.442695, %v4180_v25  ;;  %v4138_v54 = vmul.f32 %v10014_v63, %v13067_v22 }
 0x45e   :  { %v10920_v5 = vpop.eup %6535  ;;  %6555 = vpow2.f32 %v5412_v13  ;;  %v4185_v59 = vadd.f32 %v4136_v44, %v10016_v47  ;;  %v5417_v7 = vmul.f32 -1.442695, %v4181_v6  ;;  %v4139_v55 = vmul.f32 %v10014_v63, %v13070_v58 }
 0x45f   :  { %v10925_v24 = vpop.eup %6537  ;;  %6557 = vpow2.f32 %v5413_v42  ;;  %v4186_v30 = vadd.f32 %v4137_v36, %v10016_v47  ;;  %v5418_v33 = vmul.f32 -1.442695, %v4182_v28  ;;  %v4140_v25 = vmul.f32 %v10014_v63, %v13073_v37 }
 0x460   :  { %v10930_v56 = vpop.eup %6539  ;;  %6559 = vpow2.f32 %v5414_v1  ;;  %v4187_v22 = vadd.f32 %v4138_v54, %v10016_v47  ;;  %v5419_v44 = vmul.f32 -1.442695, %v4183_v39  ;;  %v4141_v6 = vmul.f32 %v10014_v63, %v13076_v9 }
 0x461   :  { %v10935_v13 = vpop.eup %6541  ;;  %6561 = vpow2.f32 %v5415_v49  ;;  %v4188_v58 = vadd.f32 %v4139_v55, %v10016_v47  ;;  %v5420_v36 = vmul.f32 -1.442695, %v4184_v19  ;;  %v4142_v28 = vmul.f32 %v10014_v63, %v13079_v0 }
 0x462   :  { %v10940_v42 = vpop.eup %6543  ;;  %6563 = vpow2.f32 %v5416_v57  ;;  %v4189_v37 = vadd.f32 %v4140_v25, %v10016_v47  ;;  %v5421_v54 = vmul.f32 -1.442695, %v4185_v59  ;;  %v4143_v39 = vmul.f32 %v10014_v63, %v13081_v61 }
 0x463   :  { %v10945_v1 = vpop.eup %6545  ;;  %6565 = vpow2.f32 %v5417_v7  ;;  %v4190_v9 = vadd.f32 %v4141_v6, %v10016_v47  ;;  %v5422_v55 = vmul.f32 -1.442695, %v4186_v30  ;;  %v4144_v19 = vmul.f32 %v10014_v63, %v13084_v27 }
 0x464   :  { %v10950_v49 = vpop.eup %6547  ;;  %6567 = vpow2.f32 %v5418_v33  ;;  %v4191_v0 = vadd.f32 %v4142_v28, %v10016_v47  ;;  %v5423_v25 = vmul.f32 -1.442695, %v4187_v22  ;;  %v4145_v59 = vmul.f32 %v10014_v63, %v13087_v34 }
 0x465   :  { %v10955_v57 = vpop.eup %6549  ;;  %6569 = vpow2.f32 %v5419_v44  ;;  %v4192_v61 = vadd.f32 %v4143_v39, %v10016_v47  ;;  %v5424_v6 = vmul.f32 -1.442695, %v4188_v58  ;;  %v4146_v30 = vmul.f32 %v10014_v63, %v13090_v45  ;;  %v13341_v58 = vld [vmem:[#allocation185_spill] sm:$0xff] }
 0x466   :  { %v10960_v7 = vpop.eup %6551  ;;  %6571 = vpow2.f32 %v5420_v36  ;;  %v4193_v27 = vadd.f32 %v4144_v19, %v10016_v47  ;;  %v5425_v28 = vmul.f32 -1.442695, %v4189_v37  ;;  %v4147_v22 = vmul.f32 %v10014_v63, %v13093_v2  ;;  %v13342_v37 = vld [vmem:[#allocation187_spill] sm:$0xff] }
 0x467   :  { %v10965_v33 = vpop.eup %6553  ;;  %6573 = vpow2.f32 %v5421_v54  ;;  %v4194_v34 = vadd.f32 %v4145_v59, %v10016_v47  ;;  %v5426_v39 = vmul.f32 -1.442695, %v4190_v9  ;;  %v4148_v35 = vmul.f32 %v10014_v63, %v13341_v58  ;;  %v13343_v9 = vld [vmem:[#allocation189_spill] sm:$0xff] }
 0x468   :  { %v10970_v44 = vpop.eup %6555  ;;  %6575 = vpow2.f32 %v5422_v55  ;;  %v4195_v45 = vadd.f32 %v4146_v30, %v10016_v47  ;;  %v5427_v19 = vmul.f32 -1.442695, %v4191_v0  ;;  %v4149_v41 = vmul.f32 %v10014_v63, %v13342_v37  ;;  %v13344_v0 = vld [vmem:[#allocation191_spill] sm:$0xff] }
 0x469   :  { %v10975_v36 = vpop.eup %6557  ;;  %6577 = vpow2.f32 %v5423_v25  ;;  %v4196_v2 = vadd.f32 %v4147_v22, %v10016_v47  ;;  %v5428_v59 = vmul.f32 -1.442695, %v4192_v61  ;;  %v4150_v31 = vmul.f32 %v10014_v63, %v13343_v9  ;;  %v13345_v61 = vld [vmem:[#allocation193_spill] sm:$0xff] }
 0x46a   :  { %v10980_v54 = vpop.eup %6559  ;;  %6579 = vpow2.f32 %v5424_v6  ;;  %v4197_v58 = vadd.f32 %v4148_v35, %v10016_v47  ;;  %v5429_v30 = vmul.f32 -1.442695, %v4193_v27  ;;  %v4151_v4 = vmul.f32 %v10014_v63, %v13344_v0  ;;  %v13346_v27 = vld [vmem:[#allocation195_spill] sm:$0xff] }
 0x46b   :  { %v10985_v55 = vpop.eup %6561  ;;  %6581 = vpow2.f32 %v5425_v28  ;;  %v4198_v37 = vadd.f32 %v4149_v41, %v10016_v47  ;;  %v5430_v22 = vmul.f32 -1.442695, %v4194_v34  ;;  %v4152_v52 = vmul.f32 %v10014_v63, %v13345_v61 }
 0x46c   :  { %v10990_v25 = vpop.eup %6563  ;;  %6583 = vpow2.f32 %v5426_v39  ;;  %v4199_v9 = vadd.f32 %v4150_v31, %v10016_v47  ;;  %v5431_v35 = vmul.f32 -1.442695, %v4195_v45  ;;  %v4153_v40 = vmul.f32 %v10014_v63, %v13346_v27 }
 0x46d   :  { %v10995_v6 = vpop.eup %6565  ;;  %6585 = vpow2.f32 %v5427_v19  ;;  %v4200_v0 = vadd.f32 %v4151_v4, %v10016_v47  ;;  %v5432_v41 = vmul.f32 -1.442695, %v4196_v2  ;;  %v4201_v34 = vadd.f32 %v4152_v52, %v10016_v47 }
 0x46e   :  { %v11000_v28 = vpop.eup %6567  ;;  %6587 = vpow2.f32 %v5428_v59  ;;  %v5433_v8 = vmul.f32 -1.442695, %v4197_v58  ;;  %v4202_v31 = vadd.f32 %v4153_v40, %v10016_v47  ;;  %v5434_v45 = vmul.f32 -1.442695, %v4198_v37 }
 0x46f   :  { %v11005_v39 = vpop.eup %6569  ;;  %6589 = vpow2.f32 %v5429_v30  ;;  %v5435_v27 = vmul.f32 -1.442695, %v4199_v9  ;;  %v5436_v4 = vmul.f32 -1.442695, %v4200_v0  ;;  %v5437_v52 = vmul.f32 -1.442695, %v4201_v34 }
 0x470   :  { %v11008_v61 = vpop.eup %6571  ;;  %6591 = vpow2.f32 %v5430_v22  ;;  %v5438_v58 = vmul.f32 -1.442695, %v4202_v31  ;;  %v4350_v40 = vadd.f32 1.0, %v10860_v60  ;;  %v4351_v22 = vadd.f32 1.0, %v10865_v38 }
 0x471   :  { %v11011_v19 = vpop.eup %6573  ;;  %6593 = vpow2.f32 %v5431_v35  ;;  %v4353_v0 = vadd.f32 1.0, %v10875_v18  ;;  %v4354_v34 = vadd.f32 1.0, %v10880_v14  ;;  %v4355_v31 = vadd.f32 1.0, %v10885_v17 }
 0x472   :  { %v11013_v3 = vpop.eup %6575  ;;  %6595 = vpow2.f32 %v5432_v41  ;;  %v4358_v14 = vadd.f32 1.0, %v10900_v48  ;;  %v4359_v17 = vadd.f32 1.0, %v10905_v62  ;;  %v4362_v48 = vadd.f32 1.0, %v10920_v5 }
 0x473   :  { %v11015_v2 = vpop.eup %6577  ;;  %6597 = vpow2.f32 %v5433_v8  ;;  %v4352_v8 = vadd.f32 1.0, %v10870_v15  ;;  %v4363_v62 = vadd.f32 1.0, %v10925_v24  ;;  %v4366_v5 = vadd.f32 1.0, %v10940_v42 }
 0x474   :  { %v11017_v59 = vpop.eup %6579  ;;  %6599 = vpow2.f32 %v5434_v45  ;;  %v4356_v45 = vadd.f32 1.0, %v10890_v53  ;;  %v4360_v53 = vadd.f32 1.0, %v10910_v51  ;;  %v4364_v51 = vadd.f32 1.0, %v10930_v56 }
 0x475   :  { %v11019_v30 = vpop.eup %6581  ;;  %6601 = vpow2.f32 %v5435_v27  ;;  %v4357_v27 = vadd.f32 1.0, %v10895_v10  ;;  %v4361_v10 = vadd.f32 1.0, %v10915_v29  ;;  %v4365_v29 = vadd.f32 1.0, %v10935_v13 }
 0x476   :  { %v11022_v37 = vpop.eup %6583  ;;  %6603 = vpow2.f32 %v5436_v4  ;;  %v4367_v24 = vadd.f32 1.0, %v10945_v1  ;;  %v4368_v56 = vadd.f32 1.0, %v10950_v49  ;;  %v4369_v13 = vadd.f32 1.0, %v10955_v57 }
 0x477   :  { %v11025_v9 = vpop.eup %6585  ;;  %6605 = vpow2.f32 %v5437_v52  ;;  %v4370_v42 = vadd.f32 1.0, %v10960_v7  ;;  %v4371_v1 = vadd.f32 1.0, %v10965_v33  ;;  %v4372_v49 = vadd.f32 1.0, %v10970_v44  ;;  %v13358_v7 = vld [vmem:[#allocation96_spill] sm:$0xff]  ;;  %v13360_v44 = vld [vmem:[#allocation99_spill] sm:$0xff] }
 0x478   :  { %v11028_v35 = vpop.eup %6587  ;;  %6607 = vpow2.f32 %v5438_v58  ;;  %v4373_v57 = vadd.f32 1.0, %v10975_v36 }
 0x479   :  { %v11031_v41 = vpop.eup %6589  ;;  %6609 = vrcp.f32 %v4350_v40 }
 0x47a   :  { %v11034_v60 = vpop.eup %6591  ;;  %6611 = vrcp.f32 %v4351_v22 }
 0x47b   :  { %v11037_v38 = vpop.eup %6593  ;;  %6613 = vrcp.f32 %v4352_v8 }
 0x47c   :  { %v11040_v15 = vpop.eup %6595  ;;  %6615 = vrcp.f32 %v4353_v0 }
 0x47d   :  { %v11043_v18 = vpop.eup %6597  ;;  %6617 = vrcp.f32 %v4354_v34 }
 0x47e   :  { %v11046_v4 = vpop.eup %6599  ;;  %6619 = vrcp.f32 %v4355_v31 }
 0x47f   :  { %v11049_v52 = vpop.eup %6601  ;;  %6621 = vrcp.f32 %v4356_v45 }
 0x480   :  { %v11052_v58 = vpop.eup %6603  ;;  %6623 = vrcp.f32 %v4357_v27 }
 0x481   :  { %v11055_v40 = vpop.eup %6605  ;;  %6625 = vrcp.f32 %v4358_v14 }
 0x482   :  { %v11058_v22 = vpop.eup %6607  ;;  %6627 = vrcp.f32 %v4359_v17 }
 0x483   :  { %v11061_v8 = vpop.eup %6609  ;;  %6629 = vrcp.f32 %v4360_v53 }
 0x484   :  { %13347 = vst [vmem:[#allocation23_spill] sm:$0xff] %v11061_v8  ;;  %v11064_v0 = vpop.eup %6611  ;;  %6631 = vrcp.f32 %v4361_v10 }
 0x485   :  { %13348 = vst [vmem:[#allocation25_spill] sm:$0xff] %v11064_v0  ;;  %v11067_v34 = vpop.eup %6613  ;;  %6633 = vrcp.f32 %v4362_v48  ;;  %v13357_v48 = vld [vmem:[#allocation95_spill] sm:$0xff] }
 0x486   :  { %13349 = vst [vmem:[#allocation27_spill] sm:$0xff] %v11067_v34  ;;  %v11070_v31 = vpop.eup %6615  ;;  %6635 = vrcp.f32 %v4363_v62  ;;  %v11093_v62 = vmul.f32 %v10014_v63, %v13357_v48  ;;  %v13363_v48 = vld [vmem:[#allocation107_spill] sm:$0xff] }
 0x487   :  { %13350 = vst [vmem:[#allocation29_spill] sm:$0xff] %v11070_v31  ;;  %v11073_v45 = vpop.eup %6617  ;;  %6637 = vrcp.f32 %v4364_v51  ;;  %v11097_v51 = vmul.f32 %v10014_v63, %v13358_v7  ;;  %v11115_v7 = vmul.f32 %v10014_v63, %v13363_v48  ;;  %v4377_v48 = vadd.f32 1.0, %v10995_v6 }
 0x488   :  { %13351 = vst [vmem:[#allocation31_spill] sm:$0xff] %v11073_v45  ;;  %v11076_v27 = vpop.eup %6619  ;;  %6639 = vrcp.f32 %v4365_v29  ;;  %v4374_v29 = vadd.f32 1.0, %v10980_v54 }
 0x489   :  { %13352 = vst [vmem:[#allocation33_spill] sm:$0xff] %v11076_v27  ;;  %v11079_v14 = vpop.eup %6621  ;;  %6641 = vrcp.f32 %v4366_v5  ;;  %v11104_v5 = vmul.f32 %v10014_v63, %v13360_v44  ;;  %v4376_v44 = vadd.f32 1.0, %v10990_v25 }
 0x48a   :  { %13353 = vst [vmem:[#allocation35_spill] sm:$0xff] %v11079_v14  ;;  %v11082_v17 = vpop.eup %6623  ;;  %6643 = vrcp.f32 %v4367_v24  ;;  %v13361_v24 = vld [vmem:[#allocation105_spill] sm:$0xff] }
 0x48b   :  { %13354 = vst [vmem:[#allocation37_spill] sm:$0xff] %v11082_v17  ;;  %v11085_v53 = vpop.eup %6625  ;;  %6645 = vrcp.f32 %v4368_v56  ;;  %v11108_v36 = vmul.f32 %v10014_v63, %v13361_v24  ;;  %v13366_v24 = vld [vmem:[#allocation115_spill] sm:$0xff] }
 0x48c   :  { %13355 = vst [vmem:[#allocation39_spill] sm:$0xff] %v11085_v53  ;;  %v11088_v10 = vpop.eup %6627  ;;  %6647 = vrcp.f32 %v4369_v13  ;;  %v4375_v13 = vadd.f32 1.0, %v10985_v55 }
 0x48d   :  { %13356 = vst [vmem:[#allocation41_spill] sm:$0xff] %v11088_v10  ;;  %v11099_v33 = vpop.eup %6629  ;;  %6649 = vrcp.f32 %v4370_v42  ;;  %v11126_v10 = vmul.f32 %v10014_v63, %v13366_v24  ;;  %v4378_v24 = vadd.f32 1.0, %v11000_v28 }
 0x48e   :  { %13359 = vst [vmem:[#allocation43_spill] sm:$0xff] %v11099_v33  ;;  %v11110_v56 = vpop.eup %6631  ;;  %6651 = vrcp.f32 %v4371_v1  ;;  %v13364_v33 = vld [vmem:[#allocation113_spill] sm:$0xff] }
 0x48f   :  { %13362 = vst [vmem:[#allocation45_spill] sm:$0xff] %v11110_v56  ;;  %v11119_v54 = vmul.f32 %v10014_v63, %v13364_v33  ;;  %v11121_v42 = vpop.eup %6633  ;;  %6653 = vrcp.f32 %v4372_v49  ;;  %v13367_v56 = vld [vmem:[#allocation121_spill] sm:$0xff]  ;;  %v13369_v33 = vld [vmem:[#allocation123_spill] sm:$0xff] }
 0x490   :  { %13365 = vst [vmem:[#allocation47_spill] sm:$0xff] %v11121_v42  ;;  %v11130_v55 = vmul.f32 %v10014_v63, %v13367_v56  ;;  %v11132_v1 = vpop.eup %6635  ;;  %6655 = vrcp.f32 %v4373_v57  ;;  %v11137_v53 = vmul.f32 %v10014_v63, %v13369_v33  ;;  %v13370_v42 = vld [vmem:[#allocation129_spill] sm:$0xff]  ;;  %v13372_v56 = vld [vmem:[#allocation131_spill] sm:$0xff]  ;;  %v4379_v33 = vadd.f32 1.0, %v11005_v39 }
 0x491   :  { %13368 = vst [vmem:[#allocation49_spill] sm:$0xff] %v11132_v1  ;;  %v11141_v25 = vmul.f32 %v10014_v63, %v13370_v42  ;;  %v11143_v49 = vpop.eup %6637  ;;  %6657 = vrcp.f32 %v4374_v29  ;;  %v11148_v17 = vmul.f32 %v10014_v63, %v13372_v56  ;;  %v13373_v1 = vld [vmem:[#allocation74_spill] sm:$0xff]  ;;  %v13375_v42 = vld [vmem:[#allocation75_spill] sm:$0xff]  ;;  %v4380_v56 = vadd.f32 1.0, %v11008_v61 }
 0x492   :  { %13371 = vst [vmem:[#allocation51_spill] sm:$0xff] %v11143_v49  ;;  %v11152_v6 = vmul.f32 %v10014_v63, %v13373_v1  ;;  %v11154_v57 = vpop.eup %6639  ;;  %6659 = vrcp.f32 %v4375_v13  ;;  %v11159_v14 = vmul.f32 %v10014_v63, %v13375_v42  ;;  %v13376_v49 = vld [vmem:[#allocation135_spill] sm:$0xff]  ;;  %v13378_v1 = vld [vmem:[#allocation76_spill] sm:$0xff]  ;;  %v4381_v42 = vadd.f32 1.0, %v11011_v19 }
 0x493   :  { %13374 = vst [vmem:[#allocation53_spill] sm:$0xff] %v11154_v57  ;;  %v11163_v28 = vmul.f32 %v10014_v63, %v13376_v49  ;;  %v11165_v29 = vpop.eup %6641  ;;  %6661 = vrcp.f32 %v4376_v44  ;;  %v11170_v27 = vmul.f32 %v10014_v63, %v13378_v1  ;;  %v13379_v57 = vld [vmem:[#allocation77_spill] sm:$0xff]  ;;  %v13381_v49 = vld [vmem:[#allocation83_spill] sm:$0xff]  ;;  %v4382_v1 = vadd.f32 1.0, %v11013_v3 }
 0x494   :  { %13377 = vst [vmem:[#allocation55_spill] sm:$0xff] %v11165_v29  ;;  %v11174_v39 = vmul.f32 %v10014_v63, %v13379_v57  ;;  %v11176_v13 = vpop.eup %6643  ;;  %6663 = vrcp.f32 %v4377_v48  ;;  %v11181_v45 = vmul.f32 %v10014_v63, %v13381_v49  ;;  %v13382_v29 = vld [vmem:[#allocation88_spill] sm:$0xff]  ;;  %v13384_v57 = vld [vmem:[#allocation98_spill] sm:$0xff]  ;;  %v4383_v49 = vadd.f32 1.0, %v11015_v2 }
 0x495   :  { %13380 = vst [vmem:[#allocation57_spill] sm:$0xff] %v11176_v13  ;;  %v11185_v61 = vmul.f32 %v10014_v63, %v13382_v29  ;;  %v11187_v44 = vpop.eup %6645  ;;  %6665 = vrcp.f32 %v4378_v24  ;;  %v11192_v31 = vmul.f32 %v10014_v63, %v13384_v57  ;;  %v13385_v13 = vld [vmem:[#allocation140_spill] sm:$0xff]  ;;  %v13387_v29 = vld [vmem:[#allocation142_spill] sm:$0xff]  ;;  %v4384_v57 = vadd.f32 1.0, %v11017_v59 }
 0x496   :  { %13383 = vst [vmem:[#allocation59_spill] sm:$0xff] %v11187_v44  ;;  %v11196_v19 = vmul.f32 %v10014_v63, %v13385_v13  ;;  %v11198_v48 = vpop.eup %6647  ;;  %6667 = vrcp.f32 %v4379_v33  ;;  %v11203_v34 = vmul.f32 %v10014_v63, %v13387_v29  ;;  %v13388_v44 = vld [vmem:[#allocation144_spill] sm:$0xff]  ;;  %v13390_v13 = vld [vmem:[#allocation146_spill] sm:$0xff]  ;;  %v4385_v29 = vadd.f32 1.0, %v11019_v30 }
 0x497   :  { %13386 = vst [vmem:[#allocation61_spill] sm:$0xff] %v11198_v48  ;;  %v11207_v3 = vmul.f32 %v10014_v63, %v13388_v44  ;;  %v11209_v24 = vpop.eup %6649  ;;  %6669 = vrcp.f32 %v4380_v56  ;;  %v11214_v0 = vmul.f32 %v10014_v63, %v13390_v13  ;;  %v13391_v48 = vld [vmem:[#allocation148_spill] sm:$0xff]  ;;  %v13394_v44 = vld [vmem:[#allocation150_spill] sm:$0xff]  ;;  %v4386_v13 = vadd.f32 1.0, %v11022_v37 }
 0x498   :  { %13389 = vst [vmem:[#allocation63_spill] sm:$0xff] %v11209_v24  ;;  %v11218_v2 = vmul.f32 %v10014_v63, %v13391_v48  ;;  %v11220_v33 = vpop.eup %6651  ;;  %6671 = vrcp.f32 %v4381_v42  ;;  %v11225_v8 = vmul.f32 %v10014_v63, %v13394_v44  ;;  %v13396_v24 = vld [vmem:[#allocation152_spill] sm:$0xff]  ;;  %v13398_v48 = vld [vmem:[#allocation154_spill] sm:$0xff]  ;;  %v13402_v44 = vld [vmem:[#allocation163_spill] sm:$0xff] }
 0x499   :  { %13393 = vst [vmem:[#allocation67_spill] sm:$0xff] %v11220_v33  ;;  %v11229_v59 = vmul.f32 %v10014_v63, %v13396_v24  ;;  %v11231_v56 = vpop.eup %6653  ;;  %6673 = vrcp.f32 %v4382_v1  ;;  %v13400_v33 = vld [vmem:[#allocation156_spill] sm:$0xff]  ;;  %v4387_v24 = vadd.f32 1.0, %v11025_v9  ;;  %v4389_v9 = vadd.f32 1.0, %v11031_v41 }
 0x49a   :  { %13392 = vst [vmem:[#allocation65_spill] sm:$0xff] %v11218_v2  ;;  %13395 = vst [vmem:[#allocation69_spill] sm:$0xff] %v11225_v8  ;;  %v11236_v2 = vmul.f32 %v10014_v63, %v13398_v48  ;;  %v11240_v30 = vmul.f32 %v10014_v63, %v13400_v33  ;;  %v11242_v42 = vpop.eup %6655  ;;  %v11246_v8 = vadd.f32 %v10669_v32, %v13402_v44  ;;  %6675 = vrcp.f32 %v4383_v49  ;;  %v13405_v48 = vld [vmem:[#allocation165_spill] sm:$0xff]  ;;  %v13409_v49 = vld [vmem:[#allocation162_spill] sm:$0xff] }
 0x49b   :  { %13397 = vst [vmem:[#allocation71_spill] sm:$0xff] %v11231_v56  ;;  %13401 = vst [vmem:[#allocation89_spill] sm:$0xff] %v11242_v42  ;;  %v13403_v56 = vld [vmem:[#allocation158_spill] sm:$0xff]  ;;  %v11253_v1 = vpop.eup %6657  ;;  %v4388_v33 = vadd.f32 1.0, %v11028_v35  ;;  %6677 = vrcp.f32 %v4384_v57  ;;  %v13407_v42 = vld [vmem:[#allocation160_spill] sm:$0xff] }
 0x49c   :  { %13399 = vst [vmem:[#allocation73_spill] sm:$0xff] %v11236_v2  ;;  %v11251_v37 = vmul.f32 %v10014_v63, %v13403_v56  ;;  %13404 = vst [vmem:[#allocation86_spill] sm:$0xff] %v11253_v1  ;;  %v11257_v2 = vadd.f32 %v10672_v43, %v13405_v48  ;;  %v11262_v32 = vmul.f32 %v10014_v63, %v13407_v42  ;;  %v11264_v44 = vpop.eup %6659  ;;  %6679 = vrcp.f32 %v4385_v29  ;;  %v13410_v1 = vld [vmem:[#allocation164_spill] sm:$0xff]  ;;  %v13412_v35 = vld [vmem:[#allocation167_spill] sm:$0xff] }
 0x49d   :  { %13408 = vst [vmem:[#allocation97_spill] sm:$0xff] %v11264_v44  ;;  %v11269_v56 = vmul.f32 %v10014_v63, %v13409_v49  ;;  %v11273_v43 = vmul.f32 %v10014_v63, %v13410_v1  ;;  %v11275_v48 = vpop.eup %6661  ;;  %v11279_v57 = vadd.f32 %v10675_v21, %v13412_v35  ;;  %v4390_v42 = vadd.f32 1.0, %v11034_v60  ;;  %v13413_v44 = vld [vmem:[#allocation166_spill] sm:$0xff]  ;;  %v13415_v49 = vld [vmem:[#allocation169_spill] sm:$0xff] }
 0x49e   :  { %13406 = vst [vmem:[#allocation90_spill] sm:$0xff] %v11257_v2  ;;  %13411 = vst [vmem:[#allocation100_spill] sm:$0xff] %v11275_v48  ;;  %6681 = vrcp.f32 %v4386_v13  ;;  %v11284_v41 = vmul.f32 %v10014_v63, %v13413_v44  ;;  %v11286_v29 = vpop.eup %6663  ;;  %v11290_v2 = vadd.f32 %v10678_v20, %v13415_v49  ;;  %v4391_v1 = vadd.f32 1.0, %v11037_v38  ;;  %v13417_v48 = vld [vmem:[#allocation168_spill] sm:$0xff]  ;;  %v13419_v13 = vld [vmem:[#allocation170_spill] sm:$0xff] }
 0x49f   :  { %13414 = vst [vmem:[#allocation106_spill] sm:$0xff] %v11286_v29  ;;  %6683 = vrcp.f32 %v4387_v24  ;;  %v11295_v21 = vmul.f32 %v10014_v63, %v13417_v48  ;;  %v11297_v35 = vpop.eup %6665  ;;  %v4392_v60 = vadd.f32 1.0, %v11040_v15  ;;  %v11302_v44 = vmul.f32 %v10014_v63, %v13419_v13  ;;  %v13420_v29 = vld [vmem:[#allocation172_spill] sm:$0xff]  ;;  %v13422_v38 = vld [vmem:[#allocation171_spill] sm:$0xff]  ;;  %v13425_v13 = vld [vmem:[#allocation173_spill] sm:$0xff] }
 0x4a0   :  { %13416 = vst [vmem:[#allocation108_spill] sm:$0xff] %v11290_v2  ;;  %13418 = vst [vmem:[#allocation114_spill] sm:$0xff] %v11297_v35  ;;  %6685 = vrcp.f32 %v4388_v33  ;;  %v11306_v20 = vmul.f32 %v10014_v63, %v13420_v29  ;;  %v11308_v49 = vpop.eup %6667  ;;  %v11312_v24 = vadd.f32 %v10681_v23, %v13422_v38  ;;  %v4393_v48 = vadd.f32 1.0, %v11043_v18  ;;  %v13423_v35 = vld [vmem:[#allocation174_spill] sm:$0xff] }
 0x4a1   :  { %13421 = vst [vmem:[#allocation116_spill] sm:$0xff] %v11308_v49  ;;  %6687 = vrcp.f32 %v4389_v9  ;;  %v11317_v15 = vmul.f32 %v10014_v63, %v13423_v35  ;;  %v11319_v33 = vpop.eup %6669  ;;  %v11323_v2 = vadd.f32 %v10684_v12, %v13425_v13  ;;  %v4394_v29 = vadd.f32 1.0, %v11046_v4  ;;  %v13426_v49 = vld [vmem:[#allocation176_spill] sm:$0xff]  ;;  %v13428_v9 = vld [vmem:[#allocation178_spill] sm:$0xff] }
 0x4a2   :  { %13424 = vst [vmem:[#allocation122_spill] sm:$0xff] %v11319_v33  ;;  %6689 = vrcp.f32 %v4390_v42  ;;  %v11328_v23 = vmul.f32 %v10014_v63, %v13426_v49  ;;  %v11330_v38 = vpop.eup %6671  ;;  %v4395_v18 = vadd.f32 1.0, %v11049_v52  ;;  %v11335_v35 = vmul.f32 %v10014_v63, %v13428_v9  ;;  %v13430_v42 = vld [vmem:[#allocation180_spill] sm:$0xff] }
 0x4a3   :  { %13427 = vst [vmem:[#allocation124_spill] sm:$0xff] %v11330_v38  ;;  %6691 = vrcp.f32 %v4391_v1  ;;  %v4595_v12 = vadd.f32 %v11093_v62, %v10016_v47  ;;  %v11339_v13 = vpop.eup %6673  ;;  %v4396_v4 = vadd.f32 1.0, %v11052_v58  ;;  %v11344_v49 = vmul.f32 %v10014_v63, %v13430_v42  ;;  %v13432_v38 = vld [vmem:[#allocation175_spill] sm:$0xff] }
 0x4a4   :  { %13429 = vst [vmem:[#allocation130_spill] sm:$0xff] %v11339_v13  ;;  %6693 = vrcp.f32 %v4392_v60  ;;  %v4596_v52 = vadd.f32 %v11097_v51, %v10016_v47  ;;  %v11348_v1 = vpop.eup %6675  ;;  %v11352_v9 = vadd.f32 %v10687_v46, %v13432_v38  ;;  %v4397_v62 = vadd.f32 1.0, %v11055_v40  ;;  %v13434_v13 = vld [vmem:[#allocation182_spill] sm:$0xff]  ;;  %v13436_v40 = vld [vmem:[#allocation184_spill] sm:$0xff] }
 0x4a5   :  { %13431 = vst [vmem:[#allocation132_spill] sm:$0xff] %v11348_v1  ;;  %6695 = vrcp.f32 %v4393_v48  ;;  %v4597_v58 = vadd.f32 %v11104_v5, %v10016_v47  ;;  %v11357_v60 = vpop.eup %6677  ;;  %v4398_v42 = vadd.f32 1.0, %v11058_v22  ;;  %v11362_v51 = vmul.f32 %v10014_v63, %v13434_v13 }
 0x4a6   :  { %13433 = vst [vmem:[#allocation133_spill] sm:$0xff] %v11357_v60  ;;  %6697 = vrcp.f32 %v4394_v29  ;;  %v4598_v1 = vadd.f32 %v11108_v36, %v10016_v47  ;;  %v11366_v46 = vpop.eup %6679  ;;  %v11370_v48 = vmul.f32 %v10014_v63, %v13436_v40  ;;  %v4599_v5 = vadd.f32 %v11115_v7, %v10016_v47  ;;  %v13438_v29 = vld [vmem:[#allocation177_spill] sm:$0xff]  ;;  %v13440_v40 = vld [vmem:[#allocation186_spill] sm:$0xff] }
 0x4a7   :  { %13435 = vst [vmem:[#allocation134_spill] sm:$0xff] %v11366_v46  ;;  %6699 = vrcp.f32 %v4395_v18  ;;  %v5439_v38 = vmul.f32 -1.442695, %v4595_v12  ;;  %v11378_v13 = vadd.f32 %v10690_v11, %v13438_v29  ;;  %v4600_v36 = vadd.f32 %v11119_v54, %v10016_v47  ;;  %v13442_v11 = vld [vmem:[#allocation188_spill] sm:$0xff]  ;;  %v13444_v29 = vld [vmem:[#allocation179_spill] sm:$0xff] }
 0x4a8   :  { %v11374_v22 = vpop.eup %6681  ;;  %6701 = vrcp.f32 %v4396_v4  ;;  %v5440_v46 = vmul.f32 -1.442695, %v4596_v52  ;;  %v11386_v60 = vmul.f32 %v10014_v63, %v13440_v40  ;;  %v4601_v7 = vadd.f32 %v11126_v10, %v10016_v47 }
 0x4a9   :  { %13437 = vst [vmem:[#allocation136_spill] sm:$0xff] %v11374_v22  ;;  %v11382_v18 = vpop.eup %6683  ;;  %6703 = vrcp.f32 %v4397_v62  ;;  %v5441_v12 = vmul.f32 -1.442695, %v4597_v58  ;;  %v11394_v4 = vmul.f32 %v10014_v63, %v13442_v11  ;;  %v4602_v54 = vadd.f32 %v11130_v55, %v10016_v47 }
 0x4aa   :  { %13439 = vst [vmem:[#allocation82_spill] sm:$0xff] %v11382_v18  ;;  %v11390_v22 = vpop.eup %6685  ;;  %6705 = vrcp.f32 %v4398_v42  ;;  %v5442_v52 = vmul.f32 -1.442695, %v4598_v1  ;;  %v11402_v40 = vadd.f32 %v10693_v26, %v13444_v29  ;;  %v4603_v10 = vadd.f32 %v11137_v53, %v10016_v47  ;;  %v13448_v26 = vld [vmem:[#allocation192_spill] sm:$0xff] }
 0x4ab   :  { %13441 = vst [vmem:[#allocation87_spill] sm:$0xff] %v11390_v22  ;;  %v11398_v62 = vpop.eup %6687  ;;  %6707 = vpow2.f32 %v5439_v38  ;;  %v5443_v58 = vmul.f32 -1.442695, %v4599_v5  ;;  %v13446_v22 = vld [vmem:[#allocation190_spill] sm:$0xff]  ;;  %v4604_v55 = vadd.f32 %v11141_v25, %v10016_v47  ;;  %v5444_v1 = vmul.f32 -1.442695, %v4600_v36 }
 0x4ac   :  { %13443 = vst [vmem:[#allocation137_spill] sm:$0xff] %v11398_v62  ;;  %v11406_v42 = vpop.eup %6689  ;;  %v11410_v11 = vmul.f32 %v10014_v63, %v13446_v22  ;;  %6709 = vpow2.f32 %v5440_v46  ;;  %v11418_v29 = vmul.f32 %v10014_v63, %v13448_v26  ;;  %v4605_v53 = vadd.f32 %v11148_v17, %v10016_v47  ;;  %v13450_v22 = vld [vmem:[#allocation181_spill] sm:$0xff]  ;;  %v13452_v26 = vld [vmem:[#allocation194_spill] sm:$0xff] }
 0x4ad   :  { %13445 = vst [vmem:[#allocation138_spill] sm:$0xff] %v11406_v42  ;;  %v11414_v62 = vpop.eup %6691  ;;  %6711 = vpow2.f32 %v5441_v12  ;;  %v5445_v5 = vmul.f32 -1.442695, %v4601_v7  ;;  %v11426_v42 = vadd.f32 %v10696_v50, %v13450_v22  ;;  %v4606_v25 = vadd.f32 %v11152_v6, %v10016_v47  ;;  %v13454_v50 = vld [vmem:[#allocation196_spill] sm:$0xff] }
 0x4ae   :  { %13447 = vst [vmem:[#allocation139_spill] sm:$0xff] %v11414_v62  ;;  %v11422_v38 = vpop.eup %6693  ;;  %6713 = vpow2.f32 %v5442_v52  ;;  %v5446_v46 = vmul.f32 -1.442695, %v4602_v54  ;;  %v11434_v62 = vmul.f32 %v10014_v63, %v13452_v26  ;;  %v4607_v17 = vadd.f32 %v11159_v14, %v10016_v47  ;;  %v13456_v26 = vld [vmem:[#allocation183_spill] sm:$0xff] }
 0x4af   :  { %13449 = vst [vmem:[#allocation141_spill] sm:$0xff] %v11422_v38  ;;  %v11430_v36 = vpop.eup %6695  ;;  %6715 = vpow2.f32 %v5443_v58  ;;  %v5447_v7 = vmul.f32 -1.442695, %v4603_v10  ;;  %v11442_v22 = vmul.f32 %v10014_v63, %v13454_v50  ;;  %v4608_v6 = vadd.f32 %v11163_v28, %v10016_v47  ;;  %v13458_v50 = vld [vmem:[#allocation197_spill] sm:$0xff] }
 0x4b0   :  { %13451 = vst [vmem:[#allocation143_spill] sm:$0xff] %v11430_v36  ;;  %v11438_v12 = vpop.eup %6697  ;;  %6717 = vpow2.f32 %v5444_v1  ;;  %v5448_v54 = vmul.f32 -1.442695, %v4604_v55  ;;  %v11450_v36 = vadd.f32 %v10699_v16, %v13456_v26  ;;  %v4609_v14 = vadd.f32 %v11170_v27, %v10016_v47  ;;  %v13460_v16 = vld [vmem:[#allocation199_spill] sm:$0xff]  ;;  %v13461_v26 = vld [vmem:[#allocation44_spill] sm:$0xff] }
 0x4b1   :  { %13453 = vst [vmem:[#allocation145_spill] sm:$0xff] %v11438_v12  ;;  %v11446_v52 = vpop.eup %6699  ;;  %6719 = vpow2.f32 %v5445_v5  ;;  %v5449_v10 = vmul.f32 -1.442695, %v4605_v53  ;;  %v11458_v12 = vmul.f32 %v10014_v63, %v13458_v50  ;;  %v4610_v28 = vadd.f32 %v11174_v39, %v10016_v47  ;;  %v13463_v63 = vld [vmem:[#allocation200_spill] sm:$0xff]  ;;  %v13464_v50 = vld [vmem:[#allocation46_spill] sm:$0xff] }
 0x4b2   :  { %13455 = vst [vmem:[#allocation147_spill] sm:$0xff] %v11446_v52  ;;  %v11454_v58 = vpop.eup %6701  ;;  %6721 = vpow2.f32 %v5446_v46  ;;  %v5450_v55 = vmul.f32 -1.442695, %v4606_v25  ;;  %v11466_v52 = vadd.f32 %v13461_v26, %v13460_v16  ;;  %v4611_v27 = vadd.f32 %v11181_v45, %v10016_v47  ;;  %v13465_v16 = vld [vmem:[#allocation201_spill] sm:$0xff]  ;;  %v13466_v26 = vld [vmem:[#allocation48_spill] sm:$0xff] }
 0x4b3   :  { %13457 = vst [vmem:[#allocation149_spill] sm:$0xff] %v11454_v58  ;;  %v11462_v1 = vpop.eup %6703  ;;  %6723 = vpow2.f32 %v5447_v7  ;;  %v5451_v53 = vmul.f32 -1.442695, %v4607_v17  ;;  %v11474_v58 = vadd.f32 %v13464_v50, %v13463_v63  ;;  %v4612_v39 = vadd.f32 %v11185_v61, %v10016_v47  ;;  %v13467_v63 = vld [vmem:[#allocation198_spill] sm:$0xff] }
 0x4b4   :  { %13459 = vst [vmem:[#allocation151_spill] sm:$0xff] %v11462_v1  ;;  %v11470_v5 = vpop.eup %6705  ;;  %6725 = vpow2.f32 %v5448_v54  ;;  %v5452_v25 = vmul.f32 -1.442695, %v4608_v6  ;;  %v11482_v1 = vadd.f32 %v13466_v26, %v13465_v16  ;;  %v4613_v45 = vadd.f32 %v11192_v31, %v10016_v47  ;;  %v13468_v50 = vld [vmem:[#allocation50_spill] sm:$0xff]  ;;  %v13469_v16 = vld [vmem:[#allocation79_spill] sm:$0xff]  ;;  %v13470_v26 = vld [vmem:[#allocation52_spill] sm:$0xff] }
 0x4b5   :  { %13462 = vst [vmem:[#allocation153_spill] sm:$0xff] %v11470_v5  ;;  %v11478_v46 = vpop.eup %6707  ;;  %6727 = vpow2.f32 %v5449_v10  ;;  %v5453_v17 = vmul.f32 -1.442695, %v4609_v14  ;;  %v11490_v5 = vadd.f32 %v13468_v50, %v13467_v63  ;;  %v4614_v61 = vadd.f32 %v11196_v19, %v10016_v47  ;;  %v13471_v63 = vld [vmem:[#allocation78_spill] sm:$0xff] }
 0x4b6   :  { %v11486_v7 = vpop.eup %6709  ;;  %6729 = vpow2.f32 %v5450_v55  ;;  %v5454_v6 = vmul.f32 -1.442695, %v4610_v28  ;;  %v11498_v38 = vadd.f32 %v13470_v26, %v13469_v16  ;;  %v4615_v31 = vadd.f32 %v11203_v34, %v10016_v47  ;;  %v13472_v50 = vld [vmem:[#allocation54_spill] sm:$0xff]  ;;  %v13475_v16 = vld [vmem:[#allocation84_spill] sm:$0xff] }
 0x4b7   :  { %v11494_v54 = vpop.eup %6711  ;;  %6731 = vpow2.f32 %v5451_v53  ;;  %v5455_v14 = vmul.f32 -1.442695, %v4611_v27  ;;  %v11506_v18 = vadd.f32 %v13472_v50, %v13471_v63  ;;  %v4616_v19 = vadd.f32 %v11207_v3, %v10016_v47  ;;  %v13476_v26 = vld [vmem:[#allocation56_spill] sm:$0xff]  ;;  %v13479_v63 = vld [vmem:[#allocation91_spill] sm:$0xff]  ;;  %v13480_v50 = vld [vmem:[#allocation58_spill] sm:$0xff] }
 0x4b8   :  { %v11502_v10 = vpop.eup %6713  ;;  %6733 = vpow2.f32 %v5452_v25  ;;  %v5456_v28 = vmul.f32 -1.442695, %v4612_v39  ;;  %v11514_v33 = vadd.f32 %v13476_v26, %v13475_v16  ;;  %v4617_v34 = vadd.f32 %v11214_v0, %v10016_v47  ;;  %v13482_v3 = vld [vmem:[#allocation65_spill] sm:$0xff]  ;;  %v13485_v26 = vld [vmem:[#allocation60_spill] sm:$0xff] }
 0x4b9   :  { %13473 = vst [vmem:[#allocation155_spill] sm:$0xff] %v11506_v18  ;;  %v11510_v55 = vpop.eup %6715  ;;  %6735 = vpow2.f32 %v5453_v17  ;;  %v5457_v27 = vmul.f32 -1.442695, %v4613_v45  ;;  %v11522_v18 = vadd.f32 %v13480_v50, %v13479_v63  ;;  %v4618_v39 = vadd.f32 %v13482_v3, %v10016_v47  ;;  %v13484_v16 = vld [vmem:[#allocation93_spill] sm:$0xff]  ;;  %v13489_v50 = vld [vmem:[#allocation62_spill] sm:$0xff] }
 0x4ba   :  { %13474 = vst [vmem:[#allocation157_spill] sm:$0xff] %v11510_v55  ;;  %13477 = vst [vmem:[#allocation159_spill] sm:$0xff] %v11514_v33  ;;  %v11518_v53 = vpop.eup %6717  ;;  %6737 = vpow2.f32 %v5454_v6  ;;  %v5458_v25 = vmul.f32 -1.442695, %v4614_v61  ;;  %v11530_v33 = vadd.f32 %v13485_v26, %v13484_v16  ;;  %v13486_v0 = vld [vmem:[#allocation69_spill] sm:$0xff]  ;;  %v4620_v61 = vadd.f32 %v11229_v59, %v10016_v47  ;;  %v13492_v16 = vld [vmem:[#allocation103_spill] sm:$0xff] }
 0x4bb   :  { %13478 = vst [vmem:[#allocation161_spill] sm:$0xff] %v11518_v53  ;;  %13481 = vst [vmem:[#allocation185_spill] sm:$0xff] %v11522_v18  ;;  %v11526_v55 = vpop.eup %6719  ;;  %v4619_v45 = vadd.f32 %v13486_v0, %v10016_v47  ;;  %6739 = vpow2.f32 %v5455_v14  ;;  %v5459_v17 = vmul.f32 -1.442695, %v4615_v31  ;;  %v13488_v63 = vld [vmem:[#allocation101_spill] sm:$0xff]  ;;  %v13493_v26 = vld [vmem:[#allocation64_spill] sm:$0xff]  ;;  %v4622_v59 = vadd.f32 %v11240_v30, %v10016_v47 }
 0x4bc   :  { %13483 = vst [vmem:[#allocation187_spill] sm:$0xff] %v11526_v55  ;;  %v11534_v53 = vpop.eup %6721  ;;  %v11538_v18 = vadd.f32 %v13489_v50, %v13488_v63  ;;  %6741 = vpow2.f32 %v5456_v28  ;;  %v5460_v6 = vmul.f32 -1.442695, %v4616_v19  ;;  %v11546_v55 = vadd.f32 %v13493_v26, %v13492_v16  ;;  %v13494_v14 = vld [vmem:[#allocation73_spill] sm:$0xff]  ;;  %v13497_v50 = vld [vmem:[#allocation66_spill] sm:$0xff]  ;;  %v13499_v16 = vld [vmem:[#allocation111_spill] sm:$0xff] }
 0x4bd   :  { %13487 = vst [vmem:[#allocation189_spill] sm:$0xff] %v11534_v53  ;;  %v11542_v3 = vpop.eup %6723  ;;  %v4621_v31 = vadd.f32 %v13494_v14, %v10016_v47  ;;  %6743 = vpow2.f32 %v5457_v27  ;;  %v5461_v0 = vmul.f32 -1.442695, %v4617_v34  ;;  %v13496_v63 = vld [vmem:[#allocation109_spill] sm:$0xff]  ;;  %v5462_v19 = vmul.f32 -1.442695, %v4618_v39 }
 0x4be   :  { %13490 = vst [vmem:[#allocation191_spill] sm:$0xff] %v11538_v18  ;;  %13491 = vst [vmem:[#allocation193_spill] sm:$0xff] %v11542_v3  ;;  %v11550_v53 = vpop.eup %6725  ;;  %v11554_v18 = vadd.f32 %v13497_v50, %v13496_v63  ;;  %6745 = vpow2.f32 %v5458_v25  ;;  %v13500_v26 = vld [vmem:[#allocation68_spill] sm:$0xff]  ;;  %v4623_v34 = vadd.f32 %v11251_v37, %v10016_v47  ;;  %v5463_v27 = vmul.f32 -1.442695, %v4619_v45  ;;  %v13502_v63 = vld [vmem:[#allocation117_spill] sm:$0xff] }
 0x4bf   :  { %13495 = vst [vmem:[#allocation195_spill] sm:$0xff] %v11550_v53  ;;  %v11558_v28 = vpop.eup %6727  ;;  %v11562_v3 = vadd.f32 %v13500_v26, %v13499_v16  ;;  %6747 = vpow2.f32 %v5459_v17  ;;  %v13503_v50 = vld [vmem:[#allocation70_spill] sm:$0xff]  ;;  %v4624_v30 = vadd.f32 %v11262_v32, %v10016_v47  ;;  %v5464_v39 = vmul.f32 -1.442695, %v4620_v61  ;;  %v13505_v16 = vld [vmem:[#allocation119_spill] sm:$0xff]  ;;  %v13506_v26 = vld [vmem:[#allocation72_spill] sm:$0xff] }
 0x4c0   :  { %13498 = vst [vmem:[#allocation95_spill] sm:$0xff] %v11558_v28  ;;  %v11566_v14 = vpop.eup %6729  ;;  %v11570_v53 = vadd.f32 %v13503_v50, %v13502_v63  ;;  %6749 = vpow2.f32 %v5460_v6  ;;  %v11578_v28 = vadd.f32 %v13506_v26, %v13505_v16  ;;  %v4625_v37 = vadd.f32 %v11269_v56, %v10016_v47  ;;  %v13507_v63 = vld [vmem:[#allocation125_spill] sm:$0xff]  ;;  %v13508_v50 = vld [vmem:[#allocation80_spill] sm:$0xff]  ;;  %v13510_v16 = vld [vmem:[#allocation127_spill] sm:$0xff] }
 0x4c1   :  { %13501 = vst [vmem:[#allocation96_spill] sm:$0xff] %v11566_v14  ;;  %v11574_v25 = vpop.eup %6731  ;;  %6751 = vpow2.f32 %v5461_v0  ;;  %v5465_v45 = vmul.f32 -1.442695, %v4621_v31  ;;  %v11586_v14 = vadd.f32 %v13508_v50, %v13507_v63  ;;  %v4626_v32 = vadd.f32 %v11273_v43, %v10016_v47  ;;  %v13511_v26 = vld [vmem:[#allocation81_spill] sm:$0xff]  ;;  %v13513_v50 = vld [vmem:[#allocation2_spill] sm:$0xff] }
 0x4c2   :  { %13504 = vst [vmem:[#allocation99_spill] sm:$0xff] %v11574_v25  ;;  %v11582_v17 = vpop.eup %6733  ;;  %6753 = vpow2.f32 %v5462_v19  ;;  %v5466_v61 = vmul.f32 -1.442695, %v4622_v59  ;;  %v11594_v25 = vadd.f32 %v13511_v26, %v13510_v16  ;;  %v4627_v56 = vadd.f32 %v11284_v41, %v10016_v47  ;;  %v13514_v16 = vld [vmem:[#allocation85_spill] sm:$0xff] }
 0x4c3   :  { %v11590_v6 = vpop.eup %6735  ;;  %6755 = vpow2.f32 %v5463_v27  ;;  %v5467_v31 = vmul.f32 -1.442695, %v4623_v34  ;;  %v4628_v63 = vadd.f32 %v11295_v21, %v10016_v47  ;;  %v4629_v43 = vadd.f32 %v11302_v44, %v10016_v47  ;;  %v13517_v21 = vld [vmem:[#allocation92_spill] sm:$0xff] }
 0x4c4   :  { %13509 = vst [vmem:[#allocation105_spill] sm:$0xff] %v11590_v6  ;;  %v11598_v0 = vpop.eup %6737  ;;  %6757 = vpow2.f32 %v5464_v39  ;;  %v5468_v59 = vmul.f32 -1.442695, %v4624_v30  ;;  %v11608_v26 = vadd.f32 %v13514_v16, %v13513_v50  ;;  %v4630_v41 = vadd.f32 %v11306_v20, %v10016_v47  ;;  %v13520_v16 = vld [vmem:[#allocation6_spill] sm:$0xff] }
 0x4c5   :  { %13512 = vst [vmem:[#allocation107_spill] sm:$0xff] %v11598_v0  ;;  %v11604_v19 = vpop.eup %6739  ;;  %6759 = vpow2.f32 %v5465_v45  ;;  %v5469_v34 = vmul.f32 -1.442695, %v4625_v37  ;;  %v13516_v0 = vld [vmem:[#allocation4_spill] sm:$0xff]  ;;  %v4631_v44 = vadd.f32 %v11317_v15, %v10016_v47  ;;  %v5470_v30 = vmul.f32 -1.442695, %v4626_v32 }
 0x4c6   :  { %v11612_v27 = vpop.eup %6741  ;;  %v11616_v6 = vadd.f32 %v13517_v21, %v13516_v0  ;;  %6761 = vpow2.f32 %v5466_v61  ;;  %v4632_v50 = vadd.f32 %v11328_v23, %v10016_v47  ;;  %v4633_v20 = vadd.f32 %v11335_v35, %v10016_v47  ;;  %v13521_v0 = vld [vmem:[#allocation94_spill] sm:$0xff] }
 0x4c7   :  { %13515 = vst [vmem:[#allocation113_spill] sm:$0xff] %v11612_v27  ;;  %v11620_v39 = vpop.eup %6743  ;;  %6763 = vpow2.f32 %v5467_v31  ;;  %v5471_v37 = vmul.f32 -1.442695, %v4627_v56  ;;  %v11630_v21 = vadd.f32 %v13521_v0, %v13520_v16  ;;  %v4634_v15 = vadd.f32 %v11344_v49, %v10016_v47  ;;  %v13524_v23 = vld [vmem:[#allocation102_spill] sm:$0xff] }
 0x4c8   :  { %13518 = vst [vmem:[#allocation115_spill] sm:$0xff] %v11620_v39  ;;  %v11626_v45 = vpop.eup %6745  ;;  %6765 = vpow2.f32 %v5468_v59  ;;  %v5472_v32 = vmul.f32 -1.442695, %v4628_v63  ;;  %v13523_v39 = vld [vmem:[#allocation8_spill] sm:$0xff]  ;;  %v4635_v35 = vadd.f32 %v11362_v51, %v10016_v47  ;;  %v5473_v56 = vmul.f32 -1.442695, %v4629_v43 }
 0x4c9   :  { %13519 = vst [vmem:[#allocation121_spill] sm:$0xff] %v11626_v45  ;;  %v11634_v61 = vpop.eup %6747  ;;  %v11638_v27 = vadd.f32 %v13524_v23, %v13523_v39  ;;  %6767 = vpow2.f32 %v5469_v34  ;;  %v4636_v16 = vadd.f32 %v11370_v48, %v10016_v47  ;;  %v4637_v49 = vadd.f32 %v11386_v60, %v10016_v47  ;;  %v13527_v0 = vld [vmem:[#allocation10_spill] sm:$0xff]  ;;  %v13528_v39 = vld [vmem:[#allocation104_spill] sm:$0xff] }
 0x4ca   :  { %13522 = vst [vmem:[#allocation123_spill] sm:$0xff] %v11634_v61  ;;  %v11642_v31 = vpop.eup %6749  ;;  %6769 = vpow2.f32 %v5470_v30  ;;  %v5474_v63 = vmul.f32 -1.442695, %v4630_v41  ;;  %v11652_v23 = vadd.f32 %v13528_v39, %v13527_v0  ;;  %v4638_v51 = vadd.f32 %v11394_v4, %v10016_v47  ;;  %v13531_v48 = vld [vmem:[#allocation110_spill] sm:$0xff] }
 0x4cb   :  { %13525 = vst [vmem:[#allocation129_spill] sm:$0xff] %v11642_v31  ;;  %v11648_v59 = vpop.eup %6751  ;;  %6771 = vpow2.f32 %v5471_v37  ;;  %v5475_v43 = vmul.f32 -1.442695, %v4631_v44  ;;  %v13530_v31 = vld [vmem:[#allocation12_spill] sm:$0xff]  ;;  %v4639_v60 = vadd.f32 %v11410_v11, %v10016_v47  ;;  %v5476_v41 = vmul.f32 -1.442695, %v4632_v50 }
 0x4cc   :  { %13526 = vst [vmem:[#allocation131_spill] sm:$0xff] %v11648_v59  ;;  %v11656_v34 = vpop.eup %6753  ;;  %v11660_v61 = vadd.f32 %v13531_v48, %v13530_v31  ;;  %6773 = vpow2.f32 %v5472_v32  ;;  %v4640_v0 = vadd.f32 %v11418_v29, %v10016_v47  ;;  %v4641_v4 = vadd.f32 %v11434_v62, %v10016_v47  ;;  %v13534_v39 = vld [vmem:[#allocation14_spill] sm:$0xff]  ;;  %v13535_v31 = vld [vmem:[#allocation112_spill] sm:$0xff] }
 0x4cd   :  { %13529 = vst [vmem:[#allocation74_spill] sm:$0xff] %v11656_v34  ;;  %v11664_v30 = vpop.eup %6755  ;;  %6775 = vpow2.f32 %v5473_v56  ;;  %v5477_v44 = vmul.f32 -1.442695, %v4633_v20  ;;  %v11674_v48 = vadd.f32 %v13535_v31, %v13534_v39  ;;  %v4642_v11 = vadd.f32 %v11442_v22, %v10016_v47  ;;  %v13538_v29 = vld [vmem:[#allocation118_spill] sm:$0xff]  ;;  %v13541_v31 = vld [vmem:[#allocation120_spill] sm:$0xff] }
 0x4ce   :  { %13532 = vst [vmem:[#allocation75_spill] sm:$0xff] %v11664_v30  ;;  %v11670_v37 = vpop.eup %6757  ;;  %6777 = vpow2.f32 %v5474_v63  ;;  %v5478_v50 = vmul.f32 -1.442695, %v4634_v15  ;;  %v13537_v30 = vld [vmem:[#allocation16_spill] sm:$0xff]  ;;  %v4643_v62 = vadd.f32 %v11458_v12, %v10016_v47  ;;  %v5479_v20 = vmul.f32 -1.442695, %v4635_v35 }
 0x4cf   :  { %13533 = vst [vmem:[#allocation135_spill] sm:$0xff] %v11670_v37  ;;  %v11678_v32 = vpop.eup %6759  ;;  %v11682_v34 = vadd.f32 %v13538_v29, %v13537_v30  ;;  %6779 = vpow2.f32 %v5475_v43  ;;  %v13540_v39 = vld [vmem:[#allocation18_spill] sm:$0xff]  ;;  %v13542_v22 = vld [vmem:[#allocation20_spill] sm:$0xff]  ;;  %v13549_v12 = vld [vmem:[#allocation3_spill] sm:$0xff]  ;;  %v5481_v43 = vmul.f32 -1.442695, %v4637_v49 }
 0x4d0   :  { %13536 = vst [vmem:[#allocation76_spill] sm:$0xff] %v11678_v32  ;;  %v11686_v56 = vpop.eup %6761  ;;  %v11690_v37 = vadd.f32 %v13541_v31, %v13540_v39  ;;  %v13543_v63 = vld [vmem:[#allocation126_spill] sm:$0xff]  ;;  %6781 = vpow2.f32 %v5476_v41  ;;  %v5480_v32 = vmul.f32 -1.442695, %v4636_v16  ;;  %v13546_v29 = vld [vmem:[#allocation128_spill] sm:$0xff]  ;;  %v13555_v16 = vld [vmem:[#allocation7_spill] sm:$0xff] }
 0x4d1   :  { %13539 = vst [vmem:[#allocation77_spill] sm:$0xff] %v11686_v56  ;;  %v11694_v15 = vadd.f32 %v13543_v63, %v13542_v22  ;;  %v11696_v59 = vpop.eup %6763  ;;  %v13545_v30 = vld [vmem:[#allocation22_spill] sm:$0xff]  ;;  %v13548_v47 = vld [vmem:[#allocation24_spill] sm:$0xff]  ;;  %6783 = vpow2.f32 %v5477_v44  ;;  %v13552_v56 = vld [vmem:[#allocation5_spill] sm:$0xff] }
 0x4d2   :  { %13544 = vst [vmem:[#allocation83_spill] sm:$0xff] %v11696_v59  ;;  %v11700_v45 = vadd.f32 %v13546_v29, %v13545_v30  ;;  %v11704_v35 = vadd.f32 %v13549_v12, %v13548_v47  ;;  %v11706_v39 = vpop.eup %6765  ;;  %v13551_v31 = vld [vmem:[#allocation26_spill] sm:$0xff]  ;;  %v13554_v41 = vld [vmem:[#allocation28_spill] sm:$0xff]  ;;  %6785 = vpow2.f32 %v5478_v50  ;;  %v5482_v59 = vmul.f32 -1.442695, %v4638_v51  ;;  %v13561_v49 = vld [vmem:[#allocation11_spill] sm:$0xff] }
 0x4d3   :  { %v11710_v22 = vadd.f32 %v13552_v56, %v13551_v31  ;;  %v11714_v63 = vadd.f32 %v13555_v16, %v13554_v41  ;;  %v11716_v30 = vpop.eup %6767  ;;  %v13557_v29 = vld [vmem:[#allocation30_spill] sm:$0xff]  ;;  %v13560_v44 = vld [vmem:[#allocation32_spill] sm:$0xff]  ;;  %6787 = vpow2.f32 %v5479_v20  ;;  %v13567_v51 = vld [vmem:[#allocation15_spill] sm:$0xff] }
 0x4d4   :  { %13547 = vst [vmem:[#allocation88_spill] sm:$0xff] %v11700_v45  ;;  %13550 = vst [vmem:[#allocation98_spill] sm:$0xff] %v11704_v35  ;;  %v13558_v45 = vld [vmem:[#allocation9_spill] sm:$0xff]  ;;  %v11724_v12 = vadd.f32 %v13561_v49, %v13560_v44  ;;  %v5483_v35 = vmul.f32 -1.442695, %v4639_v60  ;;  %v11726_v56 = vpop.eup %6769  ;;  %v13563_v31 = vld [vmem:[#allocation34_spill] sm:$0xff]  ;;  %6789 = vpow2.f32 %v5480_v32 }
 0x4d5   :  { %13553 = vst [vmem:[#allocation140_spill] sm:$0xff] %v11710_v22  ;;  %13556 = vst [vmem:[#allocation142_spill] sm:$0xff] %v11714_v63  ;;  %v11720_v47 = vadd.f32 %v13558_v45, %v13557_v29  ;;  %v13564_v22 = vld [vmem:[#allocation13_spill] sm:$0xff]  ;;  %v13566_v50 = vld [vmem:[#allocation36_spill] sm:$0xff]  ;;  %v5484_v63 = vmul.f32 -1.442695, %v4640_v0  ;;  %v11736_v45 = vpop.eup %6771  ;;  %6791 = vpow2.f32 %v5481_v43 }
 0x4d6   :  { %13562 = vst [vmem:[#allocation146_spill] sm:$0xff] %v11724_v12  ;;  %v11730_v41 = vadd.f32 %v13564_v22, %v13563_v31  ;;  %v11734_v16 = vadd.f32 %v13567_v51, %v13566_v50  ;;  %v5485_v29 = vmul.f32 -1.442695, %v4641_v4  ;;  %v5486_v44 = vmul.f32 -1.442695, %v4642_v11  ;;  %v11738_v20 = vpop.eup %6773  ;;  %v13569_v60 = vld [vmem:[#allocation23_spill] sm:$0xff] }
 0x4d7   :  { %13559 = vst [vmem:[#allocation144_spill] sm:$0xff] %v11720_v47  ;;  %v5487_v49 = vmul.f32 -1.442695, %v4643_v62  ;;  %v11742_v12 = vadd.f32 %v13569_v60, %v11246_v8  ;;  %v13570_v22 = vld [vmem:[#allocation90_spill] sm:$0xff]  ;;  %v13571_v31 = vld [vmem:[#allocation25_spill] sm:$0xff]  ;;  %v13572_v50 = vld [vmem:[#allocation27_spill] sm:$0xff]  ;;  %6793 = vpow2.f32 %v5482_v59  ;;  %v11752_v0 = vpop.eup %6775 }
 0x4d8   :  { %13565 = vst [vmem:[#allocation148_spill] sm:$0xff] %v11730_v41  ;;  %13568 = vst [vmem:[#allocation150_spill] sm:$0xff] %v11734_v16  ;;  %v11746_v41 = vadd.f32 %v13571_v31, %v13570_v22  ;;  %v11750_v32 = vadd.f32 %v13572_v50, %v11279_v57  ;;  %v13573_v4 = vld [vmem:[#allocation108_spill] sm:$0xff]  ;;  %v13574_v11 = vld [vmem:[#allocation29_spill] sm:$0xff]  ;;  %6795 = vpow2.f32 %v5483_v35  ;;  %v11766_v22 = vpop.eup %6777 }
 0x4d9   :  { %v11756_v62 = vadd.f32 %v13574_v11, %v13573_v4  ;;  %v13575_v43 = vld [vmem:[#allocation31_spill] sm:$0xff]  ;;  %v13576_v8 = vld [vmem:[#allocation33_spill] sm:$0xff]  ;;  %6797 = vpow2.f32 %v5484_v63  ;;  %v4791_v4 = vadd.f32 1.0, %v11478_v46 }
 0x4da   :  { %v11760_v51 = vadd.f32 %v13575_v43, %v11312_v24  ;;  %v11764_v60 = vadd.f32 %v13576_v8, %v11323_v2  ;;  %v13577_v57 = vld [vmem:[#allocation35_spill] sm:$0xff]  ;;  %v13578_v31 = vld [vmem:[#allocation37_spill] sm:$0xff]  ;;  %v11777_v24 = vpop.eup %6779  ;;  %6799 = vpow2.f32 %v5485_v29 }
 0x4db   :  { %v11770_v59 = vadd.f32 %v13577_v57, %v11352_v9  ;;  %v11774_v50 = vadd.f32 %v13578_v31, %v11378_v13  ;;  %v13579_v11 = vld [vmem:[#allocation39_spill] sm:$0xff]  ;;  %v13580_v35 = vld [vmem:[#allocation41_spill] sm:$0xff]  ;;  %v4792_v9 = vadd.f32 1.0, %v11486_v7  ;;  %v11788_v8 = vpop.eup %6781  ;;  %6801 = vpow2.f32 %v5486_v44 }
 0x4dc   :  { %v11781_v2 = vadd.f32 %v13579_v11, %v11402_v40  ;;  %v11785_v43 = vadd.f32 %v13580_v35, %v11426_v42  ;;  %13581 = vst [vmem:[#allocation152_spill] sm:$0xff] %v11788_v8  ;;  %v13582_v13 = vld [vmem:[#allocation43_spill] sm:$0xff]  ;;  %v13583_v46 = vld [vmem:[#allocation45_spill] sm:$0xff]  ;;  %v4793_v40 = vadd.f32 1.0, %v11494_v54  ;;  %v11799_v31 = vpop.eup %6783  ;;  %6803 = vpow2.f32 %v5487_v49 }
 0x4dd   :  { %v11792_v63 = vadd.f32 %v13582_v13, %v11450_v36  ;;  %v11796_v57 = vadd.f32 %v13583_v46, %v11466_v52  ;;  %13584 = vst [vmem:[#allocation154_spill] sm:$0xff] %v11799_v31  ;;  %v13585_v42 = vld [vmem:[#allocation47_spill] sm:$0xff]  ;;  %v13586_v7 = vld [vmem:[#allocation49_spill] sm:$0xff]  ;;  %v4794_v36 = vadd.f32 1.0, %v11502_v10  ;;  %v11810_v35 = vpop.eup %6785  ;;  %6805 = vrcp.f32 %v4791_v4 }
 0x4de   :  { %v11803_v29 = vadd.f32 %v13585_v42, %v11474_v58  ;;  %v11807_v11 = vadd.f32 %v13586_v7, %v11482_v1  ;;  %13587 = vst [vmem:[#allocation156_spill] sm:$0xff] %v11810_v35  ;;  %v13588_v52 = vld [vmem:[#allocation51_spill] sm:$0xff]  ;;  %v13589_v54 = vld [vmem:[#allocation53_spill] sm:$0xff]  ;;  %v11821_v42 = vpop.eup %6787  ;;  %6807 = vrcp.f32 %v4792_v9 }
 0x4df   :  { %v11814_v44 = vadd.f32 %v13588_v52, %v11490_v5  ;;  %v11818_v13 = vadd.f32 %v13589_v54, %v11498_v38  ;;  %v13590_v46 = vld [vmem:[#allocation157_spill] sm:$0xff]  ;;  %13591 = vst [vmem:[#allocation163_spill] sm:$0xff] %v11821_v42  ;;  %v13592_v1 = vld [vmem:[#allocation155_spill] sm:$0xff]  ;;  %v11832_v52 = vpop.eup %6789  ;;  %6809 = vrcp.f32 %v4793_v40 }
 0x4e0   :  { %v4795_v58 = vadd.f32 1.0, %v13590_v46  ;;  %v13593_v7 = vld [vmem:[#allocation55_spill] sm:$0xff]  ;;  %v13595_v16 = vld [vmem:[#allocation57_spill] sm:$0xff]  ;;  %13597 = vst [vmem:[#allocation158_spill] sm:$0xff] %v11832_v52  ;;  %6811 = vrcp.f32 %v4794_v36 }
 0x4e1   :  { %v11825_v49 = vadd.f32 %v13593_v7, %v13592_v1  ;;  %v13594_v10 = vld [vmem:[#allocation159_spill] sm:$0xff]  ;;  %v13596_v35 = vld [vmem:[#allocation161_spill] sm:$0xff]  ;;  %v11843_v7 = vpop.eup %6791 }
 0x4e2   :  { %v11829_v47 = vadd.f32 %v13595_v16, %v13594_v10  ;;  %v4796_v5 = vadd.f32 1.0, %v13596_v35  ;;  %v13598_v38 = vld [vmem:[#allocation185_spill] sm:$0xff]  ;;  %v13599_v54 = vld [vmem:[#allocation59_spill] sm:$0xff]  ;;  %13602 = vst [vmem:[#allocation165_spill] sm:$0xff] %v11843_v7  ;;  %6813 = vrcp.f32 %v4795_v58  ;;  %v13617_v58 = vld [vmem:[#allocation106_spill] sm:$0xff] }
 0x4e3   :  { %v11836_v31 = vadd.f32 %v13599_v54, %v13598_v38  ;;  %v13600_v4 = vld [vmem:[#allocation61_spill] sm:$0xff]  ;;  %v13601_v42 = vld [vmem:[#allocation187_spill] sm:$0xff]  ;;  %v11854_v54 = vpop.eup %6793 }
 0x4e4   :  { %v11840_v46 = vadd.f32 %v13600_v4, %v11530_v33  ;;  %v4797_v1 = vadd.f32 1.0, %v13601_v42  ;;  %v13603_v16 = vld [vmem:[#allocation191_spill] sm:$0xff]  ;;  %v13606_v52 = vld [vmem:[#allocation189_spill] sm:$0xff]  ;;  %13607 = vst [vmem:[#allocation160_spill] sm:$0xff] %v11854_v54  ;;  %6815 = vrcp.f32 %v4796_v5  ;;  %v13621_v5 = vld [vmem:[#allocation116_spill] sm:$0xff] }
 0x4e5   :  { %v13604_v10 = vld [vmem:[#allocation63_spill] sm:$0xff]  ;;  %v4798_v38 = vadd.f32 1.0, %v13606_v52  ;;  %v13609_v40 = vld [vmem:[#allocation89_spill] sm:$0xff] }
 0x4e6   :  { %v11847_v8 = vadd.f32 %v13604_v10, %v13603_v16  ;;  %v13605_v9 = vld [vmem:[#allocation67_spill] sm:$0xff]  ;;  %v11862_v42 = vadd.f32 %v13609_v40, %v11562_v3  ;;  %v13610_v7 = vld [vmem:[#allocation193_spill] sm:$0xff]  ;;  %v11865_v10 = vpop.eup %6795  ;;  %v13616_v3 = vld [vmem:[#allocation100_spill] sm:$0xff]  ;;  %6817 = vrcp.f32 %v4797_v1 }
 0x4e7   :  { %v11851_v35 = vadd.f32 %v13605_v9, %v11546_v55  ;;  %v13608_v33 = vld [vmem:[#allocation71_spill] sm:$0xff]  ;;  %v4799_v16 = vadd.f32 1.0, %v13610_v7  ;;  %13611 = vst [vmem:[#allocation162_spill] sm:$0xff] %v11865_v10  ;;  %v13612_v55 = vld [vmem:[#allocation86_spill] sm:$0xff]  ;;  %v13613_v36 = vld [vmem:[#allocation97_spill] sm:$0xff]  ;;  %v11880_v40 = vadd.f32 %v13616_v3, %v11586_v14  ;;  %v11884_v7 = vadd.f32 %v13617_v58, %v11594_v25 }
 0x4e8   :  { %v11858_v4 = vadd.f32 %v13608_v33, %v11554_v18  ;;  %v11869_v9 = vadd.f32 %v13612_v55, %v11570_v53  ;;  %v11873_v52 = vadd.f32 %v13613_v36, %v11578_v28  ;;  %v13614_v54 = vld [vmem:[#allocation195_spill] sm:$0xff]  ;;  %v11876_v33 = vpop.eup %6797  ;;  %v13620_v28 = vld [vmem:[#allocation114_spill] sm:$0xff]  ;;  %6819 = vrcp.f32 %v4798_v38  ;;  %v13625_v1 = vld [vmem:[#allocation124_spill] sm:$0xff] }
 0x4e9   :  { %v4800_v18 = vadd.f32 1.0, %v13614_v54  ;;  %13615 = vst [vmem:[#allocation164_spill] sm:$0xff] %v11876_v33  ;;  %v13618_v10 = vld [vmem:[#allocation95_spill] sm:$0xff]  ;;  %v11887_v55 = vpop.eup %6799  ;;  %v11891_v36 = vadd.f32 %v13620_v28, %v11608_v26  ;;  %v11895_v54 = vadd.f32 %v13621_v5, %v11616_v6  ;;  %v13622_v33 = vld [vmem:[#allocation96_spill] sm:$0xff]  ;;  %v13624_v25 = vld [vmem:[#allocation122_spill] sm:$0xff]  ;;  %6821 = vrcp.f32 %v4799_v16 }
 0x4ea   :  { %v4801_v53 = vadd.f32 1.0, %v13618_v10  ;;  %13619 = vst [vmem:[#allocation167_spill] sm:$0xff] %v11887_v55  ;;  %v4802_v14 = vadd.f32 1.0, %v13622_v33  ;;  %v11898_v3 = vpop.eup %6801  ;;  %v11902_v58 = vadd.f32 %v13624_v25, %v11630_v21  ;;  %v11906_v10 = vadd.f32 %v13625_v1, %v11638_v27  ;;  %v13626_v55 = vld [vmem:[#allocation99_spill] sm:$0xff]  ;;  %v13628_v6 = vld [vmem:[#allocation130_spill] sm:$0xff]  ;;  %v13629_v38 = vld [vmem:[#allocation132_spill] sm:$0xff] }
 0x4eb   :  { %13623 = vst [vmem:[#allocation166_spill] sm:$0xff] %v11898_v3  ;;  %v4803_v26 = vadd.f32 1.0, %v13626_v55  ;;  %v11909_v28 = vpop.eup %6803  ;;  %v11913_v5 = vadd.f32 %v13628_v6, %v11652_v23  ;;  %v11917_v33 = vadd.f32 %v13629_v38, %v11660_v61  ;;  %v4804_v21 = vadd.f32 1.0, %v11582_v17  ;;  %v13631_v27 = vld [vmem:[#allocation133_spill] sm:$0xff]  ;;  %v13632_v16 = vld [vmem:[#allocation134_spill] sm:$0xff]  ;;  %v13635_v6 = vld [vmem:[#allocation136_spill] sm:$0xff] }
 0x4ec   :  { %13627 = vst [vmem:[#allocation169_spill] sm:$0xff] %v11909_v28  ;;  %6823 = vrcp.f32 %v4800_v18  ;;  %v6806_v25 = vpop.eup %6805  ;;  %v11922_v1 = vadd.f32 %v13631_v27, %v11674_v48  ;;  %v11926_v55 = vadd.f32 %v13632_v16, %v11682_v34  ;;  %v13634_v28 = vld [vmem:[#allocation105_spill] sm:$0xff]  ;;  %v11931_v61 = vadd.f32 %v13635_v6, %v11690_v37  ;;  %v13636_v38 = vld [vmem:[#allocation107_spill] sm:$0xff]  ;;  %v13637_v48 = vld [vmem:[#allocation82_spill] sm:$0xff] }
 0x4ed   :  { %13630 = vst [vmem:[#allocation168_spill] sm:$0xff] %v11917_v33  ;;  %v4805_v3 = vadd.f32 1.0, %v13634_v28  ;;  %6825 = vrcp.f32 %v4801_v53  ;;  %v6808_v23 = vpop.eup %6807  ;;  %v4806_v17 = vadd.f32 1.0, %v13636_v38  ;;  %v4938_v18 = vadd.f32 %v6806_v25, %v11742_v12  ;;  %v13639_v16 = vld [vmem:[#allocation113_spill] sm:$0xff]  ;;  %v13640_v38 = vld [vmem:[#allocation115_spill] sm:$0xff] }
 0x4ee   :  { %13633 = vst [vmem:[#allocation170_spill] sm:$0xff] %v11926_v55  ;;  %6827 = vrcp.f32 %v4802_v14  ;;  %v6810_v33 = vpop.eup %6809  ;;  %v11937_v27 = vadd.f32 %v13637_v48, %v11694_v15  ;;  %v4807_v34 = vadd.f32 1.0, %v11604_v19  ;;  %v4939_v53 = vadd.f32 %v6808_v23, %v11746_v41 }
 0x4ef   :  { %6829 = vrcp.f32 %v4803_v26  ;;  %v6812_v28 = vpop.eup %6811  ;;  %v4808_v55 = vadd.f32 1.0, %v13639_v16  ;;  %v4940_v37 = vadd.f32 %v6810_v33, %v11750_v32  ;;  %v4987_v6 = vmul.f32 0.25, %v4938_v18  ;;  %v13642_v33 = vld [vmem:[#allocation123_spill] sm:$0xff] }
 0x4f0   :  { %13638 = vst [vmem:[#allocation172_spill] sm:$0xff] %v11937_v27  ;;  %6831 = vrcp.f32 %v4804_v21  ;;  %v6814_v14 = vpop.eup %6813  ;;  %v4809_v12 = vadd.f32 1.0, %v13640_v38  ;;  %v4941_v25 = vadd.f32 %v6812_v28, %v11756_v62  ;;  %v4988_v15 = vmul.f32 0.25, %v4939_v53  ;;  %v13641_v27 = vld [vmem:[#allocation121_spill] sm:$0xff] }
 0x4f1   :  { %6833 = vrcp.f32 %v4805_v3  ;;  %v6816_v48 = vpop.eup %6815  ;;  %v4810_v19 = vadd.f32 1.0, %v13641_v27  ;;  %v4942_v41 = vadd.f32 %v6814_v14, %v11760_v51  ;;  %v4989_v26 = vmul.f32 0.25, %v4940_v37  ;;  %5036 = vst.msk [vmem:[%s12238_s8] sm:$0xff] %vm1976_vm4, %v4987_v6  ;;  %v13643_v51 = vld [vmem:[#allocation129_spill] sm:$0xff] }
 0x4f2   :  { %6835 = vrcp.f32 %v4806_v17  ;;  %v6818_v32 = vpop.eup %6817  ;;  %v4811_v21 = vadd.f32 1.0, %v13642_v33  ;;  %v4943_v3 = vadd.f32 %v6816_v48, %v11764_v60  ;;  %v4990_v62 = vmul.f32 0.25, %v4941_v25  ;;  %5037 = vst.msk [vmem:[%s12238_s8 + $0x8] sm:$0xff] %vm1976_vm4, %v4988_v15  ;;  %v13644_v60 = vld [vmem:[#allocation131_spill] sm:$0xff] }
 0x4f3   :  { %6837 = vrcp.f32 %v4807_v34  ;;  %v6820_v23 = vpop.eup %6819  ;;  %v4812_v17 = vadd.f32 1.0, %v13643_v51  ;;  %v4944_v18 = vadd.f32 %v6818_v32, %v11770_v59  ;;  %v4991_v27 = vmul.f32 0.25, %v4942_v41  ;;  %5038 = vst.msk [vmem:[%s12238_s8 + $0x10] sm:$0xff] %vm1976_vm4, %v4989_v26  ;;  %v13645_v59 = vld [vmem:[#allocation74_spill] sm:$0xff] }
 0x4f4   :  { %6839 = vrcp.f32 %v4808_v55  ;;  %v6822_v34 = vpop.eup %6821  ;;  %v4813_v53 = vadd.f32 1.0, %v13644_v60  ;;  %v4945_v28 = vadd.f32 %v6820_v23, %v11774_v50  ;;  %v4992_v16 = vmul.f32 0.25, %v4943_v3  ;;  %5039 = vst.msk [vmem:[%s12238_s8 + $0x18] sm:$0xff] %vm1976_vm4, %v4990_v62  ;;  %v13646_v50 = vld [vmem:[#allocation75_spill] sm:$0xff] }
 0x4f5   :  { %6841 = vrcp.f32 %v4809_v12  ;;  %v4814_v37 = vadd.f32 1.0, %v13645_v59  ;;  %v4946_v6 = vadd.f32 %v6822_v34, %v11781_v2  ;;  %v4993_v14 = vmul.f32 0.25, %v4944_v18  ;;  %5040 = vst.msk [vmem:[%s12238_s8 + $0x20] sm:$0xff] %vm1976_vm4, %v4991_v27  ;;  %v13647_v2 = vld [vmem:[#allocation135_spill] sm:$0xff] }
 0x4f6   :  { %v6824_v55 = vpop.eup %6823  ;;  %6843 = vrcp.f32 %v4810_v19  ;;  %v4815_v12 = vadd.f32 1.0, %v13646_v50  ;;  %v4994_v15 = vmul.f32 0.25, %v4945_v28  ;;  %5041 = vst.msk [vmem:[%s12238_s8 + $0x28] sm:$0xff] %vm1976_vm4, %v4992_v16  ;;  %v4816_v19 = vadd.f32 1.0, %v13647_v2 }
 0x4f7   :  { %v6826_v38 = vpop.eup %6825  ;;  %6845 = vrcp.f32 %v4811_v21  ;;  %v4947_v25 = vadd.f32 %v6824_v55, %v11785_v43  ;;  %v4995_v26 = vmul.f32 0.25, %v4946_v6  ;;  %5042 = vst.msk [vmem:[%s12238_s8 + $0x30] sm:$0xff] %vm1976_vm4, %v4993_v14  ;;  %v13648_v43 = vld [vmem:[#allocation76_spill] sm:$0xff] }
 0x4f8   :  { %v6828_v48 = vpop.eup %6827  ;;  %6847 = vrcp.f32 %v4812_v17  ;;  %v4948_v41 = vadd.f32 %v6826_v38, %v11792_v63  ;;  %v4817_v33 = vadd.f32 1.0, %v13648_v43  ;;  %5043 = vst.msk [vmem:[%s12238_s8 + $0x38] sm:$0xff] %vm1976_vm4, %v4994_v15  ;;  %v13649_v63 = vld [vmem:[#allocation77_spill] sm:$0xff] }
 0x4f9   :  { %v6830_v32 = vpop.eup %6829  ;;  %6849 = vrcp.f32 %v4813_v53  ;;  %v4949_v21 = vadd.f32 %v6828_v48, %v11796_v57  ;;  %v4996_v3 = vmul.f32 0.25, %v4947_v25  ;;  %v4818_v23 = vadd.f32 1.0, %v13649_v63  ;;  %5044 = vst.msk [vmem:[%s12238_s8 + $0x40] sm:$0xff] %vm1976_vm4, %v4995_v26  ;;  %v13650_v57 = vld [vmem:[#allocation83_spill] sm:$0xff] }
 0x4fa   :  { %v6832_v62 = vpop.eup %6831  ;;  %6851 = vrcp.f32 %v4814_v37  ;;  %v4950_v51 = vadd.f32 %v6830_v32, %v11803_v29  ;;  %v4997_v17 = vmul.f32 0.25, %v4948_v41  ;;  %v4819_v27 = vadd.f32 1.0, %v13650_v57 }
 0x4fb   :  { %v6834_v18 = vpop.eup %6833  ;;  %6853 = vrcp.f32 %v4815_v12  ;;  %v4951_v34 = vadd.f32 %v6832_v62, %v11807_v11  ;;  %v4998_v60 = vmul.f32 0.25, %v4949_v21  ;;  %5045 = vst.msk [vmem:[%s12238_s8 + $0x48] sm:$0xff] %vm1976_vm4, %v4996_v3  ;;  %v4820_v29 = vadd.f32 1.0, %v11706_v39 }
 0x4fc   :  { %v6836_v53 = vpop.eup %6835  ;;  %6855 = vrcp.f32 %v4816_v19  ;;  %v4952_v28 = vadd.f32 %v6834_v18, %v11814_v44  ;;  %v4999_v16 = vmul.f32 0.25, %v4950_v51  ;;  %5046 = vst.msk [vmem:[%s12238_s8 + $0x50] sm:$0xff] %vm1976_vm4, %v4997_v17  ;;  %v4821_v11 = vadd.f32 1.0, %v11716_v30 }
 0x4fd   :  { %v6838_v55 = vpop.eup %6837  ;;  %6857 = vrcp.f32 %v4817_v33  ;;  %v4953_v59 = vadd.f32 %v6836_v53, %v11818_v13  ;;  %v5000_v37 = vmul.f32 0.25, %v4951_v34  ;;  %5047 = vst.msk [vmem:[%s12238_s8 + $0x58] sm:$0xff] %vm1976_vm4, %v4998_v60  ;;  %v4822_v44 = vadd.f32 1.0, %v11726_v56 }
 0x4fe   :  { %v6840_v39 = vpop.eup %6839  ;;  %6859 = vrcp.f32 %v4818_v23  ;;  %v4954_v6 = vadd.f32 %v6838_v55, %v11825_v49  ;;  %v5001_v14 = vmul.f32 0.25, %v4952_v28  ;;  %5048 = vst.msk [vmem:[%s12238_s8 + $0x60] sm:$0xff] %vm1976_vm4, %v4999_v16  ;;  %v4823_v13 = vadd.f32 1.0, %v11736_v45 }
 0x4ff   :  { %v6842_v30 = vpop.eup %6841  ;;  %6861 = vrcp.f32 %v4819_v27  ;;  %v4955_v38 = vadd.f32 %v6840_v39, %v11829_v47  ;;  %v5002_v50 = vmul.f32 0.25, %v4953_v59  ;;  %5049 = vst.msk [vmem:[%s12238_s8 + $0x68] sm:$0xff] %vm1976_vm4, %v5000_v37  ;;  %v4824_v49 = vadd.f32 1.0, %v11738_v20 }
 0x500   :  { %v6844_v56 = vpop.eup %6843  ;;  %6863 = vrcp.f32 %v4820_v29  ;;  %v4956_v12 = vadd.f32 %v6842_v30, %v11836_v31  ;;  %v5003_v25 = vmul.f32 0.25, %v4954_v6  ;;  %5050 = vst.msk [vmem:[%s12238_s8 + $0x70] sm:$0xff] %vm1976_vm4, %v5001_v14  ;;  %v4825_v47 = vadd.f32 1.0, %v11752_v0 }
 0x501   :  { %v6846_v45 = vpop.eup %6845  ;;  %6865 = vrcp.f32 %v4821_v11  ;;  %v4957_v15 = vadd.f32 %v6844_v56, %v11840_v46  ;;  %v5004_v48 = vmul.f32 0.25, %v4955_v38  ;;  %5051 = vst.msk [vmem:[%s12238_s8 + $0x78] sm:$0xff] %vm1976_vm4, %v5002_v50  ;;  %v4826_v31 = vadd.f32 1.0, %v11766_v22 }
 0x502   :  { %v6848_v20 = vpop.eup %6847  ;;  %6867 = vrcp.f32 %v4822_v44  ;;  %v4958_v2 = vadd.f32 %v6846_v45, %v11847_v8  ;;  %v5005_v19 = vmul.f32 0.25, %v4956_v12  ;;  %5052 = vst.msk [vmem:[%s12238_s8 + $0x80] sm:$0xff] %vm1976_vm4, %v5003_v25  ;;  %v4827_v46 = vadd.f32 1.0, %v11777_v24  ;;  %v13651_v8 = vld [vmem:[#allocation152_spill] sm:$0xff] }
 0x503   :  { %v6850_v0 = vpop.eup %6849  ;;  %6869 = vrcp.f32 %v4823_v13  ;;  %v4959_v41 = vadd.f32 %v6848_v20, %v11851_v35  ;;  %v5006_v26 = vmul.f32 0.25, %v4957_v15  ;;  %5053 = vst.msk [vmem:[%s12238_s8 + $0x88] sm:$0xff] %vm1976_vm4, %v5004_v48  ;;  %v4828_v32 = vadd.f32 1.0, %v13651_v8  ;;  %v13652_v35 = vld [vmem:[#allocation154_spill] sm:$0xff]  ;;  %v13665_v8 = vld [vmem:[#allocation87_spill] sm:$0xff] }
 0x504   :  { %v6852_v22 = vpop.eup %6851  ;;  %6871 = vrcp.f32 %v4824_v49  ;;  %v4960_v43 = vadd.f32 %v6850_v0, %v11858_v4  ;;  %v5007_v33 = vmul.f32 0.25, %v4958_v2  ;;  %5054 = vst.msk [vmem:[%s12238_s8 + $0x90] sm:$0xff] %vm1976_vm4, %v5005_v19  ;;  %v4829_v21 = vadd.f32 1.0, %v13652_v35  ;;  %v13653_v4 = vld [vmem:[#allocation156_spill] sm:$0xff]  ;;  %v13666_v35 = vld [vmem:[#allocation98_spill] sm:$0xff] }
 0x505   :  { %v6854_v24 = vpop.eup %6853  ;;  %6873 = vrcp.f32 %v4825_v47  ;;  %v4961_v3 = vadd.f32 %v6852_v22, %v11862_v42  ;;  %v5008_v62 = vmul.f32 0.25, %v4959_v41  ;;  %5055 = vst.msk [vmem:[%s12238_s8 + $0x98] sm:$0xff] %vm1976_vm4, %v5006_v26  ;;  %v4830_v23 = vadd.f32 1.0, %v13653_v4  ;;  %v13654_v42 = vld [vmem:[#allocation163_spill] sm:$0xff] }
 0x506   :  { %v6856_v63 = vpop.eup %6855  ;;  %6875 = vrcp.f32 %v4826_v31  ;;  %v4962_v51 = vadd.f32 %v6854_v24, %v11869_v9  ;;  %v5009_v17 = vmul.f32 0.25, %v4960_v43  ;;  %5056 = vst.msk [vmem:[%s12238_s8 + $0xa0] sm:$0xff] %vm1976_vm4, %v5007_v33  ;;  %v4831_v57 = vadd.f32 1.0, %v13654_v42  ;;  %v13655_v9 = vld [vmem:[#allocation158_spill] sm:$0xff] }
 0x507   :  { %v6858_v18 = vpop.eup %6857  ;;  %6877 = vrcp.f32 %v4827_v46  ;;  %v4963_v27 = vadd.f32 %v6856_v63, %v11873_v52  ;;  %v5010_v34 = vmul.f32 0.25, %v4961_v3  ;;  %5057 = vst.msk [vmem:[%s12238_s8 + $0xa8] sm:$0xff] %vm1976_vm4, %v5008_v62  ;;  %v4832_v53 = vadd.f32 1.0, %v13655_v9  ;;  %v13656_v52 = vld [vmem:[#allocation165_spill] sm:$0xff]  ;;  %v13663_v46 = vld [vmem:[#allocation168_spill] sm:$0xff]  ;;  %v13668_v62 = vld [vmem:[#allocation170_spill] sm:$0xff] }
 0x508   :  { %v6860_v60 = vpop.eup %6859  ;;  %6879 = vrcp.f32 %v4828_v32  ;;  %v4964_v29 = vadd.f32 %v6858_v18, %v11880_v40  ;;  %v5011_v28 = vmul.f32 0.25, %v4962_v51  ;;  %5058 = vst.msk [vmem:[%s12238_s8 + $0xb0] sm:$0xff] %vm1976_vm4, %v5009_v17  ;;  %v4833_v55 = vadd.f32 1.0, %v13656_v52  ;;  %v13657_v40 = vld [vmem:[#allocation160_spill] sm:$0xff]  ;;  %v13670_v51 = vld [vmem:[#allocation138_spill] sm:$0xff] }
 0x509   :  { %v6862_v16 = vpop.eup %6861  ;;  %6881 = vrcp.f32 %v4829_v21  ;;  %v4965_v11 = vadd.f32 %v6860_v60, %v11884_v7  ;;  %v5012_v59 = vmul.f32 0.25, %v4963_v27  ;;  %5059 = vst.msk [vmem:[%s12238_s8 + $0xb8] sm:$0xff] %vm1976_vm4, %v5010_v34  ;;  %v4834_v39 = vadd.f32 1.0, %v13657_v40  ;;  %v13658_v7 = vld [vmem:[#allocation162_spill] sm:$0xff]  ;;  %v13667_v21 = vld [vmem:[#allocation137_spill] sm:$0xff]  ;;  %v13672_v34 = vld [vmem:[#allocation139_spill] sm:$0xff] }
 0x50a   :  { %v6864_v37 = vpop.eup %6863  ;;  %6883 = vrcp.f32 %v4830_v23  ;;  %v4966_v44 = vadd.f32 %v6862_v16, %v11891_v36  ;;  %v5013_v6 = vmul.f32 0.25, %v4964_v29  ;;  %5060 = vst.msk [vmem:[%s12238_s8 + $0xc0] sm:$0xff] %vm1976_vm4, %v5011_v28  ;;  %v4835_v30 = vadd.f32 1.0, %v13658_v7  ;;  %v13659_v36 = vld [vmem:[#allocation164_spill] sm:$0xff]  ;;  %v13671_v27 = vld [vmem:[#allocation142_spill] sm:$0xff]  ;;  %v13675_v16 = vld [vmem:[#allocation17_spill] sm:$0xff] }
 0x50b   :  { %v6866_v14 = vpop.eup %6865  ;;  %6885 = vrcp.f32 %v4831_v57  ;;  %v4967_v13 = vadd.f32 %v6864_v37, %v11895_v54  ;;  %v5014_v38 = vmul.f32 0.25, %v4965_v11  ;;  %5061 = vst.msk [vmem:[%s12238_s8 + $0xc8] sm:$0xff] %vm1976_vm4, %v5012_v59  ;;  %v4836_v56 = vadd.f32 1.0, %v13659_v36  ;;  %v13660_v54 = vld [vmem:[#allocation167_spill] sm:$0xff]  ;;  %v13669_v23 = vld [vmem:[#allocation140_spill] sm:$0xff]  ;;  %v13674_v28 = vld [vmem:[#allocation38_spill] sm:$0xff] }
 0x50c   :  { %v6868_v50 = vpop.eup %6867  ;;  %6887 = vrcp.f32 %v4832_v53  ;;  %v4968_v49 = vadd.f32 %v6866_v14, %v11902_v58  ;;  %v5015_v12 = vmul.f32 0.25, %v4966_v44  ;;  %5062 = vst.msk [vmem:[%s12238_s8 + $0xd0] sm:$0xff] %vm1976_vm4, %v5013_v6  ;;  %v4837_v45 = vadd.f32 1.0, %v13660_v54  ;;  %v13661_v58 = vld [vmem:[#allocation166_spill] sm:$0xff]  ;;  %v13673_v9 = vld [vmem:[#allocation172_spill] sm:$0xff]  ;;  %v13677_v11 = vld [vmem:[#allocation141_spill] sm:$0xff] }
 0x50d   :  { %v6870_v25 = vpop.eup %6869  ;;  %6889 = vrcp.f32 %v4833_v55  ;;  %v4969_v47 = vadd.f32 %v6868_v50, %v11906_v10  ;;  %v5016_v15 = vmul.f32 0.25, %v4967_v13  ;;  %5063 = vst.msk [vmem:[%s12238_s8 + $0xd8] sm:$0xff] %vm1976_vm4, %v5014_v38  ;;  %v4838_v20 = vadd.f32 1.0, %v13661_v58  ;;  %v13662_v10 = vld [vmem:[#allocation169_spill] sm:$0xff]  ;;  %v13676_v55 = vld [vmem:[#allocation144_spill] sm:$0xff]  ;;  %v13679_v6 = vld [vmem:[#allocation19_spill] sm:$0xff] }
 0x50e   :  { %v6872_v48 = vpop.eup %6871  ;;  %6891 = vrcp.f32 %v4834_v39  ;;  %v4970_v31 = vadd.f32 %v6870_v25, %v11913_v5  ;;  %v5017_v2 = vmul.f32 0.25, %v4968_v49  ;;  %5064 = vst.msk [vmem:[%s12238_s8 + $0xe0] sm:$0xff] %vm1976_vm4, %v5015_v12  ;;  %v4839_v0 = vadd.f32 1.0, %v13662_v10  ;;  %v13664_v5 = vld [vmem:[#allocation88_spill] sm:$0xff]  ;;  %v13680_v7 = vld [vmem:[#allocation146_spill] sm:$0xff]  ;;  %v13683_v49 = vld [vmem:[#allocation21_spill] sm:$0xff] }
 0x50f   :  { %v6874_v19 = vpop.eup %6873  ;;  %6893 = vrcp.f32 %v4835_v30  ;;  %v4971_v41 = vadd.f32 %v6872_v48, %v13663_v46  ;;  %v5018_v26 = vmul.f32 0.25, %v4969_v47  ;;  %5065 = vst.msk [vmem:[%s12238_s8 + $0xe8] sm:$0xff] %vm1976_vm4, %v5016_v15  ;;  %v4535_v32 = vadd.f32 %v13665_v8, %v13664_v5  ;;  %v13678_v44 = vld [vmem:[#allocation40_spill] sm:$0xff]  ;;  %v13681_v30 = vld [vmem:[#allocation143_spill] sm:$0xff]  ;;  %v13685_v54 = vld [vmem:[#allocation145_spill] sm:$0xff] }
 0x510   :  { %v6876_v22 = vpop.eup %6875  ;;  %6895 = vrcp.f32 %v4836_v56  ;;  %v4972_v43 = vadd.f32 %v6874_v19, %v11922_v1  ;;  %v5019_v33 = vmul.f32 0.25, %v4970_v31  ;;  %5066 = vst.msk [vmem:[%s12238_s8 + $0xf0] sm:$0xff] %vm1976_vm4, %v5017_v2  ;;  %v4536_v3 = vadd.f32 %v13667_v21, %v13666_v35  ;;  %v13682_v56 = vld [vmem:[#allocation42_spill] sm:$0xff]  ;;  %v13684_v25 = vld [vmem:[#allocation148_spill] sm:$0xff]  ;;  %v13689_v5 = vld [vmem:[#allocation151_spill] sm:$0xff] }
 0x511   :  { %v6878_v24 = vpop.eup %6877  ;;  %6897 = vrcp.f32 %v4837_v45  ;;  %v4973_v63 = vadd.f32 %v6876_v22, %v13668_v62  ;;  %v5020_v4 = vmul.f32 0.25, %v4971_v41  ;;  %5067 = vst.msk [vmem:[%s12238_s8 + $0xf8] sm:$0xff] %vm1976_vm4, %v5018_v26  ;;  %v4537_v17 = vadd.f32 %v13670_v51, %v13669_v23  ;;  %v13686_v58 = vld [vmem:[#allocation150_spill] sm:$0xff] }
 0x512   :  { %v6880_v1 = vpop.eup %6879  ;;  %6899 = vrcp.f32 %v4838_v20  ;;  %v4974_v18 = vadd.f32 %v6878_v24, %v11931_v61  ;;  %v5021_v42 = vmul.f32 0.25, %v4972_v43  ;;  %5068 = vst.msk [vmem:[%s12238_s8 + $0x100] sm:$0xff] %vm1976_vm4, %v5019_v33  ;;  %v4538_v60 = vadd.f32 %v13672_v34, %v13671_v27  ;;  %v13687_v20 = vld [vmem:[#allocation147_spill] sm:$0xff]  ;;  %v13690_v24 = vld [vmem:[#allocation153_spill] sm:$0xff] }
 0x513   :  { %v6882_v57 = vpop.eup %6881  ;;  %6901 = vrcp.f32 %v4839_v0  ;;  %v4975_v53 = vadd.f32 %v6880_v1, %v13673_v9  ;;  %v5022_v29 = vmul.f32 0.25, %v4973_v63  ;;  %5069 = vst.msk [vmem:[%s12238_s8 + $0x108] sm:$0xff] %vm1976_vm4, %v5020_v4  ;;  %v4102_v52 = vadd.f32 %v13675_v16, %v13674_v28  ;;  %v13688_v0 = vld [vmem:[#allocation149_spill] sm:$0xff] }
 0x514   :  { %v6884_v61 = vpop.eup %6883  ;;  %v4539_v59 = vadd.f32 %v13677_v11, %v13676_v55  ;;  %v4976_v37 = vadd.f32 %v6882_v57, %v4535_v32  ;;  %v5023_v40 = vmul.f32 0.25, %v4974_v18  ;;  %5070 = vst.msk [vmem:[%s12238_s8 + $0x110] sm:$0xff] %vm1976_vm4, %v5021_v42  ;;  %v4103_v14 = vadd.f32 %v13679_v6, %v13678_v44 }
 0x515   :  { %v6886_v39 = vpop.eup %6885  ;;  %v4540_v13 = vadd.f32 %v13681_v30, %v13680_v7  ;;  %v4977_v38 = vadd.f32 %v6884_v61, %v4536_v3  ;;  %v5024_v50 = vmul.f32 0.25, %v4975_v53  ;;  %5071 = vst.msk [vmem:[%s12238_s8 + $0x118] sm:$0xff] %vm1976_vm4, %v5022_v29  ;;  %v4104_v12 = vadd.f32 %v13683_v49, %v13682_v56 }
 0x516   :  { %v6888_v36 = vpop.eup %6887  ;;  %v4541_v45 = vadd.f32 %v13685_v54, %v13684_v25  ;;  %v4978_v47 = vadd.f32 %v6886_v39, %v4537_v17  ;;  %v5025_v15 = vmul.f32 0.25, %v4976_v37  ;;  %5072 = vst.msk [vmem:[%s12238_s8 + $0x120] sm:$0xff] %vm1976_vm4, %v5023_v40  ;;  %v4542_v31 = vadd.f32 %v13687_v20, %v13686_v58 }
 0x517   :  { %v6890_v48 = vpop.eup %6889  ;;  %v4979_v2 = vadd.f32 %v6888_v36, %v4538_v60  ;;  %v5026_v19 = vmul.f32 0.25, %v4977_v38  ;;  %5073 = vst.msk [vmem:[%s12238_s8 + $0x128] sm:$0xff] %vm1976_vm4, %v5024_v50  ;;  %v4543_v46 = vadd.f32 %v13688_v0, %v4102_v52  ;;  %v4544_v8 = vadd.f32 %v13689_v5, %v4103_v14 }
 0x518   :  { %v6892_v10 = vpop.eup %6891  ;;  %v4980_v41 = vadd.f32 %v6890_v48, %v4539_v59  ;;  %v5027_v26 = vmul.f32 0.25, %v4978_v47  ;;  %5074 = vst.msk [vmem:[%s12238_s8 + $0x130] sm:$0xff] %vm1976_vm4, %v5025_v15  ;;  %v4545_v35 = vadd.f32 %v13690_v24, %v4104_v12 }
 0x519   :  { %v6894_v22 = vpop.eup %6893  ;;  %v4981_v32 = vadd.f32 %v6892_v10, %v4540_v13  ;;  %v5028_v43 = vmul.f32 0.25, %v4979_v2  ;;  %5075 = vst.msk [vmem:[%s12238_s8 + $0x138] sm:$0xff] %vm1976_vm4, %v5026_v19 }
 0x51a   :  { %v6896_v33 = vpop.eup %6895  ;;  %v4982_v21 = vadd.f32 %v6894_v22, %v4541_v45  ;;  %v5029_v3 = vmul.f32 0.25, %v4980_v41  ;;  %5076 = vst.msk [vmem:[%s12238_s8 + $0x140] sm:$0xff] %vm1976_vm4, %v5027_v26 }
 0x51b   :  { %v6898_v62 = vpop.eup %6897  ;;  %v4983_v63 = vadd.f32 %v6896_v33, %v4542_v31  ;;  %v5030_v4 = vmul.f32 0.25, %v4981_v32  ;;  %5077 = vst.msk [vmem:[%s12238_s8 + $0x148] sm:$0xff] %vm1976_vm4, %v5028_v43 }
 0x51c   :  { %v6900_v1 = vpop.eup %6899  ;;  %v4984_v23 = vadd.f32 %v6898_v62, %v4543_v46  ;;  %v5031_v51 = vmul.f32 0.25, %v4982_v21  ;;  %5078 = vst.msk [vmem:[%s12238_s8 + $0x150] sm:$0xff] %vm1976_vm4, %v5029_v3 }
 0x51d   :  { %v6902_v17 = vpop.eup %6901  ;;  %v4985_v18 = vadd.f32 %v6900_v1, %v4544_v8  ;;  %v5032_v42 = vmul.f32 0.25, %v4983_v63  ;;  %5079 = vst.msk [vmem:[%s12238_s8 + $0x158] sm:$0xff] %vm1976_vm4, %v5030_v4 }
 0x51e   :  { %v4986_v57 = vadd.f32 %v6902_v17, %v4545_v35  ;;  %v5033_v27 = vmul.f32 0.25, %v4984_v23  ;;  %5080 = vst.msk [vmem:[%s12238_s8 + $0x160] sm:$0xff] %vm1976_vm4, %v5031_v51 }
 0x51f   :  { %v5034_v34 = vmul.f32 0.25, %v4985_v18  ;;  %5081 = vst.msk [vmem:[%s12238_s8 + $0x168] sm:$0xff] %vm1976_vm4, %v5032_v42 }
 0x520   :  { %v5035_v60 = vmul.f32 0.25, %v4986_v57  ;;  %5082 = vst.msk [vmem:[%s12238_s8 + $0x170] sm:$0xff] %vm1976_vm4, %v5033_v27 }
 0x521   :  { %5083 = vst.msk [vmem:[%s12238_s8 + $0x178] sm:$0xff] %vm1976_vm4, %v5034_v34 }
 0x522   :  { %5084 = vst.msk [vmem:[%s12238_s8 + $0x180] sm:$0xff] %vm1976_vm4, %v5035_v60 }

// kernel: lenet_bn_forward.4
= control target key start
LH: loop header
LB: loop body
LE: loop exit
PB: predicated region body
PF: predicated region fallthrough
CT: control target
= control target key end

     0   :  { %v1348_v0 = vmov 0   ;;  %vm153_vm0 = vcmask 179200   ;;  %vm166_vm1 = vcmask 1042432   ;;  %vm582_vm2 = vcmask 130048   ;;  %s1999_s4 = inlined_call_operand.vmem [shape: bf16[150,16], index: 4, kind: input, shape index: {}]   ;;  %s2000_s0 = inlined_call_operand.vmem [shape: bf16[50,150], index: 0, kind: input, shape index: {}]   ;;  %s2001_s1 = inlined_call_operand.vmem [shape: bf16[50,150], index: 1, kind: input, shape index: {}]   ;;  %s2002_s2 = inlined_call_operand.vmem [shape: bf16[50,150], index: 2, kind: input, shape index: {}]   ;;  %s2003_s3 = inlined_call_operand.vmem [shape: bf16[50,150], index: 3, kind: input, shape index: {}]   ;;  %s2004_s5 = inlined_call_operand.vmem [shape: f32[1,16], index: 5, kind: input, shape index: {}]   ;;  %s2005_s6 = inlined_call_operand.vmem [shape: f32[1,16], index: 6, kind: input, shape index: {}]   ;;  %s2006_s7 = inlined_call_operand.vmem [shape: f32[1,16], index: 7, kind: input, shape index: {}]   ;;  %s2007_s8 = inlined_call_operand.vmem [shape: f32[50,16], index: 8, kind: output, shape index: {}]  }
   0x1   :  { %170 = vmatprep.subr.bf16.mxu0 %v1348_v0  ;;  %286 = vmatprep.subr.bf16.mxu1 %v1348_v0  ;;  %v1399_v1 = vld [vmem:[%s1999_s4] sm:$0xff]   ;;  %v1406_v2 = vld [vmem:[%s1999_s4 + $0x8] sm:$0xff]   ;;  %v1415_v3 = vld [vmem:[%s1999_s4 + $0x10] sm:$0xff]   ;;  %vm594_vm3 = vcmask 123904  }
   0x2   :  { %171 = vmatpush1.bf16.msra.mxu0 %v1399_v1  ;;  %287 = vmatpush1.bf16.msra.mxu1 %v1399_v1  ;;  %v1424_v4 = vld [vmem:[%s1999_s4 + $0x18] sm:$0xff]   ;;  %v1192_v5 = vld [vmem:[%s2000_s0 + $0x4] ss:$8 sps:$4 sm:$0xff]   ;;  %v1459_v9 = vld [vmem:[%s1999_s4 + $0x30] sm:$0xff]  }
   0x3   :  { %172 = vmatprep.subr.bf16.mxu0 %v1348_v0  ;;  %288 = vmatprep.subr.bf16.mxu1 %v1348_v0  ;;  %v1195_v6 = vld [vmem:[%s2001_s1 + $0x4] ss:$8 sps:$4 sm:$0xff]   ;;  %v1468_v10 = vld [vmem:[%s1999_s4 + $0x38] sm:$0xff]   ;;  %v1189_v12 = vld [vmem:[%s1999_s4 + $0x48] ss:$0 sps:$4 sm:$0x77]  }
   0x4   :  { %1111 = vmatprep.mubr.msk.bf16.mxu0 %vm153_vm0, %v1192_v5  ;;  %v1440_v7 = vld [vmem:[%s1999_s4 + $0x20] sm:$0xff]   ;;  %1123 = vmatprep.mubr.msk.bf16.mxu1 %vm153_vm0, %v1195_v6  ;;  %v1450_v8 = vld [vmem:[%s1999_s4 + $0x28] sm:$0xff]   ;;  %v1488_v13 = vsel %vm166_vm1, %v1189_v12, 0  ;;  %v1196_v16 = vld [vmem:[%s2000_s0 + $0x14] ss:$8 sps:$4 sm:$0xff]  }
   0x5   :  { %v1477_v11 = vld [vmem:[%s1999_s4 + $0x40] sm:$0xff]   ;;  %v1198_v17 = vld [vmem:[%s2001_s1 + $0x14] ss:$8 sps:$4 sm:$0xff]   ;;  %v1200_v18 = vld [vmem:[%s2000_s0 + $0x10] ss:$8 sps:$4 sm:$0xff]  }
   0x6   :  { %173 = vmatpush1.bf16.msra.mxu0 %v1406_v2  ;;  %289 = vmatpush1.bf16.msra.mxu1 %v1406_v2  ;;  %v1190_v14 = vld [vmem:[%s2000_s0] ss:$8 sps:$4 sm:$0xff]   ;;  %v1201_v19 = vld [vmem:[%s2001_s1 + $0x10] ss:$8 sps:$4 sm:$0xff]   ;;  %v1202_v20 = vld [vmem:[%s2000_s0 + $0x24] ss:$8 sps:$4 sm:$0xff]  }
   0x7   :  { %174 = vmatprep.subr.bf16.mxu0 %v1348_v0  ;;  %290 = vmatprep.subr.bf16.mxu1 %v1348_v0  ;;  %v1193_v15 = vld [vmem:[%s2001_s1] ss:$8 sps:$4 sm:$0xff]   ;;  %v1204_v21 = vld [vmem:[%s2001_s1 + $0x24] ss:$8 sps:$4 sm:$0xff]   ;;  %v56_v24 = vld [vmem:[%s2000_s0 + $0x30] sm:$0x11] }
   0x8   :  { %v1206_v22 = vld [vmem:[%s2000_s0 + $0x20] ss:$8 sps:$4 sm:$0xff]   ;;  %v240_v25 = vld [vmem:[%s2001_s1 + $0x30] sm:$0x11]  ;;  %v1100_v26 = vcombine.high %v56_v24, %v56_v24  ;;  %v1099_v28 = vcombine.low %v56_v24, %v56_v24  ;;  %v1214_v30 = vld [vmem:[%s2002_s2 + $0x4] ss:$8 sps:$4 sm:$0xff]  }
   0x9   :  { %v1207_v23 = vld [vmem:[%s2001_s1 + $0x20] ss:$8 sps:$4 sm:$0xff]   ;;  %v1122_v27 = vcombine.high %v240_v25, %v240_v25  ;;  %v1121_v29 = vcombine.low %v240_v25, %v240_v25  ;;  %v1217_v31 = vld [vmem:[%s2003_s3 + $0x4] ss:$8 sps:$4 sm:$0xff]   ;;  %v1218_v34 = vld [vmem:[%s2002_s2 + $0x14] ss:$8 sps:$4 sm:$0xff]  }
   0xa   :  { %175 = vmatpush1.bf16.msra.mxu0 %v1415_v3  ;;  %291 = vmatpush1.bf16.msra.mxu1 %v1415_v3  ;;  %v1212_v32 = vld [vmem:[%s2002_s2] ss:$8 sps:$4 sm:$0xff]   ;;  %v1220_v35 = vld [vmem:[%s2003_s3 + $0x14] ss:$8 sps:$4 sm:$0xff]   ;;  %v1222_v36 = vld [vmem:[%s2002_s2 + $0x10] ss:$8 sps:$4 sm:$0xff]  }
   0xb   :  { %176 = vmatprep.subr.bf16.mxu0 %v1348_v0  ;;  %292 = vmatprep.subr.bf16.mxu1 %v1348_v0  ;;  %v1215_v33 = vld [vmem:[%s2003_s3] ss:$8 sps:$4 sm:$0xff]   ;;  %v1223_v37 = vld [vmem:[%s2003_s3 + $0x10] ss:$8 sps:$4 sm:$0xff]   ;;  %v1224_v38 = vld [vmem:[%s2002_s2 + $0x24] ss:$8 sps:$4 sm:$0xff]  }
   0xc   :  { %v1226_v39 = vld [vmem:[%s2003_s3 + $0x24] ss:$8 sps:$4 sm:$0xff]   ;;  %v356_v40 = vld [vmem:[%s2002_s2 + $0x30] sm:$0x11]  ;;  %v1228_v42 = vld [vmem:[%s2002_s2 + $0x20] ss:$8 sps:$4 sm:$0xff]  }
   0xd   :  { %v472_v41 = vld [vmem:[%s2003_s3 + $0x30] sm:$0x11]  ;;  %v1229_v43 = vld [vmem:[%s2003_s3 + $0x20] ss:$8 sps:$4 sm:$0xff]   ;;  %v1134_v44 = vcombine.high %v356_v40, %v356_v40  ;;  %v1133_v46 = vcombine.low %v356_v40, %v356_v40 }
   0xe   :  { %177 = vmatpush1.bf16.msra.mxu0 %v1424_v4  ;;  %293 = vmatpush1.bf16.msra.mxu1 %v1424_v4  ;;  %v1146_v45 = vcombine.high %v472_v41, %v472_v41  ;;  %v1145_v47 = vcombine.low %v472_v41, %v472_v41 }
   0xf   :  { %178 = vmatprep.subr.bf16.mxu0 %v1348_v0  ;;  %294 = vmatprep.subr.bf16.mxu1 %v1348_v0 }
  0x12   :  { %179 = vmatpush1.bf16.msra.mxu0 %v1440_v7  ;;  %295 = vmatpush1.bf16.msra.mxu1 %v1440_v7 }
  0x13   :  { %180 = vmatprep.subr.bf16.mxu0 %v1348_v0  ;;  %296 = vmatprep.subr.bf16.mxu1 %v1348_v0 }
  0x16   :  { %181 = vmatpush1.bf16.msra.mxu0 %v1450_v8  ;;  %297 = vmatpush1.bf16.msra.mxu1 %v1450_v8 }
  0x17   :  { %182 = vmatprep.subr.bf16.mxu0 %v1348_v0  ;;  %298 = vmatprep.subr.bf16.mxu1 %v1348_v0 }
  0x1a   :  { %183 = vmatpush1.bf16.msra.mxu0 %v1459_v9  ;;  %299 = vmatpush1.bf16.msra.mxu1 %v1459_v9 }
  0x1b   :  { %184 = vmatprep.subr.bf16.mxu0 %v1348_v0  ;;  %300 = vmatprep.subr.bf16.mxu1 %v1348_v0 }
  0x1e   :  { %185 = vmatpush1.bf16.msra.mxu0 %v1468_v10  ;;  %301 = vmatpush1.bf16.msra.mxu1 %v1468_v10 }
  0x1f   :  { %186 = vmatprep.subr.bf16.mxu0 %v1348_v0  ;;  %302 = vmatprep.subr.bf16.mxu1 %v1348_v0 }
  0x22   :  { %187 = vmatpush1.bf16.msra.mxu0 %v1477_v11  ;;  %303 = vmatpush1.bf16.msra.mxu1 %v1477_v11 }
  0x23   :  { %188 = vmatprep.subr.bf16.mxu0 %v1348_v0  ;;  %304 = vmatprep.subr.bf16.mxu1 %v1348_v0 }
  0x26   :  { %189 = vmatpush1.bf16.msra.mxu0 %v1488_v13  ;;  %305 = vmatpush1.bf16.msra.mxu1 %v1488_v13 }
  0x27   :  { %402 = vmatprep.subr.bf16.mxu0 %v1348_v0  ;;  %518 = vmatprep.subr.bf16.mxu1 %v1348_v0 }
  0x29   :  { %203 = vmatmul.mubr.bf16.vlgmr.msra.gmra.mrb[0].mxu0 %v1190_v14  ;;  %319 = vmatmul.mubr.bf16.vlgmr.msra.gmra.mrb[0].mxu1 %v1193_v15 }
  0x2a   :  { %403 = vmatpush1.bf16.msra.mxu0 %v1399_v1  ;;  %519 = vmatpush1.bf16.msra.mxu1 %v1399_v1 }
  0x2b   :  { %404 = vmatprep.subr.bf16.mxu0 %v1348_v0  ;;  %520 = vmatprep.subr.bf16.mxu1 %v1348_v0 }
  0x2c   :  { %1112 = vmatprep.mubr.msk.bf16.mxu0 %vm153_vm0, %v1196_v16  ;;  %1124 = vmatprep.mubr.msk.bf16.mxu1 %vm153_vm0, %v1198_v17  ;;  %v1627_v16 = vld [vmem:[%s2004_s5] ss:$0 sm:$0xff] }
  0x2e   :  { %405 = vmatpush1.bf16.msra.mxu0 %v1406_v2  ;;  %521 = vmatpush1.bf16.msra.mxu1 %v1406_v2 }
  0x2f   :  { %406 = vmatprep.subr.bf16.mxu0 %v1348_v0  ;;  %522 = vmatprep.subr.bf16.mxu1 %v1348_v0 }
  0x31   :  { %211 = vmatmul.mubr.bf16.gmra.mrb[4].mxu0 %v1200_v18  ;;  %327 = vmatmul.mubr.bf16.gmra.mrb[4].mxu1 %v1201_v19 }
  0x32   :  { %407 = vmatpush1.bf16.msra.mxu0 %v1415_v3  ;;  %523 = vmatpush1.bf16.msra.mxu1 %v1415_v3 }
  0x33   :  { %408 = vmatprep.subr.bf16.mxu0 %v1348_v0  ;;  %524 = vmatprep.subr.bf16.mxu1 %v1348_v0 }
  0x34   :  { %1113 = vmatprep.mubr.msk.bf16.mxu0 %vm153_vm0, %v1202_v20  ;;  %1125 = vmatprep.mubr.msk.bf16.mxu1 %vm153_vm0, %v1204_v21 }
  0x36   :  { %409 = vmatpush1.bf16.msra.mxu0 %v1424_v4  ;;  %525 = vmatpush1.bf16.msra.mxu1 %v1424_v4 }
  0x37   :  { %410 = vmatprep.subr.bf16.mxu0 %v1348_v0  ;;  %526 = vmatprep.subr.bf16.mxu1 %v1348_v0 }
  0x39   :  { %219 = vmatmul.mubr.bf16.gmra.mrb[8].mxu0 %v1206_v22  ;;  %335 = vmatmul.mubr.bf16.gmra.mrb[8].mxu1 %v1207_v23 }
  0x3a   :  { %411 = vmatpush1.bf16.msra.mxu0 %v1440_v7  ;;  %527 = vmatpush1.bf16.msra.mxu1 %v1440_v7 }
  0x3b   :  { %412 = vmatprep.subr.bf16.mxu0 %v1348_v0  ;;  %528 = vmatprep.subr.bf16.mxu1 %v1348_v0 }
  0x3c   :  { %1114 = vmatprep.mubr.msk.bf16.mxu0 %vm153_vm0, %v1100_v26  ;;  %1126 = vmatprep.mubr.msk.bf16.mxu1 %vm153_vm0, %v1122_v27 }
  0x3e   :  { %413 = vmatpush1.bf16.msra.mxu0 %v1450_v8  ;;  %529 = vmatpush1.bf16.msra.mxu1 %v1450_v8 }
  0x3f   :  { %414 = vmatprep.subr.bf16.mxu0 %v1348_v0  ;;  %530 = vmatprep.subr.bf16.mxu1 %v1348_v0 }
  0x41   :  { %227 = vmatmul.mubr.bf16.gmra.mrb[12].mxu0 %v1099_v28  ;;  %343 = vmatmul.mubr.bf16.gmra.mrb[12].mxu1 %v1121_v29 }
  0x42   :  { %415 = vmatpush1.bf16.msra.mxu0 %v1459_v9  ;;  %531 = vmatpush1.bf16.msra.mxu1 %v1459_v9 }
  0x43   :  { %416 = vmatprep.subr.bf16.mxu0 %v1348_v0  ;;  %532 = vmatprep.subr.bf16.mxu1 %v1348_v0 }
  0x44   :  { %1135 = vmatprep.mubr.msk.bf16.mxu0 %vm153_vm0, %v1214_v30  ;;  %1147 = vmatprep.mubr.msk.bf16.mxu1 %vm153_vm0, %v1217_v31 }
  0x46   :  { %417 = vmatpush1.bf16.msra.mxu0 %v1468_v10  ;;  %533 = vmatpush1.bf16.msra.mxu1 %v1468_v10 }
  0x47   :  { %418 = vmatprep.subr.bf16.mxu0 %v1348_v0  ;;  %534 = vmatprep.subr.bf16.mxu1 %v1348_v0 }
  0x4a   :  { %419 = vmatpush1.bf16.msra.mxu0 %v1477_v11  ;;  %535 = vmatpush1.bf16.msra.mxu1 %v1477_v11 }
  0x4b   :  { %420 = vmatprep.subr.bf16.mxu0 %v1348_v0  ;;  %536 = vmatprep.subr.bf16.mxu1 %v1348_v0 }
  0x4e   :  { %421 = vmatpush1.bf16.msra.mxu0 %v1488_v13  ;;  %537 = vmatpush1.bf16.msra.mxu1 %v1488_v13 }
  0x51   :  { %435 = vmatmul.mubr.bf16.vlgmr.msra.gmra.mrb[16].mxu0 %v1212_v32  ;;  %551 = vmatmul.mubr.bf16.vlgmr.msra.gmra.mrb[16].mxu1 %v1215_v33 }
  0x52   :  { %1136 = vmatprep.mubr.msk.bf16.mxu0 %vm153_vm0, %v1218_v34  ;;  %1148 = vmatprep.mubr.msk.bf16.mxu1 %vm153_vm0, %v1220_v35 }
  0x59   :  { %443 = vmatmul.mubr.bf16.gmra.mrb[20].mxu0 %v1222_v36  ;;  %559 = vmatmul.mubr.bf16.gmra.mrb[20].mxu1 %v1223_v37 }
  0x5a   :  { %1137 = vmatprep.mubr.msk.bf16.mxu0 %vm153_vm0, %v1224_v38  ;;  %1149 = vmatprep.mubr.msk.bf16.mxu1 %vm153_vm0, %v1226_v39 }
  0x61   :  { %451 = vmatmul.mubr.bf16.gmra.mrb[24].mxu0 %v1228_v42  ;;  %567 = vmatmul.mubr.bf16.gmra.mrb[24].mxu1 %v1229_v43 }
  0x62   :  { %1138 = vmatprep.mubr.msk.bf16.mxu0 %vm153_vm0, %v1134_v44  ;;  %1150 = vmatprep.mubr.msk.bf16.mxu1 %vm153_vm0, %v1146_v45 }
  0x69   :  { %459 = vmatmul.mubr.bf16.gmra.mrb[28].mxu0 %v1133_v46  ;;  %575 = vmatmul.mubr.bf16.gmra.mrb[28].mxu1 %v1145_v47 }
  0xfc   :  { %v204_v48 = vpop.f32.mrb[0].mxu0  ;;  %v320_v49 = vpop.f32.mrb[0].mxu1 }
  0xfd   :  { %v206_v50 = vpop.f32.mrb[1].mxu0  ;;  %v322_v51 = vpop.f32.mrb[1].mxu1  ;;  %v1630_v17 = vadd.f32 %v1627_v16, %v204_v48  ;;  %v1633_v18 = vadd.f32 %v1627_v16, %v320_v49 }
  0xfe   :  { %v207_v52 = vpop.f32.mrb[2].mxu0  ;;  %v323_v53 = vpop.f32.mrb[2].mxu1 }
  0xff   :  { %v209_v54 = vpop.f32.mrb[3].mxu0  ;;  %v325_v55 = vpop.f32.mrb[3].mxu1  ;;  %v1636_v19 = vadd.f32 %v1627_v16, %v207_v52  ;;  %v1639_v20 = vadd.f32 %v1627_v16, %v323_v53  ;;  %v583_v23 = vsel %vm582_vm2, %v1630_v17, 0.0  ;;  %v604_v24 = vsel %vm582_vm2, %v1633_v18, 0.0 }
 0x101   :  { %v584_v25 = vsel %vm582_vm2, %v1636_v19, 0.0  ;;  %v605_v26 = vsel %vm582_vm2, %v1639_v20, 0.0 }
 0x102   :  { %v585_v31 = vadd.f32 %v584_v25, %v583_v23  ;;  %v606_v32 = vadd.f32 %v605_v26, %v604_v24 }
 0x104   :  { %v212_v56 = vpop.f32.mrb[4].mxu0  ;;  %v328_v57 = vpop.f32.mrb[4].mxu1 }
 0x105   :  { %v214_v58 = vpop.f32.mrb[5].mxu0  ;;  %v330_v59 = vpop.f32.mrb[5].mxu1  ;;  %v1642_v21 = vadd.f32 %v1627_v16, %v212_v56  ;;  %v1645_v22 = vadd.f32 %v1627_v16, %v328_v57 }
 0x106   :  { %v215_v60 = vpop.f32.mrb[6].mxu0  ;;  %v331_v61 = vpop.f32.mrb[6].mxu1 }
 0x107   :  { %v217_v62 = vpop.f32.mrb[7].mxu0  ;;  %v333_v63 = vpop.f32.mrb[7].mxu1  ;;  %v586_v27 = vsel %vm582_vm2, %v1642_v21, 0.0  ;;  %v607_v28 = vsel %vm582_vm2, %v1645_v22, 0.0  ;;  %v1660_v29 = vadd.f32 %v1627_v16, %v215_v60  ;;  %v1663_v30 = vadd.f32 %v1627_v16, %v331_v61 }
 0x108   :  { %v587_v35 = vadd.f32 %v586_v27, %v585_v31  ;;  %v608_v36 = vadd.f32 %v607_v28, %v606_v32 }
 0x109   :  { %v588_v39 = vsel %vm582_vm2, %v1660_v29, 0.0  ;;  %v609_v40 = vsel %vm582_vm2, %v1663_v30, 0.0 }
 0x10a   :  { %v589_v51 = vadd.f32 %v588_v39, %v587_v35  ;;  %v610_v52 = vadd.f32 %v609_v40, %v608_v36 }
 0x10c   :  { %v220_v0 = vpop.f32.mrb[8].mxu0  ;;  %v336_v1 = vpop.f32.mrb[8].mxu1 }
 0x10d   :  { %v222_v2 = vpop.f32.mrb[9].mxu0  ;;  %v338_v3 = vpop.f32.mrb[9].mxu1  ;;  %v1666_v33 = vadd.f32 %v1627_v16, %v220_v0  ;;  %v1669_v34 = vadd.f32 %v1627_v16, %v336_v1 }
 0x10e   :  { %v223_v4 = vpop.f32.mrb[10].mxu0  ;;  %v339_v5 = vpop.f32.mrb[10].mxu1 }
 0x10f   :  { %v225_v6 = vpop.f32.mrb[11].mxu0  ;;  %v341_v7 = vpop.f32.mrb[11].mxu1  ;;  %v1676_v43 = vadd.f32 %v1627_v16, %v223_v4  ;;  %v590_v46 = vsel %vm582_vm2, %v1666_v33, 0.0  ;;  %v611_v47 = vsel %vm582_vm2, %v1669_v34, 0.0  ;;  %v1683_v48 = vadd.f32 %v1627_v16, %v339_v5 }
 0x110   :  { %v591_v55 = vadd.f32 %v590_v46, %v589_v51  ;;  %v612_v56 = vadd.f32 %v611_v47, %v610_v52 }
 0x111   :  { %v592_v57 = vsel %vm582_vm2, %v1676_v43, 0.0  ;;  %v613_v58 = vsel %vm582_vm2, %v1683_v48, 0.0 }
 0x112   :  { %v593_v7 = vadd.f32 %v592_v57, %v591_v55 }
 0x114   :  { %v228_v8 = vpop.f32.mrb[12].mxu0  ;;  %v344_v9 = vpop.f32.mrb[12].mxu1 }
 0x115   :  { %v230_v10 = vpop.f32.mrb[13].mxu0  ;;  %v346_v11 = vpop.f32.mrb[13].mxu1  ;;  %v1686_v53 = vadd.f32 %v1627_v16, %v228_v8  ;;  %v1689_v54 = vadd.f32 %v1627_v16, %v344_v9  ;;  %v614_v8 = vadd.f32 %v613_v58, %v612_v56 }
 0x116   :  { %v231_v12 = vpop.f32.mrb[14].mxu0  ;;  %v347_v13 = vpop.f32.mrb[14].mxu1 }
 0x117   :  { %v232_v14 = vpop.f32.mrb[15].mxu0  ;;  %v348_v15 = vpop.f32.mrb[15].mxu1  ;;  %v595_v1 = vsel %vm594_vm3, %v1686_v53, 0.0  ;;  %v615_v2 = vsel %vm594_vm3, %v1689_v54, 0.0 }
 0x118   :  { %v596_v23 = vadd.f32 %v595_v1, %v593_v7  ;;  %v616_v24 = vadd.f32 %v615_v2, %v614_v8 }
 0x11a   :  { %v597_v36 = vrot.slane %v596_v23, 4 }
 0x124   :  { %v436_v37 = vpop.f32.mrb[16].mxu0  ;;  %v552_v38 = vpop.f32.mrb[16].mxu1 }
 0x125   :  { %v438_v41 = vpop.f32.mrb[17].mxu0  ;;  %v554_v42 = vpop.f32.mrb[17].mxu1  ;;  %v1696_v59 = vadd.f32 %v1627_v16, %v552_v38  ;;  %v1705_v62 = vadd.f32 %v1627_v16, %v436_v37  ;;  %v617_v37 = vrot.slane %v616_v24, 4 }
 0x126   :  { %v439_v44 = vpop.f32.mrb[18].mxu0  ;;  %v555_v45 = vpop.f32.mrb[18].mxu1 }
 0x127   :  { %v441_v49 = vpop.f32.mrb[19].mxu0  ;;  %v557_v50 = vpop.f32.mrb[19].mxu1  ;;  %v1699_v60 = vadd.f32 %v1627_v16, %v439_v44  ;;  %v1702_v61 = vadd.f32 %v1627_v16, %v555_v45  ;;  %v644_v11 = vsel %vm582_vm2, %v1696_v59, 0.0  ;;  %v624_v25 = vsel %vm582_vm2, %v1705_v62, 0.0 }
 0x128   :  { %v618_v1 = vadd.f32 %v617_v37, %v616_v24 }
 0x129   :  { %v625_v12 = vsel %vm582_vm2, %v1699_v60, 0.0  ;;  %v645_v13 = vsel %vm582_vm2, %v1702_v61, 0.0 }
 0x12a   :  { %v626_v32 = vadd.f32 %v625_v12, %v624_v25  ;;  %v646_v35 = vadd.f32 %v645_v13, %v644_v11  ;;  %v619_v11 = vrot.slane %v618_v1, 2 }
 0x12c   :  { %v444_v63 = vpop.f32.mrb[20].mxu0  ;;  %v560_v0 = vpop.f32.mrb[20].mxu1 }
 0x12d   :  { %v1712_v3 = vadd.f32 %v1627_v16, %v444_v63  ;;  %v1715_v4 = vadd.f32 %v1627_v16, %v560_v0  ;;  %v446_v5 = vpop.f32.mrb[21].mxu0  ;;  %v562_v6 = vpop.f32.mrb[21].mxu1  ;;  %v598_v0 = vadd.f32 %v597_v36, %v596_v23 }
 0x12e   :  { %v447_v9 = vpop.f32.mrb[22].mxu0  ;;  %v563_v10 = vpop.f32.mrb[22].mxu1 }
 0x12f   :  { %v449_v14 = vpop.f32.mrb[23].mxu0  ;;  %v565_v15 = vpop.f32.mrb[23].mxu1  ;;  %v627_v26 = vsel %vm582_vm2, %v1712_v3, 0.0  ;;  %v647_v27 = vsel %vm582_vm2, %v1715_v4, 0.0  ;;  %v1730_v28 = vadd.f32 %v1627_v16, %v447_v9  ;;  %v1733_v31 = vadd.f32 %v1627_v16, %v563_v10 }
 0x130   :  { %v628_v38 = vadd.f32 %v627_v26, %v626_v32  ;;  %v648_v39 = vadd.f32 %v647_v27, %v646_v35  ;;  %v599_v10 = vrot.slane %v598_v0, 2 }
 0x131   :  { %v629_v42 = vsel %vm582_vm2, %v1730_v28, 0.0  ;;  %v649_v44 = vsel %vm582_vm2, %v1733_v31, 0.0 }
 0x132   :  { %v630_v2 = vadd.f32 %v629_v42, %v628_v38  ;;  %v650_v5 = vadd.f32 %v649_v44, %v648_v39  ;;  %v600_v39 = vadd.f32 %v599_v10, %v598_v0 }
 0x134   :  { %v452_v40 = vpop.f32.mrb[24].mxu0  ;;  %v568_v41 = vpop.f32.mrb[24].mxu1 }
 0x135   :  { %v1740_v45 = vadd.f32 %v1627_v16, %v452_v40  ;;  %v1743_v46 = vadd.f32 %v1627_v16, %v568_v41  ;;  %v454_v47 = vpop.f32.mrb[25].mxu0  ;;  %v570_v49 = vpop.f32.mrb[25].mxu1  ;;  %v620_v40 = vadd.f32 %v619_v11, %v618_v1 }
 0x136   :  { %v455_v50 = vpop.f32.mrb[26].mxu0  ;;  %v571_v51 = vpop.f32.mrb[26].mxu1  ;;  %v601_v47 = vrot.slane %v600_v39, 1 }
 0x137   :  { %v631_v52 = vsel %vm582_vm2, %v1740_v45, 0.0  ;;  %v651_v55 = vsel %vm582_vm2, %v1743_v46, 0.0  ;;  %v1750_v56 = vadd.f32 %v1627_v16, %v455_v50  ;;  %v1753_v57 = vadd.f32 %v1627_v16, %v571_v51  ;;  %v457_v58 = vpop.f32.mrb[27].mxu0  ;;  %v573_v63 = vpop.f32.mrb[27].mxu1 }
 0x138   :  { %v632_v6 = vadd.f32 %v631_v52, %v630_v2  ;;  %v652_v7 = vadd.f32 %v651_v55, %v650_v5  ;;  %v621_v49 = vrot.slane %v620_v40, 1  ;;  %v602_v58 = vadd.f32 %v601_v47, %v600_v39 }
 0x139   :  { %v633_v8 = vsel %vm582_vm2, %v1750_v56, 0.0  ;;  %v653_v9 = vsel %vm582_vm2, %v1753_v57, 0.0 }
 0x13a   :  { %v634_v25 = vadd.f32 %v633_v8, %v632_v6  ;;  %v654_v26 = vadd.f32 %v653_v9, %v652_v7  ;;  %v622_v63 = vadd.f32 %v621_v49, %v620_v40 }
 0x13c   :  { %v460_v12 = vpop.f32.mrb[28].mxu0  ;;  %v576_v13 = vpop.f32.mrb[28].mxu1  ;;  %v623_v8 = vadd.f32 %v622_v63, %v602_v58 }
 0x13d   :  { %v1760_v14 = vadd.f32 %v1627_v16, %v460_v12  ;;  %v1763_v15 = vadd.f32 %v1627_v16, %v576_v13  ;;  %v462_v23 = vpop.f32.mrb[29].mxu0  ;;  %v578_v24 = vpop.f32.mrb[29].mxu1 }
 0x13e   :  { %v463_v27 = vpop.f32.mrb[30].mxu0  ;;  %v579_v32 = vpop.f32.mrb[30].mxu1 }
 0x13f   :  { %v635_v35 = vsel %vm594_vm3, %v1760_v14, 0.0  ;;  %v655_v36 = vsel %vm594_vm3, %v1763_v15, 0.0  ;;  %v464_v37 = vpop.f32.mrb[31].mxu0  ;;  %v580_v38 = vpop.f32.mrb[31].mxu1 }
 0x140   :  { %v636_v41 = vadd.f32 %v635_v35, %v634_v25  ;;  %v656_v42 = vadd.f32 %v655_v36, %v654_v26 }
 0x142   :  { %v637_v16 = vrot.slane %v636_v41, 4  ;;  %v657_v44 = vrot.slane %v656_v42, 4 }
 0x144   :  { %v638_v50 = vadd.f32 %v637_v16, %v636_v41  ;;  %v658_v51 = vadd.f32 %v657_v44, %v656_v42 }
 0x146   :  { %v639_v52 = vrot.slane %v638_v50, 2  ;;  %v659_v55 = vrot.slane %v658_v51, 2 }
 0x148   :  { %v640_v2 = vadd.f32 %v639_v52, %v638_v50  ;;  %v660_v5 = vadd.f32 %v659_v55, %v658_v51 }
 0x14a   :  { %v641_v6 = vrot.slane %v640_v2, 1  ;;  %v661_v7 = vrot.slane %v660_v5, 1 }
 0x14c   :  { %v642_v9 = vadd.f32 %v641_v6, %v640_v2  ;;  %v662_v1 = vadd.f32 %v661_v7, %v660_v5 }
 0x14e   :  { %v643_v0 = vadd.f32 %v642_v9, %v623_v8 }
 0x150   :  { %v663_v10 = vadd.f32 %v662_v1, %v643_v0 }
 0x152   :  { %v1769_v11 = vmul.f32 0.005, %v663_v10 }
 0x154   :  { %v666_v12 = vsub.f32 %v1630_v17, %v1769_v11  ;;  %v667_v13 = vsub.f32 %v1636_v19, %v1769_v11  ;;  %v668_v23 = vsub.f32 %v1642_v21, %v1769_v11  ;;  %v669_v24 = vsub.f32 %v1660_v29, %v1769_v11 }
 0x155   :  { %v670_v25 = vsub.f32 %v1666_v33, %v1769_v11  ;;  %v671_v26 = vsub.f32 %v1676_v43, %v1769_v11  ;;  %v672_v27 = vsub.f32 %v1686_v53, %v1769_v11  ;;  %v700_v37 = vsub.f32 %v1633_v18, %v1769_v11 }
 0x156   :  { %v673_v32 = vmul.f32 %v666_v12, %v666_v12  ;;  %v674_v35 = vmul.f32 %v667_v13, %v667_v13  ;;  %v675_v36 = vmul.f32 %v668_v23, %v668_v23  ;;  %v701_v38 = vsub.f32 %v1639_v20, %v1769_v11 }
 0x157   :  { %v676_v39 = vmul.f32 %v669_v24, %v669_v24  ;;  %v677_v40 = vmul.f32 %v670_v25, %v670_v25  ;;  %v678_v16 = vmul.f32 %v671_v26, %v671_v26  ;;  %v679_v47 = vmul.f32 %v672_v27, %v672_v27 }
 0x158   :  { %v680_v41 = vsel %vm582_vm2, %v673_v32, 0.0  ;;  %v681_v42 = vsel %vm582_vm2, %v674_v35, 0.0  ;;  %v683_v49 = vsel %vm582_vm2, %v675_v36, 0.0  ;;  %v702_v50 = vsub.f32 %v1645_v22, %v1769_v11 }
 0x159   :  { %v682_v44 = vadd.f32 %v681_v42, %v680_v41  ;;  %v703_v51 = vsub.f32 %v1663_v30, %v1769_v11  ;;  %v704_v55 = vsub.f32 %v1669_v34, %v1769_v11  ;;  %v707_v58 = vmul.f32 %v700_v37, %v700_v37 }
 0x15a   :  { %v708_v63 = vmul.f32 %v701_v38, %v701_v38  ;;  %v685_v2 = vsel %vm582_vm2, %v676_v39, 0.0  ;;  %v687_v5 = vsel %vm582_vm2, %v677_v40, 0.0  ;;  %v705_v6 = vsub.f32 %v1683_v48, %v1769_v11 }
 0x15b   :  { %v684_v52 = vadd.f32 %v683_v49, %v682_v44  ;;  %v709_v7 = vmul.f32 %v702_v50, %v702_v50  ;;  %v710_v9 = vmul.f32 %v703_v51, %v703_v51  ;;  %v714_v0 = vsel %vm582_vm2, %v707_v58, 0.0 }
 0x15c   :  { %v715_v1 = vsel %vm582_vm2, %v708_v63, 0.0  ;;  %v689_v10 = vsel %vm582_vm2, %v678_v16, 0.0  ;;  %v691_v12 = vsel %vm594_vm3, %v679_v47, 0.0  ;;  %v706_v13 = vsub.f32 %v1689_v54, %v1769_v11 }
 0x15d   :  { %v686_v8 = vadd.f32 %v685_v2, %v684_v52  ;;  %v716_v23 = vadd.f32 %v715_v1, %v714_v0  ;;  %v711_v25 = vmul.f32 %v704_v55, %v704_v55  ;;  %v717_v26 = vsel %vm582_vm2, %v709_v7, 0.0 }
 0x15e   :  { %v734_v27 = vsub.f32 %v1705_v62, %v1769_v11  ;;  %v735_v35 = vsub.f32 %v1699_v60, %v1769_v11  ;;  %v736_v36 = vsub.f32 %v1712_v3, %v1769_v11  ;;  %v737_v37 = vsub.f32 %v1730_v28, %v1769_v11 }
 0x15f   :  { %v688_v24 = vadd.f32 %v687_v5, %v686_v8  ;;  %v718_v32 = vadd.f32 %v717_v26, %v716_v23  ;;  %v712_v39 = vmul.f32 %v705_v6, %v705_v6  ;;  %v719_v40 = vsel %vm582_vm2, %v710_v9, 0.0 }
 0x160   :  { %v738_v41 = vsub.f32 %v1740_v45, %v1769_v11  ;;  %v741_v16 = vmul.f32 %v734_v27, %v734_v27  ;;  %v742_v44 = vmul.f32 %v735_v35, %v735_v35  ;;  %v743_v47 = vmul.f32 %v736_v36, %v736_v36 }
 0x161   :  { %v690_v38 = vadd.f32 %v689_v10, %v688_v24  ;;  %v720_v42 = vadd.f32 %v719_v40, %v718_v32  ;;  %v713_v50 = vmul.f32 %v706_v13, %v706_v13  ;;  %v721_v51 = vsel %vm582_vm2, %v711_v25, 0.0 }
 0x162   :  { %v739_v52 = vsub.f32 %v1750_v56, %v1769_v11  ;;  %v744_v58 = vmul.f32 %v737_v37, %v737_v37  ;;  %v748_v63 = vsel %vm582_vm2, %v741_v16, 0.0  ;;  %v749_v2 = vsel %vm582_vm2, %v742_v44, 0.0 }
 0x163   :  { %v692_v49 = vadd.f32 %v691_v12, %v690_v38  ;;  %v722_v55 = vadd.f32 %v721_v51, %v720_v42  ;;  %v723_v5 = vsel %vm582_vm2, %v712_v39, 0.0  ;;  %v740_v6 = vsub.f32 %v1760_v14, %v1769_v11 }
 0x164   :  { %v745_v7 = vmul.f32 %v738_v41, %v738_v41  ;;  %v750_v8 = vadd.f32 %v749_v2, %v748_v63  ;;  %v751_v1 = vsel %vm582_vm2, %v743_v47, 0.0  ;;  %v725_v10 = vsel %vm594_vm3, %v713_v50, 0.0 }
 0x165   :  { %v693_v9 = vrot.slane %v692_v49, 4  ;;  %v724_v0 = vadd.f32 %v723_v5, %v722_v55  ;;  %v768_v13 = vsub.f32 %v1696_v59, %v1769_v11  ;;  %v769_v23 = vsub.f32 %v1702_v61, %v1769_v11 }
 0x166   :  { %v752_v12 = vadd.f32 %v751_v1, %v750_v8  ;;  %v746_v25 = vmul.f32 %v739_v52, %v739_v52  ;;  %v753_v26 = vsel %vm582_vm2, %v744_v58, 0.0  ;;  %v770_v27 = vsub.f32 %v1715_v4, %v1769_v11 }
 0x167   :  { %v726_v24 = vadd.f32 %v725_v10, %v724_v0  ;;  %v747_v32 = vmul.f32 %v740_v6, %v740_v6  ;;  %v755_v36 = vsel %vm582_vm2, %v745_v7, 0.0  ;;  %v771_v37 = vsub.f32 %v1733_v31, %v1769_v11 }
 0x168   :  { %v754_v35 = vadd.f32 %v753_v26, %v752_v12  ;;  %v694_v38 = vadd.f32 %v693_v9, %v692_v49  ;;  %v775_v40 = vmul.f32 %v768_v13, %v768_v13  ;;  %v776_v41 = vmul.f32 %v769_v23, %v769_v23 }
 0x169   :  { %v727_v39 = vrot.slane %v726_v24, 4  ;;  %v772_v16 = vsub.f32 %v1743_v46, %v1769_v11  ;;  %v777_v44 = vmul.f32 %v770_v27, %v770_v27  ;;  %v757_v50 = vsel %vm582_vm2, %v746_v25, 0.0 }
 0x16a   :  { %v756_v42 = vadd.f32 %v755_v36, %v754_v35  ;;  %v782_v51 = vsel %vm582_vm2, %v775_v40, 0.0  ;;  %v773_v55 = vsub.f32 %v1753_v57, %v1769_v11  ;;  %v778_v58 = vmul.f32 %v771_v37, %v771_v37 }
 0x16b   :  { %v728_v47 = vadd.f32 %v727_v39, %v726_v24  ;;  %v783_v49 = vsel %vm582_vm2, %v776_v41, 0.0  ;;  %v695_v63 = vrot.slane %v694_v38, 2  ;;  %v759_v5 = vsel %vm594_vm3, %v747_v32, 0.0 }
 0x16c   :  { %v758_v52 = vadd.f32 %v757_v50, %v756_v42  ;;  %v784_v6 = vadd.f32 %v783_v49, %v782_v51  ;;  %v774_v8 = vsub.f32 %v1763_v15, %v1769_v11  ;;  %v779_v9 = vmul.f32 %v772_v16, %v772_v16 }
 0x16d   :  { %v729_v2 = vrot.slane %v728_v47, 2  ;;  %v785_v0 = vsel %vm582_vm2, %v777_v44, 0.0  ;;  %v780_v12 = vmul.f32 %v773_v55, %v773_v55  ;;  %v787_v13 = vsel %vm582_vm2, %v778_v58, 0.0 }
 0x16e   :  { %v760_v7 = vadd.f32 %v759_v5, %v758_v52  ;;  %v786_v1 = vadd.f32 %v785_v0, %v784_v6  ;;  %v696_v23 = vadd.f32 %v695_v63, %v694_v38  ;;  %v781_v27 = vmul.f32 %v774_v8, %v774_v8 }
 0x16f   :  { %v730_v24 = vadd.f32 %v729_v2, %v728_v47  ;;  %v789_v32 = vsel %vm582_vm2, %v779_v9, 0.0  ;;  %v791_v37 = vsel %vm582_vm2, %v780_v12, 0.0  ;;  %v811_v0 = vlaneseq }
 0x170   :  { %v761_v10 = vrot.slane %v760_v7, 4  ;;  %v788_v25 = vadd.f32 %v787_v13, %v786_v1  ;;  %v697_v39 = vrot.slane %v696_v23, 1  ;;  %v793_v42 = vsel %vm594_vm3, %v781_v27, 0.0 }
 0x171   :  { %v731_v40 = vrot.slane %v730_v24, 1  ;;  %v812_v1 = vshrl.u32 %v811_v0, 7 }
 0x172   :  { %v762_v26 = vadd.f32 %v761_v10, %v760_v7  ;;  %v790_v35 = vadd.f32 %v789_v32, %v788_v25  ;;  %v698_v50 = vadd.f32 %v697_v39, %v696_v23  ;;  %v803_v10 = vld [vmem:[%s2005_s6] sm:$0x1] }
 0x173   :  { %v732_v51 = vadd.f32 %v731_v40, %v730_v24  ;;  %v813_v12 = vsub.s32 0, %v812_v1  ;;  %v807_v24 = vld [vmem:[%s2006_s7] sm:$0x1] }
 0x174   :  { %v763_v36 = vrot.slane %v762_v26, 2  ;;  %v792_v41 = vadd.f32 %v791_v37, %v790_v35 }
 0x175   :  { %v733_v55 = vadd.f32 %v732_v51, %v698_v50 }
 0x176   :  { %v764_v16 = vadd.f32 %v763_v36, %v762_v26  ;;  %v794_v44 = vadd.f32 %v793_v42, %v792_v41 }
 0x178   :  { %v795_v38 = vrot.slane %v794_v44, 4  ;;  %v765_v47 = vrot.slane %v764_v16, 1 }
 0x17a   :  { %v796_v52 = vadd.f32 %v795_v38, %v794_v44  ;;  %v766_v49 = vadd.f32 %v765_v47, %v764_v16 }
 0x17c   :  { %v797_v58 = vrot.slane %v796_v52, 2  ;;  %v767_v2 = vadd.f32 %v766_v49, %v733_v55 }
 0x17e   :  { %v798_v63 = vadd.f32 %v797_v58, %v796_v52 }
 0x180   :  { %v799_v5 = vrot.slane %v798_v63, 1 }
 0x182   :  { %v800_v6 = vadd.f32 %v799_v5, %v798_v63 }
 0x184   :  { %v801_v7 = vadd.f32 %v800_v6, %v767_v2 }
 0x186   :  { %v802_v8 = vmul.f32 0.005, %v801_v7 }
 0x188   :  { %v804_v9 = vadd.f32 1e-05, %v802_v8 }
 0x18a   :  { %1234 = vrsqrt.f32 %v804_v9 }
 0x194   :  { %v1235_v13 = vpop.eup %1234 }
 0x195   :  { %v806_v23 = vmul.f32 %v1235_v13, %v803_v10 }
 0x197   :  { %v808_v25 = vmul.f32 %v806_v23, %v1769_v11  ;;  %v1862_v26 = vrot.slane %v806_v23, %v813_v12 }
 0x199   :  { %v809_v27 = vsub.f32 %v807_v24, %v808_v25  ;;  %v816_v32 = vmul.f32 %v1862_v26, %v1630_v17  ;;  %v817_v35 = vmul.f32 %v1862_v26, %v1636_v19  ;;  %v818_v36 = vmul.f32 %v1862_v26, %v1642_v21 }
 0x19a   :  { %v819_v37 = vmul.f32 %v1862_v26, %v1660_v29  ;;  %v820_v11 = vmul.f32 %v1862_v26, %v1666_v33  ;;  %v821_v40 = vmul.f32 %v1862_v26, %v1676_v43  ;;  %v822_v17 = vmul.f32 %v1862_v26, %v1686_v53 }
 0x19b   :  { %v1872_v39 = vrot.slane %v809_v27, %v813_v12  ;;  %v885_v33 = vmul.f32 %v1862_v26, %v1633_v18  ;;  %v886_v43 = vmul.f32 %v1862_v26, %v1639_v20  ;;  %v887_v47 = vmul.f32 %v1862_v26, %v1645_v22 }
 0x19c   :  { %v888_v58 = vmul.f32 %v1862_v26, %v1663_v30  ;;  %v889_v22 = vmul.f32 %v1862_v26, %v1669_v34  ;;  %v890_v6 = vmul.f32 %v1862_v26, %v1683_v48  ;;  %v891_v24 = vmul.f32 %v1862_v26, %v1689_v54 }
 0x19d   :  { %v829_v41 = vadd.f32 %v1872_v39, %v816_v32  ;;  %v830_v19 = vadd.f32 %v1872_v39, %v817_v35  ;;  %v831_v21 = vadd.f32 %v1872_v39, %v818_v36  ;;  %v832_v42 = vadd.f32 %v1872_v39, %v819_v37 }
 0x19e   :  { %v833_v29 = vadd.f32 %v1872_v39, %v820_v11  ;;  %v834_v16 = vadd.f32 %v1872_v39, %v821_v40  ;;  %v835_v53 = vadd.f32 %v1872_v39, %v822_v17  ;;  %v892_v52 = vadd.f32 %v885_v33, %v1872_v39 }
 0x19f   :  { %v1151_v44 = vmul.f32 -1.442695, %v829_v41  ;;  %v1152_v50 = vmul.f32 -1.442695, %v830_v19  ;;  %v1153_v51 = vmul.f32 -1.442695, %v831_v21  ;;  %v893_v18 = vadd.f32 %v886_v43, %v1872_v39 }
 0x1a0   :  { %v1154_v38 = vmul.f32 -1.442695, %v832_v42  ;;  %v1155_v55 = vmul.f32 -1.442695, %v833_v29  ;;  %v1156_v20 = vmul.f32 -1.442695, %v834_v16  ;;  %v894_v49 = vadd.f32 %v887_v47, %v1872_v39 }
 0x1a1   :  { %1236 = vpow2.f32 %v1151_v44  ;;  %v1157_v63 = vmul.f32 -1.442695, %v835_v53  ;;  %v895_v2 = vadd.f32 %v888_v58, %v1872_v39  ;;  %v1158_v5 = vmul.f32 -1.442695, %v892_v52 }
 0x1a2   :  { %1238 = vpow2.f32 %v1152_v50  ;;  %v1159_v30 = vmul.f32 -1.442695, %v893_v18  ;;  %v896_v7 = vadd.f32 %v889_v22, %v1872_v39  ;;  %v1160_v8 = vmul.f32 -1.442695, %v894_v49 }
 0x1a3   :  { %1240 = vpow2.f32 %v1153_v51  ;;  %v897_v9 = vadd.f32 %v890_v6, %v1872_v39  ;;  %v1161_v0 = vmul.f32 -1.442695, %v895_v2  ;;  %v898_v36 = vadd.f32 %v891_v24, %v1872_v39 }
 0x1a4   :  { %1242 = vpow2.f32 %v1154_v38  ;;  %v1162_v1 = vmul.f32 -1.442695, %v896_v7  ;;  %v948_v54 = vmul.f32 %v1862_v26, %v1705_v62  ;;  %v949_v29 = vmul.f32 %v1862_v26, %v1699_v60 }
 0x1a5   :  { %1244 = vpow2.f32 %v1155_v55  ;;  %v1163_v34 = vmul.f32 -1.442695, %v897_v9  ;;  %v1164_v42 = vmul.f32 -1.442695, %v898_v36  ;;  %v950_v43 = vmul.f32 %v1862_v26, %v1712_v3 }
 0x1a6   :  { %1246 = vpow2.f32 %v1156_v20  ;;  %v955_v53 = vadd.f32 %v948_v54, %v1872_v39  ;;  %v951_v62 = vmul.f32 %v1862_v26, %v1730_v28  ;;  %v956_v51 = vadd.f32 %v949_v29, %v1872_v39 }
 0x1a7   :  { %1248 = vpow2.f32 %v1157_v63  ;;  %v952_v60 = vmul.f32 %v1862_v26, %v1740_v45  ;;  %v957_v47 = vadd.f32 %v950_v43, %v1872_v39  ;;  %v953_v28 = vmul.f32 %v1862_v26, %v1750_v56 }
 0x1a8   :  { %1250 = vpow2.f32 %v1158_v5  ;;  %v958_v3 = vadd.f32 %v951_v62, %v1872_v39  ;;  %v1165_v18 = vmul.f32 -1.442695, %v955_v53  ;;  %v1166_v49 = vmul.f32 -1.442695, %v956_v51 }
 0x1a9   :  { %1252 = vpow2.f32 %v1159_v30  ;;  %v959_v58 = vadd.f32 %v952_v60, %v1872_v39  ;;  %v1167_v45 = vmul.f32 -1.442695, %v957_v47  ;;  %v1011_v2 = vmul.f32 %v1862_v26, %v1696_v59 }
 0x1aa   :  { %1254 = vpow2.f32 %v1160_v8  ;;  %v960_v5 = vadd.f32 %v953_v28, %v1872_v39  ;;  %v1168_v6 = vmul.f32 -1.442695, %v958_v3  ;;  %v1012_v30 = vmul.f32 %v1862_v26, %v1702_v61 }
 0x1ab   :  { %v1237_v10 = vpop.eup %1236  ;;  %1256 = vpow2.f32 %v1161_v0  ;;  %v1169_v56 = vmul.f32 -1.442695, %v959_v58  ;;  %v1013_v8 = vmul.f32 %v1862_v26, %v1715_v4  ;;  %v1018_v9 = vadd.f32 %v1011_v2, %v1872_v39 }
 0x1ac   :  { %v1239_v12 = vpop.eup %1238  ;;  %v857_v13 = vadd.f32 1.0, %v1237_v10  ;;  %1258 = vpow2.f32 %v1162_v1  ;;  %v1014_v1 = vmul.f32 %v1862_v26, %v1733_v31  ;;  %v1019_v10 = vadd.f32 %v1012_v30, %v1872_v39 }
 0x1ad   :  { %v1241_v23 = vpop.eup %1240  ;;  %v858_v48 = vadd.f32 1.0, %v1239_v12  ;;  %1260 = vpow2.f32 %v1163_v34  ;;  %v1015_v12 = vmul.f32 %v1862_v26, %v1743_v46  ;;  %v1020_v4 = vadd.f32 %v1013_v8, %v1872_v39 }
 0x1ae   :  { %v1243_v25 = vpop.eup %1242  ;;  %v859_v27 = vadd.f32 1.0, %v1241_v23  ;;  %1262 = vrcp.f32 %v857_v13  ;;  %v954_v23 = vmul.f32 %v1862_v26, %v1760_v14  ;;  %v1021_v31 = vadd.f32 %v1014_v1, %v1872_v39 }
 0x1af   :  { %v1245_v32 = vpop.eup %1244  ;;  %v860_v35 = vadd.f32 1.0, %v1243_v25  ;;  %1264 = vrcp.f32 %v858_v48  ;;  %v1170_v48 = vmul.f32 -1.442695, %v960_v5  ;;  %v1022_v25 = vadd.f32 %v1015_v12, %v1872_v39 }
 0x1b0   :  { %v1247_v37 = vpop.eup %1246  ;;  %v861_v11 = vadd.f32 1.0, %v1245_v32  ;;  %1266 = vrcp.f32 %v859_v27  ;;  %v1172_v27 = vmul.f32 -1.442695, %v1018_v9  ;;  %v961_v46 = vadd.f32 %v954_v23, %v1872_v39 }
 0x1b1   :  { %v1249_v40 = vpop.eup %1248  ;;  %v862_v17 = vadd.f32 1.0, %v1247_v37  ;;  %1268 = vrcp.f32 %v860_v35  ;;  %v1173_v35 = vmul.f32 -1.442695, %v1019_v10  ;;  %v1174_v37 = vmul.f32 -1.442695, %v1020_v4 }
 0x1b2   :  { %v1251_v41 = vpop.eup %1250  ;;  %v863_v19 = vadd.f32 1.0, %v1249_v40  ;;  %1270 = vrcp.f32 %v861_v11  ;;  %v1175_v14 = vmul.f32 -1.442695, %v1021_v31  ;;  %v1016_v54 = vmul.f32 %v1862_v26, %v1753_v57 }
 0x1b3   :  { %v1253_v21 = vpop.eup %1252  ;;  %v920_v33 = vadd.f32 1.0, %v1251_v41  ;;  %1272 = vrcp.f32 %v862_v17  ;;  %v1176_v17 = vmul.f32 -1.442695, %v1022_v25 }
 0x1b4   :  { %v1255_v16 = vpop.eup %1254  ;;  %v921_v50 = vadd.f32 1.0, %v1253_v21  ;;  %1274 = vrcp.f32 %v863_v19  ;;  %v1171_v19 = vmul.f32 -1.442695, %v961_v46  ;;  %v1023_v43 = vadd.f32 %v1016_v54, %v1872_v39 }
 0x1b5   :  { %v1257_v44 = vpop.eup %1256  ;;  %v922_v38 = vadd.f32 1.0, %v1255_v16  ;;  %1276 = vpow2.f32 %v1164_v42 }
 0x1b6   :  { %v923_v52 = vadd.f32 1.0, %v1257_v44  ;;  %v1259_v55 = vpop.eup %1258  ;;  %1278 = vrcp.f32 %v920_v33  ;;  %v1017_v33 = vmul.f32 %v1862_v26, %v1763_v15  ;;  %v1177_v47 = vmul.f32 -1.442695, %v1023_v43 }
 0x1b7   :  { %v1261_v20 = vpop.eup %1260  ;;  %1280 = vrcp.f32 %v921_v50  ;;  %v924_v59 = vadd.f32 1.0, %v1259_v55 }
 0x1b8   :  { %v1925_v63 = vpop.eup %1262  ;;  %1282 = vrcp.f32 %v922_v38  ;;  %v925_v61 = vadd.f32 1.0, %v1261_v20  ;;  %v1024_v57 = vadd.f32 %v1017_v33, %v1872_v39 }
 0x1b9   :  { %v1929_v22 = vpop.eup %1264  ;;  %1284 = vrcp.f32 %v923_v52 }
 0x1ba   :  { %v1934_v7 = vpop.eup %1266  ;;  %1286 = vpow2.f32 %v1165_v18  ;;  %v1178_v26 = vmul.f32 -1.442695, %v1024_v57 }
 0x1bb   :  { %v1939_v0 = vpop.eup %1268  ;;  %1288 = vpow2.f32 %v1166_v49 }
 0x1bc   :  { %v1944_v34 = vpop.eup %1270  ;;  %1290 = vpow2.f32 %v1167_v45 }
 0x1bd   :  { %v1949_v13 = vpop.eup %1272  ;;  %1292 = vpow2.f32 %v1168_v6 }
 0x1be   :  { %v1954_v24 = vpop.eup %1274  ;;  %1294 = vpow2.f32 %v1169_v56 }
 0x1bf   :  { %v1277_v32 = vpop.eup %1276  ;;  %1296 = vrcp.f32 %v924_v59 }
 0x1c0   :  { %v1279_v36 = vpop.eup %1278  ;;  %1298 = vrcp.f32 %v925_v61  ;;  %v926_v42 = vadd.f32 1.0, %v1277_v32 }
 0x1c1   :  { %v1281_v11 = vpop.eup %1280  ;;  %1300 = vpow2.f32 %v1170_v48  ;;  %v941_v9 = vadd.f32 %v1279_v36, %v1925_v63 }
 0x1c2   :  { %v1283_v40 = vpop.eup %1282  ;;  %1302 = vpow2.f32 %v1172_v27  ;;  %v942_v1 = vadd.f32 %v1281_v11, %v1929_v22 }
 0x1c3   :  { %v1285_v41 = vpop.eup %1284  ;;  %1304 = vpow2.f32 %v1173_v35  ;;  %v943_v12 = vadd.f32 %v1283_v40, %v1934_v7 }
 0x1c4   :  { %v1287_v21 = vpop.eup %1286  ;;  %1306 = vpow2.f32 %v1174_v37  ;;  %v944_v23 = vadd.f32 %v1285_v41, %v1939_v0 }
 0x1c5   :  { %v1289_v29 = vpop.eup %1288  ;;  %v983_v16 = vadd.f32 1.0, %v1287_v21  ;;  %1308 = vpow2.f32 %v1175_v14 }
 0x1c6   :  { %v1291_v53 = vpop.eup %1290  ;;  %v984_v44 = vadd.f32 1.0, %v1289_v29  ;;  %1310 = vpow2.f32 %v1176_v17 }
 0x1c7   :  { %v1293_v50 = vpop.eup %1292  ;;  %1312 = vpow2.f32 %v1171_v19  ;;  %v985_v62 = vadd.f32 1.0, %v1291_v53 }
 0x1c8   :  { %v1295_v51 = vpop.eup %1294  ;;  %1314 = vrcp.f32 %v926_v42  ;;  %v986_v38 = vadd.f32 1.0, %v1293_v50 }
 0x1c9   :  { %v1297_v60 = vpop.eup %1296  ;;  %1316 = vrcp.f32 %v983_v16  ;;  %v987_v3 = vadd.f32 1.0, %v1295_v51 }
 0x1ca   :  { %v1299_v52 = vpop.eup %1298  ;;  %1318 = vrcp.f32 %v984_v44  ;;  %v945_v31 = vadd.f32 %v1297_v60, %v1944_v34 }
 0x1cb   :  { %v1301_v15 = vpop.eup %1300  ;;  %1320 = vrcp.f32 %v985_v62  ;;  %v946_v34 = vadd.f32 %v1299_v52, %v1949_v13 }
 0x1cc   :  { %v1303_v55 = vpop.eup %1302  ;;  %1322 = vrcp.f32 %v986_v38  ;;  %v988_v56 = vadd.f32 1.0, %v1301_v15 }
 0x1cd   :  { %v1305_v58 = vpop.eup %1304  ;;  %1324 = vpow2.f32 %v1177_v47  ;;  %v1046_v18 = vadd.f32 1.0, %v1303_v55 }
 0x1ce   :  { %v1307_v20 = vpop.eup %1306  ;;  %1326 = vrcp.f32 %v987_v3  ;;  %v1047_v39 = vadd.f32 1.0, %v1305_v58 }
 0x1cf   :  { %v1309_v28 = vpop.eup %1308  ;;  %1328 = vpow2.f32 %v1178_v26  ;;  %v1048_v49 = vadd.f32 1.0, %v1307_v20 }
 0x1d0   :  { %v1311_v45 = vpop.eup %1310  ;;  %v1049_v2 = vadd.f32 1.0, %v1309_v28  ;;  %1330 = vrcp.f32 %v1046_v18 }
 0x1d1   :  { %v1313_v5 = vpop.eup %1312  ;;  %v1050_v6 = vadd.f32 1.0, %v1311_v45  ;;  %1332 = vrcp.f32 %v1047_v39 }
 0x1d2   :  { %v1315_v30 = vpop.eup %1314  ;;  %1334 = vrcp.f32 %v1048_v49  ;;  %v989_v10 = vadd.f32 1.0, %v1313_v5 }
 0x1d3   :  { %v1317_v8 = vpop.eup %1316  ;;  %1336 = vrcp.f32 %v1049_v2  ;;  %v947_v29 = vadd.f32 %v1315_v30, %v1954_v24 }
 0x1d4   :  { %v1319_v59 = vpop.eup %1318  ;;  %1338 = vrcp.f32 %v1050_v6  ;;  %v1004_v25 = vadd.f32 %v1317_v8, %v941_v9 }
 0x1d5   :  { %v1321_v61 = vpop.eup %1320  ;;  %1340 = vrcp.f32 %v988_v56  ;;  %v1005_v63 = vadd.f32 %v1319_v59, %v942_v1 }
 0x1d6   :  { %v1323_v4 = vpop.eup %1322  ;;  %1342 = vrcp.f32 %v989_v10  ;;  %v1006_v35 = vadd.f32 %v1321_v61, %v943_v12 }
 0x1d7   :  { %v1325_v48 = vpop.eup %1324  ;;  %v1007_v36 = vadd.f32 %v1323_v4, %v944_v23 }
 0x1d8   :  { %v1327_v27 = vpop.eup %1326  ;;  %v1051_v32 = vadd.f32 1.0, %v1325_v48 }
 0x1d9   :  { %v1329_v46 = vpop.eup %1328  ;;  %v1008_v7 = vadd.f32 %v1327_v27, %v945_v31 }
 0x1da   :  { %v1331_v22 = vpop.eup %1330  ;;  %v1052_v37 = vadd.f32 1.0, %v1329_v46  ;;  %1344 = vrcp.f32 %v1051_v32 }
 0x1db   :  { %v1333_v11 = vpop.eup %1332  ;;  %v1067_v14 = vadd.f32 %v1331_v22, %v1004_v25 }
 0x1dc   :  { %v1335_v40 = vpop.eup %1334  ;;  %1346 = vrcp.f32 %v1052_v37  ;;  %v1068_v0 = vadd.f32 %v1333_v11, %v1005_v63 }
 0x1dd   :  { %v1337_v17 = vpop.eup %1336  ;;  %v1069_v41 = vadd.f32 %v1335_v40, %v1006_v35  ;;  %v1074_v19 = vmul.f32 0.25, %v1067_v14 }
 0x1de   :  { %v1339_v54 = vpop.eup %1338  ;;  %v1070_v21 = vadd.f32 %v1337_v17, %v1007_v36  ;;  %v1075_v42 = vmul.f32 0.25, %v1068_v0 }
 0x1df   :  { %v1071_v16 = vadd.f32 %v1339_v54, %v1008_v7  ;;  %v1076_v33 = vmul.f32 0.25, %v1069_v41  ;;  %1081 = vst.msk [vmem:[%s2007_s8] sm:$0xff] %vm582_vm2, %v1074_v19  ;;  %v1341_v43 = vpop.eup %1340 }
 0x1e0   :  { %v1077_v53 = vmul.f32 0.25, %v1070_v21  ;;  %1082 = vst.msk [vmem:[%s2007_s8 + $0x8] sm:$0xff] %vm582_vm2, %v1075_v42  ;;  %v1009_v13 = vadd.f32 %v1341_v43, %v946_v34  ;;  %v1343_v24 = vpop.eup %1342 }
 0x1e1   :  { %v1078_v44 = vmul.f32 0.25, %v1071_v16  ;;  %1083 = vst.msk [vmem:[%s2007_s8 + $0x10] sm:$0xff] %vm582_vm2, %v1076_v33  ;;  %v1010_v50 = vadd.f32 %v1343_v24, %v947_v29 }
 0x1e2   :  { %1084 = vst.msk [vmem:[%s2007_s8 + $0x18] sm:$0xff] %vm582_vm2, %v1077_v53 }
 0x1e3   :  { %1085 = vst.msk [vmem:[%s2007_s8 + $0x20] sm:$0xff] %vm582_vm2, %v1078_v44 }
 0x1e4   :  { %v1345_v62 = vpop.eup %1344 }
 0x1e5   :  { %v1072_v57 = vadd.f32 %v1345_v62, %v1009_v13 }
 0x1e6   :  { %v1347_v51 = vpop.eup %1346 }
 0x1e7   :  { %v1073_v38 = vadd.f32 %v1347_v51, %v1010_v50  ;;  %v1079_v60 = vmul.f32 0.25, %v1072_v57 }
 0x1e9   :  { %v1080_v47 = vmul.f32 0.25, %v1073_v38  ;;  %1086 = vst.msk [vmem:[%s2007_s8 + $0x28] sm:$0xff] %vm582_vm2, %v1079_v60 }
 0x1eb   :  { %1087 = vst.msk [vmem:[%s2007_s8 + $0x30] sm:$0x3] %vm594_vm3, %v1080_v47 }

// kernel: lenet_bn_forward.5
= control target key start
LH: loop header
LB: loop body
LE: loop exit
PB: predicated region body
PF: predicated region fallthrough
CT: control target
= control target key end

     0   :  { %v887_v1 = vmov 0   ;;  %v110_v21 = vlaneseq  ;;  %v888_v26 = vmov 1966171168   ;;  %vm276_vm0 = vcmask 130048   ;;  %s1141_s0 = inlined_call_operand.vmem [shape: bf16[2,400], index: 0, kind: input, shape index: {}]   ;;  %s1142_s1 = inlined_call_operand.vmem [shape: bf16[400,120], index: 1, kind: input, shape index: {}]   ;;  %s1143_s2 = inlined_call_operand.vmem [shape: f32[1,120], index: 2, kind: input, shape index: {}]   ;;  %s1144_s3 = inlined_call_operand.vmem [shape: f32[1,120], index: 3, kind: input, shape index: {}]   ;;  %s1145_s4 = inlined_call_operand.vmem [shape: f32[1,120], index: 4, kind: input, shape index: {}]   ;;  %s1146_s5 = inlined_call_operand.vmem [shape: bf16[120,84], index: 5, kind: input, shape index: {}]   ;;  %s1147_s6 = inlined_call_operand.vmem [shape: f32[1,84], index: 6, kind: input, shape index: {}]   ;;  %s1148_s7 = inlined_call_operand.vmem [shape: f32[1,84], index: 7, kind: input, shape index: {}]   ;;  %s1149_s8 = inlined_call_operand.vmem [shape: f32[1,84], index: 8, kind: input, shape index: {}]   ;;  %s1150_s9 = inlined_call_operand.vmem [shape: bf16[84,10], index: 9, kind: input, shape index: {}]   ;;  %s1151_s10 = inlined_call_operand.vmem [shape: f32[1,10], index: 10, kind: input, shape index: {}]   ;;  %s1152_s11 = inlined_call_operand.hbm [shape: f32[2,10], index: 11, kind: output, shape index: {}]  }
   0x1   :  { %v812_v0 = vld [vmem:[%s1142_s1 + $0x40] sm:$0xff]   ;;  %320 = vmatprep.subr.bf16.mxu1 %v887_v1  ;;  %v815_v4 = vld [vmem:[%s1142_s1 + $0x48] sm:$0xff]   ;;  %v818_v7 = vld [vmem:[%s1142_s1 + $0x50] sm:$0xff]   ;;  %v108_v27 = vunpack.c.l.s4 %v888_v26 }
   0x2   :  { %v813_v2 = vld [vmem:[%s1142_s1 + $0x80] sm:$0xff]   ;;  %733 = vmatprep.subr.bf16.mxu0 %v812_v0  ;;  %v816_v5 = vld [vmem:[%s1142_s1 + $0x88] sm:$0xff]   ;;  %v819_v8 = vld [vmem:[%s1142_s1 + $0x90] sm:$0xff]   ;;  %v1031_v28 = vshrl.u32 %v110_v21, 7 }
   0x3   :  { %v814_v3 = vld [vmem:[%s1142_s1] sm:$0xff]   ;;  %321 = vmatpush1.bf16.msra.mxu1 %v813_v2  ;;  %v817_v6 = vld [vmem:[%s1142_s1 + $0x8] sm:$0xff]   ;;  %v820_v9 = vld [vmem:[%s1142_s1 + $0x10] sm:$0xff]   ;;  %v109_v31 = vunpack.c.0.s8 %v108_v27 }
   0x4   :  { %734 = vmatpush3.bf16.msra.mxu0 %v814_v3  ;;  %322 = vmatprep.subr.bf16.mxu1 %v887_v1  ;;  %v821_v10 = vld [vmem:[%s1142_s1 + $0x58] sm:$0xff]   ;;  %v824_v13 = vld [vmem:[%s1142_s1 + $0x60] sm:$0xff]   ;;  %v827_v16 = vld [vmem:[%s1142_s1 + $0x68] sm:$0xff]  }
   0x5   :  { %735 = vmatprep.subr.bf16.mxu0 %v815_v4  ;;  %v822_v11 = vld [vmem:[%s1142_s1 + $0x98] sm:$0xff]   ;;  %v825_v14 = vld [vmem:[%s1142_s1 + $0xa0] sm:$0xff]   ;;  %v828_v17 = vld [vmem:[%s1142_s1 + $0xa8] sm:$0xff]   ;;  %v112_v32 = vsub.s32 %v109_v31, %v1031_v28 }
   0x6   :  { %v823_v12 = vld [vmem:[%s1142_s1 + $0x18] sm:$0xff]   ;;  %v826_v15 = vld [vmem:[%s1142_s1 + $0x20] sm:$0xff]   ;;  %v829_v18 = vld [vmem:[%s1142_s1 + $0x28] sm:$0xff]  }
   0x7   :  { %323 = vmatpush1.bf16.msra.mxu1 %v816_v5  ;;  %v830_v19 = vld [vmem:[%s1142_s1 + $0x70] sm:$0xff]   ;;  %v833_v23 = vld [vmem:[%s1142_s1 + $0x78] sm:$0xff]   ;;  %v686_v24 = vld.sshfl [vmem:[%s1141_s0] sm:$0x33 pattern:$0x75316420] }
   0x8   :  { %736 = vmatpush3.bf16.msra.mxu0 %v817_v6  ;;  %324 = vmatprep.subr.bf16.mxu1 %v887_v1  ;;  %v831_v20 = vld [vmem:[%s1142_s1 + $0xb0] sm:$0xff]   ;;  %v834_v25 = vld [vmem:[%s1142_s1 + $0xb8] sm:$0xff]   ;;  %v106_v30 = vcombine.high %v686_v24, %v686_v24  ;;  %v836_v33 = vld [vmem:[%s1142_s1 + $0xc0] sm:$0xff]   ;;  %v113_v35 = vrot.slane %v686_v24, %v112_v32 }
   0x9   :  { %737 = vmatprep.subr.bf16.mxu0 %v818_v7  ;;  %v832_v22 = vld [vmem:[%s1142_s1 + $0x30] sm:$0xff]   ;;  %v835_v29 = vld [vmem:[%s1142_s1 + $0x38] sm:$0xff]  }
   0xa   :  { %v120_v34 = vrot.slane %v106_v30, %v112_v32  ;;  %v121_v37 = vcombine.high %v113_v35, %v113_v35 }
   0xb   :  { %325 = vmatpush1.bf16.msra.mxu1 %v819_v8 }
   0xc   :  { %738 = vmatpush3.bf16.msra.mxu0 %v820_v9  ;;  %326 = vmatprep.subr.bf16.mxu1 %v887_v1  ;;  %v122_v36 = vcombine.high %v120_v34, %v120_v34 }
   0xd   :  { %739 = vmatprep.subr.bf16.mxu0 %v821_v10  ;;  %312 = vmatprep.mubr.bf16.mxu0 %v120_v34 }
   0xf   :  { %327 = vmatpush1.bf16.msra.mxu1 %v822_v11 }
  0x10   :  { %740 = vmatpush3.bf16.msra.mxu0 %v823_v12  ;;  %328 = vmatprep.subr.bf16.mxu1 %v887_v1 }
  0x11   :  { %741 = vmatprep.subr.bf16.mxu0 %v824_v13 }
  0x13   :  { %329 = vmatpush1.bf16.msra.mxu1 %v825_v14 }
  0x14   :  { %742 = vmatpush3.bf16.msra.mxu0 %v826_v15  ;;  %330 = vmatprep.subr.bf16.mxu1 %v887_v1 }
  0x15   :  { %743 = vmatprep.subr.bf16.mxu0 %v827_v16 }
  0x17   :  { %331 = vmatpush1.bf16.msra.mxu1 %v828_v17 }
  0x18   :  { %744 = vmatpush3.bf16.msra.mxu0 %v829_v18  ;;  %332 = vmatprep.subr.bf16.mxu1 %v887_v1 }
  0x19   :  { %745 = vmatprep.subr.bf16.mxu0 %v830_v19 }
  0x1b   :  { %333 = vmatpush1.bf16.msra.mxu1 %v831_v20 }
  0x1c   :  { %746 = vmatpush3.bf16.msra.mxu0 %v832_v22  ;;  %334 = vmatprep.subr.bf16.mxu1 %v887_v1 }
  0x1d   :  { %747 = vmatprep.subr.bf16.mxu0 %v833_v23 }
  0x1f   :  { %335 = vmatpush1.bf16.msra.mxu1 %v834_v25 }
  0x20   :  { %748 = vmatpush3.bf16.msra.mxu0 %v835_v29  ;;  %336 = vmatprep.subr.bf16.mxu1 %v887_v1 }
  0x21   :  { %16 = vsyncpa [#allocation3], 0  ;;  %712 = vmatprep.mubr.msk.bf16.mxu1 %vm276_vm0, %v122_v36  ;;  %v837_v38 = vld [vmem:[%s1146_s5] sm:$0xff]   ;;  %v889_v39 = vmov 0.0   ;;  %v838_v40 = vld [vmem:[%s1146_s5 + $0x8] sm:$0xff]   ;;  %vm890_vm1 = vmmov 0  }
  0x22   :  { %771 = vmatprep.subr.bf16.mxu0 %v889_v39  ;;  %v839_v41 = vld [vmem:[%s1146_s5 + $0x10] sm:$0xff]   ;;  %v840_v42 = vld [vmem:[%s1146_s5 + $0x18] sm:$0xff]   ;;  %v841_v43 = vld [vmem:[%s1146_s5 + $0x20] sm:$0xff]   ;;  %vm479_vm2 = vcmask 1043456   ;;  %vm362_vm3 = vcmask 975872   ;;  %v1085_v16 = vsub.s32 0, %v1031_v28 }
  0x23   :  { %313 = vmatmul.mubr.bf16.vlgmr.msra.gmra.mrb[0].mxu0 %v113_v35  ;;  %337 = vmatpush1.bf16.msra.mxu1 %v836_v33  ;;  %v842_v44 = vld [vmem:[%s1146_s5 + $0x28] sm:$0xff]   ;;  %v843_v45 = vld [vmem:[%s1146_s5 + $0x30] sm:$0xff]   ;;  %v844_v46 = vld [vmem:[%s1146_s5 + $0x38] ss:$0 sps:$4 sm:$0xff]   ;;  %vm475_vm4 = vcmask 982016   ;;  %vm625_vm5 = vcmask 1041408  }
  0x24   :  { %791 = vmatprep.subr.bf16.mxu1 %v889_v39  ;;  %772 = vmatpush3.bf16.msra.mxu0 %v837_v38  ;;  %v481_v47 = vsel %vm479_vm2, %v844_v46, 0  ;;  %v685_v50 = vld [vmem:[%s1143_s2] ss:$0 sm:$0xff]  ;;  %v846_v32 = vld [vmem:[%s1150_s9 + $0x8] sm:$0xff]   ;;  %v847_v33 = vld [vmem:[%s1150_s9 + $0x10] sm:$0xff]   ;;  %vm525_vm6 = vcmask 680960  }
  0x25   :  { %773 = vmatprep.subr.bf16.mxu0 %v889_v39  ;;  %787 = vmatprep.mubr.msk.bf16.mxu0 %vm890_vm1, %v889_v39  ;;  %v360_v15 = vld [vmem:[%s1144_s3] sm:$0x1]  ;;  %v848_v34 = vld [vmem:[%s1150_s9 + $0x18] sm:$0xff]   ;;  %v850_v36 = vld [vmem:[%s1150_s9 + $0x28] ss:$0 sps:$4 sm:$0x33]  }
  0x26   :  { %353 = vmatmul.mubr.bf16.vlgmr.msra.gmra.mrb[0].mxu1 %v121_v37  ;;  %v361_v19 = vld [vmem:[%s1145_s4] sm:$0x1]  ;;  %v627_v37 = vsel %vm625_vm5, %v850_v36, 0  ;;  %vm621_vm7 = vcmask 687104   ;;  %vm669_vm8 = vcmask 74752  }
  0x27   :  { %803 = vmatprep.mubr.msk.bf16.mxu1 %vm890_vm1, %v889_v39  ;;  %v845_v31 = vld [vmem:[%s1150_s9] sm:$0xff]  }
  0x28   :  { %774 = vmatpush3.bf16.msra.mxu0 %v838_v40  ;;  %792 = vmatpush3.bf16.msra.mxu1 %v845_v31  ;;  %v849_v35 = vld [vmem:[%s1150_s9 + $0x20] sm:$0xff]  }
  0x29   :  { %775 = vmatprep.subr.bf16.mxu0 %v889_v39  ;;  %793 = vmatprep.subr.bf16.mxu1 %v889_v39  ;;  %v714_v38 = vld [vmem:[%s1147_s6] ss:$0 sm:$0xff] }
  0x2c   :  { %776 = vmatpush3.bf16.msra.mxu0 %v839_v41  ;;  %794 = vmatpush3.bf16.msra.mxu1 %v846_v32 }
  0x2d   :  { %777 = vmatprep.subr.bf16.mxu0 %v889_v39  ;;  %795 = vmatprep.subr.bf16.mxu1 %v889_v39 }
  0x30   :  { %778 = vmatpush3.bf16.msra.mxu0 %v840_v42  ;;  %796 = vmatpush3.bf16.msra.mxu1 %v847_v33 }
  0x31   :  { %779 = vmatprep.subr.bf16.mxu0 %v889_v39  ;;  %797 = vmatprep.subr.bf16.mxu1 %v889_v39 }
  0x34   :  { %780 = vmatpush3.bf16.msra.mxu0 %v841_v43  ;;  %798 = vmatpush3.bf16.msra.mxu1 %v848_v34 }
  0x35   :  { %781 = vmatprep.subr.bf16.mxu0 %v889_v39  ;;  %799 = vmatprep.subr.bf16.mxu1 %v889_v39 }
  0x38   :  { %782 = vmatpush3.bf16.msra.mxu0 %v842_v44  ;;  %800 = vmatpush3.bf16.msra.mxu1 %v849_v35 }
  0x39   :  { %783 = vmatprep.subr.bf16.mxu0 %v889_v39  ;;  %801 = vmatprep.subr.bf16.mxu1 %v889_v39 }
  0x3c   :  { %784 = vmatpush3.bf16.msra.mxu0 %v843_v45  ;;  %802 = vmatpush3.bf16.msra.mxu1 %v627_v37 }
  0x3d   :  { %785 = vmatprep.subr.bf16.mxu0 %v889_v39 }
  0x40   :  { %786 = vmatpush3.bf16.msra.mxu0 %v481_v47 }
  0xf6   :  { %v749_v48 = vpop.f32.mrb[0].mxu0 }
  0xf7   :  { %v750_v49 = vpop.f32.mrb[1].mxu0 }
  0xf8   :  { %v751_v51 = vadd.f32 %v750_v49, %v749_v48  ;;  %v752_v52 = vpop.f32.mrb[2].mxu0 }
  0xf9   :  { %v753_v53 = vpop.f32.mrb[3].mxu0  ;;  %v354_v54 = vpop.f32.mrb[0].mxu1 }
  0xfa   :  { %v315_v55 = vadd.f32 %v751_v51, %v685_v50  ;;  %v356_v56 = vpop.f32.mrb[1].mxu1 }
  0xfb   :  { %v357_v57 = vpop.f32.mrb[2].mxu1 }
  0xfc   :  { %v355_v58 = vadd.f32 %v354_v54, %v315_v55  ;;  %v358_v59 = vpop.f32.mrb[3].mxu1 }
  0xfe   :  { %v363_v60 = vsel %vm362_vm3, %v355_v58, 0.0 }
  0xff   :  { %v364_v61 = vrot.slane %v363_v60, 4 }
 0x101   :  { %v365_v62 = vadd.f32 %v364_v61, %v363_v60 }
 0x103   :  { %v366_v63 = vrot.slane %v365_v62, 2 }
 0x105   :  { %v367_v0 = vadd.f32 %v366_v63, %v365_v62  ;;  %v523_v63 = vld [vmem:[%s1148_s7] sm:$0x1] }
 0x107   :  { %v368_v1 = vrot.slane %v367_v0, 1 }
 0x109   :  { %v369_v2 = vadd.f32 %v368_v1, %v367_v0 }
 0x10b   :  { %v371_v3 = vmul.f32 0.5, %v369_v2  ;;  %v524_v2 = vld [vmem:[%s1149_s8] sm:$0x1]  ;;  %s891_s8 = smov [#allocation2]  }
 0x10c   :  { %s677_s24 = sshll.u32 %s891_s8, 4  ;;  %s678_s24 = int_to_ptr.vmem [resolvable:$true] %s677_s24 }
 0x10d   :  { %v372_v4 = vsub.f32 %v355_v58, %v371_v3  ;;  %s863_s25 = scalar_lea.vmem %s678_s24, 32  ;;  %p868_p1 = scmp.lt.s32.totalorder %s678_s24, %s678_s24 }
 0x10e   :  { %p864_p0 = scmp.ne.s32.totalorder %s678_s24, %s863_s25  ;;  %p869_p2 = scmp.lt.s32.totalorder %s863_s25, %s863_s25 }
 0x10f   :  { %v373_v5 = vmul.f32 %v372_v4, %v372_v4 }
 0x110   :  { %p870_p3 = por %p869_p2, %p868_p1 }
 0x111   :  { %v374_v6 = vsel %vm362_vm3, %v373_v5, 0.0 }
 0x112   :  { %v375_v7 = vrot.slane %v374_v6, 4  ;;  %p871_p4 = pnand %p870_p3, %p864_p0 }
 0x114   :  { %v376_v8 = vadd.f32 %v375_v7, %v374_v6 }
 0x116   :  { %v377_v9 = vrot.slane %v376_v8, 2 }
 0x118   :  { %v378_v10 = vadd.f32 %v377_v9, %v376_v8 }
 0x11a   :  { %v379_v11 = vrot.slane %v378_v10, 1 }
 0x11c   :  { %v380_v12 = vadd.f32 %v379_v11, %v378_v10 }
 0x11e   :  { %v381_v13 = vmul.f32 0.5, %v380_v12 }
 0x120   :  { %v382_v14 = vadd.f32 1e-05, %v381_v13 }
 0x122   :  { %851 = vrsqrt.f32 %v382_v14  ;;  %v725_v14 = vld [vmem:[%s1151_s10] ss:$0 sm:$0xff] }
 0x12c   :  { %v852_v17 = vpop.eup %851 }
 0x12d   :  { %v384_v18 = vmul.f32 %v852_v17, %v360_v15 }
 0x12f   :  { %v389_v20 = vrot.slane %v384_v18, %v1085_v16  ;;  %v392_v21 = vmul.f32 %v384_v18, %v371_v3 }
 0x131   :  { %v393_v22 = vsub.f32 %v361_v19, %v392_v21  ;;  %v391_v23 = vmul.f32 %v389_v20, %v355_v58 }
 0x133   :  { %v398_v24 = vrot.slane %v393_v22, %v1085_v16 }
 0x135   :  { %v400_v25 = vadd.f32 %v398_v24, %v391_v23 }
 0x137   :  { %v713_v26 = vmul.f32 -1.442695, %v400_v25 }
 0x139   :  { %853 = vpow2.f32 %v713_v26 }
 0x143   :  { %v854_v27 = vpop.eup %853 }
 0x144   :  { %v404_v29 = vadd.f32 1.0, %v854_v27 }
 0x146   :  { %855 = vrcp.f32 %v404_v29 }
 0x150   :  { %v856_v28 = vpop.eup %855 }
 0x151   :  { %v407_v30 = vpack.c.bf16 %v856_v28, %v856_v28 }
 0x153   :  { %788 = vmatmul.mubr.msk.bf16.vlgmr.msra.gmra.mrb[4].mxu0 %vm475_vm4, %v407_v30 }
 0x226   :  { %v517_v40 = vpop.f32.mrb[4].mxu0 }
 0x227   :  { %v518_v41 = vadd.f32 %v714_v38, %v517_v40  ;;  %v789_v42 = vpop.f32.mrb[5].mxu0 }
 0x228   :  { %v520_v43 = vpop.f32.mrb[6].mxu0 }
 0x229   :  { %v526_v44 = vsel %vm525_vm6, %v518_v41, 0.0  ;;  %v790_v45 = vpop.f32.mrb[7].mxu0 }
 0x22a   :  { %v527_v46 = vrot.slane %v526_v44, 4 }
 0x22c   :  { %v528_v47 = vadd.f32 %v527_v46, %v526_v44 }
 0x22e   :  { %v529_v48 = vrot.slane %v528_v47, 2 }
 0x230   :  { %v530_v49 = vadd.f32 %v529_v48, %v528_v47 }
 0x232   :  { %v531_v50 = vrot.slane %v530_v49, 1 }
 0x234   :  { %v532_v51 = vadd.f32 %v531_v50, %v530_v49 }
 0x236   :  { %v533_v39 = vmul.f32 0.5, %v532_v51 }
 0x238   :  { %v534_v52 = vsub.f32 %v518_v41, %v533_v39 }
 0x23a   :  { %v535_v53 = vmul.f32 %v534_v52, %v534_v52 }
 0x23c   :  { %v536_v54 = vsel %vm525_vm6, %v535_v53, 0.0 }
 0x23d   :  { %v537_v55 = vrot.slane %v536_v54, 4 }
 0x23f   :  { %v538_v56 = vadd.f32 %v537_v55, %v536_v54 }
 0x241   :  { %v539_v57 = vrot.slane %v538_v56, 2 }
 0x243   :  { %v540_v58 = vadd.f32 %v539_v57, %v538_v56 }
 0x245   :  { %v541_v59 = vrot.slane %v540_v58, 1 }
 0x247   :  { %v542_v60 = vadd.f32 %v541_v59, %v540_v58 }
 0x249   :  { %v543_v61 = vmul.f32 0.5, %v542_v60 }
 0x24b   :  { %v544_v62 = vadd.f32 1e-05, %v543_v61 }
 0x24d   :  { %857 = vrsqrt.f32 %v544_v62 }
 0x257   :  { %v858_v0 = vpop.eup %857 }
 0x258   :  { %v546_v1 = vmul.f32 %v858_v0, %v523_v63 }
 0x25a   :  { %v551_v3 = vrot.slane %v546_v1, %v1085_v16  ;;  %v554_v4 = vmul.f32 %v546_v1, %v533_v39 }
 0x25c   :  { %v555_v5 = vsub.f32 %v524_v2, %v554_v4  ;;  %v553_v6 = vmul.f32 %v551_v3, %v518_v41 }
 0x25e   :  { %v560_v7 = vrot.slane %v555_v5, %v1085_v16 }
 0x260   :  { %v562_v8 = vadd.f32 %v560_v7, %v553_v6 }
 0x262   :  { %v724_v9 = vmul.f32 -1.442695, %v562_v8 }
 0x264   :  { %859 = vpow2.f32 %v724_v9 }
 0x26e   :  { %v860_v10 = vpop.eup %859 }
 0x26f   :  { %v566_v11 = vadd.f32 1.0, %v860_v10 }
 0x271   :  { %861 = vrcp.f32 %v566_v11 }
 0x27b   :  { %v862_v12 = vpop.eup %861 }
 0x27c   :  { %v569_v13 = vpack.c.bf16 %v862_v12, %v862_v12 }
 0x27e   :  { %804 = vmatmul.mubr.msk.bf16.vlgmr.msra.gmra.mrb[4].mxu1 %vm621_vm7, %v569_v13 }
 0x351   :  { %v663_v15 = vpop.f32.mrb[4].mxu1 }
 0x352   :  { %v664_v17 = vadd.f32 %v725_v14, %v663_v15  ;;  %v805_v16 = vpop.f32.mrb[5].mxu1 }
 0x353   :  { %v666_v18 = vpop.f32.mrb[6].mxu1 }
 0x354   :  { %v806_v19 = vpop.f32.mrb[7].mxu1  ;;  %670 = vst.msk [vmem:[#allocation2] sm:$0x3] %vm669_vm8, %v664_v17 }
 0x355   :  { %874 = shalt.err (!%p871_p4)
}
 0x356   :  { %s875_s10 = scalar_lea.hbm %s1152_s11, 32 }
 0x357   :  { %p876_p5 = scmp.ne.s32.totalorder %s1152_s11, %s875_s10  ;;  %p879_p6 = scmp.lt.u32.totalorder %s875_s10, %s1152_s11 }
 0x359   :  { %p881_p7 = pnand %p879_p6, %p876_p5 }
 0x35b   :  { %884 = shalt.err (!%p881_p7)
}
 0x35c   :  { %680 = dma.vmem_to_hbm [thread:$0]  %s678_s24, 32, %s1152_s11, [#allocation3]  }
 0x35d   :  { %885 = dma.done.wait [#allocation3], 32  }
 0x35e   :  { %886 = vsyncadd [#allocation3], 4294967264 }
 0x35f   :  { %684 = vsyncpa [#allocation3], 1 }

</bundles_post_ra>
